<compile_context>
chip_gen: v7x
topology: tpu7x:2x2x1
jax: 0.10.0
libtpu: 0.0.40
codegen_flags: <defaults>
</compile_context>

<pallas_src>
import math

import jax
import jax.numpy as jnp
from jax.experimental import pallas as pl
from jax.experimental.pallas import tpu as pltpu

# ---------------------------------------------------------------------------
# Static layer dimensions (padded to TPU-friendly multiples).
# ---------------------------------------------------------------------------
_IN = 7500
_IN_PAD = 7680          # 60 * 128
_H1, _H2, _H3 = 1024, 512, 256
_OUT = 1
_OUT_PAD = 128
_B_PAD = 16             # bf16 packs 16 rows per sublane tile

_TK = 3840              # 7680 / 3840 = 2 K steps; W0 tile 3840x1024 bf16 = 7.5 MB


def _round_up(x, m):
    return (x + m - 1) // m * m


# ---------------------------------------------------------------------------
# Fused kernel: streamed layer 0 + VMEM-resident tail on the last K step.
# ---------------------------------------------------------------------------
def _disc_kernel(x_ref, w0_ref, b0_ref, w1_ref, b1_ref, w2_ref, b2_ref,
                 w3_ref, b3_ref, o_ref, acc_ref):
    k = pl.program_id(0)

    @pl.when(k == 0)
    def _():
        acc_ref[...] = jnp.zeros_like(acc_ref)

    # x is fully VMEM-resident; slice the current K chunk in-kernel.
    x_chunk = x_ref[:, pl.ds(pl.multiple_of(k * _TK, _TK), _TK)]
    acc_ref[...] += jnp.dot(
        x_chunk, w0_ref[...], preferred_element_type=jnp.float32
    )

    @pl.when(k == pl.num_programs(0) - 1)
    def _():
        # Layer 0 epilogue
        h = acc_ref[...] + b0_ref[...]
        h = jnp.where(h > 0, h, 0.2 * h)
        # Layer 1
        h = jnp.dot(h.astype(jnp.bfloat16), w1_ref[...],
                    preferred_element_type=jnp.float32) + b1_ref[...]
        h = jnp.where(h > 0, h, 0.2 * h)
        # Layer 2
        h = jnp.dot(h.astype(jnp.bfloat16), w2_ref[...],
                    preferred_element_type=jnp.float32) + b2_ref[...]
        h = jnp.where(h > 0, h, 0.2 * h)
        # Layer 3 + sigmoid (exp on EUP, reciprocal on EUP)
        h = jnp.dot(h.astype(jnp.bfloat16), w3_ref[...],
                    preferred_element_type=jnp.float32) + b3_ref[...]
        o_ref[...] = pl.reciprocal(1.0 + jnp.exp(-h), approx=True)


def _discriminator_pallas(xp, w0, b0, w1, b1, w2, b2, w3, b3):
    bp = xp.shape[0]
    grid = (_IN_PAD // _TK,)                       # (2,) pure K loop
    const = lambda k: (0, 0)
    return pl.pallas_call(
        _disc_kernel,
        out_shape=jax.ShapeDtypeStruct((bp, _OUT_PAD), jnp.float32),
        grid_spec=pltpu.PrefetchScalarGridSpec(
            num_scalar_prefetch=0,
            grid=grid,
            in_specs=[
                pl.BlockSpec((bp, _IN_PAD), const),          # x (bf16) resident
                pl.BlockSpec((_TK, _H1), lambda k: (k, 0)),  # W0 streamed over K
                pl.BlockSpec((1, _H1), const),               # b0
                pl.BlockSpec((_H1, _H2), const),             # W1 resident
                pl.BlockSpec((1, _H2), const),               # b1
                pl.BlockSpec((_H2, _H3), const),             # W2 resident
                pl.BlockSpec((1, _H3), const),               # b2
                pl.BlockSpec((_H3, _OUT_PAD), const),        # W3 resident
                pl.BlockSpec((1, _OUT_PAD), const),          # b3
            ],
            out_specs=pl.BlockSpec((bp, _OUT_PAD), const),
            scratch_shapes=[pltpu.VMEM((bp, _H1), jnp.float32)],
        ),
        compiler_params=pltpu.CompilerParams(
            dimension_semantics=("arbitrary",),
            vmem_limit_bytes=32 * 1024 * 1024,
        ),
    )(xp, w0, b0, w1, b1, w2, b2, w3, b3)


# ---------------------------------------------------------------------------
# Parameters: padded + bf16 weights built ONCE at init time.
# ---------------------------------------------------------------------------
_LAYER_DIMS = [(_IN, _H1), (_H1, _H2), (_H2, _H3), (_H3, _OUT)]
_LAYER_PADS = [(_IN_PAD, _H1), (_H1, _H2), (_H2, _H3), (_H3, _OUT_PAD)]


def init_discriminator_params(key):
    """nn.Linear-style U[-1/sqrt(fan_in), 1/sqrt(fan_in)] init.

    Weights stored (in, out) (transposed vs PyTorch), zero-padded to
    TPU-friendly shapes and cast to bf16; biases stored f32 as (1, out_pad).
    """
    params = []
    for (fi, fo), (fip, fop) in zip(_LAYER_DIMS, _LAYER_PADS):
        key, kw, kb = jax.random.split(key, 3)
        bound = 1.0 / math.sqrt(fi)
        w = jax.random.uniform(kw, (fi, fo), jnp.float32, -bound, bound)
        b = jax.random.uniform(kb, (fo,), jnp.float32, -bound, bound)
        wp = jnp.zeros((fip, fop), jnp.bfloat16).at[:fi, :fo].set(
            w.astype(jnp.bfloat16))
        bp = jnp.zeros((1, fop), jnp.float32).at[0, :fo].set(b)
        params.extend([wp, bp])
    return tuple(params)


# ---------------------------------------------------------------------------
# Forward pass
# ---------------------------------------------------------------------------
def discriminator_forward(params, img):
    w0, b0, w1, b1, w2, b2, w3, b3 = params
    B = img.shape[0]
    x = img.reshape(B, -1).astype(jnp.bfloat16)      # img.view(B, -1), bf16
    assert x.shape[1] == _IN, f"expected {_IN} flattened features"

    bp = max(_B_PAD, _round_up(B, 16))
    xp = jnp.pad(x, ((0, bp - B), (0, _IN_PAD - _IN)))

    out = _discriminator_pallas(xp, w0, b0, w1, b1, w2, b2, w3, b3)
    return out[:B, :_OUT]                            # (B, 1)


# ---------------------------------------------------------------------------
# Pure-JAX reference mirroring the kernel's bf16 quantization (f32 accumulate).
# ---------------------------------------------------------------------------
def _reference_forward(params, img):
    w0, b0, w1, b1, w2, b2, w3, b3 = params
    B = img.shape[0]
    x = img.reshape(B, -1).astype(jnp.float32)
    x = jnp.zeros((B, _IN_PAD), jnp.float32).at[:, :_IN].set(x)

    def q(a):  # bf16 quantize, compute in f32
        return a.astype(jnp.bfloat16).astype(jnp.float32)

    def lin(a, w, b):
        return jnp.dot(q(a), w.astype(jnp.float32),
                       preferred_element_type=jnp.float32) + b

    h = lin(x, w0, b0)
    h = jnp.where(h > 0, h, 0.2 * h)
    h = lin(h, w1, b1)
    h = jnp.where(h > 0, h, 0.2 * h)
    h = lin(h, w2, b2)
    h = jnp.where(h > 0, h, 0.2 * h)
    h = lin(h, w3, b3)
    return (1.0 / (1.0 + jnp.exp(-h)))[:, :_OUT]


if __name__ == "__main__":
    key = jax.random.PRNGKey(0)
    k_params, k_img = jax.random.split(key)

    params = init_discriminator_params(k_params)
    # NCHW input (2, 3, 50, 50) -> 7500 flattened features per sample
    img = jax.random.normal(k_img, (2, 3, 50, 50), jnp.float32)

    fwd = jax.jit(discriminator_forward)
    out = jax.block_until_ready(fwd(params, img))

    ref = _reference_forward(params, img)
    assert out.shape == (2, 1), out.shape
    assert jnp.allclose(out, ref, atol=1e-3, rtol=1e-3), (out, ref)

    print("KERNEL_OK")
</pallas_src>

<mosaic_0001>
module attributes {stable_mosaic.version = 11 : i64} {
  func.func @_disc_kernel(%arg0: i32, %arg1: memref<16x7680xbf16, #tpu.memory_space<vmem>>, %arg2: memref<3840x1024xbf16, #tpu.memory_space<vmem>>, %arg3: memref<1x1024xf32, #tpu.memory_space<vmem>>, %arg4: memref<1024x512xbf16, #tpu.memory_space<vmem>>, %arg5: memref<1x512xf32, #tpu.memory_space<vmem>>, %arg6: memref<512x256xbf16, #tpu.memory_space<vmem>>, %arg7: memref<1x256xf32, #tpu.memory_space<vmem>>, %arg8: memref<256x128xbf16, #tpu.memory_space<vmem>>, %arg9: memref<1x128xf32, #tpu.memory_space<vmem>>, %arg10: memref<16x128xf32, #tpu.memory_space<vmem>>, %arg11: memref<16x1024xf32, #tpu.memory_space<vmem>>) attributes {dimension_semantics = [#tpu.dimension_semantics<arbitrary>], iteration_bounds = array<i64: 2>, scalar_prefetch = 0 : i64, scratch_operands = 1 : i64, tpu.core_type = #tpu.core_type<tc>, window_params = [{pipeline_mode = #tpu.pipeline_mode<synchronous>, transform_indices = @transform_0, window_bounds = array<i64: 16, 7680>}, {transform_indices = @transform_1, window_bounds = array<i64: 3840, 1024>}, {pipeline_mode = #tpu.pipeline_mode<synchronous>, transform_indices = @transform_2, window_bounds = array<i64: 1, 1024>}, {pipeline_mode = #tpu.pipeline_mode<synchronous>, transform_indices = @transform_3, window_bounds = array<i64: 1024, 512>}, {pipeline_mode = #tpu.pipeline_mode<synchronous>, transform_indices = @transform_4, window_bounds = array<i64: 1, 512>}, {pipeline_mode = #tpu.pipeline_mode<synchronous>, transform_indices = @transform_5, window_bounds = array<i64: 512, 256>}, {pipeline_mode = #tpu.pipeline_mode<synchronous>, transform_indices = @transform_6, window_bounds = array<i64: 1, 256>}, {pipeline_mode = #tpu.pipeline_mode<synchronous>, transform_indices = @transform_7, window_bounds = array<i64: 256, 128>}, {pipeline_mode = #tpu.pipeline_mode<synchronous>, transform_indices = @transform_8, window_bounds = array<i64: 1, 128>}, {pipeline_mode = #tpu.pipeline_mode<synchronous>, transform_indices = @transform_9, window_bounds = array<i64: 16, 128>}]} {
    %c0_i32 = arith.constant 0 : i32
    %0 = arith.cmpi eq, %arg0, %c0_i32 : i32
    %1 = arith.extui %0 : i1 to i32
    %c0_i32_0 = arith.constant 0 : i32
    %2 = arith.cmpi ne, %1, %c0_i32_0 : i32
    scf.if %2 {
      %cst_8 = arith.constant 0.000000e+00 : f32
      %15 = vector.broadcast %cst_8 : f32 to vector<16x1024xf32>
      %c0_9 = arith.constant 0 : index
      %c0_10 = arith.constant 0 : index
      %16 = vector.load %arg11[%c0_9, %c0_10] : memref<16x1024xf32, #tpu.memory_space<vmem>>, vector<16x1024xf32>
      tpu.vector_store %arg11[%c0_9, %c0_10], %15 {strides = array<i32>} : memref<16x1024xf32, #tpu.memory_space<vmem>>, vector<16x1024xf32>,
    } else {
    }
    %c3840_i32 = arith.constant 3840 : i32
    %3 = arith.muli %arg0, %c3840_i32 : i32
    %4 = tpu.assume_multiple %3, 3840 : i32
    %c0 = arith.constant 0 : index
    %5 = arith.index_cast %4 : i32 to index
    %6 = vector.load %arg1[%c0, %5] : memref<16x7680xbf16, #tpu.memory_space<vmem>>, vector<16x3840xbf16>
    %c0_1 = arith.constant 0 : index
    %c0_2 = arith.constant 0 : index
    %7 = vector.load %arg11[%c0_1, %c0_2] : memref<16x1024xf32, #tpu.memory_space<vmem>>, vector<16x1024xf32>
    %c0_3 = arith.constant 0 : index
    %c0_4 = arith.constant 0 : index
    %8 = vector.load %arg2[%c0_3, %c0_4] : memref<3840x1024xbf16, #tpu.memory_space<vmem>>, vector<3840x1024xbf16>
    %cst = arith.constant dense<0.000000e+00> : vector<16x1024xf32>
    %9 = tpu.matmul %6, %8, %cst {dimension_numbers = #tpu.dot_dimension_numbers<[1], [0], [0], [1], [0, 0, 1, 1], [], []>} : vector<16x3840xbf16>, vector<3840x1024xbf16>, vector<16x1024xf32> -> vector<16x1024xf32>
    %10 = arith.addf %7, %9 : vector<16x1024xf32>
    %c0_5 = arith.constant 0 : index
    %c0_6 = arith.constant 0 : index
    %11 = vector.load %arg11[%c0_5, %c0_6] : memref<16x1024xf32, #tpu.memory_space<vmem>>, vector<16x1024xf32>
    tpu.vector_store %arg11[%c0_5, %c0_6], %10 {strides = array<i32>} : memref<16x1024xf32, #tpu.memory_space<vmem>>, vector<16x1024xf32>,
    %c1_i32 = arith.constant 1 : i32
    %12 = arith.cmpi eq, %arg0, %c1_i32 : i32
    %13 = arith.extui %12 : i1 to i32
    %c0_i32_7 = arith.constant 0 : i32
    %14 = arith.cmpi ne, %13, %c0_i32_7 : i32
    scf.if %14 {
      %c0_8 = arith.constant 0 : index
      %c0_9 = arith.constant 0 : index
      %15 = vector.load %arg11[%c0_8, %c0_9] : memref<16x1024xf32, #tpu.memory_space<vmem>>, vector<16x1024xf32>
      %c0_10 = arith.constant 0 : index
      %c0_11 = arith.constant 0 : index
      %16 = vector.load %arg3[%c0_10, %c0_11] : memref<1x1024xf32, #tpu.memory_space<vmem>>, vector<1x1024xf32>
      %17 = vector.broadcast %16 : vector<1x1024xf32> to vector<16x1024xf32>
      %18 = arith.addf %15, %17 : vector<16x1024xf32>
      %cst_12 = arith.constant 0.000000e+00 : f32
      %19 = vector.broadcast %cst_12 : f32 to vector<16x1024xf32>
      %20 = arith.cmpf ogt, %18, %19 : vector<16x1024xf32>
      %cst_13 = arith.constant 2.000000e-01 : f32
      %21 = vector.broadcast %cst_13 : f32 to vector<16x1024xf32>
      %22 = arith.mulf %21, %18 : vector<16x1024xf32>
      %23 = arith.select %20, %18, %22 : vector<16x1024xi1>, vector<16x1024xf32>
      %24 = arith.truncf %23 : vector<16x1024xf32> to vector<16x1024xbf16>
      %c0_14 = arith.constant 0 : index
      %c0_15 = arith.constant 0 : index
      %25 = vector.load %arg4[%c0_14, %c0_15] : memref<1024x512xbf16, #tpu.memory_space<vmem>>, vector<1024x512xbf16>
      %cst_16 = arith.constant dense<0.000000e+00> : vector<16x512xf32>
      %26 = tpu.matmul %24, %25, %cst_16 {dimension_numbers = #tpu.dot_dimension_numbers<[1], [0], [0], [1], [0, 0, 1, 1], [], []>} : vector<16x1024xbf16>, vector<1024x512xbf16>, vector<16x512xf32> -> vector<16x512xf32>
      %c0_17 = arith.constant 0 : index
      %c0_18 = arith.constant 0 : index
      %27 = vector.load %arg5[%c0_17, %c0_18] : memref<1x512xf32, #tpu.memory_space<vmem>>, vector<1x512xf32>
      %28 = vector.broadcast %27 : vector<1x512xf32> to vector<16x512xf32>
      %29 = arith.addf %26, %28 : vector<16x512xf32>
      %cst_19 = arith.constant 0.000000e+00 : f32
      %30 = vector.broadcast %cst_19 : f32 to vector<16x512xf32>
      %31 = arith.cmpf ogt, %29, %30 : vector<16x512xf32>
      %cst_20 = arith.constant 2.000000e-01 : f32
      %32 = vector.broadcast %cst_20 : f32 to vector<16x512xf32>
      %33 = arith.mulf %32, %29 : vector<16x512xf32>
      %34 = arith.select %31, %29, %33 : vector<16x512xi1>, vector<16x512xf32>
      %35 = arith.truncf %34 : vector<16x512xf32> to vector<16x512xbf16>
      %c0_21 = arith.constant 0 : index
      %c0_22 = arith.constant 0 : index
      %36 = vector.load %arg6[%c0_21, %c0_22] : memref<512x256xbf16, #tpu.memory_space<vmem>>, vector<512x256xbf16>
      %cst_23 = arith.constant dense<0.000000e+00> : vector<16x256xf32>
      %37 = tpu.matmul %35, %36, %cst_23 {dimension_numbers = #tpu.dot_dimension_numbers<[1], [0], [0], [1], [0, 0, 1, 1], [], []>} : vector<16x512xbf16>, vector<512x256xbf16>, vector<16x256xf32> -> vector<16x256xf32>
      %c0_24 = arith.constant 0 : index
      %c0_25 = arith.constant 0 : index
      %38 = vector.load %arg7[%c0_24, %c0_25] : memref<1x256xf32, #tpu.memory_space<vmem>>, vector<1x256xf32>
      %39 = vector.broadcast %38 : vector<1x256xf32> to vector<16x256xf32>
      %40 = arith.addf %37, %39 : vector<16x256xf32>
      %cst_26 = arith.constant 0.000000e+00 : f32
      %41 = vector.broadcast %cst_26 : f32 to vector<16x256xf32>
      %42 = arith.cmpf ogt, %40, %41 : vector<16x256xf32>
      %cst_27 = arith.constant 2.000000e-01 : f32
      %43 = vector.broadcast %cst_27 : f32 to vector<16x256xf32>
      %44 = arith.mulf %43, %40 : vector<16x256xf32>
      %45 = arith.select %42, %40, %44 : vector<16x256xi1>, vector<16x256xf32>
      %46 = arith.truncf %45 : vector<16x256xf32> to vector<16x256xbf16>
      %c0_28 = arith.constant 0 : index
      %c0_29 = arith.constant 0 : index
      %47 = vector.load %arg8[%c0_28, %c0_29] : memref<256x128xbf16, #tpu.memory_space<vmem>>, vector<256x128xbf16>
      %cst_30 = arith.constant dense<0.000000e+00> : vector<16x128xf32>
      %48 = tpu.matmul %46, %47, %cst_30 {dimension_numbers = #tpu.dot_dimension_numbers<[1], [0], [0], [1], [0, 0, 1, 1], [], []>} : vector<16x256xbf16>, vector<256x128xbf16>, vector<16x128xf32> -> vector<16x128xf32>
      %c0_31 = arith.constant 0 : index
      %c0_32 = arith.constant 0 : index
      %49 = vector.load %arg9[%c0_31, %c0_32] : memref<1x128xf32, #tpu.memory_space<vmem>>, vector<1x128xf32>
      %50 = vector.broadcast %49 : vector<1x128xf32> to vector<16x128xf32>
      %51 = arith.addf %48, %50 : vector<16x128xf32>
      %cst_33 = arith.constant 0.000000e+00 : f32
      %52 = vector.broadcast %cst_33 : f32 to vector<16x128xf32>
      %53 = arith.subf %52, %51 : vector<16x128xf32>
      %54 = math.exp %53 : vector<16x128xf32>
      %cst_34 = arith.constant 1.000000e+00 : f32
      %55 = vector.broadcast %cst_34 : f32 to vector<16x128xf32>
      %56 = arith.addf %55, %54 : vector<16x128xf32>
      %57 = tpu.reciprocal %56 {approx = true} : vector<16x128xf32> -> vector<16x128xf32>
      %c0_35 = arith.constant 0 : index
      %c0_36 = arith.constant 0 : index
      %58 = vector.load %arg10[%c0_35, %c0_36] : memref<16x128xf32, #tpu.memory_space<vmem>>, vector<16x128xf32>
      tpu.vector_store %arg10[%c0_35, %c0_36], %57 {strides = array<i32>} : memref<16x128xf32, #tpu.memory_space<vmem>>, vector<16x128xf32>,
    } else {
    }
    return
  }
  func.func @transform_0(%arg0: i32) -> (i32, i32) {
    %c0_i32 = arith.constant 0 : i32
    %c0_i32_0 = arith.constant 0 : i32
    %c0_i32_1 = arith.constant 0 : i32
    return %c0_i32, %c0_i32_0 : i32, i32
  }
  func.func @transform_1(%arg0: i32) -> (i32, i32) {
    %c0_i32 = arith.constant 0 : i32
    %c0_i32_0 = arith.constant 0 : i32
    return %arg0, %c0_i32 : i32, i32
  }
  func.func @transform_2(%arg0: i32) -> (i32, i32) {
    %c0_i32 = arith.constant 0 : i32
    %c0_i32_0 = arith.constant 0 : i32
    %c0_i32_1 = arith.constant 0 : i32
    return %c0_i32, %c0_i32_0 : i32, i32
  }
  func.func @transform_3(%arg0: i32) -> (i32, i32) {
    %c0_i32 = arith.constant 0 : i32
    %c0_i32_0 = arith.constant 0 : i32
    %c0_i32_1 = arith.constant 0 : i32
    return %c0_i32, %c0_i32_0 : i32, i32
  }
  func.func @transform_4(%arg0: i32) -> (i32, i32) {
    %c0_i32 = arith.constant 0 : i32
    %c0_i32_0 = arith.constant 0 : i32
    %c0_i32_1 = arith.constant 0 : i32
    return %c0_i32, %c0_i32_0 : i32, i32
  }
  func.func @transform_5(%arg0: i32) -> (i32, i32) {
    %c0_i32 = arith.constant 0 : i32
    %c0_i32_0 = arith.constant 0 : i32
    %c0_i32_1 = arith.constant 0 : i32
    return %c0_i32, %c0_i32_0 : i32, i32
  }
  func.func @transform_6(%arg0: i32) -> (i32, i32) {
    %c0_i32 = arith.constant 0 : i32
    %c0_i32_0 = arith.constant 0 : i32
    %c0_i32_1 = arith.constant 0 : i32
    return %c0_i32, %c0_i32_0 : i32, i32
  }
  func.func @transform_7(%arg0: i32) -> (i32, i32) {
    %c0_i32 = arith.constant 0 : i32
    %c0_i32_0 = arith.constant 0 : i32
    %c0_i32_1 = arith.constant 0 : i32
    return %c0_i32, %c0_i32_0 : i32, i32
  }
  func.func @transform_8(%arg0: i32) -> (i32, i32) {
    %c0_i32 = arith.constant 0 : i32
    %c0_i32_0 = arith.constant 0 : i32
    %c0_i32_1 = arith.constant 0 : i32
    return %c0_i32, %c0_i32_0 : i32, i32
  }
  func.func @transform_9(%arg0: i32) -> (i32, i32) {
    %c0_i32 = arith.constant 0 : i32
    %c0_i32_0 = arith.constant 0 : i32
    %c0_i32_1 = arith.constant 0 : i32
    return %c0_i32, %c0_i32_0 : i32, i32
  }
}

</mosaic_0001>

<bundles_post_ra>
// kernel: discriminator_forward.1
= control target key start
LH: loop header
LB: loop body
LE: loop exit
PB: predicated region body
PF: predicated region fallthrough
CT: control target
= control target key end

     0   :  { %s23671_s0 = inlined_call_operand.vmem [shape: bf16[16,7680], index: 0, kind: input, shape index: {}]   ;;  %s23672_s1 = inlined_call_operand.hbm [shape: bf16[7680,1024], index: 1, kind: input, shape index: {}]   ;;  %s23673_s2 = inlined_call_operand.hbm [shape: f32[1,1024], index: 2, kind: input, shape index: {}]   ;;  %s23674_s3 = inlined_call_operand.hbm [shape: bf16[1024,512], index: 3, kind: input, shape index: {}]   ;;  %s23675_s4 = inlined_call_operand.hbm [shape: f32[1,512], index: 4, kind: input, shape index: {}]   ;;  %s23676_s5 = inlined_call_operand.hbm [shape: bf16[512,256], index: 5, kind: input, shape index: {}]   ;;  %s23677_s6 = inlined_call_operand.hbm [shape: f32[1,256], index: 6, kind: input, shape index: {}]   ;;  %s23678_s7 = inlined_call_operand.hbm [shape: bf16[256,128], index: 7, kind: input, shape index: {}]   ;;  %s23679_s8 = inlined_call_operand.hbm [shape: f32[1,128], index: 8, kind: input, shape index: {}]   ;;  %s23680_s9 = inlined_call_operand.vmem [shape: f32[16,128], index: 9, kind: output, shape index: {}]  }
   0x1   :  { %23683 = sst [smem:[#allocation21_spill]] %s23673_s2 }
   0x2   :  { %14 = vsyncpa [#allocation4], 0 }
   0x3   :  { %16 = vsyncpa [#allocation4 + $0x1], 0 }
   0x4   :  { %17 = vsyncpa [#allocation6], 0 }
   0x5   :  { %18 = vsyncpa [#allocation9], 0 }
   0x6   :  { %19 = vsyncpa [#allocation12], 0 }
   0x7   :  { %20 = vsyncpa [#allocation15], 0  ;;  %s21290_s30 = smov 0   ;;  %s21292_s10 = smov 0  }
   0x8   :  { %s21294_s11 = smov 0   ;;  %s21296_s12 = smov 0  }
   0x9 LB: > { %s21223_s13 = smov [#allocation5]   ;;  %s21311_s15 = sadd.s32 4294967295, %s21221_s12   ;;  %s21221_s12 = sphi %s21296_s12, %s23704_s12   ;;  %s21217_s11 = sphi %s21294_s11, %s23703_s11   ;;  %s21213_s10 = sphi %s21292_s10, %s23702_s10   ;;  %s21209_s30 = sphi %s21290_s30, %s23701_s30  }
   0xa   : > { %s262_s14 = sshll.u32 %s21223_s13, 4  ;;  %p17645_p0 = scmp.ge.s32.totalorder %s21221_s12, 1  ;;  %s21317_s14 = int_to_ptr.vmem [resolvable:$true] %s262_s14 }
   0xb   : > { %p23681_p1 = scmp.eq.s32.totalorder %s21311_s15, 0  ;;  %p246_p2 = scmp.lt.s32.totalorder %s21221_s12, 3 }
   0xc   : > { %s21224_s17 = smov [#allocation8]   ;;  %s21225_s19 = smov [#allocation11]  }
   0xd   : > { %p21319_p4 = pnand %p17645_p0, %p246_p2  ;;  %s286_s18 = sshll.u32 %s21224_s17, 4  ;;  %s21325_s18 = int_to_ptr.vmem [resolvable:$true] %s286_s18 }
   0xe   : > { %s310_s20 = sshll.u32 %s21225_s19, 4  ;;  %s21226_s22 = smov [#allocation7]   ;;  %s21333_s20 = int_to_ptr.vmem [resolvable:$true] %s310_s20 }
   0xf   : > { %s23684_s16 = scalar_select %p21319_p4, 1, 0 }
  0x10   : > { %p20277_p5 = pneg %p21319_p4  ;;  %s21335_s23 = sshll.u32 %s21226_s22, 4  ;;  %s273_s23 = int_to_ptr.vmem [resolvable:$true] %s21335_s23 }
  0x11   : > { %s23686_s2 = sld [smem:[#allocation21_spill]] }
  0x12   : > { %p21329_p6 = pnand %p20277_p5, %p23681_p1 }
  0x14   : > { %p21345_p8 = pneg %p21329_p6 }
  0x17   : > { %s20945_s26 = scalar_lea.hbm %s23686_s2, 128 }
  0x18   : > { %p20946_p7 = scmp.ne.s32.totalorder %s23686_s2, %s20945_s26  ;;  %p20952_p11 = scmp.lt.u32.totalorder %s20945_s26, %s23686_s2 }
  0x1a   : > { %p20948_p9 = pnand %p21345_p8, %p20946_p7 }
  0x1c   : > { %p20949_p10 = pneg %p20948_p9 }
  0x1e   : > { %p20954_p12 = pnand %p20952_p11, %p20949_p10 }
  0x20   : > { %20957 = shalt.err (!%p20954_p12)
}
  0x21   : > { %s20958_s19 = scalar_lea.vmem %s21317_s14, 128  ;;  %p20966_p5 = scmp.lt.s32.totalorder %s21317_s14, %s21317_s14 }
  0x22   : > { %p20959_p13 = scmp.ne.s32.totalorder %s21317_s14, %s20958_s19  ;;  %p20967_p3 = scmp.lt.s32.totalorder %s20958_s19, %s20958_s19 }
  0x24   : > { %p20961_p0 = pnand %p20959_p13, %p21345_p8  ;;  %p20968_p7 = por %p20967_p3, %p20966_p5 }
  0x26   : > { %p20962_p2 = pneg %p20961_p0 }
  0x28   : > { %p20969_p9 = pnand %p20968_p7, %p20962_p2 }
  0x2a   : > { %20972 = shalt.err (!%p20969_p9)
}
  0x2b   : > { %20280 = dma.hbm_to_vmem [thread:$0]  (!%p21329_p6), %s23686_s2, 128, %s21317_s14, [#allocation6]  }
  0x2c   : > { %s20973_s27 = scalar_lea.hbm %s23675_s4, 64 }
  0x2d   : > { %p20974_p10 = scmp.ne.s32.totalorder %s23675_s4, %s20973_s27  ;;  %p20980_p12 = scmp.lt.u32.totalorder %s20973_s27, %s23675_s4 }
  0x2f   : > { %p20976_p3 = pnand %p20974_p10, %p21345_p8 }
  0x31   : > { %p20977_p11 = pneg %p20976_p3 }
  0x33   : > { %p20982_p13 = pnand %p20980_p12, %p20977_p11 }
  0x35   : > { %20985 = shalt.err (!%p20982_p13)
}
  0x36   : > { %s20986_s14 = scalar_lea.vmem %s21325_s18, 64  ;;  %p20994_p7 = scmp.lt.s32.totalorder %s21325_s18, %s21325_s18 }
  0x37   : > { %p20987_p0 = scmp.ne.s32.totalorder %s21325_s18, %s20986_s14  ;;  %p20995_p9 = scmp.lt.s32.totalorder %s20986_s14, %s20986_s14 }
  0x39   : > { %p20989_p2 = pnand %p20987_p0, %p21345_p8  ;;  %p20996_p10 = por %p20995_p9, %p20994_p7 }
  0x3b   : > { %p20990_p5 = pneg %p20989_p2 }
  0x3d   : > { %p20997_p3 = pnand %p20996_p10, %p20990_p5 }
  0x3f   : > { %21000 = shalt.err (!%p20997_p3)
}
  0x40   : > { %20286 = dma.hbm_to_vmem [thread:$0]  (!%p21329_p6), %s23675_s4, 64, %s21325_s18, [#allocation9]  }
  0x41   : > { %s21001_s27 = scalar_lea.hbm %s23677_s6, 32 }
  0x42   : > { %p21002_p11 = scmp.ne.s32.totalorder %s23677_s6, %s21001_s27  ;;  %p21008_p0 = scmp.lt.u32.totalorder %s21001_s27, %s23677_s6 }
  0x44   : > { %p21004_p12 = pnand %p21002_p11, %p21345_p8 }
  0x46   : > { %p21005_p13 = pneg %p21004_p12 }
  0x48   : > { %p21010_p2 = pnand %p21008_p0, %p21005_p13 }
  0x4a   : > { %21013 = shalt.err (!%p21010_p2)
}
  0x4b   : > { %s21014_s18 = scalar_lea.vmem %s21333_s20, 32  ;;  %p21022_p10 = scmp.lt.s32.totalorder %s21333_s20, %s21333_s20 }
  0x4c   : > { %p21015_p5 = scmp.ne.s32.totalorder %s21333_s20, %s21014_s18  ;;  %p21023_p3 = scmp.lt.s32.totalorder %s21014_s18, %s21014_s18 }
  0x4e   : > { %p21017_p7 = pnand %p21015_p5, %p21345_p8  ;;  %p21024_p11 = por %p21023_p3, %p21022_p10 }
  0x50   : > { %p21018_p9 = pneg %p21017_p7 }
  0x52   : > { %p21025_p12 = pnand %p21024_p11, %p21018_p9 }
  0x54   : > { %21028 = shalt.err (!%p21025_p12)
}
  0x55   : > { %20292 = dma.hbm_to_vmem [thread:$0]  (!%p21329_p6), %s23677_s6, 32, %s21333_s20, [#allocation12]  }
  0x56   : > { %s21029_s26 = scalar_lea.hbm %s23674_s3, 32768 }
  0x57   : > { %p21030_p13 = scmp.ne.s32.totalorder %s23674_s3, %s21029_s26  ;;  %p21036_p5 = scmp.lt.u32.totalorder %s21029_s26, %s23674_s3 }
  0x59   : > { %p21032_p0 = pnand %p21030_p13, %p21345_p8 }
  0x5b   : > { %p21033_p2 = pneg %p21032_p0 }
  0x5d   : > { %p21038_p7 = pnand %p21036_p5, %p21033_p2 }
  0x5f   : > { %21041 = shalt.err (!%p21038_p7)
}
  0x60   : > { %s21042_s19 = scalar_lea.vmem %s273_s23, 32768  ;;  %p21050_p11 = scmp.lt.s32.totalorder %s273_s23, %s273_s23 }
  0x61   : > { %p21043_p9 = scmp.ne.s32.totalorder %s273_s23, %s21042_s19  ;;  %p21051_p12 = scmp.lt.s32.totalorder %s21042_s19, %s21042_s19 }
  0x63   : > { %p21045_p10 = pnand %p21043_p9, %p21345_p8  ;;  %p21052_p1 = por %p21051_p12, %p21050_p11 }
  0x65   : > { %p21046_p3 = pneg %p21045_p10 }
  0x67   : > { %p21053_p4 = pnand %p21052_p1, %p21046_p3 }
  0x69   : > { %21056 = shalt.err (!%p21053_p4)
}
  0x6a   : > { %s21227_s20 = smov 256   ;;  %s21228_s18 = smov 16  }
  0x6b   : > { %20283 = dma.hbm_to_vmem [thread:$0]  (!%p21329_p6), %s23674_s3, 32768, %s273_s23, [#allocation6], %s21227_s20, %s21227_s20, %s21228_s18  }
  0x6c   : > { %s21229_s24 = smov [#allocation10]   ;;  %s21057_s28 = scalar_lea.hbm %s23676_s5, 8192 }
  0x6d   : > { %s296_s25 = sshll.u32 %s21229_s24, 4  ;;  %p21058_p1 = scmp.ne.s32.totalorder %s23676_s5, %s21057_s28  ;;  %s297_s25 = int_to_ptr.vmem [resolvable:$true] %s296_s25 }
  0x6e   : > { %p21064_p0 = scmp.lt.u32.totalorder %s21057_s28, %s23676_s5 }
  0x6f   : > { %p21060_p4 = pnand %p21058_p1, %p21345_p8 }
  0x71   : > { %p21061_p13 = pneg %p21060_p4 }
  0x73   : > { %p21066_p2 = pnand %p21064_p0, %p21061_p13 }
  0x75   : > { %21069 = shalt.err (!%p21066_p2)
}
  0x76   : > { %s21070_s23 = scalar_lea.vmem %s297_s25, 8192  ;;  %p21078_p10 = scmp.lt.s32.totalorder %s297_s25, %s297_s25 }
  0x77   : > { %p21071_p5 = scmp.ne.s32.totalorder %s297_s25, %s21070_s23  ;;  %p21079_p3 = scmp.lt.s32.totalorder %s21070_s23, %s21070_s23 }
  0x79   : > { %p21073_p7 = pnand %p21071_p5, %p21345_p8  ;;  %p21080_p11 = por %p21079_p3, %p21078_p10 }
  0x7b   : > { %p21074_p9 = pneg %p21073_p7 }
  0x7d   : > { %p21081_p12 = pnand %p21080_p11, %p21074_p9 }
  0x7f   : > { %21084 = shalt.err (!%p21081_p12)
}
  0x80   : > { %s21230_s20 = smov 128   ;;  %s21231_s18 = smov 8  }
  0x81   : > { %20289 = dma.hbm_to_vmem [thread:$0]  (!%p21329_p6), %s23676_s5, 8192, %s297_s25, [#allocation9], %s21230_s20, %s21230_s20, %s21231_s18  }
  0x82   : > { %s21232_s22 = smov [#allocation13]   ;;  %s21085_s28 = scalar_lea.hbm %s23678_s7, 2048 }
  0x83   : > { %s320_s24 = sshll.u32 %s21232_s22, 4  ;;  %p21086_p1 = scmp.ne.s32.totalorder %s23678_s7, %s21085_s28  ;;  %s321_s24 = int_to_ptr.vmem [resolvable:$true] %s320_s24 }
  0x84   : > { %p21092_p0 = scmp.lt.u32.totalorder %s21085_s28, %s23678_s7 }
  0x85   : > { %p21088_p4 = pnand %p21086_p1, %p21345_p8 }
  0x87   : > { %p21089_p13 = pneg %p21088_p4 }
  0x89   : > { %p21094_p2 = pnand %p21092_p0, %p21089_p13 }
  0x8b   : > { %21097 = shalt.err (!%p21094_p2)
}
  0x8c   : > { %s21098_s25 = scalar_lea.vmem %s321_s24, 2048  ;;  %p21106_p10 = scmp.lt.s32.totalorder %s321_s24, %s321_s24 }
  0x8d   : > { %p21099_p5 = scmp.ne.s32.totalorder %s321_s24, %s21098_s25  ;;  %p21107_p3 = scmp.lt.s32.totalorder %s21098_s25, %s21098_s25 }
  0x8f   : > { %p21101_p7 = pnand %p21099_p5, %p21345_p8  ;;  %p21108_p11 = por %p21107_p3, %p21106_p10 }
  0x91   : > { %p21102_p9 = pneg %p21101_p7 }
  0x93   : > { %p21109_p12 = pnand %p21108_p11, %p21102_p9 }
  0x95   : > { %21112 = shalt.err (!%p21109_p12)
}
  0x96   : > { %s21233_s20 = smov 64   ;;  %s21234_s18 = smov 4  }
  0x97   : > { %20295 = dma.hbm_to_vmem [thread:$0]  (!%p21329_p6), %s23678_s7, 2048, %s321_s24, [#allocation12], %s21233_s20, %s21233_s20, %s21234_s18  }
  0x98   : > { %s21235_s22 = smov [#allocation14]   ;;  %s21113_s13 = scalar_lea.hbm %s23679_s8, 16 }
  0x99   : > { %s334_s26 = sshll.u32 %s21235_s22, 4  ;;  %p21114_p1 = scmp.ne.s32.totalorder %s23679_s8, %s21113_s13  ;;  %s335_s26 = int_to_ptr.vmem [resolvable:$true] %s334_s26 }
  0x9a   : > { %p21120_p0 = scmp.lt.u32.totalorder %s21113_s13, %s23679_s8 }
  0x9b   : > { %p21116_p4 = pnand %p21114_p1, %p21345_p8 }
  0x9d   : > { %p21117_p13 = pneg %p21116_p4 }
  0x9f   : > { %p21122_p2 = pnand %p21120_p0, %p21117_p13 }
  0xa1   : > { %21125 = shalt.err (!%p21122_p2)
}
  0xa2   : > { %s21126_s24 = scalar_lea.vmem %s335_s26, 16  ;;  %s21133_s20 = scalar_lea.vmem %s335_s26, 32 }
  0xa3   : > { %p21127_p5 = scmp.ne.s32.totalorder %s335_s26, %s21126_s24  ;;  %p21134_p10 = scmp.lt.s32.totalorder %s335_s26, %s335_s26 }
  0xa4   : > { %p21135_p3 = scmp.lt.s32.totalorder %s21133_s20, %s21126_s24 }
  0xa5   : > { %p21129_p7 = pnand %p21127_p5, %p21345_p8 }
  0xa6   : > { %p21136_p11 = por %p21135_p3, %p21134_p10 }
  0xa7   : > { %p21130_p9 = pneg %p21129_p7 }
  0xa9   : > { %p21137_p12 = pnand %p21136_p11, %p21130_p9 }
  0xab   : > { %21140 = shalt.err (!%p21137_p12)
}
  0xac   : > { %20298 = dma.hbm_to_vmem [thread:$0]  (!%p21329_p6), %s23679_s8, 16, %s335_s26, [#allocation15]  }
  0xad   : > { %s21486_s29 = sadd.s32 1, %s21221_s12   ;;  %s54_s14 = sadd.s32 1, %s21217_s11 }
  0xae   : > { %s51_s21 = ssub.s32 %s21221_s12, %s21486_s29  ;;  %p61_p1 = scmp.ne.s32.totalorder %s21217_s11, %s21213_s10 }
  0xaf   : > { %p52_p8 = scmp.eq.s32.totalorder %s51_s21, 0  ;;  %p62_p4 = scmp.eq.s32.totalorder %s21221_s12, 0 }
  0xb0   : > { %p67_p13 = scmp.ne.s32.totalorder %s21213_s10, %s21209_s30  ;;  %p23688_p2 = scmp.eq.s32.totalorder %s21311_s15, 0 }
  0xb1   : > { %s21497_s22 = scalar_select %p52_p8, %s21217_s11, %s54_s14  }
  0xb2   : > { %p63_p0 = por %p62_p4, %p61_p1  ;;  %p21501_p5 = por %p23688_p2, %p67_p13 }
  0xb3   : > { %p20310_p7 = scmp.lt.s32.totalorder %s21221_s12, 2  ;;  %s345_s28 = sand.u32 1, %s21217_s11  }
  0xb4   : > { %s20245_s26 = smul.u32 15360, %s345_s28  ;;  %s21146_s21 = scalar_lea.hbm %s23672_s1, 491520 }
  0xb5   : > { %s19958_s13 = smul.u32 245760, %s21221_s12  ;;  %p21508_p6 = pnand %p20310_p7, %p63_p0 }
  0xb6   : > { %s349_s25 = scalar_lea.vmem [#allocation3], %s20245_s26  ;;  %s21519_s12 = scalar_lea.sflag [#allocation4], %s345_s28 }
  0xb7   : > { %s21515_s30 = scalar_lea.hbm %s23672_s1, %s19958_s13  ;;  %s357_s24 = sshll.u32 %s349_s25, 4  ;;  %s21517_s24 = int_to_ptr.vmem [resolvable:$true] %s357_s24 }
  0xb8   : > { %s21141_s20 = scalar_lea.hbm %s21515_s30, 245760  ;;  %p21143_p10 = pneg %p21508_p6 }
  0xb9   : > { %p21142_p9 = scmp.ne.s32.totalorder %s21515_s30, %s21141_s20  ;;  %p21147_p12 = scmp.lt.u32.totalorder %s21515_s30, %s23672_s1 }
  0xba   : > { %p21148_p8 = scmp.lt.u32.totalorder %s21146_s21, %s21141_s20  ;;  %p21150_p4 = scmp.lt.u32.totalorder %s21141_s20, %s21515_s30 }
  0xbb   : > { %p21144_p3 = pnand %p21143_p10, %p21142_p9 }
  0xbc   : > { %p21149_p1 = por %p21148_p8, %p21147_p12 }
  0xbd   : > { %p21145_p11 = pneg %p21144_p3 }
  0xbe   : > { %p21151_p13 = por %p21150_p4, %p21149_p1 }
  0xc0   : > { %p21152_p0 = pnand %p21151_p13, %p21145_p11 }
  0xc2   : > { %21155 = shalt.err (!%p21152_p0)
}
  0xc3   : > { %s21156_s28 = scalar_lea.vmem %s21517_s24, 245760  ;;  %s21236_s26 = smov [#allocation3]  }
  0xc4   : > { %p21157_p2 = scmp.ne.s32.totalorder %s21517_s24, %s21156_s28  ;;  %s21161_s19 = sshll.u32 %s21236_s26, 4  ;;  %s21162_s19 = int_to_ptr.vmem [resolvable:$false] %s21161_s19 }
  0xc5   : > { %s21163_s23 = scalar_lea.vmem %s21162_s19, 491520  ;;  %p21164_p3 = scmp.lt.s32.totalorder %s21517_s24, %s21162_s19 }
  0xc6   : > { %p21159_p7 = pnand %p21157_p2, %p21143_p10  ;;  %p21165_p12 = scmp.lt.s32.totalorder %s21163_s23, %s21156_s28 }
  0xc8   : > { %p21160_p9 = pneg %p21159_p7  ;;  %p21166_p8 = por %p21165_p12, %p21164_p3 }
  0xca   : > { %p21167_p1 = pnand %p21166_p8, %p21160_p9 }
  0xcc   : > { %21170 = shalt.err (!%p21167_p1)
}
  0xcd   : > { %s21237_s25 = smov 512   ;;  %s21238_s20 = smov 32  }
  0xce   : > { %20302 = dma.hbm_to_vmem [thread:$0]  (!%p21508_p6), %s21515_s30, 245760, %s21517_s24, %s21519_s12, %s21237_s25, %s21237_s25, %s21238_s20  }
  0xcf   : > { %p23691_p10 = scmp.ne.s32.totalorder %s23684_s16, 0 }
  0xd0   : > { %s371_s18 = sand.u32 (!%p23691_p10), 1, %s21213_s10  }
  0xd1   : > { %369 = sbr.rel (%p23691_p10) target bundleno = 3352 (0xd18), region = 56  ;;  %s372_s21 = scalar_lea.sflag (!%p23691_p10), [#allocation4], %s371_s18 }
  0xd2   : > { %s20246_s2 = smul.u32 (!%p23691_p10), 15360, %s371_s18 }
  0xd4   : > { %s21550_s14 = scalar_lea.vmem (!%p23691_p10), [#allocation3], %s20246_s2 }
  0xd8   : > { %21188 = dma.done.wait (%p21501_p5), %s372_s21, 245760  }
  0xd9   : > { %21190 = vsyncadd (%p21501_p5), %s372_s21, 4294721536  ;;  %p23692_p11 = scmp.eq.s32.totalorder %s21311_s15, 0 }
  0xdb   : > { %21192 = dma.done.wait (%p23692_p11), [#allocation6], 32896   ;;  %p23693_p6 = pmov %p23692_p11 }
  0xdd   : > { %21194 = vsyncadd (%p23693_p6), [#allocation6], 4294934400  ;;  %p23694_p4 = pmov %p23693_p6 }
  0xdf   : > { %21196 = dma.done.wait (%p23694_p4), [#allocation9], 8256   ;;  %p23695_p13 = pmov %p23694_p4 }
  0xe0   : > { %p23696_p0 = pmov %p23694_p4 }
  0xe1   : > { %21198 = vsyncadd (%p23695_p13), [#allocation9], 4294959040 }
  0xe2   : > { %21200 = dma.done.wait (%p23696_p0), [#allocation12], 2080   ;;  %p23697_p2 = pmov %p23696_p0 }
  0xe3   : > { %p23698_p5 = pmov %p23696_p0 }
  0xe4   : > { %21202 = vsyncadd (%p23697_p2), [#allocation12], 4294965216 }
  0xe5   : > { %21204 = dma.done.wait (%p23698_p5), [#allocation15], 16   ;;  %p23699_p7 = pmov %p23696_p0 }
  0xe6   : > { %p23700_p9 = scmp.ne.s32.totalorder %s21311_s15, 0 }
  0xe7   : > { %21206 = vsyncadd (%p23699_p7), [#allocation15], 4294967280  ;;  %v21239_v0 = vmov (!%p23700_p9), 0.0  }
  0xe8   : > { %438 = sbr.rel (%p23700_p9) target bundleno = 240 (0xf0), region = 92  ;;  %439 = vst [vmem:[#allocation2] sm:$0xff] (!%p23700_p9), %v21239_v0  ;;  %440 = vst [vmem:[#allocation2 + $0x8] sm:$0xff] (!%p23700_p9), %v21239_v0 }
  0xe9   : > { %441 = vst [vmem:[#allocation2 + $0x10] sm:$0xff] (!%p23700_p9), %v21239_v0  ;;  %442 = vst [vmem:[#allocation2 + $0x18] sm:$0xff] (!%p23700_p9), %v21239_v0 }
  0xea   : > { %443 = vst [vmem:[#allocation2 + $0x20] sm:$0xff] (!%p23700_p9), %v21239_v0  ;;  %444 = vst [vmem:[#allocation2 + $0x28] sm:$0xff] (!%p23700_p9), %v21239_v0 }
  0xeb   : > { %445 = vst [vmem:[#allocation2 + $0x30] sm:$0xff] (!%p23700_p9), %v21239_v0  ;;  %446 = vst [vmem:[#allocation2 + $0x38] sm:$0xff] (!%p23700_p9), %v21239_v0 }
  0xec   : > { %447 = vst [vmem:[#allocation2 + $0x40] sm:$0xff] (!%p23700_p9), %v21239_v0  ;;  %448 = vst [vmem:[#allocation2 + $0x48] sm:$0xff] (!%p23700_p9), %v21239_v0 }
  0xed   : > { %449 = vst [vmem:[#allocation2 + $0x50] sm:$0xff] (!%p23700_p9), %v21239_v0  ;;  %450 = vst [vmem:[#allocation2 + $0x58] sm:$0xff] (!%p23700_p9), %v21239_v0 }
  0xee   : > { %451 = vst [vmem:[#allocation2 + $0x60] sm:$0xff] (!%p23700_p9), %v21239_v0  ;;  %452 = vst [vmem:[#allocation2 + $0x68] sm:$0xff] (!%p23700_p9), %v21239_v0 }
  0xef   : > { %453 = vst [vmem:[#allocation2 + $0x70] sm:$0xff] %v21239_v0  ;;  %454 = vst [vmem:[#allocation2 + $0x78] sm:$0xff] %v21239_v0 }
  0xf0 PF: > { %v506_v1 = vld [vmem:[%s21550_s14] sm:$0xff]  ;;  %v507_v3 = vld [vmem:[%s21550_s14 + $0x8] sm:$0xff]  ;;  %s455_s16 = smul.u32 3840, %s21311_s15  ;;  %p19616_p3 = scmp.ne.s32.totalorder %s21311_s15, 1 }
  0xf1   : > { %v510_v2 = vld [vmem:[%s21550_s14 + $0x20] sm:$0xff]  ;;  %v511_v5 = vld [vmem:[%s21550_s14 + $0x28] sm:$0xff] }
  0xf2   : > { %v17697_v4 = vcombine.high %v506_v1, %v510_v2  ;;  %v17696_v6 = vcombine.low %v506_v1, %v510_v2  ;;  %v514_v7 = vld [vmem:[%s21550_s14 + $0x40] sm:$0xff]  ;;  %v17699_v9 = vcombine.high %v507_v3, %v511_v5  ;;  %v17698_v10 = vcombine.low %v507_v3, %v511_v5  ;;  %v515_v12 = vld [vmem:[%s21550_s14 + $0x48] sm:$0xff]  ;;  %s456_s27 = sshra.s32 %s455_s16, 7 }
  0xf3   : > { %v518_v8 = vld [vmem:[%s21550_s14 + $0x60] sm:$0xff]  ;;  %v519_v13 = vld [vmem:[%s21550_s14 + $0x68] sm:$0xff]  ;;  %s17665_s17 = sshll.u32 %s456_s27, 2 }
  0xf4   : > { %v17705_v11 = vcombine.high %v514_v7, %v518_v8  ;;  %v522_v14 = vld [vmem:[%s21550_s14 + $0x80] sm:$0xff]  ;;  %12176 = vmatprep.subr.bf16.mxu0 %v17697_v4  ;;  %v17707_v15 = vcombine.high %v515_v12, %v519_v13  ;;  %v523_v17 = vld [vmem:[%s21550_s14 + $0x88] sm:$0xff]  ;;  %12821 = vmatprep.subr.bf16.mxu1 %v17699_v9  ;;  %v17704_v19 = vcombine.low %v514_v7, %v518_v8  ;;  %s21606_s12 = scalar_lea.vmem %s23671_s0, %s17665_s17 }
  0xf5   : > { %v526_v16 = vld [vmem:[%s21550_s14 + $0xa0] sm:$0xff]  ;;  %v527_v18 = vld [vmem:[%s21550_s14 + $0xa8] sm:$0xff]  ;;  %12177 = vmatpush1.bf16.msra.mxu0 %v17696_v6  ;;  %12822 = vmatpush1.bf16.msra.mxu1 %v17698_v10  ;;  %v17706_v20 = vcombine.low %v515_v12, %v519_v13 }
  0xf6   : > { %12178 = vmatprep.subr.bf16.mxu0 %v17705_v11  ;;  %v17713_v21 = vcombine.high %v522_v14, %v526_v16  ;;  %12823 = vmatprep.subr.bf16.mxu1 %v17707_v15  ;;  %v17715_v22 = vcombine.high %v523_v17, %v527_v18  ;;  %v530_v23 = vld [vmem:[%s21550_s14 + $0xc0] sm:$0xff]  ;;  %v531_v25 = vld [vmem:[%s21550_s14 + $0xc8] sm:$0xff]  ;;  %v17712_v27 = vcombine.low %v522_v14, %v526_v16 }
  0xf7   : > { %v534_v24 = vld [vmem:[%s21550_s14 + $0xe0] sm:$0xff]  ;;  %v535_v26 = vld [vmem:[%s21550_s14 + $0xe8] sm:$0xff]  ;;  %v17714_v28 = vcombine.low %v523_v17, %v527_v18 }
  0xf8   : > { %v17721_v29 = vcombine.high %v530_v23, %v534_v24  ;;  %v17723_v30 = vcombine.high %v531_v25, %v535_v26  ;;  %v538_v31 = vld [vmem:[%s21550_s14 + $0x100] sm:$0xff]  ;;  %v539_v33 = vld [vmem:[%s21550_s14 + $0x108] sm:$0xff]  ;;  %v17720_v35 = vcombine.low %v530_v23, %v534_v24  ;;  %v17722_v36 = vcombine.low %v531_v25, %v535_v26 }
  0xf9   : > { %12179 = vmatpush1.bf16.msra.mxu0 %v17704_v19  ;;  %12824 = vmatpush1.bf16.msra.mxu1 %v17706_v20  ;;  %v542_v32 = vld [vmem:[%s21550_s14 + $0x120] sm:$0xff]  ;;  %v543_v34 = vld [vmem:[%s21550_s14 + $0x128] sm:$0xff] }
  0xfa   : > { %12180 = vmatprep.subr.bf16.mxu0 %v17713_v21  ;;  %12825 = vmatprep.subr.bf16.mxu1 %v17715_v22  ;;  %v17729_v37 = vcombine.high %v538_v31, %v542_v32  ;;  %v17731_v38 = vcombine.high %v539_v33, %v543_v34  ;;  %v546_v39 = vld [vmem:[%s21550_s14 + $0x140] sm:$0xff]  ;;  %v547_v41 = vld [vmem:[%s21550_s14 + $0x148] sm:$0xff]  ;;  %v17728_v43 = vcombine.low %v538_v31, %v542_v32 }
  0xfb   : > { %v550_v40 = vld [vmem:[%s21550_s14 + $0x160] sm:$0xff]  ;;  %v551_v42 = vld [vmem:[%s21550_s14 + $0x168] sm:$0xff]  ;;  %v17730_v44 = vcombine.low %v539_v33, %v543_v34 }
  0xfc   : > { %v17737_v45 = vcombine.high %v546_v39, %v550_v40  ;;  %v17739_v46 = vcombine.high %v547_v41, %v551_v42  ;;  %v554_v47 = vld [vmem:[%s21550_s14 + $0x180] sm:$0xff]  ;;  %v555_v49 = vld [vmem:[%s21550_s14 + $0x188] sm:$0xff]  ;;  %v17736_v51 = vcombine.low %v546_v39, %v550_v40  ;;  %v17738_v52 = vcombine.low %v547_v41, %v551_v42 }
  0xfd   : > { %12181 = vmatpush1.bf16.msra.mxu0 %v17712_v27  ;;  %12826 = vmatpush1.bf16.msra.mxu1 %v17714_v28  ;;  %v558_v48 = vld [vmem:[%s21550_s14 + $0x1a0] sm:$0xff]  ;;  %v559_v50 = vld [vmem:[%s21550_s14 + $0x1a8] sm:$0xff] }
  0xfe   : > { %12182 = vmatprep.subr.bf16.mxu0 %v17721_v29  ;;  %12827 = vmatprep.subr.bf16.mxu1 %v17723_v30  ;;  %v17745_v53 = vcombine.high %v554_v47, %v558_v48  ;;  %v17747_v54 = vcombine.high %v555_v49, %v559_v50  ;;  %v562_v55 = vld [vmem:[%s21550_s14 + $0x1c0] sm:$0xff]  ;;  %v563_v58 = vld [vmem:[%s21550_s14 + $0x1c8] sm:$0xff]  ;;  %v17744_v60 = vcombine.low %v554_v47, %v558_v48 }
  0xff   : > { %v566_v56 = vld [vmem:[%s21550_s14 + $0x1e0] sm:$0xff]  ;;  %v567_v59 = vld [vmem:[%s21550_s14 + $0x1e8] sm:$0xff]  ;;  %v17746_v61 = vcombine.low %v555_v49, %v559_v50 }
 0x100   : > { %v20366_v57 = vld [vmem:[%s21606_s12 + $0x4] ss:$240 sps:$4 sm:$0xff]   ;;  %v17753_v62 = vcombine.high %v562_v55, %v566_v56  ;;  %v17755_v63 = vcombine.high %v563_v58, %v567_v59  ;;  %v571_v2 = vld [vmem:[%s21550_s14 + $0x208] sm:$0xff]  ;;  %v17752_v4 = vcombine.low %v562_v55, %v566_v56  ;;  %v17754_v5 = vcombine.low %v563_v58, %v567_v59 }
 0x101   : > { %12183 = vmatpush1.bf16.msra.mxu0 %v17720_v35  ;;  %12828 = vmatpush1.bf16.msra.mxu1 %v17722_v36  ;;  %v570_v0 = vld [vmem:[%s21550_s14 + $0x200] sm:$0xff]  ;;  %v575_v3 = vld [vmem:[%s21550_s14 + $0x228] sm:$0xff] }
 0x102   : > { %12184 = vmatprep.subr.bf16.mxu0 %v17729_v37  ;;  %12829 = vmatprep.subr.bf16.mxu1 %v17731_v38  ;;  %v574_v1 = vld [vmem:[%s21550_s14 + $0x220] sm:$0xff]  ;;  %v17763_v7 = vcombine.high %v571_v2, %v575_v3  ;;  %v579_v10 = vld [vmem:[%s21550_s14 + $0x248] sm:$0xff]  ;;  %v17762_v13 = vcombine.low %v571_v2, %v575_v3 }
 0x103   : > { %12208 = vmatprep.mubr.bf16.mxu0 %v20366_v57  ;;  %12853 = vmatprep.mubr.bf16.mxu1 %v20366_v57  ;;  %v17761_v6 = vcombine.high %v570_v0, %v574_v1  ;;  %v578_v8 = vld [vmem:[%s21550_s14 + $0x240] sm:$0xff]  ;;  %v583_v11 = vld [vmem:[%s21550_s14 + $0x268] sm:$0xff]  ;;  %v17760_v12 = vcombine.low %v570_v0, %v574_v1 }
 0x104   : > { %v582_v9 = vld [vmem:[%s21550_s14 + $0x260] sm:$0xff]  ;;  %v17771_v15 = vcombine.high %v579_v10, %v583_v11  ;;  %v587_v18 = vld [vmem:[%s21550_s14 + $0x288] sm:$0xff]  ;;  %v17770_v21 = vcombine.low %v579_v10, %v583_v11 }
 0x105   : > { %12185 = vmatpush1.bf16.msra.mxu0 %v17728_v43  ;;  %12830 = vmatpush1.bf16.msra.mxu1 %v17730_v44  ;;  %v17769_v14 = vcombine.high %v578_v8, %v582_v9  ;;  %v586_v16 = vld [vmem:[%s21550_s14 + $0x280] sm:$0xff]  ;;  %v591_v19 = vld [vmem:[%s21550_s14 + $0x2a8] sm:$0xff]  ;;  %v17768_v20 = vcombine.low %v578_v8, %v582_v9 }
 0x106   : > { %12186 = vmatprep.subr.bf16.mxu0 %v17737_v45  ;;  %12831 = vmatprep.subr.bf16.mxu1 %v17739_v46  ;;  %v590_v17 = vld [vmem:[%s21550_s14 + $0x2a0] sm:$0xff]  ;;  %v17779_v23 = vcombine.high %v587_v18, %v591_v19  ;;  %v595_v26 = vld [vmem:[%s21550_s14 + $0x2c8] sm:$0xff]  ;;  %v17778_v29 = vcombine.low %v587_v18, %v591_v19 }
 0x107   : > { %v17777_v22 = vcombine.high %v586_v16, %v590_v17  ;;  %v594_v24 = vld [vmem:[%s21550_s14 + $0x2c0] sm:$0xff]  ;;  %v599_v27 = vld [vmem:[%s21550_s14 + $0x2e8] sm:$0xff]  ;;  %v17776_v28 = vcombine.low %v586_v16, %v590_v17 }
 0x108   : > { %v598_v25 = vld [vmem:[%s21550_s14 + $0x2e0] sm:$0xff]  ;;  %v17787_v31 = vcombine.high %v595_v26, %v599_v27  ;;  %v603_v34 = vld [vmem:[%s21550_s14 + $0x308] sm:$0xff]  ;;  %v17786_v37 = vcombine.low %v595_v26, %v599_v27 }
 0x109   : > { %12187 = vmatpush1.bf16.msra.mxu0 %v17736_v51  ;;  %12832 = vmatpush1.bf16.msra.mxu1 %v17738_v52  ;;  %v17785_v30 = vcombine.high %v594_v24, %v598_v25  ;;  %v602_v32 = vld [vmem:[%s21550_s14 + $0x300] sm:$0xff]  ;;  %v607_v35 = vld [vmem:[%s21550_s14 + $0x328] sm:$0xff]  ;;  %v17784_v36 = vcombine.low %v594_v24, %v598_v25 }
 0x10a   : > { %12188 = vmatprep.subr.bf16.mxu0 %v17745_v53  ;;  %12833 = vmatprep.subr.bf16.mxu1 %v17747_v54  ;;  %v606_v33 = vld [vmem:[%s21550_s14 + $0x320] sm:$0xff]  ;;  %v17795_v39 = vcombine.high %v603_v34, %v607_v35  ;;  %v611_v42 = vld [vmem:[%s21550_s14 + $0x348] sm:$0xff]  ;;  %v17794_v45 = vcombine.low %v603_v34, %v607_v35 }
 0x10b   : > { %v17793_v38 = vcombine.high %v602_v32, %v606_v33  ;;  %v610_v40 = vld [vmem:[%s21550_s14 + $0x340] sm:$0xff]  ;;  %v615_v43 = vld [vmem:[%s21550_s14 + $0x368] sm:$0xff]  ;;  %v17792_v44 = vcombine.low %v602_v32, %v606_v33 }
 0x10c   : > { %v614_v41 = vld [vmem:[%s21550_s14 + $0x360] sm:$0xff]  ;;  %v17803_v47 = vcombine.high %v611_v42, %v615_v43  ;;  %v619_v50 = vld [vmem:[%s21550_s14 + $0x388] sm:$0xff]  ;;  %v17802_v53 = vcombine.low %v611_v42, %v615_v43 }
 0x10d   : > { %12189 = vmatpush1.bf16.msra.mxu0 %v17744_v60  ;;  %12834 = vmatpush1.bf16.msra.mxu1 %v17746_v61  ;;  %v17801_v46 = vcombine.high %v610_v40, %v614_v41  ;;  %v618_v48 = vld [vmem:[%s21550_s14 + $0x380] sm:$0xff]  ;;  %v623_v51 = vld [vmem:[%s21550_s14 + $0x3a8] sm:$0xff]  ;;  %v17800_v52 = vcombine.low %v610_v40, %v614_v41 }
 0x10e   : > { %12190 = vmatprep.subr.bf16.mxu0 %v17753_v62  ;;  %12835 = vmatprep.subr.bf16.mxu1 %v17755_v63  ;;  %v622_v49 = vld [vmem:[%s21550_s14 + $0x3a0] sm:$0xff]  ;;  %v17811_v55 = vcombine.high %v619_v50, %v623_v51  ;;  %v627_v58 = vld [vmem:[%s21550_s14 + $0x3c8] sm:$0xff]  ;;  %v17810_v61 = vcombine.low %v619_v50, %v623_v51 }
 0x10f   : > { %v17809_v54 = vcombine.high %v618_v48, %v622_v49  ;;  %v626_v56 = vld [vmem:[%s21550_s14 + $0x3c0] sm:$0xff]  ;;  %v631_v59 = vld [vmem:[%s21550_s14 + $0x3e8] sm:$0xff]  ;;  %v17808_v60 = vcombine.low %v618_v48, %v622_v49 }
 0x110   : > { %v630_v57 = vld [vmem:[%s21550_s14 + $0x3e0] sm:$0xff]  ;;  %v17819_v63 = vcombine.high %v627_v58, %v631_v59  ;;  %v635_v2 = vld [vmem:[%s21550_s14 + $0x408] sm:$0xff] }
 0x111   : > { %12191 = vmatpush1.bf16.msra.mxu0 %v17752_v4  ;;  %12836 = vmatpush1.bf16.msra.mxu1 %v17754_v5  ;;  %v17817_v62 = vcombine.high %v626_v56, %v630_v57  ;;  %v634_v0 = vld [vmem:[%s21550_s14 + $0x400] sm:$0xff]  ;;  %v639_v3 = vld [vmem:[%s21550_s14 + $0x428] sm:$0xff]  ;;  %v17816_v4 = vcombine.low %v626_v56, %v630_v57  ;;  %v17818_v5 = vcombine.low %v627_v58, %v631_v59 }
 0x112   : > { %12192 = vmatprep.subr.bf16.mxu0 %v17761_v6  ;;  %12837 = vmatprep.subr.bf16.mxu1 %v17763_v7  ;;  %v638_v1 = vld [vmem:[%s21550_s14 + $0x420] sm:$0xff]  ;;  %v17827_v7 = vcombine.high %v635_v2, %v639_v3  ;;  %v643_v11 = vld [vmem:[%s21550_s14 + $0x448] sm:$0xff] }
 0x113   : > { %v17825_v6 = vcombine.high %v634_v0, %v638_v1  ;;  %v642_v8 = vld [vmem:[%s21550_s14 + $0x440] sm:$0xff]  ;;  %v20369_v19 = vld [vmem:[%s21606_s12 + $0xc] ss:$240 sps:$4 sm:$0xff]  }
 0x114   : > { %v646_v9 = vld [vmem:[%s21550_s14 + $0x460] sm:$0xff]  ;;  %v667_v35 = vld [vmem:[%s21550_s14 + $0x508] sm:$0xff] }
 0x115   : > { %12193 = vmatpush1.bf16.msra.mxu0 %v17760_v12  ;;  %12838 = vmatpush1.bf16.msra.mxu1 %v17762_v13  ;;  %v20368_v10 = vld [vmem:[%s21606_s12] ss:$240 sps:$4 sm:$0xff]   ;;  %v647_v12 = vld [vmem:[%s21550_s14 + $0x468] sm:$0xff]  ;;  %v17824_v13 = vcombine.low %v634_v0, %v638_v1 }
 0x116   : > { %12194 = vmatprep.subr.bf16.mxu0 %v17769_v14  ;;  %12839 = vmatprep.subr.bf16.mxu1 %v17771_v15  ;;  %v17826_v14 = vcombine.low %v635_v2, %v639_v3  ;;  %v17833_v15 = vcombine.high %v642_v8, %v646_v9  ;;  %v650_v16 = vld [vmem:[%s21550_s14 + $0x480] sm:$0xff]  ;;  %v17835_v17 = vcombine.high %v643_v11, %v647_v12  ;;  %v675_v43 = vld [vmem:[%s21550_s14 + $0x548] sm:$0xff] }
 0x117   : > { %v654_v18 = vld [vmem:[%s21550_s14 + $0x4a0] sm:$0xff] }
 0x118   : > { %v17841_v24 = vcombine.high %v650_v16, %v654_v18  ;;  %v658_v25 = vld [vmem:[%s21550_s14 + $0x4c0] sm:$0xff] }
 0x119   : > { %12195 = vmatpush1.bf16.msra.mxu0 %v17768_v20  ;;  %12840 = vmatpush1.bf16.msra.mxu1 %v17770_v21  ;;  %v651_v20 = vld [vmem:[%s21550_s14 + $0x488] sm:$0xff]  ;;  %v662_v26 = vld [vmem:[%s21550_s14 + $0x4e0] sm:$0xff] }
 0x11a   : > { %12196 = vmatprep.subr.bf16.mxu0 %v17777_v22  ;;  %12841 = vmatprep.subr.bf16.mxu1 %v17779_v23  ;;  %v655_v21 = vld [vmem:[%s21550_s14 + $0x4a8] sm:$0xff]  ;;  %v17832_v22 = vcombine.low %v642_v8, %v646_v9  ;;  %v17834_v23 = vcombine.low %v643_v11, %v647_v12  ;;  %v17849_v32 = vcombine.high %v658_v25, %v662_v26  ;;  %v666_v33 = vld [vmem:[%s21550_s14 + $0x500] sm:$0xff] }
 0x11b   : > { %v17843_v27 = vcombine.high %v651_v20, %v655_v21  ;;  %v670_v34 = vld [vmem:[%s21550_s14 + $0x520] sm:$0xff]  ;;  %v707_v12 = vld [vmem:[%s21550_s14 + $0x648] sm:$0xff] }
 0x11c   : > { %v17857_v40 = vcombine.high %v666_v33, %v670_v34  ;;  %v674_v41 = vld [vmem:[%s21550_s14 + $0x540] sm:$0xff] }
 0x11d   : > { %12197 = vmatpush1.bf16.msra.mxu0 %v17776_v28  ;;  %12842 = vmatpush1.bf16.msra.mxu1 %v17778_v29  ;;  %v659_v28 = vld [vmem:[%s21550_s14 + $0x4c8] sm:$0xff]  ;;  %v678_v42 = vld [vmem:[%s21550_s14 + $0x560] sm:$0xff] }
 0x11e   : > { %12198 = vmatprep.subr.bf16.mxu0 %v17785_v30  ;;  %12843 = vmatprep.subr.bf16.mxu1 %v17787_v31  ;;  %v663_v29 = vld [vmem:[%s21550_s14 + $0x4e8] sm:$0xff]  ;;  %v17840_v30 = vcombine.low %v650_v16, %v654_v18  ;;  %v17842_v31 = vcombine.low %v651_v20, %v655_v21  ;;  %v17865_v48 = vcombine.high %v674_v41, %v678_v42  ;;  %v682_v50 = vld [vmem:[%s21550_s14 + $0x580] sm:$0xff] }
 0x11f   : > { %v686_v51 = vld [vmem:[%s21550_s14 + $0x5a0] sm:$0xff]  ;;  %v715_v20 = vld [vmem:[%s21550_s14 + $0x688] sm:$0xff] }
 0x120   : > { %v17873_v56 = vcombine.high %v682_v50, %v686_v51  ;;  %v690_v58 = vld [vmem:[%s21550_s14 + $0x5c0] sm:$0xff]  ;;  %v719_v21 = vld [vmem:[%s21550_s14 + $0x6a8] sm:$0xff] }
 0x121   : > { %12199 = vmatpush1.bf16.msra.mxu0 %v17784_v36  ;;  %12844 = vmatpush1.bf16.msra.mxu1 %v17786_v37  ;;  %v17851_v36 = vcombine.high %v659_v28, %v663_v29  ;;  %v671_v37 = vld [vmem:[%s21550_s14 + $0x528] sm:$0xff]  ;;  %v694_v59 = vld [vmem:[%s21550_s14 + $0x5e0] sm:$0xff] }
 0x122   : > { %12200 = vmatprep.subr.bf16.mxu0 %v17793_v38  ;;  %12845 = vmatprep.subr.bf16.mxu1 %v17795_v39  ;;  %v17848_v38 = vcombine.low %v658_v25, %v662_v26  ;;  %v17850_v39 = vcombine.low %v659_v28, %v663_v29  ;;  %v17881_v0 = vcombine.high %v690_v58, %v694_v59  ;;  %v698_v2 = vld [vmem:[%s21550_s14 + $0x600] sm:$0xff]  ;;  %v723_v28 = vld [vmem:[%s21550_s14 + $0x6c8] sm:$0xff] }
 0x123   : > { %v702_v3 = vld [vmem:[%s21550_s14 + $0x620] sm:$0xff]  ;;  %v17907_v25 = vcombine.high %v715_v20, %v719_v21  ;;  %v727_v29 = vld [vmem:[%s21550_s14 + $0x6e8] sm:$0xff] }
 0x124   : > { %v17889_v8 = vcombine.high %v698_v2, %v702_v3  ;;  %v710_v11 = vld [vmem:[%s21550_s14 + $0x660] sm:$0xff] }
 0x125   : > { %12201 = vmatpush1.bf16.msra.mxu0 %v17792_v44  ;;  %12846 = vmatpush1.bf16.msra.mxu1 %v17794_v45  ;;  %v17859_v44 = vcombine.high %v667_v35, %v671_v37  ;;  %v679_v45 = vld [vmem:[%s21550_s14 + $0x568] sm:$0xff]  ;;  %v714_v18 = vld [vmem:[%s21550_s14 + $0x680] sm:$0xff] }
 0x126   : > { %12202 = vmatprep.subr.bf16.mxu0 %v17801_v46  ;;  %12847 = vmatprep.subr.bf16.mxu1 %v17803_v47  ;;  %v17856_v46 = vcombine.low %v666_v33, %v670_v34  ;;  %v17858_v47 = vcombine.low %v667_v35, %v671_v37  ;;  %v17867_v49 = vcombine.high %v675_v43, %v679_v45  ;;  %v722_v26 = vld [vmem:[%s21550_s14 + $0x6c0] sm:$0xff]  ;;  %v735_v37 = vld [vmem:[%s21550_s14 + $0x728] sm:$0xff] }
 0x127   : > { %v17915_v33 = vcombine.high %v723_v28, %v727_v29  ;;  %v730_v34 = vld [vmem:[%s21550_s14 + $0x700] sm:$0xff] }
 0x128   : > { %v734_v35 = vld [vmem:[%s21550_s14 + $0x720] sm:$0xff] }
 0x129   : > { %12203 = vmatpush1.bf16.msra.mxu0 %v17800_v52  ;;  %12848 = vmatpush1.bf16.msra.mxu1 %v17802_v53  ;;  %v683_v52 = vld [vmem:[%s21550_s14 + $0x588] sm:$0xff] }
 0x12a   : > { %12204 = vmatprep.subr.bf16.mxu0 %v17809_v54  ;;  %12849 = vmatprep.subr.bf16.mxu1 %v17811_v55  ;;  %v687_v53 = vld [vmem:[%s21550_s14 + $0x5a8] sm:$0xff]  ;;  %v17864_v54 = vcombine.low %v674_v41, %v678_v42  ;;  %v17866_v55 = vcombine.low %v675_v43, %v679_v45  ;;  %v738_v42 = vld [vmem:[%s21550_s14 + $0x740] sm:$0xff] }
 0x12b   : > { %v17875_v57 = vcombine.high %v683_v52, %v687_v53  ;;  %v742_v43 = vld [vmem:[%s21550_s14 + $0x760] sm:$0xff]  ;;  %v743_v45 = vld [vmem:[%s21550_s14 + $0x768] sm:$0xff] }
 0x12d   : > { %12205 = vmatpush1.bf16.msra.mxu0 %v17808_v60  ;;  %12850 = vmatpush1.bf16.msra.mxu1 %v17810_v61  ;;  %v691_v60 = vld [vmem:[%s21550_s14 + $0x5c8] sm:$0xff] }
 0x12e   : > { %12206 = vmatprep.subr.bf16.mxu0 %v17817_v62  ;;  %12851 = vmatprep.subr.bf16.mxu1 %v17819_v63  ;;  %v695_v61 = vld [vmem:[%s21550_s14 + $0x5e8] sm:$0xff]  ;;  %v17872_v62 = vcombine.low %v682_v50, %v686_v51  ;;  %v17874_v63 = vcombine.low %v683_v52, %v687_v53  ;;  %v746_v50 = vld [vmem:[%s21550_s14 + $0x780] sm:$0xff] }
 0x12f   : > { %v17883_v1 = vcombine.high %v691_v60, %v695_v61  ;;  %v750_v51 = vld [vmem:[%s21550_s14 + $0x7a0] sm:$0xff]  ;;  %v747_v52 = vld [vmem:[%s21550_s14 + $0x788] sm:$0xff] }
 0x130   : > { %v751_v53 = vld [vmem:[%s21550_s14 + $0x7a8] sm:$0xff] }
 0x131   : > { %12207 = vmatpush1.bf16.msra.mxu0 %v17816_v4  ;;  %12852 = vmatpush1.bf16.msra.mxu1 %v17818_v5  ;;  %v699_v4 = vld [vmem:[%s21550_s14 + $0x608] sm:$0xff] }
 0x132   : > { %12219 = vmatprep.subr.bf16.mxu0 %v17825_v6  ;;  %12864 = vmatprep.subr.bf16.mxu1 %v17827_v7  ;;  %v703_v5 = vld [vmem:[%s21550_s14 + $0x628] sm:$0xff]  ;;  %v17880_v6 = vcombine.low %v690_v58, %v694_v59  ;;  %v17882_v7 = vcombine.low %v691_v60, %v695_v61  ;;  %v754_v58 = vld [vmem:[%s21550_s14 + $0x7c0] sm:$0xff] }
 0x133   : > { %v17891_v9 = vcombine.high %v699_v4, %v703_v5  ;;  %v758_v59 = vld [vmem:[%s21550_s14 + $0x7e0] sm:$0xff]  ;;  %v755_v60 = vld [vmem:[%s21550_s14 + $0x7c8] sm:$0xff] }
 0x134   : > { %12209 = vmatmul.mubr.bf16.vlgmr.msra.gmra.mrb[0].mxu0 %v20368_v10  ;;  %12854 = vmatmul.mubr.bf16.vlgmr.msra.gmra.mrb[0].mxu1 %v20368_v10  ;;  %v706_v10 = vld [vmem:[%s21550_s14 + $0x640] sm:$0xff]  ;;  %v759_v61 = vld [vmem:[%s21550_s14 + $0x7e8] sm:$0xff] }
 0x135   : > { %12220 = vmatpush1.bf16.msra.mxu0 %v17824_v13  ;;  %12865 = vmatpush1.bf16.msra.mxu1 %v17826_v14  ;;  %v711_v13 = vld [vmem:[%s21550_s14 + $0x668] sm:$0xff]  ;;  %v17888_v14 = vcombine.low %v698_v2, %v702_v3  ;;  %v17897_v16 = vcombine.high %v706_v10, %v710_v11  ;;  %v762_v2 = vld [vmem:[%s21550_s14 + $0x800] sm:$0xff] }
 0x136   : > { %12221 = vmatprep.subr.bf16.mxu0 %v17833_v15  ;;  %12866 = vmatprep.subr.bf16.mxu1 %v17835_v17  ;;  %v17890_v15 = vcombine.low %v699_v4, %v703_v5  ;;  %v17899_v17 = vcombine.high %v707_v12, %v711_v13  ;;  %v766_v3 = vld [vmem:[%s21550_s14 + $0x820] sm:$0xff]  ;;  %v763_v4 = vld [vmem:[%s21550_s14 + $0x808] sm:$0xff] }
 0x137   : > { %12251 = vmatprep.mubr.bf16.mxu0 %v20369_v19  ;;  %12896 = vmatprep.mubr.bf16.mxu1 %v20369_v19  ;;  %v718_v19 = vld [vmem:[%s21550_s14 + $0x6a0] sm:$0xff]  ;;  %v767_v5 = vld [vmem:[%s21550_s14 + $0x828] sm:$0xff] }
 0x139   : > { %12222 = vmatpush1.bf16.msra.mxu0 %v17832_v22  ;;  %12867 = vmatpush1.bf16.msra.mxu1 %v17834_v23  ;;  %v17896_v22 = vcombine.low %v706_v10, %v710_v11  ;;  %v17898_v23 = vcombine.low %v707_v12, %v711_v13  ;;  %v770_v10 = vld [vmem:[%s21550_s14 + $0x840] sm:$0xff]  ;;  %v20371_v12 = vld [vmem:[%s21606_s12 + $0x8] ss:$240 sps:$4 sm:$0xff]  }
 0x13a   : > { %12223 = vmatprep.subr.bf16.mxu0 %v17841_v24  ;;  %12868 = vmatprep.subr.bf16.mxu1 %v17843_v27  ;;  %v17905_v24 = vcombine.high %v714_v18, %v718_v19  ;;  %v726_v27 = vld [vmem:[%s21550_s14 + $0x6e0] sm:$0xff]  ;;  %v771_v13 = vld [vmem:[%s21550_s14 + $0x848] sm:$0xff] }
 0x13b   : > { %v774_v11 = vld [vmem:[%s21550_s14 + $0x860] sm:$0xff] }
 0x13d   : > { %12224 = vmatpush1.bf16.msra.mxu0 %v17840_v30  ;;  %12869 = vmatpush1.bf16.msra.mxu1 %v17842_v31  ;;  %v17904_v30 = vcombine.low %v714_v18, %v718_v19  ;;  %v17906_v31 = vcombine.low %v715_v20, %v719_v21  ;;  %v778_v19 = vld [vmem:[%s21550_s14 + $0x880] sm:$0xff] }
 0x13e   : > { %12225 = vmatprep.subr.bf16.mxu0 %v17849_v32  ;;  %12870 = vmatprep.subr.bf16.mxu1 %v17851_v36  ;;  %v17913_v32 = vcombine.high %v722_v26, %v726_v27  ;;  %v731_v36 = vld [vmem:[%s21550_s14 + $0x708] sm:$0xff]  ;;  %v782_v20 = vld [vmem:[%s21550_s14 + $0x8a0] sm:$0xff] }
 0x13f   : > { %v17923_v41 = vcombine.high %v731_v36, %v735_v37  ;;  %v20372_v21 = vld [vmem:[%s21606_s12 + $0x14] ss:$240 sps:$4 sm:$0xff]  }
 0x141   : > { %12226 = vmatpush1.bf16.msra.mxu0 %v17848_v38  ;;  %12871 = vmatpush1.bf16.msra.mxu1 %v17850_v39  ;;  %v17912_v38 = vcombine.low %v722_v26, %v726_v27  ;;  %v17914_v39 = vcombine.low %v723_v28, %v727_v29  ;;  %v17969_v26 = vcombine.high %v778_v19, %v782_v20  ;;  %v786_v28 = vld [vmem:[%s21550_s14 + $0x8c0] sm:$0xff] }
 0x142   : > { %12227 = vmatprep.subr.bf16.mxu0 %v17857_v40  ;;  %12872 = vmatprep.subr.bf16.mxu1 %v17859_v44  ;;  %v17921_v40 = vcombine.high %v730_v34, %v734_v35  ;;  %v739_v44 = vld [vmem:[%s21550_s14 + $0x748] sm:$0xff]  ;;  %v790_v29 = vld [vmem:[%s21550_s14 + $0x8e0] sm:$0xff] }
 0x145   : > { %12228 = vmatpush1.bf16.msra.mxu0 %v17856_v46  ;;  %12873 = vmatpush1.bf16.msra.mxu1 %v17858_v47  ;;  %v17920_v46 = vcombine.low %v730_v34, %v734_v35  ;;  %v17922_v47 = vcombine.low %v731_v36, %v735_v37  ;;  %v17977_v34 = vcombine.high %v786_v28, %v790_v29  ;;  %v794_v36 = vld [vmem:[%s21550_s14 + $0x900] sm:$0xff] }
 0x146   : > { %12229 = vmatprep.subr.bf16.mxu0 %v17865_v48  ;;  %12874 = vmatprep.subr.bf16.mxu1 %v17867_v49  ;;  %v17929_v48 = vcombine.high %v738_v42, %v742_v43  ;;  %v17931_v49 = vcombine.high %v739_v44, %v743_v45  ;;  %v798_v37 = vld [vmem:[%s21550_s14 + $0x920] sm:$0xff] }
 0x149   : > { %12230 = vmatpush1.bf16.msra.mxu0 %v17864_v54  ;;  %12875 = vmatpush1.bf16.msra.mxu1 %v17866_v55  ;;  %v17928_v54 = vcombine.low %v738_v42, %v742_v43  ;;  %v17930_v55 = vcombine.low %v739_v44, %v743_v45  ;;  %v17985_v42 = vcombine.high %v794_v36, %v798_v37  ;;  %v802_v44 = vld [vmem:[%s21550_s14 + $0x940] sm:$0xff] }
 0x14a   : > { %12231 = vmatprep.subr.bf16.mxu0 %v17873_v56  ;;  %12876 = vmatprep.subr.bf16.mxu1 %v17875_v57  ;;  %v17937_v56 = vcombine.high %v746_v50, %v750_v51  ;;  %v17939_v57 = vcombine.high %v747_v52, %v751_v53  ;;  %v806_v45 = vld [vmem:[%s21550_s14 + $0x960] sm:$0xff] }
 0x14d   : > { %12232 = vmatpush1.bf16.msra.mxu0 %v17872_v62  ;;  %12877 = vmatpush1.bf16.msra.mxu1 %v17874_v63  ;;  %v17936_v62 = vcombine.low %v746_v50, %v750_v51  ;;  %v17938_v63 = vcombine.low %v747_v52, %v751_v53  ;;  %v17993_v50 = vcombine.high %v802_v44, %v806_v45  ;;  %v810_v52 = vld [vmem:[%s21550_s14 + $0x980] sm:$0xff] }
 0x14e   : > { %12233 = vmatprep.subr.bf16.mxu0 %v17881_v0  ;;  %12878 = vmatprep.subr.bf16.mxu1 %v17883_v1  ;;  %v17945_v0 = vcombine.high %v754_v58, %v758_v59  ;;  %v17947_v1 = vcombine.high %v755_v60, %v759_v61  ;;  %v814_v53 = vld [vmem:[%s21550_s14 + $0x9a0] sm:$0xff] }
 0x151   : > { %12234 = vmatpush1.bf16.msra.mxu0 %v17880_v6  ;;  %12879 = vmatpush1.bf16.msra.mxu1 %v17882_v7  ;;  %v17944_v6 = vcombine.low %v754_v58, %v758_v59  ;;  %v17946_v7 = vcombine.low %v755_v60, %v759_v61  ;;  %v18001_v58 = vcombine.high %v810_v52, %v814_v53  ;;  %v818_v60 = vld [vmem:[%s21550_s14 + $0x9c0] sm:$0xff] }
 0x152   : > { %12235 = vmatprep.subr.bf16.mxu0 %v17889_v8  ;;  %12880 = vmatprep.subr.bf16.mxu1 %v17891_v9  ;;  %v17953_v8 = vcombine.high %v762_v2, %v766_v3  ;;  %v17955_v9 = vcombine.high %v763_v4, %v767_v5  ;;  %v822_v61 = vld [vmem:[%s21550_s14 + $0x9e0] sm:$0xff] }
 0x155   : > { %12236 = vmatpush1.bf16.msra.mxu0 %v17888_v14  ;;  %12881 = vmatpush1.bf16.msra.mxu1 %v17890_v15  ;;  %v775_v14 = vld [vmem:[%s21550_s14 + $0x868] sm:$0xff]  ;;  %v17952_v15 = vcombine.low %v762_v2, %v766_v3  ;;  %v18009_v2 = vcombine.high %v818_v60, %v822_v61 }
 0x156   : > { %12237 = vmatprep.subr.bf16.mxu0 %v17897_v16  ;;  %12882 = vmatprep.subr.bf16.mxu1 %v17899_v17  ;;  %v17954_v16 = vcombine.low %v763_v4, %v767_v5  ;;  %v17961_v17 = vcombine.high %v770_v10, %v774_v11  ;;  %v17963_v18 = vcombine.high %v771_v13, %v775_v14  ;;  %v826_v4 = vld [vmem:[%s21550_s14 + $0xa00] sm:$0xff] }
 0x157   : > { %v830_v5 = vld [vmem:[%s21550_s14 + $0xa20] sm:$0xff] }
 0x159   : > { %12238 = vmatpush1.bf16.msra.mxu0 %v17896_v22  ;;  %12883 = vmatpush1.bf16.msra.mxu1 %v17898_v23  ;;  %v779_v22 = vld [vmem:[%s21550_s14 + $0x888] sm:$0xff] }
 0x15a   : > { %12239 = vmatprep.subr.bf16.mxu0 %v17905_v24  ;;  %12884 = vmatprep.subr.bf16.mxu1 %v17907_v25  ;;  %v783_v23 = vld [vmem:[%s21550_s14 + $0x8a8] sm:$0xff]  ;;  %v17960_v24 = vcombine.low %v770_v10, %v774_v11  ;;  %v17962_v25 = vcombine.low %v771_v13, %v775_v14  ;;  %v18017_v10 = vcombine.high %v826_v4, %v830_v5  ;;  %v838_v13 = vld [vmem:[%s21550_s14 + $0xa60] sm:$0xff] }
 0x15b   : > { %v17971_v27 = vcombine.high %v779_v22, %v783_v23  ;;  %v835_v14 = vld [vmem:[%s21550_s14 + $0xa48] sm:$0xff] }
 0x15d   : > { %12240 = vmatpush1.bf16.msra.mxu0 %v17904_v30  ;;  %12885 = vmatpush1.bf16.msra.mxu1 %v17906_v31  ;;  %v787_v30 = vld [vmem:[%s21550_s14 + $0x8c8] sm:$0xff] }
 0x15e   : > { %12241 = vmatprep.subr.bf16.mxu0 %v17913_v32  ;;  %12886 = vmatprep.subr.bf16.mxu1 %v17915_v33  ;;  %v791_v31 = vld [vmem:[%s21550_s14 + $0x8e8] sm:$0xff]  ;;  %v17968_v32 = vcombine.low %v778_v19, %v782_v20  ;;  %v17970_v33 = vcombine.low %v779_v22, %v783_v23  ;;  %v842_v20 = vld [vmem:[%s21550_s14 + $0xa80] sm:$0xff] }
 0x15f   : > { %v17979_v35 = vcombine.high %v787_v30, %v791_v31  ;;  %v843_v22 = vld [vmem:[%s21550_s14 + $0xa88] sm:$0xff] }
 0x160   : > { %v847_v23 = vld [vmem:[%s21550_s14 + $0xaa8] sm:$0xff] }
 0x161   : > { %12242 = vmatpush1.bf16.msra.mxu0 %v17912_v38  ;;  %12887 = vmatpush1.bf16.msra.mxu1 %v17914_v39  ;;  %v795_v38 = vld [vmem:[%s21550_s14 + $0x908] sm:$0xff] }
 0x162   : > { %12243 = vmatprep.subr.bf16.mxu0 %v17921_v40  ;;  %12888 = vmatprep.subr.bf16.mxu1 %v17923_v41  ;;  %v799_v39 = vld [vmem:[%s21550_s14 + $0x928] sm:$0xff]  ;;  %v17976_v40 = vcombine.low %v786_v28, %v790_v29  ;;  %v17978_v41 = vcombine.low %v787_v30, %v791_v31  ;;  %v850_v28 = vld [vmem:[%s21550_s14 + $0xac0] sm:$0xff] }
 0x163   : > { %v17987_v43 = vcombine.high %v795_v38, %v799_v39  ;;  %v854_v29 = vld [vmem:[%s21550_s14 + $0xae0] sm:$0xff]  ;;  %v851_v30 = vld [vmem:[%s21550_s14 + $0xac8] sm:$0xff] }
 0x164   : > { %v855_v31 = vld [vmem:[%s21550_s14 + $0xae8] sm:$0xff] }
 0x165   : > { %12244 = vmatpush1.bf16.msra.mxu0 %v17920_v46  ;;  %12889 = vmatpush1.bf16.msra.mxu1 %v17922_v47  ;;  %v803_v46 = vld [vmem:[%s21550_s14 + $0x948] sm:$0xff] }
 0x166   : > { %12245 = vmatprep.subr.bf16.mxu0 %v17929_v48  ;;  %12890 = vmatprep.subr.bf16.mxu1 %v17931_v49  ;;  %v807_v47 = vld [vmem:[%s21550_s14 + $0x968] sm:$0xff]  ;;  %v17984_v48 = vcombine.low %v794_v36, %v798_v37  ;;  %v17986_v49 = vcombine.low %v795_v38, %v799_v39  ;;  %v858_v36 = vld [vmem:[%s21550_s14 + $0xb00] sm:$0xff] }
 0x167   : > { %v17995_v51 = vcombine.high %v803_v46, %v807_v47  ;;  %v862_v37 = vld [vmem:[%s21550_s14 + $0xb20] sm:$0xff]  ;;  %v859_v38 = vld [vmem:[%s21550_s14 + $0xb08] sm:$0xff] }
 0x168   : > { %v863_v39 = vld [vmem:[%s21550_s14 + $0xb28] sm:$0xff] }
 0x169   : > { %12246 = vmatpush1.bf16.msra.mxu0 %v17928_v54  ;;  %12891 = vmatpush1.bf16.msra.mxu1 %v17930_v55  ;;  %v811_v54 = vld [vmem:[%s21550_s14 + $0x988] sm:$0xff] }
 0x16a   : > { %12247 = vmatprep.subr.bf16.mxu0 %v17937_v56  ;;  %12892 = vmatprep.subr.bf16.mxu1 %v17939_v57  ;;  %v815_v55 = vld [vmem:[%s21550_s14 + $0x9a8] sm:$0xff]  ;;  %v17992_v56 = vcombine.low %v802_v44, %v806_v45  ;;  %v17994_v57 = vcombine.low %v803_v46, %v807_v47  ;;  %v866_v44 = vld [vmem:[%s21550_s14 + $0xb40] sm:$0xff] }
 0x16b   : > { %v18003_v59 = vcombine.high %v811_v54, %v815_v55  ;;  %v870_v45 = vld [vmem:[%s21550_s14 + $0xb60] sm:$0xff]  ;;  %v867_v46 = vld [vmem:[%s21550_s14 + $0xb48] sm:$0xff] }
 0x16c   : > { %v871_v47 = vld [vmem:[%s21550_s14 + $0xb68] sm:$0xff] }
 0x16d   : > { %12248 = vmatpush1.bf16.msra.mxu0 %v17936_v62  ;;  %12893 = vmatpush1.bf16.msra.mxu1 %v17938_v63  ;;  %v819_v62 = vld [vmem:[%s21550_s14 + $0x9c8] sm:$0xff] }
 0x16e   : > { %12249 = vmatprep.subr.bf16.mxu0 %v17945_v0  ;;  %12894 = vmatprep.subr.bf16.mxu1 %v17947_v1  ;;  %v823_v63 = vld [vmem:[%s21550_s14 + $0x9e8] sm:$0xff]  ;;  %v18000_v0 = vcombine.low %v810_v52, %v814_v53  ;;  %v18002_v1 = vcombine.low %v811_v54, %v815_v55  ;;  %v874_v52 = vld [vmem:[%s21550_s14 + $0xb80] sm:$0xff] }
 0x16f   : > { %v18011_v3 = vcombine.high %v819_v62, %v823_v63  ;;  %v878_v53 = vld [vmem:[%s21550_s14 + $0xba0] sm:$0xff]  ;;  %v875_v54 = vld [vmem:[%s21550_s14 + $0xb88] sm:$0xff] }
 0x170   : > { %v879_v55 = vld [vmem:[%s21550_s14 + $0xba8] sm:$0xff] }
 0x171   : > { %12250 = vmatpush1.bf16.msra.mxu0 %v17944_v6  ;;  %12895 = vmatpush1.bf16.msra.mxu1 %v17946_v7  ;;  %v827_v6 = vld [vmem:[%s21550_s14 + $0xa08] sm:$0xff] }
 0x172   : > { %12262 = vmatprep.subr.bf16.mxu0 %v17953_v8  ;;  %12907 = vmatprep.subr.bf16.mxu1 %v17955_v9  ;;  %v831_v7 = vld [vmem:[%s21550_s14 + $0xa28] sm:$0xff]  ;;  %v18008_v8 = vcombine.low %v818_v60, %v822_v61  ;;  %v18010_v9 = vcombine.low %v819_v62, %v823_v63  ;;  %v882_v60 = vld [vmem:[%s21550_s14 + $0xbc0] sm:$0xff] }
 0x173   : > { %v18019_v11 = vcombine.high %v827_v6, %v831_v7  ;;  %v886_v61 = vld [vmem:[%s21550_s14 + $0xbe0] sm:$0xff]  ;;  %v883_v62 = vld [vmem:[%s21550_s14 + $0xbc8] sm:$0xff] }
 0x174   : > { %12252 = vmatmul.mubr.bf16.vlgmr.msra.gmra.mrb[0].mxu0 %v20371_v12  ;;  %12897 = vmatmul.mubr.bf16.vlgmr.msra.gmra.mrb[0].mxu1 %v20371_v12  ;;  %v834_v12 = vld [vmem:[%s21550_s14 + $0xa40] sm:$0xff]  ;;  %v887_v63 = vld [vmem:[%s21550_s14 + $0xbe8] sm:$0xff] }
 0x175   : > { %12263 = vmatpush1.bf16.msra.mxu0 %v17952_v15  ;;  %12908 = vmatpush1.bf16.msra.mxu1 %v17954_v16  ;;  %v839_v15 = vld [vmem:[%s21550_s14 + $0xa68] sm:$0xff]  ;;  %v18016_v16 = vcombine.low %v826_v4, %v830_v5  ;;  %v890_v4 = vld [vmem:[%s21550_s14 + $0xc00] sm:$0xff] }
 0x176   : > { %12264 = vmatprep.subr.bf16.mxu0 %v17961_v17  ;;  %12909 = vmatprep.subr.bf16.mxu1 %v17963_v18  ;;  %v18018_v17 = vcombine.low %v827_v6, %v831_v7  ;;  %v18025_v18 = vcombine.high %v834_v12, %v838_v13  ;;  %v18027_v19 = vcombine.high %v835_v14, %v839_v15  ;;  %v894_v5 = vld [vmem:[%s21550_s14 + $0xc20] sm:$0xff]  ;;  %v891_v6 = vld [vmem:[%s21550_s14 + $0xc08] sm:$0xff] }
 0x177   : > { %12294 = vmatprep.mubr.bf16.mxu0 %v20372_v21  ;;  %12939 = vmatprep.mubr.bf16.mxu1 %v20372_v21  ;;  %v846_v21 = vld [vmem:[%s21550_s14 + $0xaa0] sm:$0xff]  ;;  %v895_v7 = vld [vmem:[%s21550_s14 + $0xc28] sm:$0xff] }
 0x179   : > { %12265 = vmatpush1.bf16.msra.mxu0 %v17960_v24  ;;  %12910 = vmatpush1.bf16.msra.mxu1 %v17962_v25  ;;  %v18024_v24 = vcombine.low %v834_v12, %v838_v13  ;;  %v18026_v25 = vcombine.low %v835_v14, %v839_v15  ;;  %v898_v12 = vld [vmem:[%s21550_s14 + $0xc40] sm:$0xff]  ;;  %v899_v15 = vld [vmem:[%s21550_s14 + $0xc48] sm:$0xff] }
 0x17a   : > { %12266 = vmatprep.subr.bf16.mxu0 %v17969_v26  ;;  %12911 = vmatprep.subr.bf16.mxu1 %v17971_v27  ;;  %v18033_v26 = vcombine.high %v842_v20, %v846_v21  ;;  %v18035_v27 = vcombine.high %v843_v22, %v847_v23  ;;  %v902_v13 = vld [vmem:[%s21550_s14 + $0xc60] sm:$0xff] }
 0x17b   : > { %v20374_v14 = vld [vmem:[%s21606_s12 + $0x10] ss:$240 sps:$4 sm:$0xff]  }
 0x17d   : > { %12267 = vmatpush1.bf16.msra.mxu0 %v17968_v32  ;;  %12912 = vmatpush1.bf16.msra.mxu1 %v17970_v33  ;;  %v18032_v32 = vcombine.low %v842_v20, %v846_v21  ;;  %v18034_v33 = vcombine.low %v843_v22, %v847_v23  ;;  %v906_v21 = vld [vmem:[%s21550_s14 + $0xc80] sm:$0xff]  ;;  %v20375_v23 = vld [vmem:[%s21606_s12 + $0x1c] ss:$240 sps:$4 sm:$0xff]  }
 0x17e   : > { %12268 = vmatprep.subr.bf16.mxu0 %v17977_v34  ;;  %12913 = vmatprep.subr.bf16.mxu1 %v17979_v35  ;;  %v18041_v34 = vcombine.high %v850_v28, %v854_v29  ;;  %v18043_v35 = vcombine.high %v851_v30, %v855_v31  ;;  %v910_v22 = vld [vmem:[%s21550_s14 + $0xca0] sm:$0xff] }
 0x181   : > { %12269 = vmatpush1.bf16.msra.mxu0 %v17976_v40  ;;  %12914 = vmatpush1.bf16.msra.mxu1 %v17978_v41  ;;  %v18040_v40 = vcombine.low %v850_v28, %v854_v29  ;;  %v18042_v41 = vcombine.low %v851_v30, %v855_v31  ;;  %v18097_v28 = vcombine.high %v906_v21, %v910_v22  ;;  %v914_v30 = vld [vmem:[%s21550_s14 + $0xcc0] sm:$0xff] }
 0x182   : > { %12270 = vmatprep.subr.bf16.mxu0 %v17985_v42  ;;  %12915 = vmatprep.subr.bf16.mxu1 %v17987_v43  ;;  %v18049_v42 = vcombine.high %v858_v36, %v862_v37  ;;  %v18051_v43 = vcombine.high %v859_v38, %v863_v39  ;;  %v918_v31 = vld [vmem:[%s21550_s14 + $0xce0] sm:$0xff] }
 0x185   : > { %12271 = vmatpush1.bf16.msra.mxu0 %v17984_v48  ;;  %12916 = vmatpush1.bf16.msra.mxu1 %v17986_v49  ;;  %v18048_v48 = vcombine.low %v858_v36, %v862_v37  ;;  %v18050_v49 = vcombine.low %v859_v38, %v863_v39  ;;  %v18105_v36 = vcombine.high %v914_v30, %v918_v31  ;;  %v922_v38 = vld [vmem:[%s21550_s14 + $0xd00] sm:$0xff] }
 0x186   : > { %12272 = vmatprep.subr.bf16.mxu0 %v17993_v50  ;;  %12917 = vmatprep.subr.bf16.mxu1 %v17995_v51  ;;  %v18057_v50 = vcombine.high %v866_v44, %v870_v45  ;;  %v18059_v51 = vcombine.high %v867_v46, %v871_v47  ;;  %v926_v39 = vld [vmem:[%s21550_s14 + $0xd20] sm:$0xff] }
 0x189   : > { %12273 = vmatpush1.bf16.msra.mxu0 %v17992_v56  ;;  %12918 = vmatpush1.bf16.msra.mxu1 %v17994_v57  ;;  %v18056_v56 = vcombine.low %v866_v44, %v870_v45  ;;  %v18058_v57 = vcombine.low %v867_v46, %v871_v47  ;;  %v18113_v44 = vcombine.high %v922_v38, %v926_v39  ;;  %v930_v46 = vld [vmem:[%s21550_s14 + $0xd40] sm:$0xff] }
 0x18a   : > { %12274 = vmatprep.subr.bf16.mxu0 %v18001_v58  ;;  %12919 = vmatprep.subr.bf16.mxu1 %v18003_v59  ;;  %v18065_v58 = vcombine.high %v874_v52, %v878_v53  ;;  %v18067_v59 = vcombine.high %v875_v54, %v879_v55  ;;  %v934_v47 = vld [vmem:[%s21550_s14 + $0xd60] sm:$0xff] }
 0x18d   : > { %12275 = vmatpush1.bf16.msra.mxu0 %v18000_v0  ;;  %12920 = vmatpush1.bf16.msra.mxu1 %v18002_v1  ;;  %v18064_v0 = vcombine.low %v874_v52, %v878_v53  ;;  %v18066_v1 = vcombine.low %v875_v54, %v879_v55  ;;  %v18121_v52 = vcombine.high %v930_v46, %v934_v47  ;;  %v938_v54 = vld [vmem:[%s21550_s14 + $0xd80] sm:$0xff] }
 0x18e   : > { %12276 = vmatprep.subr.bf16.mxu0 %v18009_v2  ;;  %12921 = vmatprep.subr.bf16.mxu1 %v18011_v3  ;;  %v18073_v2 = vcombine.high %v882_v60, %v886_v61  ;;  %v18075_v3 = vcombine.high %v883_v62, %v887_v63  ;;  %v942_v55 = vld [vmem:[%s21550_s14 + $0xda0] sm:$0xff] }
 0x191   : > { %12277 = vmatpush1.bf16.msra.mxu0 %v18008_v8  ;;  %12922 = vmatpush1.bf16.msra.mxu1 %v18010_v9  ;;  %v18072_v8 = vcombine.low %v882_v60, %v886_v61  ;;  %v18074_v9 = vcombine.low %v883_v62, %v887_v63  ;;  %v18129_v60 = vcombine.high %v938_v54, %v942_v55  ;;  %v946_v62 = vld [vmem:[%s21550_s14 + $0xdc0] sm:$0xff] }
 0x192   : > { %12278 = vmatprep.subr.bf16.mxu0 %v18017_v10  ;;  %12923 = vmatprep.subr.bf16.mxu1 %v18019_v11  ;;  %v18081_v10 = vcombine.high %v890_v4, %v894_v5  ;;  %v18083_v11 = vcombine.high %v891_v6, %v895_v7  ;;  %v950_v63 = vld [vmem:[%s21550_s14 + $0xde0] sm:$0xff] }
 0x195   : > { %12279 = vmatpush1.bf16.msra.mxu0 %v18016_v16  ;;  %12924 = vmatpush1.bf16.msra.mxu1 %v18018_v17  ;;  %v903_v16 = vld [vmem:[%s21550_s14 + $0xc68] sm:$0xff]  ;;  %v18080_v17 = vcombine.low %v890_v4, %v894_v5  ;;  %v18137_v4 = vcombine.high %v946_v62, %v950_v63 }
 0x196   : > { %12280 = vmatprep.subr.bf16.mxu0 %v18025_v18  ;;  %12925 = vmatprep.subr.bf16.mxu1 %v18027_v19  ;;  %v18082_v18 = vcombine.low %v891_v6, %v895_v7  ;;  %v18089_v19 = vcombine.high %v898_v12, %v902_v13  ;;  %v18091_v20 = vcombine.high %v899_v15, %v903_v16  ;;  %v954_v6 = vld [vmem:[%s21550_s14 + $0xe00] sm:$0xff] }
 0x197   : > { %v958_v7 = vld [vmem:[%s21550_s14 + $0xe20] sm:$0xff] }
 0x199   : > { %12281 = vmatpush1.bf16.msra.mxu0 %v18024_v24  ;;  %12926 = vmatpush1.bf16.msra.mxu1 %v18026_v25  ;;  %v907_v24 = vld [vmem:[%s21550_s14 + $0xc88] sm:$0xff] }
 0x19a   : > { %12282 = vmatprep.subr.bf16.mxu0 %v18033_v26  ;;  %12927 = vmatprep.subr.bf16.mxu1 %v18035_v27  ;;  %v911_v25 = vld [vmem:[%s21550_s14 + $0xca8] sm:$0xff]  ;;  %v18088_v26 = vcombine.low %v898_v12, %v902_v13  ;;  %v18090_v27 = vcombine.low %v899_v15, %v903_v16  ;;  %v18145_v12 = vcombine.high %v954_v6, %v958_v7  ;;  %v966_v15 = vld [vmem:[%s21550_s14 + $0xe60] sm:$0xff] }
 0x19b   : > { %v18099_v29 = vcombine.high %v907_v24, %v911_v25  ;;  %v963_v16 = vld [vmem:[%s21550_s14 + $0xe48] sm:$0xff] }
 0x19d   : > { %12283 = vmatpush1.bf16.msra.mxu0 %v18032_v32  ;;  %12928 = vmatpush1.bf16.msra.mxu1 %v18034_v33  ;;  %v915_v32 = vld [vmem:[%s21550_s14 + $0xcc8] sm:$0xff] }
 0x19e   : > { %12284 = vmatprep.subr.bf16.mxu0 %v18041_v34  ;;  %12929 = vmatprep.subr.bf16.mxu1 %v18043_v35  ;;  %v919_v33 = vld [vmem:[%s21550_s14 + $0xce8] sm:$0xff]  ;;  %v18096_v34 = vcombine.low %v906_v21, %v910_v22  ;;  %v18098_v35 = vcombine.low %v907_v24, %v911_v25  ;;  %v970_v22 = vld [vmem:[%s21550_s14 + $0xe80] sm:$0xff] }
 0x19f   : > { %v18107_v37 = vcombine.high %v915_v32, %v919_v33  ;;  %v971_v24 = vld [vmem:[%s21550_s14 + $0xe88] sm:$0xff] }
 0x1a0   : > { %v975_v25 = vld [vmem:[%s21550_s14 + $0xea8] sm:$0xff] }
 0x1a1   : > { %12285 = vmatpush1.bf16.msra.mxu0 %v18040_v40  ;;  %12930 = vmatpush1.bf16.msra.mxu1 %v18042_v41  ;;  %v923_v40 = vld [vmem:[%s21550_s14 + $0xd08] sm:$0xff] }
 0x1a2   : > { %12286 = vmatprep.subr.bf16.mxu0 %v18049_v42  ;;  %12931 = vmatprep.subr.bf16.mxu1 %v18051_v43  ;;  %v927_v41 = vld [vmem:[%s21550_s14 + $0xd28] sm:$0xff]  ;;  %v18104_v42 = vcombine.low %v914_v30, %v918_v31  ;;  %v18106_v43 = vcombine.low %v915_v32, %v919_v33  ;;  %v978_v30 = vld [vmem:[%s21550_s14 + $0xec0] sm:$0xff] }
 0x1a3   : > { %v18115_v45 = vcombine.high %v923_v40, %v927_v41  ;;  %v982_v31 = vld [vmem:[%s21550_s14 + $0xee0] sm:$0xff]  ;;  %v979_v32 = vld [vmem:[%s21550_s14 + $0xec8] sm:$0xff] }
 0x1a4   : > { %v983_v33 = vld [vmem:[%s21550_s14 + $0xee8] sm:$0xff] }
 0x1a5   : > { %12287 = vmatpush1.bf16.msra.mxu0 %v18048_v48  ;;  %12932 = vmatpush1.bf16.msra.mxu1 %v18050_v49  ;;  %v931_v48 = vld [vmem:[%s21550_s14 + $0xd48] sm:$0xff] }
 0x1a6   : > { %12288 = vmatprep.subr.bf16.mxu0 %v18057_v50  ;;  %12933 = vmatprep.subr.bf16.mxu1 %v18059_v51  ;;  %v935_v49 = vld [vmem:[%s21550_s14 + $0xd68] sm:$0xff]  ;;  %v18112_v50 = vcombine.low %v922_v38, %v926_v39  ;;  %v18114_v51 = vcombine.low %v923_v40, %v927_v41  ;;  %v986_v38 = vld [vmem:[%s21550_s14 + $0xf00] sm:$0xff] }
 0x1a7   : > { %v18123_v53 = vcombine.high %v931_v48, %v935_v49  ;;  %v990_v39 = vld [vmem:[%s21550_s14 + $0xf20] sm:$0xff]  ;;  %v987_v40 = vld [vmem:[%s21550_s14 + $0xf08] sm:$0xff] }
 0x1a8   : > { %v991_v41 = vld [vmem:[%s21550_s14 + $0xf28] sm:$0xff] }
 0x1a9   : > { %12289 = vmatpush1.bf16.msra.mxu0 %v18056_v56  ;;  %12934 = vmatpush1.bf16.msra.mxu1 %v18058_v57  ;;  %v939_v56 = vld [vmem:[%s21550_s14 + $0xd88] sm:$0xff] }
 0x1aa   : > { %12290 = vmatprep.subr.bf16.mxu0 %v18065_v58  ;;  %12935 = vmatprep.subr.bf16.mxu1 %v18067_v59  ;;  %v943_v57 = vld [vmem:[%s21550_s14 + $0xda8] sm:$0xff]  ;;  %v18120_v58 = vcombine.low %v930_v46, %v934_v47  ;;  %v18122_v59 = vcombine.low %v931_v48, %v935_v49  ;;  %v994_v46 = vld [vmem:[%s21550_s14 + $0xf40] sm:$0xff] }
 0x1ab   : > { %v18131_v61 = vcombine.high %v939_v56, %v943_v57  ;;  %v998_v47 = vld [vmem:[%s21550_s14 + $0xf60] sm:$0xff]  ;;  %v995_v48 = vld [vmem:[%s21550_s14 + $0xf48] sm:$0xff] }
 0x1ac   : > { %v999_v49 = vld [vmem:[%s21550_s14 + $0xf68] sm:$0xff] }
 0x1ad   : > { %12291 = vmatpush1.bf16.msra.mxu0 %v18064_v0  ;;  %12936 = vmatpush1.bf16.msra.mxu1 %v18066_v1  ;;  %v947_v0 = vld [vmem:[%s21550_s14 + $0xdc8] sm:$0xff] }
 0x1ae   : > { %12292 = vmatprep.subr.bf16.mxu0 %v18073_v2  ;;  %12937 = vmatprep.subr.bf16.mxu1 %v18075_v3  ;;  %v951_v1 = vld [vmem:[%s21550_s14 + $0xde8] sm:$0xff]  ;;  %v18128_v2 = vcombine.low %v938_v54, %v942_v55  ;;  %v18130_v3 = vcombine.low %v939_v56, %v943_v57  ;;  %v1002_v54 = vld [vmem:[%s21550_s14 + $0xf80] sm:$0xff] }
 0x1af   : > { %v18139_v5 = vcombine.high %v947_v0, %v951_v1  ;;  %v1006_v55 = vld [vmem:[%s21550_s14 + $0xfa0] sm:$0xff]  ;;  %v1003_v56 = vld [vmem:[%s21550_s14 + $0xf88] sm:$0xff] }
 0x1b0   : > { %v1007_v57 = vld [vmem:[%s21550_s14 + $0xfa8] sm:$0xff] }
 0x1b1   : > { %12293 = vmatpush1.bf16.msra.mxu0 %v18072_v8  ;;  %12938 = vmatpush1.bf16.msra.mxu1 %v18074_v9  ;;  %v955_v8 = vld [vmem:[%s21550_s14 + $0xe08] sm:$0xff] }
 0x1b2   : > { %12305 = vmatprep.subr.bf16.mxu0 %v18081_v10  ;;  %12950 = vmatprep.subr.bf16.mxu1 %v18083_v11  ;;  %v959_v9 = vld [vmem:[%s21550_s14 + $0xe28] sm:$0xff]  ;;  %v18136_v10 = vcombine.low %v946_v62, %v950_v63  ;;  %v18138_v11 = vcombine.low %v947_v0, %v951_v1  ;;  %v1010_v62 = vld [vmem:[%s21550_s14 + $0xfc0] sm:$0xff] }
 0x1b3   : > { %v18147_v13 = vcombine.high %v955_v8, %v959_v9  ;;  %v1014_v63 = vld [vmem:[%s21550_s14 + $0xfe0] sm:$0xff]  ;;  %v1011_v0 = vld [vmem:[%s21550_s14 + $0xfc8] sm:$0xff] }
 0x1b4   : > { %12295 = vmatmul.mubr.bf16.vlgmr.msra.gmra.mrb[0].mxu0 %v20374_v14  ;;  %12940 = vmatmul.mubr.bf16.vlgmr.msra.gmra.mrb[0].mxu1 %v20374_v14  ;;  %v962_v14 = vld [vmem:[%s21550_s14 + $0xe40] sm:$0xff]  ;;  %v1015_v1 = vld [vmem:[%s21550_s14 + $0xfe8] sm:$0xff] }
 0x1b5   : > { %12306 = vmatpush1.bf16.msra.mxu0 %v18080_v17  ;;  %12951 = vmatpush1.bf16.msra.mxu1 %v18082_v18  ;;  %v967_v17 = vld [vmem:[%s21550_s14 + $0xe68] sm:$0xff]  ;;  %v18144_v18 = vcombine.low %v954_v6, %v958_v7  ;;  %v1018_v6 = vld [vmem:[%s21550_s14 + $0x1000] sm:$0xff] }
 0x1b6   : > { %12307 = vmatprep.subr.bf16.mxu0 %v18089_v19  ;;  %12952 = vmatprep.subr.bf16.mxu1 %v18091_v20  ;;  %v18146_v19 = vcombine.low %v955_v8, %v959_v9  ;;  %v18153_v20 = vcombine.high %v962_v14, %v966_v15  ;;  %v18155_v21 = vcombine.high %v963_v16, %v967_v17  ;;  %v1022_v7 = vld [vmem:[%s21550_s14 + $0x1020] sm:$0xff]  ;;  %v1019_v8 = vld [vmem:[%s21550_s14 + $0x1008] sm:$0xff] }
 0x1b7   : > { %12337 = vmatprep.mubr.bf16.mxu0 %v20375_v23  ;;  %12982 = vmatprep.mubr.bf16.mxu1 %v20375_v23  ;;  %v974_v23 = vld [vmem:[%s21550_s14 + $0xea0] sm:$0xff]  ;;  %v1023_v9 = vld [vmem:[%s21550_s14 + $0x1028] sm:$0xff] }
 0x1b9   : > { %12308 = vmatpush1.bf16.msra.mxu0 %v18088_v26  ;;  %12953 = vmatpush1.bf16.msra.mxu1 %v18090_v27  ;;  %v18152_v26 = vcombine.low %v962_v14, %v966_v15  ;;  %v18154_v27 = vcombine.low %v963_v16, %v967_v17  ;;  %v1026_v14 = vld [vmem:[%s21550_s14 + $0x1040] sm:$0xff]  ;;  %v20377_v16 = vld [vmem:[%s21606_s12 + $0x18] ss:$240 sps:$4 sm:$0xff]  }
 0x1ba   : > { %12309 = vmatprep.subr.bf16.mxu0 %v18097_v28  ;;  %12954 = vmatprep.subr.bf16.mxu1 %v18099_v29  ;;  %v18161_v28 = vcombine.high %v970_v22, %v974_v23  ;;  %v18163_v29 = vcombine.high %v971_v24, %v975_v25  ;;  %v1030_v15 = vld [vmem:[%s21550_s14 + $0x1060] sm:$0xff]  ;;  %v1027_v17 = vld [vmem:[%s21550_s14 + $0x1048] sm:$0xff] }
 0x1bd   : > { %12310 = vmatpush1.bf16.msra.mxu0 %v18096_v34  ;;  %12955 = vmatpush1.bf16.msra.mxu1 %v18098_v35  ;;  %v18160_v34 = vcombine.low %v970_v22, %v974_v23  ;;  %v18162_v35 = vcombine.low %v971_v24, %v975_v25  ;;  %v1034_v23 = vld [vmem:[%s21550_s14 + $0x1080] sm:$0xff] }
 0x1be   : > { %12311 = vmatprep.subr.bf16.mxu0 %v18105_v36  ;;  %12956 = vmatprep.subr.bf16.mxu1 %v18107_v37  ;;  %v18169_v36 = vcombine.high %v978_v30, %v982_v31  ;;  %v18171_v37 = vcombine.high %v979_v32, %v983_v33  ;;  %v1038_v24 = vld [vmem:[%s21550_s14 + $0x10a0] sm:$0xff] }
 0x1bf   : > { %v20378_v25 = vld [vmem:[%s21606_s12 + $0x24] ss:$240 sps:$4 sm:$0xff]  }
 0x1c1   : > { %12312 = vmatpush1.bf16.msra.mxu0 %v18104_v42  ;;  %12957 = vmatpush1.bf16.msra.mxu1 %v18106_v43  ;;  %v18168_v42 = vcombine.low %v978_v30, %v982_v31  ;;  %v18170_v43 = vcombine.low %v979_v32, %v983_v33  ;;  %v18225_v30 = vcombine.high %v1034_v23, %v1038_v24  ;;  %v1042_v32 = vld [vmem:[%s21550_s14 + $0x10c0] sm:$0xff] }
 0x1c2   : > { %12313 = vmatprep.subr.bf16.mxu0 %v18113_v44  ;;  %12958 = vmatprep.subr.bf16.mxu1 %v18115_v45  ;;  %v18177_v44 = vcombine.high %v986_v38, %v990_v39  ;;  %v18179_v45 = vcombine.high %v987_v40, %v991_v41  ;;  %v1046_v33 = vld [vmem:[%s21550_s14 + $0x10e0] sm:$0xff] }
 0x1c5   : > { %12314 = vmatpush1.bf16.msra.mxu0 %v18112_v50  ;;  %12959 = vmatpush1.bf16.msra.mxu1 %v18114_v51  ;;  %v18176_v50 = vcombine.low %v986_v38, %v990_v39  ;;  %v18178_v51 = vcombine.low %v987_v40, %v991_v41  ;;  %v18233_v38 = vcombine.high %v1042_v32, %v1046_v33  ;;  %v1050_v40 = vld [vmem:[%s21550_s14 + $0x1100] sm:$0xff] }
 0x1c6   : > { %12315 = vmatprep.subr.bf16.mxu0 %v18121_v52  ;;  %12960 = vmatprep.subr.bf16.mxu1 %v18123_v53  ;;  %v18185_v52 = vcombine.high %v994_v46, %v998_v47  ;;  %v18187_v53 = vcombine.high %v995_v48, %v999_v49  ;;  %v1054_v41 = vld [vmem:[%s21550_s14 + $0x1120] sm:$0xff] }
 0x1c9   : > { %12316 = vmatpush1.bf16.msra.mxu0 %v18120_v58  ;;  %12961 = vmatpush1.bf16.msra.mxu1 %v18122_v59  ;;  %v18184_v58 = vcombine.low %v994_v46, %v998_v47  ;;  %v18186_v59 = vcombine.low %v995_v48, %v999_v49  ;;  %v18241_v46 = vcombine.high %v1050_v40, %v1054_v41  ;;  %v1058_v48 = vld [vmem:[%s21550_s14 + $0x1140] sm:$0xff] }
 0x1ca   : > { %12317 = vmatprep.subr.bf16.mxu0 %v18129_v60  ;;  %12962 = vmatprep.subr.bf16.mxu1 %v18131_v61  ;;  %v18193_v60 = vcombine.high %v1002_v54, %v1006_v55  ;;  %v18195_v61 = vcombine.high %v1003_v56, %v1007_v57  ;;  %v1062_v49 = vld [vmem:[%s21550_s14 + $0x1160] sm:$0xff] }
 0x1cd   : > { %12318 = vmatpush1.bf16.msra.mxu0 %v18128_v2  ;;  %12963 = vmatpush1.bf16.msra.mxu1 %v18130_v3  ;;  %v18192_v2 = vcombine.low %v1002_v54, %v1006_v55  ;;  %v18194_v3 = vcombine.low %v1003_v56, %v1007_v57  ;;  %v18249_v54 = vcombine.high %v1058_v48, %v1062_v49  ;;  %v1066_v56 = vld [vmem:[%s21550_s14 + $0x1180] sm:$0xff] }
 0x1ce   : > { %12319 = vmatprep.subr.bf16.mxu0 %v18137_v4  ;;  %12964 = vmatprep.subr.bf16.mxu1 %v18139_v5  ;;  %v18201_v4 = vcombine.high %v1010_v62, %v1014_v63  ;;  %v18203_v5 = vcombine.high %v1011_v0, %v1015_v1  ;;  %v1070_v57 = vld [vmem:[%s21550_s14 + $0x11a0] sm:$0xff] }
 0x1d1   : > { %12320 = vmatpush1.bf16.msra.mxu0 %v18136_v10  ;;  %12965 = vmatpush1.bf16.msra.mxu1 %v18138_v11  ;;  %v18200_v10 = vcombine.low %v1010_v62, %v1014_v63  ;;  %v18202_v11 = vcombine.low %v1011_v0, %v1015_v1  ;;  %v18257_v62 = vcombine.high %v1066_v56, %v1070_v57  ;;  %v1074_v0 = vld [vmem:[%s21550_s14 + $0x11c0] sm:$0xff] }
 0x1d2   : > { %12321 = vmatprep.subr.bf16.mxu0 %v18145_v12  ;;  %12966 = vmatprep.subr.bf16.mxu1 %v18147_v13  ;;  %v18209_v12 = vcombine.high %v1018_v6, %v1022_v7  ;;  %v18211_v13 = vcombine.high %v1019_v8, %v1023_v9  ;;  %v1078_v1 = vld [vmem:[%s21550_s14 + $0x11e0] sm:$0xff] }
 0x1d5   : > { %12322 = vmatpush1.bf16.msra.mxu0 %v18144_v18  ;;  %12967 = vmatpush1.bf16.msra.mxu1 %v18146_v19  ;;  %v1031_v18 = vld [vmem:[%s21550_s14 + $0x1068] sm:$0xff]  ;;  %v18208_v19 = vcombine.low %v1018_v6, %v1022_v7  ;;  %v18265_v6 = vcombine.high %v1074_v0, %v1078_v1 }
 0x1d6   : > { %12323 = vmatprep.subr.bf16.mxu0 %v18153_v20  ;;  %12968 = vmatprep.subr.bf16.mxu1 %v18155_v21  ;;  %v18210_v20 = vcombine.low %v1019_v8, %v1023_v9  ;;  %v18217_v21 = vcombine.high %v1026_v14, %v1030_v15  ;;  %v18219_v22 = vcombine.high %v1027_v17, %v1031_v18  ;;  %v1082_v8 = vld [vmem:[%s21550_s14 + $0x1200] sm:$0xff] }
 0x1d7   : > { %v1086_v9 = vld [vmem:[%s21550_s14 + $0x1220] sm:$0xff] }
 0x1d9   : > { %12324 = vmatpush1.bf16.msra.mxu0 %v18152_v26  ;;  %12969 = vmatpush1.bf16.msra.mxu1 %v18154_v27  ;;  %v1035_v26 = vld [vmem:[%s21550_s14 + $0x1088] sm:$0xff] }
 0x1da   : > { %12325 = vmatprep.subr.bf16.mxu0 %v18161_v28  ;;  %12970 = vmatprep.subr.bf16.mxu1 %v18163_v29  ;;  %v1039_v27 = vld [vmem:[%s21550_s14 + $0x10a8] sm:$0xff]  ;;  %v18216_v28 = vcombine.low %v1026_v14, %v1030_v15  ;;  %v18218_v29 = vcombine.low %v1027_v17, %v1031_v18  ;;  %v18273_v14 = vcombine.high %v1082_v8, %v1086_v9  ;;  %v1094_v17 = vld [vmem:[%s21550_s14 + $0x1260] sm:$0xff] }
 0x1db   : > { %v18227_v31 = vcombine.high %v1035_v26, %v1039_v27  ;;  %v1091_v18 = vld [vmem:[%s21550_s14 + $0x1248] sm:$0xff] }
 0x1dd   : > { %12326 = vmatpush1.bf16.msra.mxu0 %v18160_v34  ;;  %12971 = vmatpush1.bf16.msra.mxu1 %v18162_v35  ;;  %v1043_v34 = vld [vmem:[%s21550_s14 + $0x10c8] sm:$0xff] }
 0x1de   : > { %12327 = vmatprep.subr.bf16.mxu0 %v18169_v36  ;;  %12972 = vmatprep.subr.bf16.mxu1 %v18171_v37  ;;  %v1047_v35 = vld [vmem:[%s21550_s14 + $0x10e8] sm:$0xff]  ;;  %v18224_v36 = vcombine.low %v1034_v23, %v1038_v24  ;;  %v18226_v37 = vcombine.low %v1035_v26, %v1039_v27  ;;  %v1098_v24 = vld [vmem:[%s21550_s14 + $0x1280] sm:$0xff] }
 0x1df   : > { %v18235_v39 = vcombine.high %v1043_v34, %v1047_v35  ;;  %v1099_v26 = vld [vmem:[%s21550_s14 + $0x1288] sm:$0xff] }
 0x1e0   : > { %v1103_v27 = vld [vmem:[%s21550_s14 + $0x12a8] sm:$0xff] }
 0x1e1   : > { %12328 = vmatpush1.bf16.msra.mxu0 %v18168_v42  ;;  %12973 = vmatpush1.bf16.msra.mxu1 %v18170_v43  ;;  %v1051_v42 = vld [vmem:[%s21550_s14 + $0x1108] sm:$0xff] }
 0x1e2   : > { %12329 = vmatprep.subr.bf16.mxu0 %v18177_v44  ;;  %12974 = vmatprep.subr.bf16.mxu1 %v18179_v45  ;;  %v1055_v43 = vld [vmem:[%s21550_s14 + $0x1128] sm:$0xff]  ;;  %v18232_v44 = vcombine.low %v1042_v32, %v1046_v33  ;;  %v18234_v45 = vcombine.low %v1043_v34, %v1047_v35  ;;  %v1106_v32 = vld [vmem:[%s21550_s14 + $0x12c0] sm:$0xff] }
 0x1e3   : > { %v18243_v47 = vcombine.high %v1051_v42, %v1055_v43  ;;  %v1110_v33 = vld [vmem:[%s21550_s14 + $0x12e0] sm:$0xff]  ;;  %v1107_v34 = vld [vmem:[%s21550_s14 + $0x12c8] sm:$0xff] }
 0x1e4   : > { %v1111_v35 = vld [vmem:[%s21550_s14 + $0x12e8] sm:$0xff] }
 0x1e5   : > { %12330 = vmatpush1.bf16.msra.mxu0 %v18176_v50  ;;  %12975 = vmatpush1.bf16.msra.mxu1 %v18178_v51  ;;  %v1059_v50 = vld [vmem:[%s21550_s14 + $0x1148] sm:$0xff] }
 0x1e6   : > { %12331 = vmatprep.subr.bf16.mxu0 %v18185_v52  ;;  %12976 = vmatprep.subr.bf16.mxu1 %v18187_v53  ;;  %v1063_v51 = vld [vmem:[%s21550_s14 + $0x1168] sm:$0xff]  ;;  %v18240_v52 = vcombine.low %v1050_v40, %v1054_v41  ;;  %v18242_v53 = vcombine.low %v1051_v42, %v1055_v43  ;;  %v1114_v40 = vld [vmem:[%s21550_s14 + $0x1300] sm:$0xff] }
 0x1e7   : > { %v18251_v55 = vcombine.high %v1059_v50, %v1063_v51  ;;  %v1118_v41 = vld [vmem:[%s21550_s14 + $0x1320] sm:$0xff]  ;;  %v1115_v42 = vld [vmem:[%s21550_s14 + $0x1308] sm:$0xff] }
 0x1e8   : > { %v1119_v43 = vld [vmem:[%s21550_s14 + $0x1328] sm:$0xff] }
 0x1e9   : > { %12332 = vmatpush1.bf16.msra.mxu0 %v18184_v58  ;;  %12977 = vmatpush1.bf16.msra.mxu1 %v18186_v59  ;;  %v1067_v58 = vld [vmem:[%s21550_s14 + $0x1188] sm:$0xff] }
 0x1ea   : > { %12333 = vmatprep.subr.bf16.mxu0 %v18193_v60  ;;  %12978 = vmatprep.subr.bf16.mxu1 %v18195_v61  ;;  %v1071_v59 = vld [vmem:[%s21550_s14 + $0x11a8] sm:$0xff]  ;;  %v18248_v60 = vcombine.low %v1058_v48, %v1062_v49  ;;  %v18250_v61 = vcombine.low %v1059_v50, %v1063_v51  ;;  %v1122_v48 = vld [vmem:[%s21550_s14 + $0x1340] sm:$0xff] }
 0x1eb   : > { %v18259_v63 = vcombine.high %v1067_v58, %v1071_v59  ;;  %v1126_v49 = vld [vmem:[%s21550_s14 + $0x1360] sm:$0xff]  ;;  %v1123_v50 = vld [vmem:[%s21550_s14 + $0x1348] sm:$0xff] }
 0x1ec   : > { %v1127_v51 = vld [vmem:[%s21550_s14 + $0x1368] sm:$0xff] }
 0x1ed   : > { %12334 = vmatpush1.bf16.msra.mxu0 %v18192_v2  ;;  %12979 = vmatpush1.bf16.msra.mxu1 %v18194_v3  ;;  %v1075_v2 = vld [vmem:[%s21550_s14 + $0x11c8] sm:$0xff] }
 0x1ee   : > { %12335 = vmatprep.subr.bf16.mxu0 %v18201_v4  ;;  %12980 = vmatprep.subr.bf16.mxu1 %v18203_v5  ;;  %v1079_v3 = vld [vmem:[%s21550_s14 + $0x11e8] sm:$0xff]  ;;  %v18256_v4 = vcombine.low %v1066_v56, %v1070_v57  ;;  %v18258_v5 = vcombine.low %v1067_v58, %v1071_v59  ;;  %v1130_v56 = vld [vmem:[%s21550_s14 + $0x1380] sm:$0xff] }
 0x1ef   : > { %v18267_v7 = vcombine.high %v1075_v2, %v1079_v3  ;;  %v1134_v57 = vld [vmem:[%s21550_s14 + $0x13a0] sm:$0xff]  ;;  %v1131_v58 = vld [vmem:[%s21550_s14 + $0x1388] sm:$0xff] }
 0x1f0   : > { %v1135_v59 = vld [vmem:[%s21550_s14 + $0x13a8] sm:$0xff] }
 0x1f1   : > { %12336 = vmatpush1.bf16.msra.mxu0 %v18200_v10  ;;  %12981 = vmatpush1.bf16.msra.mxu1 %v18202_v11  ;;  %v1083_v10 = vld [vmem:[%s21550_s14 + $0x1208] sm:$0xff] }
 0x1f2   : > { %12348 = vmatprep.subr.bf16.mxu0 %v18209_v12  ;;  %12993 = vmatprep.subr.bf16.mxu1 %v18211_v13  ;;  %v1087_v11 = vld [vmem:[%s21550_s14 + $0x1228] sm:$0xff]  ;;  %v18264_v12 = vcombine.low %v1074_v0, %v1078_v1  ;;  %v18266_v13 = vcombine.low %v1075_v2, %v1079_v3  ;;  %v1138_v0 = vld [vmem:[%s21550_s14 + $0x13c0] sm:$0xff] }
 0x1f3   : > { %v18275_v15 = vcombine.high %v1083_v10, %v1087_v11  ;;  %v1142_v1 = vld [vmem:[%s21550_s14 + $0x13e0] sm:$0xff]  ;;  %v1139_v2 = vld [vmem:[%s21550_s14 + $0x13c8] sm:$0xff] }
 0x1f4   : > { %12338 = vmatmul.mubr.bf16.vlgmr.msra.gmra.mrb[0].mxu0 %v20377_v16  ;;  %12983 = vmatmul.mubr.bf16.vlgmr.msra.gmra.mrb[0].mxu1 %v20377_v16  ;;  %v1090_v16 = vld [vmem:[%s21550_s14 + $0x1240] sm:$0xff]  ;;  %v1143_v3 = vld [vmem:[%s21550_s14 + $0x13e8] sm:$0xff] }
 0x1f5   : > { %12349 = vmatpush1.bf16.msra.mxu0 %v18208_v19  ;;  %12994 = vmatpush1.bf16.msra.mxu1 %v18210_v20  ;;  %v1095_v19 = vld [vmem:[%s21550_s14 + $0x1268] sm:$0xff]  ;;  %v18272_v20 = vcombine.low %v1082_v8, %v1086_v9  ;;  %v1146_v8 = vld [vmem:[%s21550_s14 + $0x1400] sm:$0xff] }
 0x1f6   : > { %12350 = vmatprep.subr.bf16.mxu0 %v18217_v21  ;;  %12995 = vmatprep.subr.bf16.mxu1 %v18219_v22  ;;  %v18274_v21 = vcombine.low %v1083_v10, %v1087_v11  ;;  %v18281_v22 = vcombine.high %v1090_v16, %v1094_v17  ;;  %v18283_v23 = vcombine.high %v1091_v18, %v1095_v19  ;;  %v1150_v9 = vld [vmem:[%s21550_s14 + $0x1420] sm:$0xff]  ;;  %v1147_v10 = vld [vmem:[%s21550_s14 + $0x1408] sm:$0xff] }
 0x1f7   : > { %12380 = vmatprep.mubr.bf16.mxu0 %v20378_v25  ;;  %13025 = vmatprep.mubr.bf16.mxu1 %v20378_v25  ;;  %v1102_v25 = vld [vmem:[%s21550_s14 + $0x12a0] sm:$0xff]  ;;  %v1151_v11 = vld [vmem:[%s21550_s14 + $0x1428] sm:$0xff] }
 0x1f9   : > { %12351 = vmatpush1.bf16.msra.mxu0 %v18216_v28  ;;  %12996 = vmatpush1.bf16.msra.mxu1 %v18218_v29  ;;  %v18280_v28 = vcombine.low %v1090_v16, %v1094_v17  ;;  %v18282_v29 = vcombine.low %v1091_v18, %v1095_v19  ;;  %v1154_v16 = vld [vmem:[%s21550_s14 + $0x1440] sm:$0xff]  ;;  %v1155_v19 = vld [vmem:[%s21550_s14 + $0x1448] sm:$0xff] }
 0x1fa   : > { %12352 = vmatprep.subr.bf16.mxu0 %v18225_v30  ;;  %12997 = vmatprep.subr.bf16.mxu1 %v18227_v31  ;;  %v18289_v30 = vcombine.high %v1098_v24, %v1102_v25  ;;  %v18291_v31 = vcombine.high %v1099_v26, %v1103_v27  ;;  %v1158_v17 = vld [vmem:[%s21550_s14 + $0x1460] sm:$0xff] }
 0x1fb   : > { %v20380_v18 = vld [vmem:[%s21606_s12 + $0x20] ss:$240 sps:$4 sm:$0xff]  }
 0x1fd   : > { %12353 = vmatpush1.bf16.msra.mxu0 %v18224_v36  ;;  %12998 = vmatpush1.bf16.msra.mxu1 %v18226_v37  ;;  %v18288_v36 = vcombine.low %v1098_v24, %v1102_v25  ;;  %v18290_v37 = vcombine.low %v1099_v26, %v1103_v27  ;;  %v1162_v25 = vld [vmem:[%s21550_s14 + $0x1480] sm:$0xff]  ;;  %v20381_v27 = vld [vmem:[%s21606_s12 + $0x2c] ss:$240 sps:$4 sm:$0xff]  }
 0x1fe   : > { %12354 = vmatprep.subr.bf16.mxu0 %v18233_v38  ;;  %12999 = vmatprep.subr.bf16.mxu1 %v18235_v39  ;;  %v18297_v38 = vcombine.high %v1106_v32, %v1110_v33  ;;  %v18299_v39 = vcombine.high %v1107_v34, %v1111_v35  ;;  %v1166_v26 = vld [vmem:[%s21550_s14 + $0x14a0] sm:$0xff] }
 0x201   : > { %12355 = vmatpush1.bf16.msra.mxu0 %v18232_v44  ;;  %13000 = vmatpush1.bf16.msra.mxu1 %v18234_v45  ;;  %v18296_v44 = vcombine.low %v1106_v32, %v1110_v33  ;;  %v18298_v45 = vcombine.low %v1107_v34, %v1111_v35  ;;  %v18353_v32 = vcombine.high %v1162_v25, %v1166_v26  ;;  %v1170_v34 = vld [vmem:[%s21550_s14 + $0x14c0] sm:$0xff] }
 0x202   : > { %12356 = vmatprep.subr.bf16.mxu0 %v18241_v46  ;;  %13001 = vmatprep.subr.bf16.mxu1 %v18243_v47  ;;  %v18305_v46 = vcombine.high %v1114_v40, %v1118_v41  ;;  %v18307_v47 = vcombine.high %v1115_v42, %v1119_v43  ;;  %v1174_v35 = vld [vmem:[%s21550_s14 + $0x14e0] sm:$0xff] }
 0x205   : > { %12357 = vmatpush1.bf16.msra.mxu0 %v18240_v52  ;;  %13002 = vmatpush1.bf16.msra.mxu1 %v18242_v53  ;;  %v18304_v52 = vcombine.low %v1114_v40, %v1118_v41  ;;  %v18306_v53 = vcombine.low %v1115_v42, %v1119_v43  ;;  %v18361_v40 = vcombine.high %v1170_v34, %v1174_v35  ;;  %v1178_v42 = vld [vmem:[%s21550_s14 + $0x1500] sm:$0xff] }
 0x206   : > { %12358 = vmatprep.subr.bf16.mxu0 %v18249_v54  ;;  %13003 = vmatprep.subr.bf16.mxu1 %v18251_v55  ;;  %v18313_v54 = vcombine.high %v1122_v48, %v1126_v49  ;;  %v18315_v55 = vcombine.high %v1123_v50, %v1127_v51  ;;  %v1182_v43 = vld [vmem:[%s21550_s14 + $0x1520] sm:$0xff] }
 0x209   : > { %12359 = vmatpush1.bf16.msra.mxu0 %v18248_v60  ;;  %13004 = vmatpush1.bf16.msra.mxu1 %v18250_v61  ;;  %v18312_v60 = vcombine.low %v1122_v48, %v1126_v49  ;;  %v18314_v61 = vcombine.low %v1123_v50, %v1127_v51  ;;  %v18369_v48 = vcombine.high %v1178_v42, %v1182_v43  ;;  %v1186_v50 = vld [vmem:[%s21550_s14 + $0x1540] sm:$0xff] }
 0x20a   : > { %12360 = vmatprep.subr.bf16.mxu0 %v18257_v62  ;;  %13005 = vmatprep.subr.bf16.mxu1 %v18259_v63  ;;  %v18321_v62 = vcombine.high %v1130_v56, %v1134_v57  ;;  %v18323_v63 = vcombine.high %v1131_v58, %v1135_v59  ;;  %v1190_v51 = vld [vmem:[%s21550_s14 + $0x1560] sm:$0xff] }
 0x20d   : > { %12361 = vmatpush1.bf16.msra.mxu0 %v18256_v4  ;;  %13006 = vmatpush1.bf16.msra.mxu1 %v18258_v5  ;;  %v18320_v4 = vcombine.low %v1130_v56, %v1134_v57  ;;  %v18322_v5 = vcombine.low %v1131_v58, %v1135_v59  ;;  %v18377_v56 = vcombine.high %v1186_v50, %v1190_v51  ;;  %v1194_v58 = vld [vmem:[%s21550_s14 + $0x1580] sm:$0xff] }
 0x20e   : > { %12362 = vmatprep.subr.bf16.mxu0 %v18265_v6  ;;  %13007 = vmatprep.subr.bf16.mxu1 %v18267_v7  ;;  %v18329_v6 = vcombine.high %v1138_v0, %v1142_v1  ;;  %v18331_v7 = vcombine.high %v1139_v2, %v1143_v3  ;;  %v1198_v59 = vld [vmem:[%s21550_s14 + $0x15a0] sm:$0xff] }
 0x211   : > { %12363 = vmatpush1.bf16.msra.mxu0 %v18264_v12  ;;  %13008 = vmatpush1.bf16.msra.mxu1 %v18266_v13  ;;  %v18328_v12 = vcombine.low %v1138_v0, %v1142_v1  ;;  %v18330_v13 = vcombine.low %v1139_v2, %v1143_v3  ;;  %v18385_v0 = vcombine.high %v1194_v58, %v1198_v59  ;;  %v1202_v2 = vld [vmem:[%s21550_s14 + $0x15c0] sm:$0xff] }
 0x212   : > { %12364 = vmatprep.subr.bf16.mxu0 %v18273_v14  ;;  %13009 = vmatprep.subr.bf16.mxu1 %v18275_v15  ;;  %v18337_v14 = vcombine.high %v1146_v8, %v1150_v9  ;;  %v18339_v15 = vcombine.high %v1147_v10, %v1151_v11  ;;  %v1206_v3 = vld [vmem:[%s21550_s14 + $0x15e0] sm:$0xff] }
 0x215   : > { %12365 = vmatpush1.bf16.msra.mxu0 %v18272_v20  ;;  %13010 = vmatpush1.bf16.msra.mxu1 %v18274_v21  ;;  %v1159_v20 = vld [vmem:[%s21550_s14 + $0x1468] sm:$0xff]  ;;  %v18336_v21 = vcombine.low %v1146_v8, %v1150_v9  ;;  %v18393_v8 = vcombine.high %v1202_v2, %v1206_v3 }
 0x216   : > { %12366 = vmatprep.subr.bf16.mxu0 %v18281_v22  ;;  %13011 = vmatprep.subr.bf16.mxu1 %v18283_v23  ;;  %v18338_v22 = vcombine.low %v1147_v10, %v1151_v11  ;;  %v18345_v23 = vcombine.high %v1154_v16, %v1158_v17  ;;  %v18347_v24 = vcombine.high %v1155_v19, %v1159_v20  ;;  %v1210_v10 = vld [vmem:[%s21550_s14 + $0x1600] sm:$0xff] }
 0x217   : > { %v1214_v11 = vld [vmem:[%s21550_s14 + $0x1620] sm:$0xff] }
 0x219   : > { %12367 = vmatpush1.bf16.msra.mxu0 %v18280_v28  ;;  %13012 = vmatpush1.bf16.msra.mxu1 %v18282_v29  ;;  %v1163_v28 = vld [vmem:[%s21550_s14 + $0x1488] sm:$0xff] }
 0x21a   : > { %12368 = vmatprep.subr.bf16.mxu0 %v18289_v30  ;;  %13013 = vmatprep.subr.bf16.mxu1 %v18291_v31  ;;  %v1167_v29 = vld [vmem:[%s21550_s14 + $0x14a8] sm:$0xff]  ;;  %v18344_v30 = vcombine.low %v1154_v16, %v1158_v17  ;;  %v18346_v31 = vcombine.low %v1155_v19, %v1159_v20  ;;  %v18401_v16 = vcombine.high %v1210_v10, %v1214_v11  ;;  %v1222_v19 = vld [vmem:[%s21550_s14 + $0x1660] sm:$0xff] }
 0x21b   : > { %v18355_v33 = vcombine.high %v1163_v28, %v1167_v29  ;;  %v1219_v20 = vld [vmem:[%s21550_s14 + $0x1648] sm:$0xff] }
 0x21d   : > { %12369 = vmatpush1.bf16.msra.mxu0 %v18288_v36  ;;  %13014 = vmatpush1.bf16.msra.mxu1 %v18290_v37  ;;  %v1171_v36 = vld [vmem:[%s21550_s14 + $0x14c8] sm:$0xff] }
 0x21e   : > { %12370 = vmatprep.subr.bf16.mxu0 %v18297_v38  ;;  %13015 = vmatprep.subr.bf16.mxu1 %v18299_v39  ;;  %v1175_v37 = vld [vmem:[%s21550_s14 + $0x14e8] sm:$0xff]  ;;  %v18352_v38 = vcombine.low %v1162_v25, %v1166_v26  ;;  %v18354_v39 = vcombine.low %v1163_v28, %v1167_v29  ;;  %v1226_v26 = vld [vmem:[%s21550_s14 + $0x1680] sm:$0xff] }
 0x21f   : > { %v18363_v41 = vcombine.high %v1171_v36, %v1175_v37  ;;  %v1227_v28 = vld [vmem:[%s21550_s14 + $0x1688] sm:$0xff] }
 0x220   : > { %v1231_v29 = vld [vmem:[%s21550_s14 + $0x16a8] sm:$0xff] }
 0x221   : > { %12371 = vmatpush1.bf16.msra.mxu0 %v18296_v44  ;;  %13016 = vmatpush1.bf16.msra.mxu1 %v18298_v45  ;;  %v1179_v44 = vld [vmem:[%s21550_s14 + $0x1508] sm:$0xff] }
 0x222   : > { %12372 = vmatprep.subr.bf16.mxu0 %v18305_v46  ;;  %13017 = vmatprep.subr.bf16.mxu1 %v18307_v47  ;;  %v1183_v45 = vld [vmem:[%s21550_s14 + $0x1528] sm:$0xff]  ;;  %v18360_v46 = vcombine.low %v1170_v34, %v1174_v35  ;;  %v18362_v47 = vcombine.low %v1171_v36, %v1175_v37  ;;  %v1234_v34 = vld [vmem:[%s21550_s14 + $0x16c0] sm:$0xff] }
 0x223   : > { %v18371_v49 = vcombine.high %v1179_v44, %v1183_v45  ;;  %v1238_v35 = vld [vmem:[%s21550_s14 + $0x16e0] sm:$0xff]  ;;  %v1235_v36 = vld [vmem:[%s21550_s14 + $0x16c8] sm:$0xff] }
 0x224   : > { %v1239_v37 = vld [vmem:[%s21550_s14 + $0x16e8] sm:$0xff] }
 0x225   : > { %12373 = vmatpush1.bf16.msra.mxu0 %v18304_v52  ;;  %13018 = vmatpush1.bf16.msra.mxu1 %v18306_v53  ;;  %v1187_v52 = vld [vmem:[%s21550_s14 + $0x1548] sm:$0xff] }
 0x226   : > { %12374 = vmatprep.subr.bf16.mxu0 %v18313_v54  ;;  %13019 = vmatprep.subr.bf16.mxu1 %v18315_v55  ;;  %v1191_v53 = vld [vmem:[%s21550_s14 + $0x1568] sm:$0xff]  ;;  %v18368_v54 = vcombine.low %v1178_v42, %v1182_v43  ;;  %v18370_v55 = vcombine.low %v1179_v44, %v1183_v45  ;;  %v1242_v42 = vld [vmem:[%s21550_s14 + $0x1700] sm:$0xff] }
 0x227   : > { %v18379_v57 = vcombine.high %v1187_v52, %v1191_v53  ;;  %v1246_v43 = vld [vmem:[%s21550_s14 + $0x1720] sm:$0xff]  ;;  %v1243_v44 = vld [vmem:[%s21550_s14 + $0x1708] sm:$0xff] }
 0x228   : > { %v1247_v45 = vld [vmem:[%s21550_s14 + $0x1728] sm:$0xff] }
 0x229   : > { %12375 = vmatpush1.bf16.msra.mxu0 %v18312_v60  ;;  %13020 = vmatpush1.bf16.msra.mxu1 %v18314_v61  ;;  %v1195_v60 = vld [vmem:[%s21550_s14 + $0x1588] sm:$0xff] }
 0x22a   : > { %12376 = vmatprep.subr.bf16.mxu0 %v18321_v62  ;;  %13021 = vmatprep.subr.bf16.mxu1 %v18323_v63  ;;  %v1199_v61 = vld [vmem:[%s21550_s14 + $0x15a8] sm:$0xff]  ;;  %v18376_v62 = vcombine.low %v1186_v50, %v1190_v51  ;;  %v18378_v63 = vcombine.low %v1187_v52, %v1191_v53  ;;  %v1250_v50 = vld [vmem:[%s21550_s14 + $0x1740] sm:$0xff] }
 0x22b   : > { %v18387_v1 = vcombine.high %v1195_v60, %v1199_v61  ;;  %v1254_v51 = vld [vmem:[%s21550_s14 + $0x1760] sm:$0xff]  ;;  %v1251_v52 = vld [vmem:[%s21550_s14 + $0x1748] sm:$0xff] }
 0x22c   : > { %v1255_v53 = vld [vmem:[%s21550_s14 + $0x1768] sm:$0xff] }
 0x22d   : > { %12377 = vmatpush1.bf16.msra.mxu0 %v18320_v4  ;;  %13022 = vmatpush1.bf16.msra.mxu1 %v18322_v5  ;;  %v1203_v4 = vld [vmem:[%s21550_s14 + $0x15c8] sm:$0xff] }
 0x22e   : > { %12378 = vmatprep.subr.bf16.mxu0 %v18329_v6  ;;  %13023 = vmatprep.subr.bf16.mxu1 %v18331_v7  ;;  %v1207_v5 = vld [vmem:[%s21550_s14 + $0x15e8] sm:$0xff]  ;;  %v18384_v6 = vcombine.low %v1194_v58, %v1198_v59  ;;  %v18386_v7 = vcombine.low %v1195_v60, %v1199_v61  ;;  %v1258_v58 = vld [vmem:[%s21550_s14 + $0x1780] sm:$0xff] }
 0x22f   : > { %v18395_v9 = vcombine.high %v1203_v4, %v1207_v5  ;;  %v1262_v59 = vld [vmem:[%s21550_s14 + $0x17a0] sm:$0xff]  ;;  %v1259_v60 = vld [vmem:[%s21550_s14 + $0x1788] sm:$0xff] }
 0x230   : > { %v1263_v61 = vld [vmem:[%s21550_s14 + $0x17a8] sm:$0xff] }
 0x231   : > { %12379 = vmatpush1.bf16.msra.mxu0 %v18328_v12  ;;  %13024 = vmatpush1.bf16.msra.mxu1 %v18330_v13  ;;  %v1211_v12 = vld [vmem:[%s21550_s14 + $0x1608] sm:$0xff] }
 0x232   : > { %12391 = vmatprep.subr.bf16.mxu0 %v18337_v14  ;;  %13036 = vmatprep.subr.bf16.mxu1 %v18339_v15  ;;  %v1215_v13 = vld [vmem:[%s21550_s14 + $0x1628] sm:$0xff]  ;;  %v18392_v14 = vcombine.low %v1202_v2, %v1206_v3  ;;  %v18394_v15 = vcombine.low %v1203_v4, %v1207_v5  ;;  %v1266_v2 = vld [vmem:[%s21550_s14 + $0x17c0] sm:$0xff] }
 0x233   : > { %v18403_v17 = vcombine.high %v1211_v12, %v1215_v13  ;;  %v1270_v3 = vld [vmem:[%s21550_s14 + $0x17e0] sm:$0xff]  ;;  %v1267_v4 = vld [vmem:[%s21550_s14 + $0x17c8] sm:$0xff] }
 0x234   : > { %12381 = vmatmul.mubr.bf16.vlgmr.msra.gmra.mrb[0].mxu0 %v20380_v18  ;;  %13026 = vmatmul.mubr.bf16.vlgmr.msra.gmra.mrb[0].mxu1 %v20380_v18  ;;  %v1218_v18 = vld [vmem:[%s21550_s14 + $0x1640] sm:$0xff]  ;;  %v1271_v5 = vld [vmem:[%s21550_s14 + $0x17e8] sm:$0xff] }
 0x235   : > { %12392 = vmatpush1.bf16.msra.mxu0 %v18336_v21  ;;  %13037 = vmatpush1.bf16.msra.mxu1 %v18338_v22  ;;  %v1223_v21 = vld [vmem:[%s21550_s14 + $0x1668] sm:$0xff]  ;;  %v18400_v22 = vcombine.low %v1210_v10, %v1214_v11  ;;  %v1274_v10 = vld [vmem:[%s21550_s14 + $0x1800] sm:$0xff] }
 0x236   : > { %12393 = vmatprep.subr.bf16.mxu0 %v18345_v23  ;;  %13038 = vmatprep.subr.bf16.mxu1 %v18347_v24  ;;  %v18402_v23 = vcombine.low %v1211_v12, %v1215_v13  ;;  %v18409_v24 = vcombine.high %v1218_v18, %v1222_v19  ;;  %v18411_v25 = vcombine.high %v1219_v20, %v1223_v21  ;;  %v1278_v11 = vld [vmem:[%s21550_s14 + $0x1820] sm:$0xff]  ;;  %v1275_v12 = vld [vmem:[%s21550_s14 + $0x1808] sm:$0xff] }
 0x237   : > { %12423 = vmatprep.mubr.bf16.mxu0 %v20381_v27  ;;  %13068 = vmatprep.mubr.bf16.mxu1 %v20381_v27  ;;  %v1230_v27 = vld [vmem:[%s21550_s14 + $0x16a0] sm:$0xff]  ;;  %v1279_v13 = vld [vmem:[%s21550_s14 + $0x1828] sm:$0xff] }
 0x239   : > { %12394 = vmatpush1.bf16.msra.mxu0 %v18344_v30  ;;  %13039 = vmatpush1.bf16.msra.mxu1 %v18346_v31  ;;  %v18408_v30 = vcombine.low %v1218_v18, %v1222_v19  ;;  %v18410_v31 = vcombine.low %v1219_v20, %v1223_v21  ;;  %v1282_v18 = vld [vmem:[%s21550_s14 + $0x1840] sm:$0xff]  ;;  %v20383_v20 = vld [vmem:[%s21606_s12 + $0x28] ss:$240 sps:$4 sm:$0xff]  }
 0x23a   : > { %12395 = vmatprep.subr.bf16.mxu0 %v18353_v32  ;;  %13040 = vmatprep.subr.bf16.mxu1 %v18355_v33  ;;  %v18417_v32 = vcombine.high %v1226_v26, %v1230_v27  ;;  %v18419_v33 = vcombine.high %v1227_v28, %v1231_v29  ;;  %v1286_v19 = vld [vmem:[%s21550_s14 + $0x1860] sm:$0xff]  ;;  %v1283_v21 = vld [vmem:[%s21550_s14 + $0x1848] sm:$0xff] }
 0x23d   : > { %12396 = vmatpush1.bf16.msra.mxu0 %v18352_v38  ;;  %13041 = vmatpush1.bf16.msra.mxu1 %v18354_v39  ;;  %v18416_v38 = vcombine.low %v1226_v26, %v1230_v27  ;;  %v18418_v39 = vcombine.low %v1227_v28, %v1231_v29  ;;  %v1290_v27 = vld [vmem:[%s21550_s14 + $0x1880] sm:$0xff] }
 0x23e   : > { %12397 = vmatprep.subr.bf16.mxu0 %v18361_v40  ;;  %13042 = vmatprep.subr.bf16.mxu1 %v18363_v41  ;;  %v18425_v40 = vcombine.high %v1234_v34, %v1238_v35  ;;  %v18427_v41 = vcombine.high %v1235_v36, %v1239_v37  ;;  %v1294_v28 = vld [vmem:[%s21550_s14 + $0x18a0] sm:$0xff] }
 0x23f   : > { %v20384_v29 = vld [vmem:[%s21606_s12 + $0x34] ss:$240 sps:$4 sm:$0xff]  }
 0x241   : > { %12398 = vmatpush1.bf16.msra.mxu0 %v18360_v46  ;;  %13043 = vmatpush1.bf16.msra.mxu1 %v18362_v47  ;;  %v18424_v46 = vcombine.low %v1234_v34, %v1238_v35  ;;  %v18426_v47 = vcombine.low %v1235_v36, %v1239_v37  ;;  %v18481_v34 = vcombine.high %v1290_v27, %v1294_v28  ;;  %v1298_v36 = vld [vmem:[%s21550_s14 + $0x18c0] sm:$0xff] }
 0x242   : > { %12399 = vmatprep.subr.bf16.mxu0 %v18369_v48  ;;  %13044 = vmatprep.subr.bf16.mxu1 %v18371_v49  ;;  %v18433_v48 = vcombine.high %v1242_v42, %v1246_v43  ;;  %v18435_v49 = vcombine.high %v1243_v44, %v1247_v45  ;;  %v1302_v37 = vld [vmem:[%s21550_s14 + $0x18e0] sm:$0xff] }
 0x245   : > { %12400 = vmatpush1.bf16.msra.mxu0 %v18368_v54  ;;  %13045 = vmatpush1.bf16.msra.mxu1 %v18370_v55  ;;  %v18432_v54 = vcombine.low %v1242_v42, %v1246_v43  ;;  %v18434_v55 = vcombine.low %v1243_v44, %v1247_v45  ;;  %v18489_v42 = vcombine.high %v1298_v36, %v1302_v37  ;;  %v1306_v44 = vld [vmem:[%s21550_s14 + $0x1900] sm:$0xff] }
 0x246   : > { %12401 = vmatprep.subr.bf16.mxu0 %v18377_v56  ;;  %13046 = vmatprep.subr.bf16.mxu1 %v18379_v57  ;;  %v18441_v56 = vcombine.high %v1250_v50, %v1254_v51  ;;  %v18443_v57 = vcombine.high %v1251_v52, %v1255_v53  ;;  %v1310_v45 = vld [vmem:[%s21550_s14 + $0x1920] sm:$0xff] }
 0x249   : > { %12402 = vmatpush1.bf16.msra.mxu0 %v18376_v62  ;;  %13047 = vmatpush1.bf16.msra.mxu1 %v18378_v63  ;;  %v18440_v62 = vcombine.low %v1250_v50, %v1254_v51  ;;  %v18442_v63 = vcombine.low %v1251_v52, %v1255_v53  ;;  %v18497_v50 = vcombine.high %v1306_v44, %v1310_v45  ;;  %v1314_v52 = vld [vmem:[%s21550_s14 + $0x1940] sm:$0xff] }
 0x24a   : > { %12403 = vmatprep.subr.bf16.mxu0 %v18385_v0  ;;  %13048 = vmatprep.subr.bf16.mxu1 %v18387_v1  ;;  %v18449_v0 = vcombine.high %v1258_v58, %v1262_v59  ;;  %v18451_v1 = vcombine.high %v1259_v60, %v1263_v61  ;;  %v1318_v53 = vld [vmem:[%s21550_s14 + $0x1960] sm:$0xff] }
 0x24d   : > { %12404 = vmatpush1.bf16.msra.mxu0 %v18384_v6  ;;  %13049 = vmatpush1.bf16.msra.mxu1 %v18386_v7  ;;  %v18448_v6 = vcombine.low %v1258_v58, %v1262_v59  ;;  %v18450_v7 = vcombine.low %v1259_v60, %v1263_v61  ;;  %v18505_v58 = vcombine.high %v1314_v52, %v1318_v53  ;;  %v1322_v60 = vld [vmem:[%s21550_s14 + $0x1980] sm:$0xff] }
 0x24e   : > { %12405 = vmatprep.subr.bf16.mxu0 %v18393_v8  ;;  %13050 = vmatprep.subr.bf16.mxu1 %v18395_v9  ;;  %v18457_v8 = vcombine.high %v1266_v2, %v1270_v3  ;;  %v18459_v9 = vcombine.high %v1267_v4, %v1271_v5  ;;  %v1326_v61 = vld [vmem:[%s21550_s14 + $0x19a0] sm:$0xff] }
 0x251   : > { %12406 = vmatpush1.bf16.msra.mxu0 %v18392_v14  ;;  %13051 = vmatpush1.bf16.msra.mxu1 %v18394_v15  ;;  %v18456_v14 = vcombine.low %v1266_v2, %v1270_v3  ;;  %v18458_v15 = vcombine.low %v1267_v4, %v1271_v5  ;;  %v18513_v2 = vcombine.high %v1322_v60, %v1326_v61  ;;  %v1330_v4 = vld [vmem:[%s21550_s14 + $0x19c0] sm:$0xff] }
 0x252   : > { %12407 = vmatprep.subr.bf16.mxu0 %v18401_v16  ;;  %13052 = vmatprep.subr.bf16.mxu1 %v18403_v17  ;;  %v18465_v16 = vcombine.high %v1274_v10, %v1278_v11  ;;  %v18467_v17 = vcombine.high %v1275_v12, %v1279_v13  ;;  %v1334_v5 = vld [vmem:[%s21550_s14 + $0x19e0] sm:$0xff] }
 0x255   : > { %12408 = vmatpush1.bf16.msra.mxu0 %v18400_v22  ;;  %13053 = vmatpush1.bf16.msra.mxu1 %v18402_v23  ;;  %v1287_v22 = vld [vmem:[%s21550_s14 + $0x1868] sm:$0xff]  ;;  %v18464_v23 = vcombine.low %v1274_v10, %v1278_v11  ;;  %v18521_v10 = vcombine.high %v1330_v4, %v1334_v5 }
 0x256   : > { %12409 = vmatprep.subr.bf16.mxu0 %v18409_v24  ;;  %13054 = vmatprep.subr.bf16.mxu1 %v18411_v25  ;;  %v18466_v24 = vcombine.low %v1275_v12, %v1279_v13  ;;  %v18473_v25 = vcombine.high %v1282_v18, %v1286_v19  ;;  %v18475_v26 = vcombine.high %v1283_v21, %v1287_v22  ;;  %v1338_v12 = vld [vmem:[%s21550_s14 + $0x1a00] sm:$0xff] }
 0x257   : > { %v1342_v13 = vld [vmem:[%s21550_s14 + $0x1a20] sm:$0xff] }
 0x259   : > { %12410 = vmatpush1.bf16.msra.mxu0 %v18408_v30  ;;  %13055 = vmatpush1.bf16.msra.mxu1 %v18410_v31  ;;  %v1291_v30 = vld [vmem:[%s21550_s14 + $0x1888] sm:$0xff] }
 0x25a   : > { %12411 = vmatprep.subr.bf16.mxu0 %v18417_v32  ;;  %13056 = vmatprep.subr.bf16.mxu1 %v18419_v33  ;;  %v1295_v31 = vld [vmem:[%s21550_s14 + $0x18a8] sm:$0xff]  ;;  %v18472_v32 = vcombine.low %v1282_v18, %v1286_v19  ;;  %v18474_v33 = vcombine.low %v1283_v21, %v1287_v22  ;;  %v18529_v18 = vcombine.high %v1338_v12, %v1342_v13  ;;  %v1350_v21 = vld [vmem:[%s21550_s14 + $0x1a60] sm:$0xff] }
 0x25b   : > { %v18483_v35 = vcombine.high %v1291_v30, %v1295_v31  ;;  %v1347_v22 = vld [vmem:[%s21550_s14 + $0x1a48] sm:$0xff] }
 0x25d   : > { %12412 = vmatpush1.bf16.msra.mxu0 %v18416_v38  ;;  %13057 = vmatpush1.bf16.msra.mxu1 %v18418_v39  ;;  %v1299_v38 = vld [vmem:[%s21550_s14 + $0x18c8] sm:$0xff] }
 0x25e   : > { %12413 = vmatprep.subr.bf16.mxu0 %v18425_v40  ;;  %13058 = vmatprep.subr.bf16.mxu1 %v18427_v41  ;;  %v1303_v39 = vld [vmem:[%s21550_s14 + $0x18e8] sm:$0xff]  ;;  %v18480_v40 = vcombine.low %v1290_v27, %v1294_v28  ;;  %v18482_v41 = vcombine.low %v1291_v30, %v1295_v31  ;;  %v1354_v28 = vld [vmem:[%s21550_s14 + $0x1a80] sm:$0xff] }
 0x25f   : > { %v18491_v43 = vcombine.high %v1299_v38, %v1303_v39  ;;  %v1355_v30 = vld [vmem:[%s21550_s14 + $0x1a88] sm:$0xff] }
 0x260   : > { %v1359_v31 = vld [vmem:[%s21550_s14 + $0x1aa8] sm:$0xff] }
 0x261   : > { %12414 = vmatpush1.bf16.msra.mxu0 %v18424_v46  ;;  %13059 = vmatpush1.bf16.msra.mxu1 %v18426_v47  ;;  %v1307_v46 = vld [vmem:[%s21550_s14 + $0x1908] sm:$0xff] }
 0x262   : > { %12415 = vmatprep.subr.bf16.mxu0 %v18433_v48  ;;  %13060 = vmatprep.subr.bf16.mxu1 %v18435_v49  ;;  %v1311_v47 = vld [vmem:[%s21550_s14 + $0x1928] sm:$0xff]  ;;  %v18488_v48 = vcombine.low %v1298_v36, %v1302_v37  ;;  %v18490_v49 = vcombine.low %v1299_v38, %v1303_v39  ;;  %v1362_v36 = vld [vmem:[%s21550_s14 + $0x1ac0] sm:$0xff] }
 0x263   : > { %v18499_v51 = vcombine.high %v1307_v46, %v1311_v47  ;;  %v1366_v37 = vld [vmem:[%s21550_s14 + $0x1ae0] sm:$0xff]  ;;  %v1363_v38 = vld [vmem:[%s21550_s14 + $0x1ac8] sm:$0xff] }
 0x264   : > { %v1367_v39 = vld [vmem:[%s21550_s14 + $0x1ae8] sm:$0xff] }
 0x265   : > { %12416 = vmatpush1.bf16.msra.mxu0 %v18432_v54  ;;  %13061 = vmatpush1.bf16.msra.mxu1 %v18434_v55  ;;  %v1315_v54 = vld [vmem:[%s21550_s14 + $0x1948] sm:$0xff] }
 0x266   : > { %12417 = vmatprep.subr.bf16.mxu0 %v18441_v56  ;;  %13062 = vmatprep.subr.bf16.mxu1 %v18443_v57  ;;  %v1319_v55 = vld [vmem:[%s21550_s14 + $0x1968] sm:$0xff]  ;;  %v18496_v56 = vcombine.low %v1306_v44, %v1310_v45  ;;  %v18498_v57 = vcombine.low %v1307_v46, %v1311_v47  ;;  %v1370_v44 = vld [vmem:[%s21550_s14 + $0x1b00] sm:$0xff] }
 0x267   : > { %v18507_v59 = vcombine.high %v1315_v54, %v1319_v55  ;;  %v1374_v45 = vld [vmem:[%s21550_s14 + $0x1b20] sm:$0xff]  ;;  %v1371_v46 = vld [vmem:[%s21550_s14 + $0x1b08] sm:$0xff] }
 0x268   : > { %v1375_v47 = vld [vmem:[%s21550_s14 + $0x1b28] sm:$0xff] }
 0x269   : > { %12418 = vmatpush1.bf16.msra.mxu0 %v18440_v62  ;;  %13063 = vmatpush1.bf16.msra.mxu1 %v18442_v63  ;;  %v1323_v62 = vld [vmem:[%s21550_s14 + $0x1988] sm:$0xff] }
 0x26a   : > { %12419 = vmatprep.subr.bf16.mxu0 %v18449_v0  ;;  %13064 = vmatprep.subr.bf16.mxu1 %v18451_v1  ;;  %v1327_v63 = vld [vmem:[%s21550_s14 + $0x19a8] sm:$0xff]  ;;  %v18504_v0 = vcombine.low %v1314_v52, %v1318_v53  ;;  %v18506_v1 = vcombine.low %v1315_v54, %v1319_v55  ;;  %v1378_v52 = vld [vmem:[%s21550_s14 + $0x1b40] sm:$0xff] }
 0x26b   : > { %v18515_v3 = vcombine.high %v1323_v62, %v1327_v63  ;;  %v1382_v53 = vld [vmem:[%s21550_s14 + $0x1b60] sm:$0xff]  ;;  %v1379_v54 = vld [vmem:[%s21550_s14 + $0x1b48] sm:$0xff] }
 0x26c   : > { %v1383_v55 = vld [vmem:[%s21550_s14 + $0x1b68] sm:$0xff] }
 0x26d   : > { %12420 = vmatpush1.bf16.msra.mxu0 %v18448_v6  ;;  %13065 = vmatpush1.bf16.msra.mxu1 %v18450_v7  ;;  %v1331_v6 = vld [vmem:[%s21550_s14 + $0x19c8] sm:$0xff] }
 0x26e   : > { %12421 = vmatprep.subr.bf16.mxu0 %v18457_v8  ;;  %13066 = vmatprep.subr.bf16.mxu1 %v18459_v9  ;;  %v1335_v7 = vld [vmem:[%s21550_s14 + $0x19e8] sm:$0xff]  ;;  %v18512_v8 = vcombine.low %v1322_v60, %v1326_v61  ;;  %v18514_v9 = vcombine.low %v1323_v62, %v1327_v63  ;;  %v1386_v60 = vld [vmem:[%s21550_s14 + $0x1b80] sm:$0xff] }
 0x26f   : > { %v18523_v11 = vcombine.high %v1331_v6, %v1335_v7  ;;  %v1390_v61 = vld [vmem:[%s21550_s14 + $0x1ba0] sm:$0xff]  ;;  %v1387_v62 = vld [vmem:[%s21550_s14 + $0x1b88] sm:$0xff] }
 0x270   : > { %v1391_v63 = vld [vmem:[%s21550_s14 + $0x1ba8] sm:$0xff] }
 0x271   : > { %12422 = vmatpush1.bf16.msra.mxu0 %v18456_v14  ;;  %13067 = vmatpush1.bf16.msra.mxu1 %v18458_v15  ;;  %v1339_v14 = vld [vmem:[%s21550_s14 + $0x1a08] sm:$0xff] }
 0x272   : > { %12434 = vmatprep.subr.bf16.mxu0 %v18465_v16  ;;  %13079 = vmatprep.subr.bf16.mxu1 %v18467_v17  ;;  %v1343_v15 = vld [vmem:[%s21550_s14 + $0x1a28] sm:$0xff]  ;;  %v18520_v16 = vcombine.low %v1330_v4, %v1334_v5  ;;  %v18522_v17 = vcombine.low %v1331_v6, %v1335_v7  ;;  %v1394_v4 = vld [vmem:[%s21550_s14 + $0x1bc0] sm:$0xff] }
 0x273   : > { %v18531_v19 = vcombine.high %v1339_v14, %v1343_v15  ;;  %v1398_v5 = vld [vmem:[%s21550_s14 + $0x1be0] sm:$0xff]  ;;  %v1395_v6 = vld [vmem:[%s21550_s14 + $0x1bc8] sm:$0xff] }
 0x274   : > { %12424 = vmatmul.mubr.bf16.vlgmr.msra.gmra.mrb[0].mxu0 %v20383_v20  ;;  %13069 = vmatmul.mubr.bf16.vlgmr.msra.gmra.mrb[0].mxu1 %v20383_v20  ;;  %v1346_v20 = vld [vmem:[%s21550_s14 + $0x1a40] sm:$0xff]  ;;  %v1399_v7 = vld [vmem:[%s21550_s14 + $0x1be8] sm:$0xff] }
 0x275   : > { %12435 = vmatpush1.bf16.msra.mxu0 %v18464_v23  ;;  %13080 = vmatpush1.bf16.msra.mxu1 %v18466_v24  ;;  %v1351_v23 = vld [vmem:[%s21550_s14 + $0x1a68] sm:$0xff]  ;;  %v18528_v24 = vcombine.low %v1338_v12, %v1342_v13  ;;  %v1402_v12 = vld [vmem:[%s21550_s14 + $0x1c00] sm:$0xff] }
 0x276   : > { %12436 = vmatprep.subr.bf16.mxu0 %v18473_v25  ;;  %13081 = vmatprep.subr.bf16.mxu1 %v18475_v26  ;;  %v18530_v25 = vcombine.low %v1339_v14, %v1343_v15  ;;  %v18537_v26 = vcombine.high %v1346_v20, %v1350_v21  ;;  %v18539_v27 = vcombine.high %v1347_v22, %v1351_v23  ;;  %v1406_v13 = vld [vmem:[%s21550_s14 + $0x1c20] sm:$0xff]  ;;  %v1403_v14 = vld [vmem:[%s21550_s14 + $0x1c08] sm:$0xff] }
 0x277   : > { %12466 = vmatprep.mubr.bf16.mxu0 %v20384_v29  ;;  %13111 = vmatprep.mubr.bf16.mxu1 %v20384_v29  ;;  %v1358_v29 = vld [vmem:[%s21550_s14 + $0x1aa0] sm:$0xff]  ;;  %v1407_v15 = vld [vmem:[%s21550_s14 + $0x1c28] sm:$0xff] }
 0x279   : > { %12437 = vmatpush1.bf16.msra.mxu0 %v18472_v32  ;;  %13082 = vmatpush1.bf16.msra.mxu1 %v18474_v33  ;;  %v18536_v32 = vcombine.low %v1346_v20, %v1350_v21  ;;  %v18538_v33 = vcombine.low %v1347_v22, %v1351_v23  ;;  %v1410_v20 = vld [vmem:[%s21550_s14 + $0x1c40] sm:$0xff]  ;;  %v1411_v23 = vld [vmem:[%s21550_s14 + $0x1c48] sm:$0xff] }
 0x27a   : > { %12438 = vmatprep.subr.bf16.mxu0 %v18481_v34  ;;  %13083 = vmatprep.subr.bf16.mxu1 %v18483_v35  ;;  %v18545_v34 = vcombine.high %v1354_v28, %v1358_v29  ;;  %v18547_v35 = vcombine.high %v1355_v30, %v1359_v31  ;;  %v1414_v21 = vld [vmem:[%s21550_s14 + $0x1c60] sm:$0xff] }
 0x27b   : > { %v20386_v22 = vld [vmem:[%s21606_s12 + $0x30] ss:$240 sps:$4 sm:$0xff]  }
 0x27d   : > { %12439 = vmatpush1.bf16.msra.mxu0 %v18480_v40  ;;  %13084 = vmatpush1.bf16.msra.mxu1 %v18482_v41  ;;  %v18544_v40 = vcombine.low %v1354_v28, %v1358_v29  ;;  %v18546_v41 = vcombine.low %v1355_v30, %v1359_v31  ;;  %v1418_v29 = vld [vmem:[%s21550_s14 + $0x1c80] sm:$0xff]  ;;  %v20387_v31 = vld [vmem:[%s21606_s12 + $0x3c] ss:$240 sps:$4 sm:$0xff]  }
 0x27e   : > { %12440 = vmatprep.subr.bf16.mxu0 %v18489_v42  ;;  %13085 = vmatprep.subr.bf16.mxu1 %v18491_v43  ;;  %v18553_v42 = vcombine.high %v1362_v36, %v1366_v37  ;;  %v18555_v43 = vcombine.high %v1363_v38, %v1367_v39  ;;  %v1422_v30 = vld [vmem:[%s21550_s14 + $0x1ca0] sm:$0xff] }
 0x281   : > { %12441 = vmatpush1.bf16.msra.mxu0 %v18488_v48  ;;  %13086 = vmatpush1.bf16.msra.mxu1 %v18490_v49  ;;  %v18552_v48 = vcombine.low %v1362_v36, %v1366_v37  ;;  %v18554_v49 = vcombine.low %v1363_v38, %v1367_v39  ;;  %v18609_v36 = vcombine.high %v1418_v29, %v1422_v30  ;;  %v1426_v38 = vld [vmem:[%s21550_s14 + $0x1cc0] sm:$0xff] }
 0x282   : > { %12442 = vmatprep.subr.bf16.mxu0 %v18497_v50  ;;  %13087 = vmatprep.subr.bf16.mxu1 %v18499_v51  ;;  %v18561_v50 = vcombine.high %v1370_v44, %v1374_v45  ;;  %v18563_v51 = vcombine.high %v1371_v46, %v1375_v47  ;;  %v1430_v39 = vld [vmem:[%s21550_s14 + $0x1ce0] sm:$0xff] }
 0x285   : > { %12443 = vmatpush1.bf16.msra.mxu0 %v18496_v56  ;;  %13088 = vmatpush1.bf16.msra.mxu1 %v18498_v57  ;;  %v18560_v56 = vcombine.low %v1370_v44, %v1374_v45  ;;  %v18562_v57 = vcombine.low %v1371_v46, %v1375_v47  ;;  %v18617_v44 = vcombine.high %v1426_v38, %v1430_v39  ;;  %v1434_v46 = vld [vmem:[%s21550_s14 + $0x1d00] sm:$0xff] }
 0x286   : > { %12444 = vmatprep.subr.bf16.mxu0 %v18505_v58  ;;  %13089 = vmatprep.subr.bf16.mxu1 %v18507_v59  ;;  %v18569_v58 = vcombine.high %v1378_v52, %v1382_v53  ;;  %v18571_v59 = vcombine.high %v1379_v54, %v1383_v55  ;;  %v1438_v47 = vld [vmem:[%s21550_s14 + $0x1d20] sm:$0xff] }
 0x289   : > { %12445 = vmatpush1.bf16.msra.mxu0 %v18504_v0  ;;  %13090 = vmatpush1.bf16.msra.mxu1 %v18506_v1  ;;  %v18568_v0 = vcombine.low %v1378_v52, %v1382_v53  ;;  %v18570_v1 = vcombine.low %v1379_v54, %v1383_v55  ;;  %v18625_v52 = vcombine.high %v1434_v46, %v1438_v47  ;;  %v1442_v54 = vld [vmem:[%s21550_s14 + $0x1d40] sm:$0xff] }
 0x28a   : > { %12446 = vmatprep.subr.bf16.mxu0 %v18513_v2  ;;  %13091 = vmatprep.subr.bf16.mxu1 %v18515_v3  ;;  %v18577_v2 = vcombine.high %v1386_v60, %v1390_v61  ;;  %v18579_v3 = vcombine.high %v1387_v62, %v1391_v63  ;;  %v1446_v55 = vld [vmem:[%s21550_s14 + $0x1d60] sm:$0xff] }
 0x28d   : > { %12447 = vmatpush1.bf16.msra.mxu0 %v18512_v8  ;;  %13092 = vmatpush1.bf16.msra.mxu1 %v18514_v9  ;;  %v18576_v8 = vcombine.low %v1386_v60, %v1390_v61  ;;  %v18578_v9 = vcombine.low %v1387_v62, %v1391_v63  ;;  %v18633_v60 = vcombine.high %v1442_v54, %v1446_v55  ;;  %v1450_v62 = vld [vmem:[%s21550_s14 + $0x1d80] sm:$0xff] }
 0x28e   : > { %12448 = vmatprep.subr.bf16.mxu0 %v18521_v10  ;;  %13093 = vmatprep.subr.bf16.mxu1 %v18523_v11  ;;  %v18585_v10 = vcombine.high %v1394_v4, %v1398_v5  ;;  %v18587_v11 = vcombine.high %v1395_v6, %v1399_v7  ;;  %v1454_v63 = vld [vmem:[%s21550_s14 + $0x1da0] sm:$0xff] }
 0x291   : > { %12449 = vmatpush1.bf16.msra.mxu0 %v18520_v16  ;;  %13094 = vmatpush1.bf16.msra.mxu1 %v18522_v17  ;;  %v18584_v16 = vcombine.low %v1394_v4, %v1398_v5  ;;  %v18586_v17 = vcombine.low %v1395_v6, %v1399_v7  ;;  %v18641_v4 = vcombine.high %v1450_v62, %v1454_v63  ;;  %v1458_v6 = vld [vmem:[%s21550_s14 + $0x1dc0] sm:$0xff] }
 0x292   : > { %12450 = vmatprep.subr.bf16.mxu0 %v18529_v18  ;;  %13095 = vmatprep.subr.bf16.mxu1 %v18531_v19  ;;  %v18593_v18 = vcombine.high %v1402_v12, %v1406_v13  ;;  %v18595_v19 = vcombine.high %v1403_v14, %v1407_v15  ;;  %v1462_v7 = vld [vmem:[%s21550_s14 + $0x1de0] sm:$0xff] }
 0x295   : > { %12451 = vmatpush1.bf16.msra.mxu0 %v18528_v24  ;;  %13096 = vmatpush1.bf16.msra.mxu1 %v18530_v25  ;;  %v1415_v24 = vld [vmem:[%s21550_s14 + $0x1c68] sm:$0xff]  ;;  %v18592_v25 = vcombine.low %v1402_v12, %v1406_v13  ;;  %v18649_v12 = vcombine.high %v1458_v6, %v1462_v7 }
 0x296   : > { %12452 = vmatprep.subr.bf16.mxu0 %v18537_v26  ;;  %13097 = vmatprep.subr.bf16.mxu1 %v18539_v27  ;;  %v18594_v26 = vcombine.low %v1403_v14, %v1407_v15  ;;  %v18601_v27 = vcombine.high %v1410_v20, %v1414_v21  ;;  %v18603_v28 = vcombine.high %v1411_v23, %v1415_v24  ;;  %v1466_v14 = vld [vmem:[%s21550_s14 + $0x1e00] sm:$0xff] }
 0x297   : > { %v1470_v15 = vld [vmem:[%s21550_s14 + $0x1e20] sm:$0xff] }
 0x299   : > { %12453 = vmatpush1.bf16.msra.mxu0 %v18536_v32  ;;  %13098 = vmatpush1.bf16.msra.mxu1 %v18538_v33  ;;  %v1419_v32 = vld [vmem:[%s21550_s14 + $0x1c88] sm:$0xff] }
 0x29a   : > { %12454 = vmatprep.subr.bf16.mxu0 %v18545_v34  ;;  %13099 = vmatprep.subr.bf16.mxu1 %v18547_v35  ;;  %v1423_v33 = vld [vmem:[%s21550_s14 + $0x1ca8] sm:$0xff]  ;;  %v18600_v34 = vcombine.low %v1410_v20, %v1414_v21  ;;  %v18602_v35 = vcombine.low %v1411_v23, %v1415_v24  ;;  %v18657_v20 = vcombine.high %v1466_v14, %v1470_v15  ;;  %v1478_v23 = vld [vmem:[%s21550_s14 + $0x1e60] sm:$0xff] }
 0x29b   : > { %v18611_v37 = vcombine.high %v1419_v32, %v1423_v33  ;;  %v1475_v24 = vld [vmem:[%s21550_s14 + $0x1e48] sm:$0xff] }
 0x29d   : > { %12455 = vmatpush1.bf16.msra.mxu0 %v18544_v40  ;;  %13100 = vmatpush1.bf16.msra.mxu1 %v18546_v41  ;;  %v1427_v40 = vld [vmem:[%s21550_s14 + $0x1cc8] sm:$0xff] }
 0x29e   : > { %12456 = vmatprep.subr.bf16.mxu0 %v18553_v42  ;;  %13101 = vmatprep.subr.bf16.mxu1 %v18555_v43  ;;  %v1431_v41 = vld [vmem:[%s21550_s14 + $0x1ce8] sm:$0xff]  ;;  %v18608_v42 = vcombine.low %v1418_v29, %v1422_v30  ;;  %v18610_v43 = vcombine.low %v1419_v32, %v1423_v33  ;;  %v1482_v30 = vld [vmem:[%s21550_s14 + $0x1e80] sm:$0xff] }
 0x29f   : > { %v18619_v45 = vcombine.high %v1427_v40, %v1431_v41  ;;  %v1483_v32 = vld [vmem:[%s21550_s14 + $0x1e88] sm:$0xff] }
 0x2a0   : > { %v1487_v33 = vld [vmem:[%s21550_s14 + $0x1ea8] sm:$0xff] }
 0x2a1   : > { %12457 = vmatpush1.bf16.msra.mxu0 %v18552_v48  ;;  %13102 = vmatpush1.bf16.msra.mxu1 %v18554_v49  ;;  %v1435_v48 = vld [vmem:[%s21550_s14 + $0x1d08] sm:$0xff] }
 0x2a2   : > { %12458 = vmatprep.subr.bf16.mxu0 %v18561_v50  ;;  %13103 = vmatprep.subr.bf16.mxu1 %v18563_v51  ;;  %v1439_v49 = vld [vmem:[%s21550_s14 + $0x1d28] sm:$0xff]  ;;  %v18616_v50 = vcombine.low %v1426_v38, %v1430_v39  ;;  %v18618_v51 = vcombine.low %v1427_v40, %v1431_v41  ;;  %v1490_v38 = vld [vmem:[%s21550_s14 + $0x1ec0] sm:$0xff] }
 0x2a3   : > { %v18627_v53 = vcombine.high %v1435_v48, %v1439_v49  ;;  %v1494_v39 = vld [vmem:[%s21550_s14 + $0x1ee0] sm:$0xff]  ;;  %v1491_v40 = vld [vmem:[%s21550_s14 + $0x1ec8] sm:$0xff] }
 0x2a4   : > { %v1495_v41 = vld [vmem:[%s21550_s14 + $0x1ee8] sm:$0xff] }
 0x2a5   : > { %12459 = vmatpush1.bf16.msra.mxu0 %v18560_v56  ;;  %13104 = vmatpush1.bf16.msra.mxu1 %v18562_v57  ;;  %v1443_v56 = vld [vmem:[%s21550_s14 + $0x1d48] sm:$0xff] }
 0x2a6   : > { %12460 = vmatprep.subr.bf16.mxu0 %v18569_v58  ;;  %13105 = vmatprep.subr.bf16.mxu1 %v18571_v59  ;;  %v1447_v57 = vld [vmem:[%s21550_s14 + $0x1d68] sm:$0xff]  ;;  %v18624_v58 = vcombine.low %v1434_v46, %v1438_v47  ;;  %v18626_v59 = vcombine.low %v1435_v48, %v1439_v49  ;;  %v1498_v46 = vld [vmem:[%s21550_s14 + $0x1f00] sm:$0xff] }
 0x2a7   : > { %v18635_v61 = vcombine.high %v1443_v56, %v1447_v57  ;;  %v1502_v47 = vld [vmem:[%s21550_s14 + $0x1f20] sm:$0xff]  ;;  %v1499_v48 = vld [vmem:[%s21550_s14 + $0x1f08] sm:$0xff] }
 0x2a8   : > { %v1503_v49 = vld [vmem:[%s21550_s14 + $0x1f28] sm:$0xff] }
 0x2a9   : > { %12461 = vmatpush1.bf16.msra.mxu0 %v18568_v0  ;;  %13106 = vmatpush1.bf16.msra.mxu1 %v18570_v1  ;;  %v1451_v0 = vld [vmem:[%s21550_s14 + $0x1d88] sm:$0xff] }
 0x2aa   : > { %12462 = vmatprep.subr.bf16.mxu0 %v18577_v2  ;;  %13107 = vmatprep.subr.bf16.mxu1 %v18579_v3  ;;  %v1455_v1 = vld [vmem:[%s21550_s14 + $0x1da8] sm:$0xff]  ;;  %v18632_v2 = vcombine.low %v1442_v54, %v1446_v55  ;;  %v18634_v3 = vcombine.low %v1443_v56, %v1447_v57  ;;  %v1506_v54 = vld [vmem:[%s21550_s14 + $0x1f40] sm:$0xff] }
 0x2ab   : > { %v18643_v5 = vcombine.high %v1451_v0, %v1455_v1  ;;  %v1510_v55 = vld [vmem:[%s21550_s14 + $0x1f60] sm:$0xff]  ;;  %v1507_v56 = vld [vmem:[%s21550_s14 + $0x1f48] sm:$0xff] }
 0x2ac   : > { %v1511_v57 = vld [vmem:[%s21550_s14 + $0x1f68] sm:$0xff] }
 0x2ad   : > { %12463 = vmatpush1.bf16.msra.mxu0 %v18576_v8  ;;  %13108 = vmatpush1.bf16.msra.mxu1 %v18578_v9  ;;  %v1459_v8 = vld [vmem:[%s21550_s14 + $0x1dc8] sm:$0xff] }
 0x2ae   : > { %12464 = vmatprep.subr.bf16.mxu0 %v18585_v10  ;;  %13109 = vmatprep.subr.bf16.mxu1 %v18587_v11  ;;  %v1463_v9 = vld [vmem:[%s21550_s14 + $0x1de8] sm:$0xff]  ;;  %v18640_v10 = vcombine.low %v1450_v62, %v1454_v63  ;;  %v18642_v11 = vcombine.low %v1451_v0, %v1455_v1  ;;  %v1514_v62 = vld [vmem:[%s21550_s14 + $0x1f80] sm:$0xff] }
 0x2af   : > { %v18651_v13 = vcombine.high %v1459_v8, %v1463_v9  ;;  %v1518_v63 = vld [vmem:[%s21550_s14 + $0x1fa0] sm:$0xff]  ;;  %v1515_v0 = vld [vmem:[%s21550_s14 + $0x1f88] sm:$0xff] }
 0x2b0   : > { %v1519_v1 = vld [vmem:[%s21550_s14 + $0x1fa8] sm:$0xff] }
 0x2b1   : > { %12465 = vmatpush1.bf16.msra.mxu0 %v18584_v16  ;;  %13110 = vmatpush1.bf16.msra.mxu1 %v18586_v17  ;;  %v1467_v16 = vld [vmem:[%s21550_s14 + $0x1e08] sm:$0xff] }
 0x2b2   : > { %12477 = vmatprep.subr.bf16.mxu0 %v18593_v18  ;;  %13122 = vmatprep.subr.bf16.mxu1 %v18595_v19  ;;  %v1471_v17 = vld [vmem:[%s21550_s14 + $0x1e28] sm:$0xff]  ;;  %v18648_v18 = vcombine.low %v1458_v6, %v1462_v7  ;;  %v18650_v19 = vcombine.low %v1459_v8, %v1463_v9  ;;  %v1522_v6 = vld [vmem:[%s21550_s14 + $0x1fc0] sm:$0xff] }
 0x2b3   : > { %v18659_v21 = vcombine.high %v1467_v16, %v1471_v17  ;;  %v1526_v7 = vld [vmem:[%s21550_s14 + $0x1fe0] sm:$0xff]  ;;  %v1523_v8 = vld [vmem:[%s21550_s14 + $0x1fc8] sm:$0xff] }
 0x2b4   : > { %12467 = vmatmul.mubr.bf16.vlgmr.msra.gmra.mrb[0].mxu0 %v20386_v22  ;;  %13112 = vmatmul.mubr.bf16.vlgmr.msra.gmra.mrb[0].mxu1 %v20386_v22  ;;  %v1474_v22 = vld [vmem:[%s21550_s14 + $0x1e40] sm:$0xff]  ;;  %v1527_v9 = vld [vmem:[%s21550_s14 + $0x1fe8] sm:$0xff] }
 0x2b5   : > { %12478 = vmatpush1.bf16.msra.mxu0 %v18592_v25  ;;  %13123 = vmatpush1.bf16.msra.mxu1 %v18594_v26  ;;  %v1479_v25 = vld [vmem:[%s21550_s14 + $0x1e68] sm:$0xff]  ;;  %v18656_v26 = vcombine.low %v1466_v14, %v1470_v15  ;;  %v1530_v14 = vld [vmem:[%s21550_s14 + $0x2000] sm:$0xff] }
 0x2b6   : > { %12479 = vmatprep.subr.bf16.mxu0 %v18601_v27  ;;  %13124 = vmatprep.subr.bf16.mxu1 %v18603_v28  ;;  %v18658_v27 = vcombine.low %v1467_v16, %v1471_v17  ;;  %v18665_v28 = vcombine.high %v1474_v22, %v1478_v23  ;;  %v18667_v29 = vcombine.high %v1475_v24, %v1479_v25  ;;  %v1534_v15 = vld [vmem:[%s21550_s14 + $0x2020] sm:$0xff]  ;;  %v1531_v16 = vld [vmem:[%s21550_s14 + $0x2008] sm:$0xff] }
 0x2b7   : > { %12509 = vmatprep.mubr.bf16.mxu0 %v20387_v31  ;;  %13154 = vmatprep.mubr.bf16.mxu1 %v20387_v31  ;;  %v1486_v31 = vld [vmem:[%s21550_s14 + $0x1ea0] sm:$0xff]  ;;  %v1535_v17 = vld [vmem:[%s21550_s14 + $0x2028] sm:$0xff] }
 0x2b9   : > { %12480 = vmatpush1.bf16.msra.mxu0 %v18600_v34  ;;  %13125 = vmatpush1.bf16.msra.mxu1 %v18602_v35  ;;  %v18664_v34 = vcombine.low %v1474_v22, %v1478_v23  ;;  %v18666_v35 = vcombine.low %v1475_v24, %v1479_v25  ;;  %v1538_v22 = vld [vmem:[%s21550_s14 + $0x2040] sm:$0xff]  ;;  %v20389_v24 = vld [vmem:[%s21606_s12 + $0x38] ss:$240 sps:$4 sm:$0xff]  }
 0x2ba   : > { %12481 = vmatprep.subr.bf16.mxu0 %v18609_v36  ;;  %13126 = vmatprep.subr.bf16.mxu1 %v18611_v37  ;;  %v18673_v36 = vcombine.high %v1482_v30, %v1486_v31  ;;  %v18675_v37 = vcombine.high %v1483_v32, %v1487_v33  ;;  %v1542_v23 = vld [vmem:[%s21550_s14 + $0x2060] sm:$0xff]  ;;  %v1539_v25 = vld [vmem:[%s21550_s14 + $0x2048] sm:$0xff] }
 0x2bd   : > { %12482 = vmatpush1.bf16.msra.mxu0 %v18608_v42  ;;  %13127 = vmatpush1.bf16.msra.mxu1 %v18610_v43  ;;  %v18672_v42 = vcombine.low %v1482_v30, %v1486_v31  ;;  %v18674_v43 = vcombine.low %v1483_v32, %v1487_v33  ;;  %v1546_v31 = vld [vmem:[%s21550_s14 + $0x2080] sm:$0xff] }
 0x2be   : > { %12483 = vmatprep.subr.bf16.mxu0 %v18617_v44  ;;  %13128 = vmatprep.subr.bf16.mxu1 %v18619_v45  ;;  %v18681_v44 = vcombine.high %v1490_v38, %v1494_v39  ;;  %v18683_v45 = vcombine.high %v1491_v40, %v1495_v41  ;;  %v1550_v32 = vld [vmem:[%s21550_s14 + $0x20a0] sm:$0xff] }
 0x2bf   : > { %v20390_v33 = vld [vmem:[%s21606_s12 + $0x44] ss:$240 sps:$4 sm:$0xff]  }
 0x2c1   : > { %12484 = vmatpush1.bf16.msra.mxu0 %v18616_v50  ;;  %13129 = vmatpush1.bf16.msra.mxu1 %v18618_v51  ;;  %v18680_v50 = vcombine.low %v1490_v38, %v1494_v39  ;;  %v18682_v51 = vcombine.low %v1491_v40, %v1495_v41  ;;  %v18737_v38 = vcombine.high %v1546_v31, %v1550_v32  ;;  %v1554_v40 = vld [vmem:[%s21550_s14 + $0x20c0] sm:$0xff] }
 0x2c2   : > { %12485 = vmatprep.subr.bf16.mxu0 %v18625_v52  ;;  %13130 = vmatprep.subr.bf16.mxu1 %v18627_v53  ;;  %v18689_v52 = vcombine.high %v1498_v46, %v1502_v47  ;;  %v18691_v53 = vcombine.high %v1499_v48, %v1503_v49  ;;  %v1558_v41 = vld [vmem:[%s21550_s14 + $0x20e0] sm:$0xff] }
 0x2c5   : > { %12486 = vmatpush1.bf16.msra.mxu0 %v18624_v58  ;;  %13131 = vmatpush1.bf16.msra.mxu1 %v18626_v59  ;;  %v18688_v58 = vcombine.low %v1498_v46, %v1502_v47  ;;  %v18690_v59 = vcombine.low %v1499_v48, %v1503_v49  ;;  %v18745_v46 = vcombine.high %v1554_v40, %v1558_v41  ;;  %v1562_v48 = vld [vmem:[%s21550_s14 + $0x2100] sm:$0xff] }
 0x2c6   : > { %12487 = vmatprep.subr.bf16.mxu0 %v18633_v60  ;;  %13132 = vmatprep.subr.bf16.mxu1 %v18635_v61  ;;  %v18697_v60 = vcombine.high %v1506_v54, %v1510_v55  ;;  %v18699_v61 = vcombine.high %v1507_v56, %v1511_v57  ;;  %v1566_v49 = vld [vmem:[%s21550_s14 + $0x2120] sm:$0xff] }
 0x2c9   : > { %12488 = vmatpush1.bf16.msra.mxu0 %v18632_v2  ;;  %13133 = vmatpush1.bf16.msra.mxu1 %v18634_v3  ;;  %v18696_v2 = vcombine.low %v1506_v54, %v1510_v55  ;;  %v18698_v3 = vcombine.low %v1507_v56, %v1511_v57  ;;  %v18753_v54 = vcombine.high %v1562_v48, %v1566_v49  ;;  %v1570_v56 = vld [vmem:[%s21550_s14 + $0x2140] sm:$0xff] }
 0x2ca   : > { %12489 = vmatprep.subr.bf16.mxu0 %v18641_v4  ;;  %13134 = vmatprep.subr.bf16.mxu1 %v18643_v5  ;;  %v18705_v4 = vcombine.high %v1514_v62, %v1518_v63  ;;  %v18707_v5 = vcombine.high %v1515_v0, %v1519_v1  ;;  %v1574_v57 = vld [vmem:[%s21550_s14 + $0x2160] sm:$0xff] }
 0x2cd   : > { %12490 = vmatpush1.bf16.msra.mxu0 %v18640_v10  ;;  %13135 = vmatpush1.bf16.msra.mxu1 %v18642_v11  ;;  %v18704_v10 = vcombine.low %v1514_v62, %v1518_v63  ;;  %v18706_v11 = vcombine.low %v1515_v0, %v1519_v1  ;;  %v18761_v62 = vcombine.high %v1570_v56, %v1574_v57  ;;  %v1578_v0 = vld [vmem:[%s21550_s14 + $0x2180] sm:$0xff] }
 0x2ce   : > { %12491 = vmatprep.subr.bf16.mxu0 %v18649_v12  ;;  %13136 = vmatprep.subr.bf16.mxu1 %v18651_v13  ;;  %v18713_v12 = vcombine.high %v1522_v6, %v1526_v7  ;;  %v18715_v13 = vcombine.high %v1523_v8, %v1527_v9  ;;  %v1582_v1 = vld [vmem:[%s21550_s14 + $0x21a0] sm:$0xff] }
 0x2d1   : > { %12492 = vmatpush1.bf16.msra.mxu0 %v18648_v18  ;;  %13137 = vmatpush1.bf16.msra.mxu1 %v18650_v19  ;;  %v18712_v18 = vcombine.low %v1522_v6, %v1526_v7  ;;  %v18714_v19 = vcombine.low %v1523_v8, %v1527_v9  ;;  %v18769_v6 = vcombine.high %v1578_v0, %v1582_v1  ;;  %v1586_v8 = vld [vmem:[%s21550_s14 + $0x21c0] sm:$0xff] }
 0x2d2   : > { %12493 = vmatprep.subr.bf16.mxu0 %v18657_v20  ;;  %13138 = vmatprep.subr.bf16.mxu1 %v18659_v21  ;;  %v18721_v20 = vcombine.high %v1530_v14, %v1534_v15  ;;  %v18723_v21 = vcombine.high %v1531_v16, %v1535_v17  ;;  %v1590_v9 = vld [vmem:[%s21550_s14 + $0x21e0] sm:$0xff] }
 0x2d5   : > { %12494 = vmatpush1.bf16.msra.mxu0 %v18656_v26  ;;  %13139 = vmatpush1.bf16.msra.mxu1 %v18658_v27  ;;  %v1543_v26 = vld [vmem:[%s21550_s14 + $0x2068] sm:$0xff]  ;;  %v18720_v27 = vcombine.low %v1530_v14, %v1534_v15  ;;  %v18777_v14 = vcombine.high %v1586_v8, %v1590_v9 }
 0x2d6   : > { %12495 = vmatprep.subr.bf16.mxu0 %v18665_v28  ;;  %13140 = vmatprep.subr.bf16.mxu1 %v18667_v29  ;;  %v18722_v28 = vcombine.low %v1531_v16, %v1535_v17  ;;  %v18729_v29 = vcombine.high %v1538_v22, %v1542_v23  ;;  %v18731_v30 = vcombine.high %v1539_v25, %v1543_v26  ;;  %v1594_v16 = vld [vmem:[%s21550_s14 + $0x2200] sm:$0xff] }
 0x2d7   : > { %v1598_v17 = vld [vmem:[%s21550_s14 + $0x2220] sm:$0xff] }
 0x2d9   : > { %12496 = vmatpush1.bf16.msra.mxu0 %v18664_v34  ;;  %13141 = vmatpush1.bf16.msra.mxu1 %v18666_v35  ;;  %v1547_v34 = vld [vmem:[%s21550_s14 + $0x2088] sm:$0xff] }
 0x2da   : > { %12497 = vmatprep.subr.bf16.mxu0 %v18673_v36  ;;  %13142 = vmatprep.subr.bf16.mxu1 %v18675_v37  ;;  %v1551_v35 = vld [vmem:[%s21550_s14 + $0x20a8] sm:$0xff]  ;;  %v18728_v36 = vcombine.low %v1538_v22, %v1542_v23  ;;  %v18730_v37 = vcombine.low %v1539_v25, %v1543_v26  ;;  %v18785_v22 = vcombine.high %v1594_v16, %v1598_v17  ;;  %v1606_v25 = vld [vmem:[%s21550_s14 + $0x2260] sm:$0xff] }
 0x2db   : > { %v18739_v39 = vcombine.high %v1547_v34, %v1551_v35  ;;  %v1603_v26 = vld [vmem:[%s21550_s14 + $0x2248] sm:$0xff] }
 0x2dd   : > { %12498 = vmatpush1.bf16.msra.mxu0 %v18672_v42  ;;  %13143 = vmatpush1.bf16.msra.mxu1 %v18674_v43  ;;  %v1555_v42 = vld [vmem:[%s21550_s14 + $0x20c8] sm:$0xff] }
 0x2de   : > { %12499 = vmatprep.subr.bf16.mxu0 %v18681_v44  ;;  %13144 = vmatprep.subr.bf16.mxu1 %v18683_v45  ;;  %v1559_v43 = vld [vmem:[%s21550_s14 + $0x20e8] sm:$0xff]  ;;  %v18736_v44 = vcombine.low %v1546_v31, %v1550_v32  ;;  %v18738_v45 = vcombine.low %v1547_v34, %v1551_v35  ;;  %v1610_v32 = vld [vmem:[%s21550_s14 + $0x2280] sm:$0xff] }
 0x2df   : > { %v18747_v47 = vcombine.high %v1555_v42, %v1559_v43  ;;  %v1611_v34 = vld [vmem:[%s21550_s14 + $0x2288] sm:$0xff] }
 0x2e0   : > { %v1615_v35 = vld [vmem:[%s21550_s14 + $0x22a8] sm:$0xff] }
 0x2e1   : > { %12500 = vmatpush1.bf16.msra.mxu0 %v18680_v50  ;;  %13145 = vmatpush1.bf16.msra.mxu1 %v18682_v51  ;;  %v1563_v50 = vld [vmem:[%s21550_s14 + $0x2108] sm:$0xff] }
 0x2e2   : > { %12501 = vmatprep.subr.bf16.mxu0 %v18689_v52  ;;  %13146 = vmatprep.subr.bf16.mxu1 %v18691_v53  ;;  %v1567_v51 = vld [vmem:[%s21550_s14 + $0x2128] sm:$0xff]  ;;  %v18744_v52 = vcombine.low %v1554_v40, %v1558_v41  ;;  %v18746_v53 = vcombine.low %v1555_v42, %v1559_v43  ;;  %v1618_v40 = vld [vmem:[%s21550_s14 + $0x22c0] sm:$0xff] }
 0x2e3   : > { %v18755_v55 = vcombine.high %v1563_v50, %v1567_v51  ;;  %v1622_v41 = vld [vmem:[%s21550_s14 + $0x22e0] sm:$0xff]  ;;  %v1619_v42 = vld [vmem:[%s21550_s14 + $0x22c8] sm:$0xff] }
 0x2e4   : > { %v1623_v43 = vld [vmem:[%s21550_s14 + $0x22e8] sm:$0xff] }
 0x2e5   : > { %12502 = vmatpush1.bf16.msra.mxu0 %v18688_v58  ;;  %13147 = vmatpush1.bf16.msra.mxu1 %v18690_v59  ;;  %v1571_v58 = vld [vmem:[%s21550_s14 + $0x2148] sm:$0xff] }
 0x2e6   : > { %12503 = vmatprep.subr.bf16.mxu0 %v18697_v60  ;;  %13148 = vmatprep.subr.bf16.mxu1 %v18699_v61  ;;  %v1575_v59 = vld [vmem:[%s21550_s14 + $0x2168] sm:$0xff]  ;;  %v18752_v60 = vcombine.low %v1562_v48, %v1566_v49  ;;  %v18754_v61 = vcombine.low %v1563_v50, %v1567_v51  ;;  %v1626_v48 = vld [vmem:[%s21550_s14 + $0x2300] sm:$0xff] }
 0x2e7   : > { %v18763_v63 = vcombine.high %v1571_v58, %v1575_v59  ;;  %v1630_v49 = vld [vmem:[%s21550_s14 + $0x2320] sm:$0xff]  ;;  %v1627_v50 = vld [vmem:[%s21550_s14 + $0x2308] sm:$0xff] }
 0x2e8   : > { %v1631_v51 = vld [vmem:[%s21550_s14 + $0x2328] sm:$0xff] }
 0x2e9   : > { %12504 = vmatpush1.bf16.msra.mxu0 %v18696_v2  ;;  %13149 = vmatpush1.bf16.msra.mxu1 %v18698_v3  ;;  %v1579_v2 = vld [vmem:[%s21550_s14 + $0x2188] sm:$0xff] }
 0x2ea   : > { %12505 = vmatprep.subr.bf16.mxu0 %v18705_v4  ;;  %13150 = vmatprep.subr.bf16.mxu1 %v18707_v5  ;;  %v1583_v3 = vld [vmem:[%s21550_s14 + $0x21a8] sm:$0xff]  ;;  %v18760_v4 = vcombine.low %v1570_v56, %v1574_v57  ;;  %v18762_v5 = vcombine.low %v1571_v58, %v1575_v59  ;;  %v1634_v56 = vld [vmem:[%s21550_s14 + $0x2340] sm:$0xff] }
 0x2eb   : > { %v18771_v7 = vcombine.high %v1579_v2, %v1583_v3  ;;  %v1638_v57 = vld [vmem:[%s21550_s14 + $0x2360] sm:$0xff]  ;;  %v1635_v58 = vld [vmem:[%s21550_s14 + $0x2348] sm:$0xff] }
 0x2ec   : > { %v1639_v59 = vld [vmem:[%s21550_s14 + $0x2368] sm:$0xff] }
 0x2ed   : > { %12506 = vmatpush1.bf16.msra.mxu0 %v18704_v10  ;;  %13151 = vmatpush1.bf16.msra.mxu1 %v18706_v11  ;;  %v1587_v10 = vld [vmem:[%s21550_s14 + $0x21c8] sm:$0xff] }
 0x2ee   : > { %12507 = vmatprep.subr.bf16.mxu0 %v18713_v12  ;;  %13152 = vmatprep.subr.bf16.mxu1 %v18715_v13  ;;  %v1591_v11 = vld [vmem:[%s21550_s14 + $0x21e8] sm:$0xff]  ;;  %v18768_v12 = vcombine.low %v1578_v0, %v1582_v1  ;;  %v18770_v13 = vcombine.low %v1579_v2, %v1583_v3  ;;  %v1642_v0 = vld [vmem:[%s21550_s14 + $0x2380] sm:$0xff] }
 0x2ef   : > { %v18779_v15 = vcombine.high %v1587_v10, %v1591_v11  ;;  %v1646_v1 = vld [vmem:[%s21550_s14 + $0x23a0] sm:$0xff]  ;;  %v1643_v2 = vld [vmem:[%s21550_s14 + $0x2388] sm:$0xff] }
 0x2f0   : > { %v1647_v3 = vld [vmem:[%s21550_s14 + $0x23a8] sm:$0xff] }
 0x2f1   : > { %12508 = vmatpush1.bf16.msra.mxu0 %v18712_v18  ;;  %13153 = vmatpush1.bf16.msra.mxu1 %v18714_v19  ;;  %v1595_v18 = vld [vmem:[%s21550_s14 + $0x2208] sm:$0xff] }
 0x2f2   : > { %12520 = vmatprep.subr.bf16.mxu0 %v18721_v20  ;;  %13165 = vmatprep.subr.bf16.mxu1 %v18723_v21  ;;  %v1599_v19 = vld [vmem:[%s21550_s14 + $0x2228] sm:$0xff]  ;;  %v18776_v20 = vcombine.low %v1586_v8, %v1590_v9  ;;  %v18778_v21 = vcombine.low %v1587_v10, %v1591_v11  ;;  %v1650_v8 = vld [vmem:[%s21550_s14 + $0x23c0] sm:$0xff] }
 0x2f3   : > { %v18787_v23 = vcombine.high %v1595_v18, %v1599_v19  ;;  %v1654_v9 = vld [vmem:[%s21550_s14 + $0x23e0] sm:$0xff]  ;;  %v1651_v10 = vld [vmem:[%s21550_s14 + $0x23c8] sm:$0xff] }
 0x2f4   : > { %12510 = vmatmul.mubr.bf16.vlgmr.msra.gmra.mrb[0].mxu0 %v20389_v24  ;;  %13155 = vmatmul.mubr.bf16.vlgmr.msra.gmra.mrb[0].mxu1 %v20389_v24  ;;  %v1602_v24 = vld [vmem:[%s21550_s14 + $0x2240] sm:$0xff]  ;;  %v1655_v11 = vld [vmem:[%s21550_s14 + $0x23e8] sm:$0xff] }
 0x2f5   : > { %12521 = vmatpush1.bf16.msra.mxu0 %v18720_v27  ;;  %13166 = vmatpush1.bf16.msra.mxu1 %v18722_v28  ;;  %v1607_v27 = vld [vmem:[%s21550_s14 + $0x2268] sm:$0xff]  ;;  %v18784_v28 = vcombine.low %v1594_v16, %v1598_v17  ;;  %v1658_v16 = vld [vmem:[%s21550_s14 + $0x2400] sm:$0xff] }
 0x2f6   : > { %12522 = vmatprep.subr.bf16.mxu0 %v18729_v29  ;;  %13167 = vmatprep.subr.bf16.mxu1 %v18731_v30  ;;  %v18786_v29 = vcombine.low %v1595_v18, %v1599_v19  ;;  %v18793_v30 = vcombine.high %v1602_v24, %v1606_v25  ;;  %v18795_v31 = vcombine.high %v1603_v26, %v1607_v27  ;;  %v1662_v17 = vld [vmem:[%s21550_s14 + $0x2420] sm:$0xff]  ;;  %v1659_v18 = vld [vmem:[%s21550_s14 + $0x2408] sm:$0xff] }
 0x2f7   : > { %12552 = vmatprep.mubr.bf16.mxu0 %v20390_v33  ;;  %13197 = vmatprep.mubr.bf16.mxu1 %v20390_v33  ;;  %v1614_v33 = vld [vmem:[%s21550_s14 + $0x22a0] sm:$0xff]  ;;  %v1663_v19 = vld [vmem:[%s21550_s14 + $0x2428] sm:$0xff] }
 0x2f9   : > { %12523 = vmatpush1.bf16.msra.mxu0 %v18728_v36  ;;  %13168 = vmatpush1.bf16.msra.mxu1 %v18730_v37  ;;  %v18792_v36 = vcombine.low %v1602_v24, %v1606_v25  ;;  %v18794_v37 = vcombine.low %v1603_v26, %v1607_v27  ;;  %v1666_v24 = vld [vmem:[%s21550_s14 + $0x2440] sm:$0xff]  ;;  %v1667_v27 = vld [vmem:[%s21550_s14 + $0x2448] sm:$0xff] }
 0x2fa   : > { %12524 = vmatprep.subr.bf16.mxu0 %v18737_v38  ;;  %13169 = vmatprep.subr.bf16.mxu1 %v18739_v39  ;;  %v18801_v38 = vcombine.high %v1610_v32, %v1614_v33  ;;  %v18803_v39 = vcombine.high %v1611_v34, %v1615_v35  ;;  %v1670_v25 = vld [vmem:[%s21550_s14 + $0x2460] sm:$0xff] }
 0x2fb   : > { %v20392_v26 = vld [vmem:[%s21606_s12 + $0x40] ss:$240 sps:$4 sm:$0xff]  }
 0x2fd   : > { %12525 = vmatpush1.bf16.msra.mxu0 %v18736_v44  ;;  %13170 = vmatpush1.bf16.msra.mxu1 %v18738_v45  ;;  %v18800_v44 = vcombine.low %v1610_v32, %v1614_v33  ;;  %v18802_v45 = vcombine.low %v1611_v34, %v1615_v35  ;;  %v1674_v33 = vld [vmem:[%s21550_s14 + $0x2480] sm:$0xff]  ;;  %v20393_v35 = vld [vmem:[%s21606_s12 + $0x4c] ss:$240 sps:$4 sm:$0xff]  }
 0x2fe   : > { %12526 = vmatprep.subr.bf16.mxu0 %v18745_v46  ;;  %13171 = vmatprep.subr.bf16.mxu1 %v18747_v47  ;;  %v18809_v46 = vcombine.high %v1618_v40, %v1622_v41  ;;  %v18811_v47 = vcombine.high %v1619_v42, %v1623_v43  ;;  %v1678_v34 = vld [vmem:[%s21550_s14 + $0x24a0] sm:$0xff] }
 0x301   : > { %12527 = vmatpush1.bf16.msra.mxu0 %v18744_v52  ;;  %13172 = vmatpush1.bf16.msra.mxu1 %v18746_v53  ;;  %v18808_v52 = vcombine.low %v1618_v40, %v1622_v41  ;;  %v18810_v53 = vcombine.low %v1619_v42, %v1623_v43  ;;  %v18865_v40 = vcombine.high %v1674_v33, %v1678_v34  ;;  %v1682_v42 = vld [vmem:[%s21550_s14 + $0x24c0] sm:$0xff] }
 0x302   : > { %12528 = vmatprep.subr.bf16.mxu0 %v18753_v54  ;;  %13173 = vmatprep.subr.bf16.mxu1 %v18755_v55  ;;  %v18817_v54 = vcombine.high %v1626_v48, %v1630_v49  ;;  %v18819_v55 = vcombine.high %v1627_v50, %v1631_v51  ;;  %v1686_v43 = vld [vmem:[%s21550_s14 + $0x24e0] sm:$0xff] }
 0x305   : > { %12529 = vmatpush1.bf16.msra.mxu0 %v18752_v60  ;;  %13174 = vmatpush1.bf16.msra.mxu1 %v18754_v61  ;;  %v18816_v60 = vcombine.low %v1626_v48, %v1630_v49  ;;  %v18818_v61 = vcombine.low %v1627_v50, %v1631_v51  ;;  %v18873_v48 = vcombine.high %v1682_v42, %v1686_v43  ;;  %v1690_v50 = vld [vmem:[%s21550_s14 + $0x2500] sm:$0xff] }
 0x306   : > { %12530 = vmatprep.subr.bf16.mxu0 %v18761_v62  ;;  %13175 = vmatprep.subr.bf16.mxu1 %v18763_v63  ;;  %v18825_v62 = vcombine.high %v1634_v56, %v1638_v57  ;;  %v18827_v63 = vcombine.high %v1635_v58, %v1639_v59  ;;  %v1694_v51 = vld [vmem:[%s21550_s14 + $0x2520] sm:$0xff] }
 0x309   : > { %12531 = vmatpush1.bf16.msra.mxu0 %v18760_v4  ;;  %13176 = vmatpush1.bf16.msra.mxu1 %v18762_v5  ;;  %v18824_v4 = vcombine.low %v1634_v56, %v1638_v57  ;;  %v18826_v5 = vcombine.low %v1635_v58, %v1639_v59  ;;  %v18881_v56 = vcombine.high %v1690_v50, %v1694_v51  ;;  %v1698_v58 = vld [vmem:[%s21550_s14 + $0x2540] sm:$0xff] }
 0x30a   : > { %12532 = vmatprep.subr.bf16.mxu0 %v18769_v6  ;;  %13177 = vmatprep.subr.bf16.mxu1 %v18771_v7  ;;  %v18833_v6 = vcombine.high %v1642_v0, %v1646_v1  ;;  %v18835_v7 = vcombine.high %v1643_v2, %v1647_v3  ;;  %v1702_v59 = vld [vmem:[%s21550_s14 + $0x2560] sm:$0xff] }
 0x30d   : > { %12533 = vmatpush1.bf16.msra.mxu0 %v18768_v12  ;;  %13178 = vmatpush1.bf16.msra.mxu1 %v18770_v13  ;;  %v18832_v12 = vcombine.low %v1642_v0, %v1646_v1  ;;  %v18834_v13 = vcombine.low %v1643_v2, %v1647_v3  ;;  %v18889_v0 = vcombine.high %v1698_v58, %v1702_v59  ;;  %v1706_v2 = vld [vmem:[%s21550_s14 + $0x2580] sm:$0xff] }
 0x30e   : > { %12534 = vmatprep.subr.bf16.mxu0 %v18777_v14  ;;  %13179 = vmatprep.subr.bf16.mxu1 %v18779_v15  ;;  %v18841_v14 = vcombine.high %v1650_v8, %v1654_v9  ;;  %v18843_v15 = vcombine.high %v1651_v10, %v1655_v11  ;;  %v1710_v3 = vld [vmem:[%s21550_s14 + $0x25a0] sm:$0xff] }
 0x311   : > { %12535 = vmatpush1.bf16.msra.mxu0 %v18776_v20  ;;  %13180 = vmatpush1.bf16.msra.mxu1 %v18778_v21  ;;  %v18840_v20 = vcombine.low %v1650_v8, %v1654_v9  ;;  %v18842_v21 = vcombine.low %v1651_v10, %v1655_v11  ;;  %v18897_v8 = vcombine.high %v1706_v2, %v1710_v3  ;;  %v1714_v10 = vld [vmem:[%s21550_s14 + $0x25c0] sm:$0xff] }
 0x312   : > { %12536 = vmatprep.subr.bf16.mxu0 %v18785_v22  ;;  %13181 = vmatprep.subr.bf16.mxu1 %v18787_v23  ;;  %v18849_v22 = vcombine.high %v1658_v16, %v1662_v17  ;;  %v18851_v23 = vcombine.high %v1659_v18, %v1663_v19  ;;  %v1718_v11 = vld [vmem:[%s21550_s14 + $0x25e0] sm:$0xff] }
 0x315   : > { %12537 = vmatpush1.bf16.msra.mxu0 %v18784_v28  ;;  %13182 = vmatpush1.bf16.msra.mxu1 %v18786_v29  ;;  %v1671_v28 = vld [vmem:[%s21550_s14 + $0x2468] sm:$0xff]  ;;  %v18848_v29 = vcombine.low %v1658_v16, %v1662_v17  ;;  %v18905_v16 = vcombine.high %v1714_v10, %v1718_v11 }
 0x316   : > { %12538 = vmatprep.subr.bf16.mxu0 %v18793_v30  ;;  %13183 = vmatprep.subr.bf16.mxu1 %v18795_v31  ;;  %v18850_v30 = vcombine.low %v1659_v18, %v1663_v19  ;;  %v18857_v31 = vcombine.high %v1666_v24, %v1670_v25  ;;  %v18859_v32 = vcombine.high %v1667_v27, %v1671_v28  ;;  %v1722_v18 = vld [vmem:[%s21550_s14 + $0x2600] sm:$0xff] }
 0x317   : > { %v1726_v19 = vld [vmem:[%s21550_s14 + $0x2620] sm:$0xff] }
 0x319   : > { %12539 = vmatpush1.bf16.msra.mxu0 %v18792_v36  ;;  %13184 = vmatpush1.bf16.msra.mxu1 %v18794_v37  ;;  %v1675_v36 = vld [vmem:[%s21550_s14 + $0x2488] sm:$0xff] }
 0x31a   : > { %12540 = vmatprep.subr.bf16.mxu0 %v18801_v38  ;;  %13185 = vmatprep.subr.bf16.mxu1 %v18803_v39  ;;  %v1679_v37 = vld [vmem:[%s21550_s14 + $0x24a8] sm:$0xff]  ;;  %v18856_v38 = vcombine.low %v1666_v24, %v1670_v25  ;;  %v18858_v39 = vcombine.low %v1667_v27, %v1671_v28  ;;  %v18913_v24 = vcombine.high %v1722_v18, %v1726_v19  ;;  %v1734_v27 = vld [vmem:[%s21550_s14 + $0x2660] sm:$0xff] }
 0x31b   : > { %v18867_v41 = vcombine.high %v1675_v36, %v1679_v37  ;;  %v1731_v28 = vld [vmem:[%s21550_s14 + $0x2648] sm:$0xff] }
 0x31d   : > { %12541 = vmatpush1.bf16.msra.mxu0 %v18800_v44  ;;  %13186 = vmatpush1.bf16.msra.mxu1 %v18802_v45  ;;  %v1683_v44 = vld [vmem:[%s21550_s14 + $0x24c8] sm:$0xff] }
 0x31e   : > { %12542 = vmatprep.subr.bf16.mxu0 %v18809_v46  ;;  %13187 = vmatprep.subr.bf16.mxu1 %v18811_v47  ;;  %v1687_v45 = vld [vmem:[%s21550_s14 + $0x24e8] sm:$0xff]  ;;  %v18864_v46 = vcombine.low %v1674_v33, %v1678_v34  ;;  %v18866_v47 = vcombine.low %v1675_v36, %v1679_v37  ;;  %v1738_v34 = vld [vmem:[%s21550_s14 + $0x2680] sm:$0xff] }
 0x31f   : > { %v18875_v49 = vcombine.high %v1683_v44, %v1687_v45  ;;  %v1739_v36 = vld [vmem:[%s21550_s14 + $0x2688] sm:$0xff] }
 0x320   : > { %v1743_v37 = vld [vmem:[%s21550_s14 + $0x26a8] sm:$0xff] }
 0x321   : > { %12543 = vmatpush1.bf16.msra.mxu0 %v18808_v52  ;;  %13188 = vmatpush1.bf16.msra.mxu1 %v18810_v53  ;;  %v1691_v52 = vld [vmem:[%s21550_s14 + $0x2508] sm:$0xff] }
 0x322   : > { %12544 = vmatprep.subr.bf16.mxu0 %v18817_v54  ;;  %13189 = vmatprep.subr.bf16.mxu1 %v18819_v55  ;;  %v1695_v53 = vld [vmem:[%s21550_s14 + $0x2528] sm:$0xff]  ;;  %v18872_v54 = vcombine.low %v1682_v42, %v1686_v43  ;;  %v18874_v55 = vcombine.low %v1683_v44, %v1687_v45  ;;  %v1746_v42 = vld [vmem:[%s21550_s14 + $0x26c0] sm:$0xff] }
 0x323   : > { %v18883_v57 = vcombine.high %v1691_v52, %v1695_v53  ;;  %v1750_v43 = vld [vmem:[%s21550_s14 + $0x26e0] sm:$0xff]  ;;  %v1747_v44 = vld [vmem:[%s21550_s14 + $0x26c8] sm:$0xff] }
 0x324   : > { %v1751_v45 = vld [vmem:[%s21550_s14 + $0x26e8] sm:$0xff] }
 0x325   : > { %12545 = vmatpush1.bf16.msra.mxu0 %v18816_v60  ;;  %13190 = vmatpush1.bf16.msra.mxu1 %v18818_v61  ;;  %v1699_v60 = vld [vmem:[%s21550_s14 + $0x2548] sm:$0xff] }
 0x326   : > { %12546 = vmatprep.subr.bf16.mxu0 %v18825_v62  ;;  %13191 = vmatprep.subr.bf16.mxu1 %v18827_v63  ;;  %v1703_v61 = vld [vmem:[%s21550_s14 + $0x2568] sm:$0xff]  ;;  %v18880_v62 = vcombine.low %v1690_v50, %v1694_v51  ;;  %v18882_v63 = vcombine.low %v1691_v52, %v1695_v53  ;;  %v1754_v50 = vld [vmem:[%s21550_s14 + $0x2700] sm:$0xff] }
 0x327   : > { %v18891_v1 = vcombine.high %v1699_v60, %v1703_v61  ;;  %v1758_v51 = vld [vmem:[%s21550_s14 + $0x2720] sm:$0xff]  ;;  %v1755_v52 = vld [vmem:[%s21550_s14 + $0x2708] sm:$0xff] }
 0x328   : > { %v1759_v53 = vld [vmem:[%s21550_s14 + $0x2728] sm:$0xff] }
 0x329   : > { %12547 = vmatpush1.bf16.msra.mxu0 %v18824_v4  ;;  %13192 = vmatpush1.bf16.msra.mxu1 %v18826_v5  ;;  %v1707_v4 = vld [vmem:[%s21550_s14 + $0x2588] sm:$0xff] }
 0x32a   : > { %12548 = vmatprep.subr.bf16.mxu0 %v18833_v6  ;;  %13193 = vmatprep.subr.bf16.mxu1 %v18835_v7  ;;  %v1711_v5 = vld [vmem:[%s21550_s14 + $0x25a8] sm:$0xff]  ;;  %v18888_v6 = vcombine.low %v1698_v58, %v1702_v59  ;;  %v18890_v7 = vcombine.low %v1699_v60, %v1703_v61  ;;  %v1762_v58 = vld [vmem:[%s21550_s14 + $0x2740] sm:$0xff] }
 0x32b   : > { %v18899_v9 = vcombine.high %v1707_v4, %v1711_v5  ;;  %v1766_v59 = vld [vmem:[%s21550_s14 + $0x2760] sm:$0xff]  ;;  %v1763_v60 = vld [vmem:[%s21550_s14 + $0x2748] sm:$0xff] }
 0x32c   : > { %v1767_v61 = vld [vmem:[%s21550_s14 + $0x2768] sm:$0xff] }
 0x32d   : > { %12549 = vmatpush1.bf16.msra.mxu0 %v18832_v12  ;;  %13194 = vmatpush1.bf16.msra.mxu1 %v18834_v13  ;;  %v1715_v12 = vld [vmem:[%s21550_s14 + $0x25c8] sm:$0xff] }
 0x32e   : > { %12550 = vmatprep.subr.bf16.mxu0 %v18841_v14  ;;  %13195 = vmatprep.subr.bf16.mxu1 %v18843_v15  ;;  %v1719_v13 = vld [vmem:[%s21550_s14 + $0x25e8] sm:$0xff]  ;;  %v18896_v14 = vcombine.low %v1706_v2, %v1710_v3  ;;  %v18898_v15 = vcombine.low %v1707_v4, %v1711_v5  ;;  %v1770_v2 = vld [vmem:[%s21550_s14 + $0x2780] sm:$0xff] }
 0x32f   : > { %v18907_v17 = vcombine.high %v1715_v12, %v1719_v13  ;;  %v1774_v3 = vld [vmem:[%s21550_s14 + $0x27a0] sm:$0xff]  ;;  %v1771_v4 = vld [vmem:[%s21550_s14 + $0x2788] sm:$0xff] }
 0x330   : > { %v1775_v5 = vld [vmem:[%s21550_s14 + $0x27a8] sm:$0xff] }
 0x331   : > { %12551 = vmatpush1.bf16.msra.mxu0 %v18840_v20  ;;  %13196 = vmatpush1.bf16.msra.mxu1 %v18842_v21  ;;  %v1723_v20 = vld [vmem:[%s21550_s14 + $0x2608] sm:$0xff] }
 0x332   : > { %12563 = vmatprep.subr.bf16.mxu0 %v18849_v22  ;;  %13208 = vmatprep.subr.bf16.mxu1 %v18851_v23  ;;  %v1727_v21 = vld [vmem:[%s21550_s14 + $0x2628] sm:$0xff]  ;;  %v18904_v22 = vcombine.low %v1714_v10, %v1718_v11  ;;  %v18906_v23 = vcombine.low %v1715_v12, %v1719_v13  ;;  %v1778_v10 = vld [vmem:[%s21550_s14 + $0x27c0] sm:$0xff] }
 0x333   : > { %v18915_v25 = vcombine.high %v1723_v20, %v1727_v21  ;;  %v1782_v11 = vld [vmem:[%s21550_s14 + $0x27e0] sm:$0xff]  ;;  %v1779_v12 = vld [vmem:[%s21550_s14 + $0x27c8] sm:$0xff] }
 0x334   : > { %12553 = vmatmul.mubr.bf16.vlgmr.msra.gmra.mrb[0].mxu0 %v20392_v26  ;;  %13198 = vmatmul.mubr.bf16.vlgmr.msra.gmra.mrb[0].mxu1 %v20392_v26  ;;  %v1730_v26 = vld [vmem:[%s21550_s14 + $0x2640] sm:$0xff]  ;;  %v1783_v13 = vld [vmem:[%s21550_s14 + $0x27e8] sm:$0xff] }
 0x335   : > { %12564 = vmatpush1.bf16.msra.mxu0 %v18848_v29  ;;  %13209 = vmatpush1.bf16.msra.mxu1 %v18850_v30  ;;  %v1735_v29 = vld [vmem:[%s21550_s14 + $0x2668] sm:$0xff]  ;;  %v18912_v30 = vcombine.low %v1722_v18, %v1726_v19  ;;  %v1786_v18 = vld [vmem:[%s21550_s14 + $0x2800] sm:$0xff] }
 0x336   : > { %12565 = vmatprep.subr.bf16.mxu0 %v18857_v31  ;;  %13210 = vmatprep.subr.bf16.mxu1 %v18859_v32  ;;  %v18914_v31 = vcombine.low %v1723_v20, %v1727_v21  ;;  %v18921_v32 = vcombine.high %v1730_v26, %v1734_v27  ;;  %v18923_v33 = vcombine.high %v1731_v28, %v1735_v29  ;;  %v1790_v19 = vld [vmem:[%s21550_s14 + $0x2820] sm:$0xff]  ;;  %v1787_v20 = vld [vmem:[%s21550_s14 + $0x2808] sm:$0xff] }
 0x337   : > { %12595 = vmatprep.mubr.bf16.mxu0 %v20393_v35  ;;  %13240 = vmatprep.mubr.bf16.mxu1 %v20393_v35  ;;  %v1742_v35 = vld [vmem:[%s21550_s14 + $0x26a0] sm:$0xff]  ;;  %v1791_v21 = vld [vmem:[%s21550_s14 + $0x2828] sm:$0xff] }
 0x339   : > { %12566 = vmatpush1.bf16.msra.mxu0 %v18856_v38  ;;  %13211 = vmatpush1.bf16.msra.mxu1 %v18858_v39  ;;  %v18920_v38 = vcombine.low %v1730_v26, %v1734_v27  ;;  %v18922_v39 = vcombine.low %v1731_v28, %v1735_v29  ;;  %v1794_v26 = vld [vmem:[%s21550_s14 + $0x2840] sm:$0xff]  ;;  %v20395_v28 = vld [vmem:[%s21606_s12 + $0x48] ss:$240 sps:$4 sm:$0xff]  }
 0x33a   : > { %12567 = vmatprep.subr.bf16.mxu0 %v18865_v40  ;;  %13212 = vmatprep.subr.bf16.mxu1 %v18867_v41  ;;  %v18929_v40 = vcombine.high %v1738_v34, %v1742_v35  ;;  %v18931_v41 = vcombine.high %v1739_v36, %v1743_v37  ;;  %v1798_v27 = vld [vmem:[%s21550_s14 + $0x2860] sm:$0xff]  ;;  %v1795_v29 = vld [vmem:[%s21550_s14 + $0x2848] sm:$0xff] }
 0x33d   : > { %12568 = vmatpush1.bf16.msra.mxu0 %v18864_v46  ;;  %13213 = vmatpush1.bf16.msra.mxu1 %v18866_v47  ;;  %v18928_v46 = vcombine.low %v1738_v34, %v1742_v35  ;;  %v18930_v47 = vcombine.low %v1739_v36, %v1743_v37  ;;  %v1802_v35 = vld [vmem:[%s21550_s14 + $0x2880] sm:$0xff] }
 0x33e   : > { %12569 = vmatprep.subr.bf16.mxu0 %v18873_v48  ;;  %13214 = vmatprep.subr.bf16.mxu1 %v18875_v49  ;;  %v18937_v48 = vcombine.high %v1746_v42, %v1750_v43  ;;  %v18939_v49 = vcombine.high %v1747_v44, %v1751_v45  ;;  %v1806_v36 = vld [vmem:[%s21550_s14 + $0x28a0] sm:$0xff] }
 0x33f   : > { %v20396_v37 = vld [vmem:[%s21606_s12 + $0x54] ss:$240 sps:$4 sm:$0xff]  }
 0x341   : > { %12570 = vmatpush1.bf16.msra.mxu0 %v18872_v54  ;;  %13215 = vmatpush1.bf16.msra.mxu1 %v18874_v55  ;;  %v18936_v54 = vcombine.low %v1746_v42, %v1750_v43  ;;  %v18938_v55 = vcombine.low %v1747_v44, %v1751_v45  ;;  %v18993_v42 = vcombine.high %v1802_v35, %v1806_v36  ;;  %v1810_v44 = vld [vmem:[%s21550_s14 + $0x28c0] sm:$0xff] }
 0x342   : > { %12571 = vmatprep.subr.bf16.mxu0 %v18881_v56  ;;  %13216 = vmatprep.subr.bf16.mxu1 %v18883_v57  ;;  %v18945_v56 = vcombine.high %v1754_v50, %v1758_v51  ;;  %v18947_v57 = vcombine.high %v1755_v52, %v1759_v53  ;;  %v1814_v45 = vld [vmem:[%s21550_s14 + $0x28e0] sm:$0xff] }
 0x345   : > { %12572 = vmatpush1.bf16.msra.mxu0 %v18880_v62  ;;  %13217 = vmatpush1.bf16.msra.mxu1 %v18882_v63  ;;  %v18944_v62 = vcombine.low %v1754_v50, %v1758_v51  ;;  %v18946_v63 = vcombine.low %v1755_v52, %v1759_v53  ;;  %v19001_v50 = vcombine.high %v1810_v44, %v1814_v45  ;;  %v1818_v52 = vld [vmem:[%s21550_s14 + $0x2900] sm:$0xff] }
 0x346   : > { %12573 = vmatprep.subr.bf16.mxu0 %v18889_v0  ;;  %13218 = vmatprep.subr.bf16.mxu1 %v18891_v1  ;;  %v18953_v0 = vcombine.high %v1762_v58, %v1766_v59  ;;  %v18955_v1 = vcombine.high %v1763_v60, %v1767_v61  ;;  %v1822_v53 = vld [vmem:[%s21550_s14 + $0x2920] sm:$0xff] }
 0x349   : > { %12574 = vmatpush1.bf16.msra.mxu0 %v18888_v6  ;;  %13219 = vmatpush1.bf16.msra.mxu1 %v18890_v7  ;;  %v18952_v6 = vcombine.low %v1762_v58, %v1766_v59  ;;  %v18954_v7 = vcombine.low %v1763_v60, %v1767_v61  ;;  %v19009_v58 = vcombine.high %v1818_v52, %v1822_v53  ;;  %v1826_v60 = vld [vmem:[%s21550_s14 + $0x2940] sm:$0xff] }
 0x34a   : > { %12575 = vmatprep.subr.bf16.mxu0 %v18897_v8  ;;  %13220 = vmatprep.subr.bf16.mxu1 %v18899_v9  ;;  %v18961_v8 = vcombine.high %v1770_v2, %v1774_v3  ;;  %v18963_v9 = vcombine.high %v1771_v4, %v1775_v5  ;;  %v1830_v61 = vld [vmem:[%s21550_s14 + $0x2960] sm:$0xff] }
 0x34d   : > { %12576 = vmatpush1.bf16.msra.mxu0 %v18896_v14  ;;  %13221 = vmatpush1.bf16.msra.mxu1 %v18898_v15  ;;  %v18960_v14 = vcombine.low %v1770_v2, %v1774_v3  ;;  %v18962_v15 = vcombine.low %v1771_v4, %v1775_v5  ;;  %v19017_v2 = vcombine.high %v1826_v60, %v1830_v61  ;;  %v1834_v4 = vld [vmem:[%s21550_s14 + $0x2980] sm:$0xff] }
 0x34e   : > { %12577 = vmatprep.subr.bf16.mxu0 %v18905_v16  ;;  %13222 = vmatprep.subr.bf16.mxu1 %v18907_v17  ;;  %v18969_v16 = vcombine.high %v1778_v10, %v1782_v11  ;;  %v18971_v17 = vcombine.high %v1779_v12, %v1783_v13  ;;  %v1838_v5 = vld [vmem:[%s21550_s14 + $0x29a0] sm:$0xff] }
 0x351   : > { %12578 = vmatpush1.bf16.msra.mxu0 %v18904_v22  ;;  %13223 = vmatpush1.bf16.msra.mxu1 %v18906_v23  ;;  %v18968_v22 = vcombine.low %v1778_v10, %v1782_v11  ;;  %v18970_v23 = vcombine.low %v1779_v12, %v1783_v13  ;;  %v19025_v10 = vcombine.high %v1834_v4, %v1838_v5  ;;  %v1842_v12 = vld [vmem:[%s21550_s14 + $0x29c0] sm:$0xff] }
 0x352   : > { %12579 = vmatprep.subr.bf16.mxu0 %v18913_v24  ;;  %13224 = vmatprep.subr.bf16.mxu1 %v18915_v25  ;;  %v18977_v24 = vcombine.high %v1786_v18, %v1790_v19  ;;  %v18979_v25 = vcombine.high %v1787_v20, %v1791_v21  ;;  %v1846_v13 = vld [vmem:[%s21550_s14 + $0x29e0] sm:$0xff] }
 0x355   : > { %12580 = vmatpush1.bf16.msra.mxu0 %v18912_v30  ;;  %13225 = vmatpush1.bf16.msra.mxu1 %v18914_v31  ;;  %v1799_v30 = vld [vmem:[%s21550_s14 + $0x2868] sm:$0xff]  ;;  %v18976_v31 = vcombine.low %v1786_v18, %v1790_v19  ;;  %v19033_v18 = vcombine.high %v1842_v12, %v1846_v13 }
 0x356   : > { %12581 = vmatprep.subr.bf16.mxu0 %v18921_v32  ;;  %13226 = vmatprep.subr.bf16.mxu1 %v18923_v33  ;;  %v18978_v32 = vcombine.low %v1787_v20, %v1791_v21  ;;  %v18985_v33 = vcombine.high %v1794_v26, %v1798_v27  ;;  %v18987_v34 = vcombine.high %v1795_v29, %v1799_v30  ;;  %v1850_v20 = vld [vmem:[%s21550_s14 + $0x2a00] sm:$0xff] }
 0x357   : > { %v1854_v21 = vld [vmem:[%s21550_s14 + $0x2a20] sm:$0xff] }
 0x359   : > { %12582 = vmatpush1.bf16.msra.mxu0 %v18920_v38  ;;  %13227 = vmatpush1.bf16.msra.mxu1 %v18922_v39  ;;  %v1803_v38 = vld [vmem:[%s21550_s14 + $0x2888] sm:$0xff] }
 0x35a   : > { %12583 = vmatprep.subr.bf16.mxu0 %v18929_v40  ;;  %13228 = vmatprep.subr.bf16.mxu1 %v18931_v41  ;;  %v1807_v39 = vld [vmem:[%s21550_s14 + $0x28a8] sm:$0xff]  ;;  %v18984_v40 = vcombine.low %v1794_v26, %v1798_v27  ;;  %v18986_v41 = vcombine.low %v1795_v29, %v1799_v30  ;;  %v19041_v26 = vcombine.high %v1850_v20, %v1854_v21  ;;  %v1862_v29 = vld [vmem:[%s21550_s14 + $0x2a60] sm:$0xff] }
 0x35b   : > { %v18995_v43 = vcombine.high %v1803_v38, %v1807_v39  ;;  %v1859_v30 = vld [vmem:[%s21550_s14 + $0x2a48] sm:$0xff] }
 0x35d   : > { %12584 = vmatpush1.bf16.msra.mxu0 %v18928_v46  ;;  %13229 = vmatpush1.bf16.msra.mxu1 %v18930_v47  ;;  %v1811_v46 = vld [vmem:[%s21550_s14 + $0x28c8] sm:$0xff] }
 0x35e   : > { %12585 = vmatprep.subr.bf16.mxu0 %v18937_v48  ;;  %13230 = vmatprep.subr.bf16.mxu1 %v18939_v49  ;;  %v1815_v47 = vld [vmem:[%s21550_s14 + $0x28e8] sm:$0xff]  ;;  %v18992_v48 = vcombine.low %v1802_v35, %v1806_v36  ;;  %v18994_v49 = vcombine.low %v1803_v38, %v1807_v39  ;;  %v1866_v36 = vld [vmem:[%s21550_s14 + $0x2a80] sm:$0xff] }
 0x35f   : > { %v19003_v51 = vcombine.high %v1811_v46, %v1815_v47  ;;  %v1867_v38 = vld [vmem:[%s21550_s14 + $0x2a88] sm:$0xff] }
 0x360   : > { %v1871_v39 = vld [vmem:[%s21550_s14 + $0x2aa8] sm:$0xff] }
 0x361   : > { %12586 = vmatpush1.bf16.msra.mxu0 %v18936_v54  ;;  %13231 = vmatpush1.bf16.msra.mxu1 %v18938_v55  ;;  %v1819_v54 = vld [vmem:[%s21550_s14 + $0x2908] sm:$0xff] }
 0x362   : > { %12587 = vmatprep.subr.bf16.mxu0 %v18945_v56  ;;  %13232 = vmatprep.subr.bf16.mxu1 %v18947_v57  ;;  %v1823_v55 = vld [vmem:[%s21550_s14 + $0x2928] sm:$0xff]  ;;  %v19000_v56 = vcombine.low %v1810_v44, %v1814_v45  ;;  %v19002_v57 = vcombine.low %v1811_v46, %v1815_v47  ;;  %v1874_v44 = vld [vmem:[%s21550_s14 + $0x2ac0] sm:$0xff] }
 0x363   : > { %v19011_v59 = vcombine.high %v1819_v54, %v1823_v55  ;;  %v1878_v45 = vld [vmem:[%s21550_s14 + $0x2ae0] sm:$0xff]  ;;  %v1875_v46 = vld [vmem:[%s21550_s14 + $0x2ac8] sm:$0xff] }
 0x364   : > { %v1879_v47 = vld [vmem:[%s21550_s14 + $0x2ae8] sm:$0xff] }
 0x365   : > { %12588 = vmatpush1.bf16.msra.mxu0 %v18944_v62  ;;  %13233 = vmatpush1.bf16.msra.mxu1 %v18946_v63  ;;  %v1827_v62 = vld [vmem:[%s21550_s14 + $0x2948] sm:$0xff] }
 0x366   : > { %12589 = vmatprep.subr.bf16.mxu0 %v18953_v0  ;;  %13234 = vmatprep.subr.bf16.mxu1 %v18955_v1  ;;  %v1831_v63 = vld [vmem:[%s21550_s14 + $0x2968] sm:$0xff]  ;;  %v19008_v0 = vcombine.low %v1818_v52, %v1822_v53  ;;  %v19010_v1 = vcombine.low %v1819_v54, %v1823_v55  ;;  %v1882_v52 = vld [vmem:[%s21550_s14 + $0x2b00] sm:$0xff] }
 0x367   : > { %v19019_v3 = vcombine.high %v1827_v62, %v1831_v63  ;;  %v1886_v53 = vld [vmem:[%s21550_s14 + $0x2b20] sm:$0xff]  ;;  %v1883_v54 = vld [vmem:[%s21550_s14 + $0x2b08] sm:$0xff] }
 0x368   : > { %v1887_v55 = vld [vmem:[%s21550_s14 + $0x2b28] sm:$0xff] }
 0x369   : > { %12590 = vmatpush1.bf16.msra.mxu0 %v18952_v6  ;;  %13235 = vmatpush1.bf16.msra.mxu1 %v18954_v7  ;;  %v1835_v6 = vld [vmem:[%s21550_s14 + $0x2988] sm:$0xff] }
 0x36a   : > { %12591 = vmatprep.subr.bf16.mxu0 %v18961_v8  ;;  %13236 = vmatprep.subr.bf16.mxu1 %v18963_v9  ;;  %v1839_v7 = vld [vmem:[%s21550_s14 + $0x29a8] sm:$0xff]  ;;  %v19016_v8 = vcombine.low %v1826_v60, %v1830_v61  ;;  %v19018_v9 = vcombine.low %v1827_v62, %v1831_v63  ;;  %v1890_v60 = vld [vmem:[%s21550_s14 + $0x2b40] sm:$0xff] }
 0x36b   : > { %v19027_v11 = vcombine.high %v1835_v6, %v1839_v7  ;;  %v1894_v61 = vld [vmem:[%s21550_s14 + $0x2b60] sm:$0xff]  ;;  %v1891_v62 = vld [vmem:[%s21550_s14 + $0x2b48] sm:$0xff] }
 0x36c   : > { %v1895_v63 = vld [vmem:[%s21550_s14 + $0x2b68] sm:$0xff] }
 0x36d   : > { %12592 = vmatpush1.bf16.msra.mxu0 %v18960_v14  ;;  %13237 = vmatpush1.bf16.msra.mxu1 %v18962_v15  ;;  %v1843_v14 = vld [vmem:[%s21550_s14 + $0x29c8] sm:$0xff] }
 0x36e   : > { %12593 = vmatprep.subr.bf16.mxu0 %v18969_v16  ;;  %13238 = vmatprep.subr.bf16.mxu1 %v18971_v17  ;;  %v1847_v15 = vld [vmem:[%s21550_s14 + $0x29e8] sm:$0xff]  ;;  %v19024_v16 = vcombine.low %v1834_v4, %v1838_v5  ;;  %v19026_v17 = vcombine.low %v1835_v6, %v1839_v7  ;;  %v1898_v4 = vld [vmem:[%s21550_s14 + $0x2b80] sm:$0xff] }
 0x36f   : > { %v19035_v19 = vcombine.high %v1843_v14, %v1847_v15  ;;  %v1902_v5 = vld [vmem:[%s21550_s14 + $0x2ba0] sm:$0xff]  ;;  %v1899_v6 = vld [vmem:[%s21550_s14 + $0x2b88] sm:$0xff] }
 0x370   : > { %v1903_v7 = vld [vmem:[%s21550_s14 + $0x2ba8] sm:$0xff] }
 0x371   : > { %12594 = vmatpush1.bf16.msra.mxu0 %v18968_v22  ;;  %13239 = vmatpush1.bf16.msra.mxu1 %v18970_v23  ;;  %v1851_v22 = vld [vmem:[%s21550_s14 + $0x2a08] sm:$0xff] }
 0x372   : > { %12606 = vmatprep.subr.bf16.mxu0 %v18977_v24  ;;  %13251 = vmatprep.subr.bf16.mxu1 %v18979_v25  ;;  %v1855_v23 = vld [vmem:[%s21550_s14 + $0x2a28] sm:$0xff]  ;;  %v19032_v24 = vcombine.low %v1842_v12, %v1846_v13  ;;  %v19034_v25 = vcombine.low %v1843_v14, %v1847_v15  ;;  %v1906_v12 = vld [vmem:[%s21550_s14 + $0x2bc0] sm:$0xff] }
 0x373   : > { %v19043_v27 = vcombine.high %v1851_v22, %v1855_v23  ;;  %v1910_v13 = vld [vmem:[%s21550_s14 + $0x2be0] sm:$0xff]  ;;  %v1907_v14 = vld [vmem:[%s21550_s14 + $0x2bc8] sm:$0xff] }
 0x374   : > { %12596 = vmatmul.mubr.bf16.vlgmr.msra.gmra.mrb[0].mxu0 %v20395_v28  ;;  %13241 = vmatmul.mubr.bf16.vlgmr.msra.gmra.mrb[0].mxu1 %v20395_v28  ;;  %v1858_v28 = vld [vmem:[%s21550_s14 + $0x2a40] sm:$0xff]  ;;  %v1911_v15 = vld [vmem:[%s21550_s14 + $0x2be8] sm:$0xff] }
 0x375   : > { %12607 = vmatpush1.bf16.msra.mxu0 %v18976_v31  ;;  %13252 = vmatpush1.bf16.msra.mxu1 %v18978_v32  ;;  %v1863_v31 = vld [vmem:[%s21550_s14 + $0x2a68] sm:$0xff]  ;;  %v19040_v32 = vcombine.low %v1850_v20, %v1854_v21  ;;  %v1914_v20 = vld [vmem:[%s21550_s14 + $0x2c00] sm:$0xff] }
 0x376   : > { %12608 = vmatprep.subr.bf16.mxu0 %v18985_v33  ;;  %13253 = vmatprep.subr.bf16.mxu1 %v18987_v34  ;;  %v19042_v33 = vcombine.low %v1851_v22, %v1855_v23  ;;  %v19049_v34 = vcombine.high %v1858_v28, %v1862_v29  ;;  %v19051_v35 = vcombine.high %v1859_v30, %v1863_v31  ;;  %v1918_v21 = vld [vmem:[%s21550_s14 + $0x2c20] sm:$0xff]  ;;  %v1915_v22 = vld [vmem:[%s21550_s14 + $0x2c08] sm:$0xff] }
 0x377   : > { %12638 = vmatprep.mubr.bf16.mxu0 %v20396_v37  ;;  %13283 = vmatprep.mubr.bf16.mxu1 %v20396_v37  ;;  %v1870_v37 = vld [vmem:[%s21550_s14 + $0x2aa0] sm:$0xff]  ;;  %v1919_v23 = vld [vmem:[%s21550_s14 + $0x2c28] sm:$0xff] }
 0x379   : > { %12609 = vmatpush1.bf16.msra.mxu0 %v18984_v40  ;;  %13254 = vmatpush1.bf16.msra.mxu1 %v18986_v41  ;;  %v19048_v40 = vcombine.low %v1858_v28, %v1862_v29  ;;  %v19050_v41 = vcombine.low %v1859_v30, %v1863_v31  ;;  %v1922_v28 = vld [vmem:[%s21550_s14 + $0x2c40] sm:$0xff]  ;;  %v1923_v31 = vld [vmem:[%s21550_s14 + $0x2c48] sm:$0xff] }
 0x37a   : > { %12610 = vmatprep.subr.bf16.mxu0 %v18993_v42  ;;  %13255 = vmatprep.subr.bf16.mxu1 %v18995_v43  ;;  %v19057_v42 = vcombine.high %v1866_v36, %v1870_v37  ;;  %v19059_v43 = vcombine.high %v1867_v38, %v1871_v39  ;;  %v1926_v29 = vld [vmem:[%s21550_s14 + $0x2c60] sm:$0xff] }
 0x37b   : > { %v20398_v30 = vld [vmem:[%s21606_s12 + $0x50] ss:$240 sps:$4 sm:$0xff]  }
 0x37d   : > { %12611 = vmatpush1.bf16.msra.mxu0 %v18992_v48  ;;  %13256 = vmatpush1.bf16.msra.mxu1 %v18994_v49  ;;  %v19056_v48 = vcombine.low %v1866_v36, %v1870_v37  ;;  %v19058_v49 = vcombine.low %v1867_v38, %v1871_v39  ;;  %v1930_v37 = vld [vmem:[%s21550_s14 + $0x2c80] sm:$0xff]  ;;  %v20399_v39 = vld [vmem:[%s21606_s12 + $0x5c] ss:$240 sps:$4 sm:$0xff]  }
 0x37e   : > { %12612 = vmatprep.subr.bf16.mxu0 %v19001_v50  ;;  %13257 = vmatprep.subr.bf16.mxu1 %v19003_v51  ;;  %v19065_v50 = vcombine.high %v1874_v44, %v1878_v45  ;;  %v19067_v51 = vcombine.high %v1875_v46, %v1879_v47  ;;  %v1934_v38 = vld [vmem:[%s21550_s14 + $0x2ca0] sm:$0xff] }
 0x381   : > { %12613 = vmatpush1.bf16.msra.mxu0 %v19000_v56  ;;  %13258 = vmatpush1.bf16.msra.mxu1 %v19002_v57  ;;  %v19064_v56 = vcombine.low %v1874_v44, %v1878_v45  ;;  %v19066_v57 = vcombine.low %v1875_v46, %v1879_v47  ;;  %v19121_v44 = vcombine.high %v1930_v37, %v1934_v38  ;;  %v1938_v46 = vld [vmem:[%s21550_s14 + $0x2cc0] sm:$0xff] }
 0x382   : > { %12614 = vmatprep.subr.bf16.mxu0 %v19009_v58  ;;  %13259 = vmatprep.subr.bf16.mxu1 %v19011_v59  ;;  %v19073_v58 = vcombine.high %v1882_v52, %v1886_v53  ;;  %v19075_v59 = vcombine.high %v1883_v54, %v1887_v55  ;;  %v1942_v47 = vld [vmem:[%s21550_s14 + $0x2ce0] sm:$0xff] }
 0x385   : > { %12615 = vmatpush1.bf16.msra.mxu0 %v19008_v0  ;;  %13260 = vmatpush1.bf16.msra.mxu1 %v19010_v1  ;;  %v19072_v0 = vcombine.low %v1882_v52, %v1886_v53  ;;  %v19074_v1 = vcombine.low %v1883_v54, %v1887_v55  ;;  %v19129_v52 = vcombine.high %v1938_v46, %v1942_v47  ;;  %v1946_v54 = vld [vmem:[%s21550_s14 + $0x2d00] sm:$0xff] }
 0x386   : > { %12616 = vmatprep.subr.bf16.mxu0 %v19017_v2  ;;  %13261 = vmatprep.subr.bf16.mxu1 %v19019_v3  ;;  %v19081_v2 = vcombine.high %v1890_v60, %v1894_v61  ;;  %v19083_v3 = vcombine.high %v1891_v62, %v1895_v63  ;;  %v1950_v55 = vld [vmem:[%s21550_s14 + $0x2d20] sm:$0xff] }
 0x389   : > { %12617 = vmatpush1.bf16.msra.mxu0 %v19016_v8  ;;  %13262 = vmatpush1.bf16.msra.mxu1 %v19018_v9  ;;  %v19080_v8 = vcombine.low %v1890_v60, %v1894_v61  ;;  %v19082_v9 = vcombine.low %v1891_v62, %v1895_v63  ;;  %v19137_v60 = vcombine.high %v1946_v54, %v1950_v55  ;;  %v1954_v62 = vld [vmem:[%s21550_s14 + $0x2d40] sm:$0xff] }
 0x38a   : > { %12618 = vmatprep.subr.bf16.mxu0 %v19025_v10  ;;  %13263 = vmatprep.subr.bf16.mxu1 %v19027_v11  ;;  %v19089_v10 = vcombine.high %v1898_v4, %v1902_v5  ;;  %v19091_v11 = vcombine.high %v1899_v6, %v1903_v7  ;;  %v1958_v63 = vld [vmem:[%s21550_s14 + $0x2d60] sm:$0xff] }
 0x38d   : > { %12619 = vmatpush1.bf16.msra.mxu0 %v19024_v16  ;;  %13264 = vmatpush1.bf16.msra.mxu1 %v19026_v17  ;;  %v19088_v16 = vcombine.low %v1898_v4, %v1902_v5  ;;  %v19090_v17 = vcombine.low %v1899_v6, %v1903_v7  ;;  %v19145_v4 = vcombine.high %v1954_v62, %v1958_v63  ;;  %v1962_v6 = vld [vmem:[%s21550_s14 + $0x2d80] sm:$0xff] }
 0x38e   : > { %12620 = vmatprep.subr.bf16.mxu0 %v19033_v18  ;;  %13265 = vmatprep.subr.bf16.mxu1 %v19035_v19  ;;  %v19097_v18 = vcombine.high %v1906_v12, %v1910_v13  ;;  %v19099_v19 = vcombine.high %v1907_v14, %v1911_v15  ;;  %v1966_v7 = vld [vmem:[%s21550_s14 + $0x2da0] sm:$0xff] }
 0x391   : > { %12621 = vmatpush1.bf16.msra.mxu0 %v19032_v24  ;;  %13266 = vmatpush1.bf16.msra.mxu1 %v19034_v25  ;;  %v19096_v24 = vcombine.low %v1906_v12, %v1910_v13  ;;  %v19098_v25 = vcombine.low %v1907_v14, %v1911_v15  ;;  %v19153_v12 = vcombine.high %v1962_v6, %v1966_v7  ;;  %v1970_v14 = vld [vmem:[%s21550_s14 + $0x2dc0] sm:$0xff] }
 0x392   : > { %12622 = vmatprep.subr.bf16.mxu0 %v19041_v26  ;;  %13267 = vmatprep.subr.bf16.mxu1 %v19043_v27  ;;  %v19105_v26 = vcombine.high %v1914_v20, %v1918_v21  ;;  %v19107_v27 = vcombine.high %v1915_v22, %v1919_v23  ;;  %v1974_v15 = vld [vmem:[%s21550_s14 + $0x2de0] sm:$0xff] }
 0x395   : > { %12623 = vmatpush1.bf16.msra.mxu0 %v19040_v32  ;;  %13268 = vmatpush1.bf16.msra.mxu1 %v19042_v33  ;;  %v1927_v32 = vld [vmem:[%s21550_s14 + $0x2c68] sm:$0xff]  ;;  %v19104_v33 = vcombine.low %v1914_v20, %v1918_v21  ;;  %v19161_v20 = vcombine.high %v1970_v14, %v1974_v15 }
 0x396   : > { %12624 = vmatprep.subr.bf16.mxu0 %v19049_v34  ;;  %13269 = vmatprep.subr.bf16.mxu1 %v19051_v35  ;;  %v19106_v34 = vcombine.low %v1915_v22, %v1919_v23  ;;  %v19113_v35 = vcombine.high %v1922_v28, %v1926_v29  ;;  %v19115_v36 = vcombine.high %v1923_v31, %v1927_v32  ;;  %v1978_v22 = vld [vmem:[%s21550_s14 + $0x2e00] sm:$0xff] }
 0x397   : > { %v1982_v23 = vld [vmem:[%s21550_s14 + $0x2e20] sm:$0xff] }
 0x399   : > { %12625 = vmatpush1.bf16.msra.mxu0 %v19048_v40  ;;  %13270 = vmatpush1.bf16.msra.mxu1 %v19050_v41  ;;  %v1931_v40 = vld [vmem:[%s21550_s14 + $0x2c88] sm:$0xff] }
 0x39a   : > { %12626 = vmatprep.subr.bf16.mxu0 %v19057_v42  ;;  %13271 = vmatprep.subr.bf16.mxu1 %v19059_v43  ;;  %v1935_v41 = vld [vmem:[%s21550_s14 + $0x2ca8] sm:$0xff]  ;;  %v19112_v42 = vcombine.low %v1922_v28, %v1926_v29  ;;  %v19114_v43 = vcombine.low %v1923_v31, %v1927_v32  ;;  %v19169_v28 = vcombine.high %v1978_v22, %v1982_v23  ;;  %v1990_v31 = vld [vmem:[%s21550_s14 + $0x2e60] sm:$0xff] }
 0x39b   : > { %v19123_v45 = vcombine.high %v1931_v40, %v1935_v41  ;;  %v1987_v32 = vld [vmem:[%s21550_s14 + $0x2e48] sm:$0xff] }
 0x39d   : > { %12627 = vmatpush1.bf16.msra.mxu0 %v19056_v48  ;;  %13272 = vmatpush1.bf16.msra.mxu1 %v19058_v49  ;;  %v1939_v48 = vld [vmem:[%s21550_s14 + $0x2cc8] sm:$0xff] }
 0x39e   : > { %12628 = vmatprep.subr.bf16.mxu0 %v19065_v50  ;;  %13273 = vmatprep.subr.bf16.mxu1 %v19067_v51  ;;  %v1943_v49 = vld [vmem:[%s21550_s14 + $0x2ce8] sm:$0xff]  ;;  %v19120_v50 = vcombine.low %v1930_v37, %v1934_v38  ;;  %v19122_v51 = vcombine.low %v1931_v40, %v1935_v41  ;;  %v1994_v38 = vld [vmem:[%s21550_s14 + $0x2e80] sm:$0xff] }
 0x39f   : > { %v19131_v53 = vcombine.high %v1939_v48, %v1943_v49  ;;  %v1995_v40 = vld [vmem:[%s21550_s14 + $0x2e88] sm:$0xff] }
 0x3a0   : > { %v1999_v41 = vld [vmem:[%s21550_s14 + $0x2ea8] sm:$0xff] }
 0x3a1   : > { %12629 = vmatpush1.bf16.msra.mxu0 %v19064_v56  ;;  %13274 = vmatpush1.bf16.msra.mxu1 %v19066_v57  ;;  %v1947_v56 = vld [vmem:[%s21550_s14 + $0x2d08] sm:$0xff] }
 0x3a2   : > { %12630 = vmatprep.subr.bf16.mxu0 %v19073_v58  ;;  %13275 = vmatprep.subr.bf16.mxu1 %v19075_v59  ;;  %v1951_v57 = vld [vmem:[%s21550_s14 + $0x2d28] sm:$0xff]  ;;  %v19128_v58 = vcombine.low %v1938_v46, %v1942_v47  ;;  %v19130_v59 = vcombine.low %v1939_v48, %v1943_v49  ;;  %v2002_v46 = vld [vmem:[%s21550_s14 + $0x2ec0] sm:$0xff] }
 0x3a3   : > { %v19139_v61 = vcombine.high %v1947_v56, %v1951_v57  ;;  %v2006_v47 = vld [vmem:[%s21550_s14 + $0x2ee0] sm:$0xff]  ;;  %v2003_v48 = vld [vmem:[%s21550_s14 + $0x2ec8] sm:$0xff] }
 0x3a4   : > { %v2007_v49 = vld [vmem:[%s21550_s14 + $0x2ee8] sm:$0xff] }
 0x3a5   : > { %12631 = vmatpush1.bf16.msra.mxu0 %v19072_v0  ;;  %13276 = vmatpush1.bf16.msra.mxu1 %v19074_v1  ;;  %v1955_v0 = vld [vmem:[%s21550_s14 + $0x2d48] sm:$0xff] }
 0x3a6   : > { %12632 = vmatprep.subr.bf16.mxu0 %v19081_v2  ;;  %13277 = vmatprep.subr.bf16.mxu1 %v19083_v3  ;;  %v1959_v1 = vld [vmem:[%s21550_s14 + $0x2d68] sm:$0xff]  ;;  %v19136_v2 = vcombine.low %v1946_v54, %v1950_v55  ;;  %v19138_v3 = vcombine.low %v1947_v56, %v1951_v57  ;;  %v2010_v54 = vld [vmem:[%s21550_s14 + $0x2f00] sm:$0xff] }
 0x3a7   : > { %v19147_v5 = vcombine.high %v1955_v0, %v1959_v1  ;;  %v2014_v55 = vld [vmem:[%s21550_s14 + $0x2f20] sm:$0xff]  ;;  %v2011_v56 = vld [vmem:[%s21550_s14 + $0x2f08] sm:$0xff] }
 0x3a8   : > { %v2015_v57 = vld [vmem:[%s21550_s14 + $0x2f28] sm:$0xff] }
 0x3a9   : > { %12633 = vmatpush1.bf16.msra.mxu0 %v19080_v8  ;;  %13278 = vmatpush1.bf16.msra.mxu1 %v19082_v9  ;;  %v1963_v8 = vld [vmem:[%s21550_s14 + $0x2d88] sm:$0xff] }
 0x3aa   : > { %12634 = vmatprep.subr.bf16.mxu0 %v19089_v10  ;;  %13279 = vmatprep.subr.bf16.mxu1 %v19091_v11  ;;  %v1967_v9 = vld [vmem:[%s21550_s14 + $0x2da8] sm:$0xff]  ;;  %v19144_v10 = vcombine.low %v1954_v62, %v1958_v63  ;;  %v19146_v11 = vcombine.low %v1955_v0, %v1959_v1  ;;  %v2018_v62 = vld [vmem:[%s21550_s14 + $0x2f40] sm:$0xff] }
 0x3ab   : > { %v19155_v13 = vcombine.high %v1963_v8, %v1967_v9  ;;  %v2022_v63 = vld [vmem:[%s21550_s14 + $0x2f60] sm:$0xff]  ;;  %v2019_v0 = vld [vmem:[%s21550_s14 + $0x2f48] sm:$0xff] }
 0x3ac   : > { %v2023_v1 = vld [vmem:[%s21550_s14 + $0x2f68] sm:$0xff] }
 0x3ad   : > { %12635 = vmatpush1.bf16.msra.mxu0 %v19088_v16  ;;  %13280 = vmatpush1.bf16.msra.mxu1 %v19090_v17  ;;  %v1971_v16 = vld [vmem:[%s21550_s14 + $0x2dc8] sm:$0xff] }
 0x3ae   : > { %12636 = vmatprep.subr.bf16.mxu0 %v19097_v18  ;;  %13281 = vmatprep.subr.bf16.mxu1 %v19099_v19  ;;  %v1975_v17 = vld [vmem:[%s21550_s14 + $0x2de8] sm:$0xff]  ;;  %v19152_v18 = vcombine.low %v1962_v6, %v1966_v7  ;;  %v19154_v19 = vcombine.low %v1963_v8, %v1967_v9  ;;  %v2026_v6 = vld [vmem:[%s21550_s14 + $0x2f80] sm:$0xff] }
 0x3af   : > { %v19163_v21 = vcombine.high %v1971_v16, %v1975_v17  ;;  %v2030_v7 = vld [vmem:[%s21550_s14 + $0x2fa0] sm:$0xff]  ;;  %v2027_v8 = vld [vmem:[%s21550_s14 + $0x2f88] sm:$0xff] }
 0x3b0   : > { %v2031_v9 = vld [vmem:[%s21550_s14 + $0x2fa8] sm:$0xff] }
 0x3b1   : > { %12637 = vmatpush1.bf16.msra.mxu0 %v19096_v24  ;;  %13282 = vmatpush1.bf16.msra.mxu1 %v19098_v25  ;;  %v1979_v24 = vld [vmem:[%s21550_s14 + $0x2e08] sm:$0xff] }
 0x3b2   : > { %12649 = vmatprep.subr.bf16.mxu0 %v19105_v26  ;;  %13294 = vmatprep.subr.bf16.mxu1 %v19107_v27  ;;  %v1983_v25 = vld [vmem:[%s21550_s14 + $0x2e28] sm:$0xff]  ;;  %v19160_v26 = vcombine.low %v1970_v14, %v1974_v15  ;;  %v19162_v27 = vcombine.low %v1971_v16, %v1975_v17  ;;  %v2034_v14 = vld [vmem:[%s21550_s14 + $0x2fc0] sm:$0xff] }
 0x3b3   : > { %v19171_v29 = vcombine.high %v1979_v24, %v1983_v25  ;;  %v2038_v15 = vld [vmem:[%s21550_s14 + $0x2fe0] sm:$0xff]  ;;  %v2035_v16 = vld [vmem:[%s21550_s14 + $0x2fc8] sm:$0xff] }
 0x3b4   : > { %12639 = vmatmul.mubr.bf16.vlgmr.msra.gmra.mrb[0].mxu0 %v20398_v30  ;;  %13284 = vmatmul.mubr.bf16.vlgmr.msra.gmra.mrb[0].mxu1 %v20398_v30  ;;  %v1986_v30 = vld [vmem:[%s21550_s14 + $0x2e40] sm:$0xff]  ;;  %v2039_v17 = vld [vmem:[%s21550_s14 + $0x2fe8] sm:$0xff] }
 0x3b5   : > { %12650 = vmatpush1.bf16.msra.mxu0 %v19104_v33  ;;  %13295 = vmatpush1.bf16.msra.mxu1 %v19106_v34  ;;  %v1991_v33 = vld [vmem:[%s21550_s14 + $0x2e68] sm:$0xff]  ;;  %v19168_v34 = vcombine.low %v1978_v22, %v1982_v23  ;;  %v2042_v22 = vld [vmem:[%s21550_s14 + $0x3000] sm:$0xff] }
 0x3b6   : > { %12651 = vmatprep.subr.bf16.mxu0 %v19113_v35  ;;  %13296 = vmatprep.subr.bf16.mxu1 %v19115_v36  ;;  %v19170_v35 = vcombine.low %v1979_v24, %v1983_v25  ;;  %v19177_v36 = vcombine.high %v1986_v30, %v1990_v31  ;;  %v19179_v37 = vcombine.high %v1987_v32, %v1991_v33  ;;  %v2046_v23 = vld [vmem:[%s21550_s14 + $0x3020] sm:$0xff]  ;;  %v2043_v24 = vld [vmem:[%s21550_s14 + $0x3008] sm:$0xff] }
 0x3b7   : > { %12681 = vmatprep.mubr.bf16.mxu0 %v20399_v39  ;;  %13326 = vmatprep.mubr.bf16.mxu1 %v20399_v39  ;;  %v1998_v39 = vld [vmem:[%s21550_s14 + $0x2ea0] sm:$0xff]  ;;  %v2047_v25 = vld [vmem:[%s21550_s14 + $0x3028] sm:$0xff] }
 0x3b9   : > { %12652 = vmatpush1.bf16.msra.mxu0 %v19112_v42  ;;  %13297 = vmatpush1.bf16.msra.mxu1 %v19114_v43  ;;  %v19176_v42 = vcombine.low %v1986_v30, %v1990_v31  ;;  %v19178_v43 = vcombine.low %v1987_v32, %v1991_v33  ;;  %v2050_v30 = vld [vmem:[%s21550_s14 + $0x3040] sm:$0xff]  ;;  %v20401_v32 = vld [vmem:[%s21606_s12 + $0x58] ss:$240 sps:$4 sm:$0xff]  }
 0x3ba   : > { %12653 = vmatprep.subr.bf16.mxu0 %v19121_v44  ;;  %13298 = vmatprep.subr.bf16.mxu1 %v19123_v45  ;;  %v19185_v44 = vcombine.high %v1994_v38, %v1998_v39  ;;  %v19187_v45 = vcombine.high %v1995_v40, %v1999_v41  ;;  %v2054_v31 = vld [vmem:[%s21550_s14 + $0x3060] sm:$0xff]  ;;  %v2051_v33 = vld [vmem:[%s21550_s14 + $0x3048] sm:$0xff] }
 0x3bd   : > { %12654 = vmatpush1.bf16.msra.mxu0 %v19120_v50  ;;  %13299 = vmatpush1.bf16.msra.mxu1 %v19122_v51  ;;  %v19184_v50 = vcombine.low %v1994_v38, %v1998_v39  ;;  %v19186_v51 = vcombine.low %v1995_v40, %v1999_v41  ;;  %v2058_v39 = vld [vmem:[%s21550_s14 + $0x3080] sm:$0xff] }
 0x3be   : > { %12655 = vmatprep.subr.bf16.mxu0 %v19129_v52  ;;  %13300 = vmatprep.subr.bf16.mxu1 %v19131_v53  ;;  %v19193_v52 = vcombine.high %v2002_v46, %v2006_v47  ;;  %v19195_v53 = vcombine.high %v2003_v48, %v2007_v49  ;;  %v2062_v40 = vld [vmem:[%s21550_s14 + $0x30a0] sm:$0xff] }
 0x3bf   : > { %v20402_v41 = vld [vmem:[%s21606_s12 + $0x64] ss:$240 sps:$4 sm:$0xff]  }
 0x3c1   : > { %12656 = vmatpush1.bf16.msra.mxu0 %v19128_v58  ;;  %13301 = vmatpush1.bf16.msra.mxu1 %v19130_v59  ;;  %v19192_v58 = vcombine.low %v2002_v46, %v2006_v47  ;;  %v19194_v59 = vcombine.low %v2003_v48, %v2007_v49  ;;  %v19249_v46 = vcombine.high %v2058_v39, %v2062_v40  ;;  %v2066_v48 = vld [vmem:[%s21550_s14 + $0x30c0] sm:$0xff] }
 0x3c2   : > { %12657 = vmatprep.subr.bf16.mxu0 %v19137_v60  ;;  %13302 = vmatprep.subr.bf16.mxu1 %v19139_v61  ;;  %v19201_v60 = vcombine.high %v2010_v54, %v2014_v55  ;;  %v19203_v61 = vcombine.high %v2011_v56, %v2015_v57  ;;  %v2070_v49 = vld [vmem:[%s21550_s14 + $0x30e0] sm:$0xff] }
 0x3c5   : > { %12658 = vmatpush1.bf16.msra.mxu0 %v19136_v2  ;;  %13303 = vmatpush1.bf16.msra.mxu1 %v19138_v3  ;;  %v19200_v2 = vcombine.low %v2010_v54, %v2014_v55  ;;  %v19202_v3 = vcombine.low %v2011_v56, %v2015_v57  ;;  %v19257_v54 = vcombine.high %v2066_v48, %v2070_v49  ;;  %v2074_v56 = vld [vmem:[%s21550_s14 + $0x3100] sm:$0xff] }
 0x3c6   : > { %12659 = vmatprep.subr.bf16.mxu0 %v19145_v4  ;;  %13304 = vmatprep.subr.bf16.mxu1 %v19147_v5  ;;  %v19209_v4 = vcombine.high %v2018_v62, %v2022_v63  ;;  %v19211_v5 = vcombine.high %v2019_v0, %v2023_v1  ;;  %v2078_v57 = vld [vmem:[%s21550_s14 + $0x3120] sm:$0xff] }
 0x3c9   : > { %12660 = vmatpush1.bf16.msra.mxu0 %v19144_v10  ;;  %13305 = vmatpush1.bf16.msra.mxu1 %v19146_v11  ;;  %v19208_v10 = vcombine.low %v2018_v62, %v2022_v63  ;;  %v19210_v11 = vcombine.low %v2019_v0, %v2023_v1  ;;  %v19265_v62 = vcombine.high %v2074_v56, %v2078_v57  ;;  %v2082_v0 = vld [vmem:[%s21550_s14 + $0x3140] sm:$0xff] }
 0x3ca   : > { %12661 = vmatprep.subr.bf16.mxu0 %v19153_v12  ;;  %13306 = vmatprep.subr.bf16.mxu1 %v19155_v13  ;;  %v19217_v12 = vcombine.high %v2026_v6, %v2030_v7  ;;  %v19219_v13 = vcombine.high %v2027_v8, %v2031_v9  ;;  %v2086_v1 = vld [vmem:[%s21550_s14 + $0x3160] sm:$0xff] }
 0x3cd   : > { %12662 = vmatpush1.bf16.msra.mxu0 %v19152_v18  ;;  %13307 = vmatpush1.bf16.msra.mxu1 %v19154_v19  ;;  %v19216_v18 = vcombine.low %v2026_v6, %v2030_v7  ;;  %v19218_v19 = vcombine.low %v2027_v8, %v2031_v9  ;;  %v19273_v6 = vcombine.high %v2082_v0, %v2086_v1  ;;  %v2090_v8 = vld [vmem:[%s21550_s14 + $0x3180] sm:$0xff] }
 0x3ce   : > { %12663 = vmatprep.subr.bf16.mxu0 %v19161_v20  ;;  %13308 = vmatprep.subr.bf16.mxu1 %v19163_v21  ;;  %v19225_v20 = vcombine.high %v2034_v14, %v2038_v15  ;;  %v19227_v21 = vcombine.high %v2035_v16, %v2039_v17  ;;  %v2094_v9 = vld [vmem:[%s21550_s14 + $0x31a0] sm:$0xff] }
 0x3d1   : > { %12664 = vmatpush1.bf16.msra.mxu0 %v19160_v26  ;;  %13309 = vmatpush1.bf16.msra.mxu1 %v19162_v27  ;;  %v19224_v26 = vcombine.low %v2034_v14, %v2038_v15  ;;  %v19226_v27 = vcombine.low %v2035_v16, %v2039_v17  ;;  %v19281_v14 = vcombine.high %v2090_v8, %v2094_v9  ;;  %v2098_v16 = vld [vmem:[%s21550_s14 + $0x31c0] sm:$0xff] }
 0x3d2   : > { %12665 = vmatprep.subr.bf16.mxu0 %v19169_v28  ;;  %13310 = vmatprep.subr.bf16.mxu1 %v19171_v29  ;;  %v19233_v28 = vcombine.high %v2042_v22, %v2046_v23  ;;  %v19235_v29 = vcombine.high %v2043_v24, %v2047_v25  ;;  %v2102_v17 = vld [vmem:[%s21550_s14 + $0x31e0] sm:$0xff] }
 0x3d5   : > { %12666 = vmatpush1.bf16.msra.mxu0 %v19168_v34  ;;  %13311 = vmatpush1.bf16.msra.mxu1 %v19170_v35  ;;  %v2055_v34 = vld [vmem:[%s21550_s14 + $0x3068] sm:$0xff]  ;;  %v19232_v35 = vcombine.low %v2042_v22, %v2046_v23  ;;  %v19289_v22 = vcombine.high %v2098_v16, %v2102_v17 }
 0x3d6   : > { %12667 = vmatprep.subr.bf16.mxu0 %v19177_v36  ;;  %13312 = vmatprep.subr.bf16.mxu1 %v19179_v37  ;;  %v19234_v36 = vcombine.low %v2043_v24, %v2047_v25  ;;  %v19241_v37 = vcombine.high %v2050_v30, %v2054_v31  ;;  %v19243_v38 = vcombine.high %v2051_v33, %v2055_v34  ;;  %v2106_v24 = vld [vmem:[%s21550_s14 + $0x3200] sm:$0xff] }
 0x3d7   : > { %v2110_v25 = vld [vmem:[%s21550_s14 + $0x3220] sm:$0xff] }
 0x3d9   : > { %12668 = vmatpush1.bf16.msra.mxu0 %v19176_v42  ;;  %13313 = vmatpush1.bf16.msra.mxu1 %v19178_v43  ;;  %v2059_v42 = vld [vmem:[%s21550_s14 + $0x3088] sm:$0xff] }
 0x3da   : > { %12669 = vmatprep.subr.bf16.mxu0 %v19185_v44  ;;  %13314 = vmatprep.subr.bf16.mxu1 %v19187_v45  ;;  %v2063_v43 = vld [vmem:[%s21550_s14 + $0x30a8] sm:$0xff]  ;;  %v19240_v44 = vcombine.low %v2050_v30, %v2054_v31  ;;  %v19242_v45 = vcombine.low %v2051_v33, %v2055_v34  ;;  %v19297_v30 = vcombine.high %v2106_v24, %v2110_v25  ;;  %v2118_v33 = vld [vmem:[%s21550_s14 + $0x3260] sm:$0xff] }
 0x3db   : > { %v19251_v47 = vcombine.high %v2059_v42, %v2063_v43  ;;  %v2115_v34 = vld [vmem:[%s21550_s14 + $0x3248] sm:$0xff] }
 0x3dd   : > { %12670 = vmatpush1.bf16.msra.mxu0 %v19184_v50  ;;  %13315 = vmatpush1.bf16.msra.mxu1 %v19186_v51  ;;  %v2067_v50 = vld [vmem:[%s21550_s14 + $0x30c8] sm:$0xff] }
 0x3de   : > { %12671 = vmatprep.subr.bf16.mxu0 %v19193_v52  ;;  %13316 = vmatprep.subr.bf16.mxu1 %v19195_v53  ;;  %v2071_v51 = vld [vmem:[%s21550_s14 + $0x30e8] sm:$0xff]  ;;  %v19248_v52 = vcombine.low %v2058_v39, %v2062_v40  ;;  %v19250_v53 = vcombine.low %v2059_v42, %v2063_v43  ;;  %v2122_v40 = vld [vmem:[%s21550_s14 + $0x3280] sm:$0xff] }
 0x3df   : > { %v19259_v55 = vcombine.high %v2067_v50, %v2071_v51  ;;  %v2123_v42 = vld [vmem:[%s21550_s14 + $0x3288] sm:$0xff] }
 0x3e0   : > { %v2127_v43 = vld [vmem:[%s21550_s14 + $0x32a8] sm:$0xff] }
 0x3e1   : > { %12672 = vmatpush1.bf16.msra.mxu0 %v19192_v58  ;;  %13317 = vmatpush1.bf16.msra.mxu1 %v19194_v59  ;;  %v2075_v58 = vld [vmem:[%s21550_s14 + $0x3108] sm:$0xff] }
 0x3e2   : > { %12673 = vmatprep.subr.bf16.mxu0 %v19201_v60  ;;  %13318 = vmatprep.subr.bf16.mxu1 %v19203_v61  ;;  %v2079_v59 = vld [vmem:[%s21550_s14 + $0x3128] sm:$0xff]  ;;  %v19256_v60 = vcombine.low %v2066_v48, %v2070_v49  ;;  %v19258_v61 = vcombine.low %v2067_v50, %v2071_v51  ;;  %v2130_v48 = vld [vmem:[%s21550_s14 + $0x32c0] sm:$0xff] }
 0x3e3   : > { %v19267_v63 = vcombine.high %v2075_v58, %v2079_v59  ;;  %v2134_v49 = vld [vmem:[%s21550_s14 + $0x32e0] sm:$0xff]  ;;  %v2131_v50 = vld [vmem:[%s21550_s14 + $0x32c8] sm:$0xff] }
 0x3e4   : > { %v2135_v51 = vld [vmem:[%s21550_s14 + $0x32e8] sm:$0xff] }
 0x3e5   : > { %12674 = vmatpush1.bf16.msra.mxu0 %v19200_v2  ;;  %13319 = vmatpush1.bf16.msra.mxu1 %v19202_v3  ;;  %v2083_v2 = vld [vmem:[%s21550_s14 + $0x3148] sm:$0xff] }
 0x3e6   : > { %12675 = vmatprep.subr.bf16.mxu0 %v19209_v4  ;;  %13320 = vmatprep.subr.bf16.mxu1 %v19211_v5  ;;  %v2087_v3 = vld [vmem:[%s21550_s14 + $0x3168] sm:$0xff]  ;;  %v19264_v4 = vcombine.low %v2074_v56, %v2078_v57  ;;  %v19266_v5 = vcombine.low %v2075_v58, %v2079_v59  ;;  %v2138_v56 = vld [vmem:[%s21550_s14 + $0x3300] sm:$0xff] }
 0x3e7   : > { %v19275_v7 = vcombine.high %v2083_v2, %v2087_v3  ;;  %v2142_v57 = vld [vmem:[%s21550_s14 + $0x3320] sm:$0xff]  ;;  %v2139_v58 = vld [vmem:[%s21550_s14 + $0x3308] sm:$0xff] }
 0x3e8   : > { %v2143_v59 = vld [vmem:[%s21550_s14 + $0x3328] sm:$0xff] }
 0x3e9   : > { %12676 = vmatpush1.bf16.msra.mxu0 %v19208_v10  ;;  %13321 = vmatpush1.bf16.msra.mxu1 %v19210_v11  ;;  %v2091_v10 = vld [vmem:[%s21550_s14 + $0x3188] sm:$0xff] }
 0x3ea   : > { %12677 = vmatprep.subr.bf16.mxu0 %v19217_v12  ;;  %13322 = vmatprep.subr.bf16.mxu1 %v19219_v13  ;;  %v2095_v11 = vld [vmem:[%s21550_s14 + $0x31a8] sm:$0xff]  ;;  %v19272_v12 = vcombine.low %v2082_v0, %v2086_v1  ;;  %v19274_v13 = vcombine.low %v2083_v2, %v2087_v3  ;;  %v2146_v0 = vld [vmem:[%s21550_s14 + $0x3340] sm:$0xff] }
 0x3eb   : > { %v19283_v15 = vcombine.high %v2091_v10, %v2095_v11  ;;  %v2150_v1 = vld [vmem:[%s21550_s14 + $0x3360] sm:$0xff]  ;;  %v2147_v2 = vld [vmem:[%s21550_s14 + $0x3348] sm:$0xff] }
 0x3ec   : > { %v2151_v3 = vld [vmem:[%s21550_s14 + $0x3368] sm:$0xff] }
 0x3ed   : > { %12678 = vmatpush1.bf16.msra.mxu0 %v19216_v18  ;;  %13323 = vmatpush1.bf16.msra.mxu1 %v19218_v19  ;;  %v2099_v18 = vld [vmem:[%s21550_s14 + $0x31c8] sm:$0xff] }
 0x3ee   : > { %12679 = vmatprep.subr.bf16.mxu0 %v19225_v20  ;;  %13324 = vmatprep.subr.bf16.mxu1 %v19227_v21  ;;  %v2103_v19 = vld [vmem:[%s21550_s14 + $0x31e8] sm:$0xff]  ;;  %v19280_v20 = vcombine.low %v2090_v8, %v2094_v9  ;;  %v19282_v21 = vcombine.low %v2091_v10, %v2095_v11  ;;  %v2154_v8 = vld [vmem:[%s21550_s14 + $0x3380] sm:$0xff] }
 0x3ef   : > { %v19291_v23 = vcombine.high %v2099_v18, %v2103_v19  ;;  %v2158_v9 = vld [vmem:[%s21550_s14 + $0x33a0] sm:$0xff]  ;;  %v2155_v10 = vld [vmem:[%s21550_s14 + $0x3388] sm:$0xff] }
 0x3f0   : > { %v2159_v11 = vld [vmem:[%s21550_s14 + $0x33a8] sm:$0xff] }
 0x3f1   : > { %12680 = vmatpush1.bf16.msra.mxu0 %v19224_v26  ;;  %13325 = vmatpush1.bf16.msra.mxu1 %v19226_v27  ;;  %v2107_v26 = vld [vmem:[%s21550_s14 + $0x3208] sm:$0xff] }
 0x3f2   : > { %12692 = vmatprep.subr.bf16.mxu0 %v19233_v28  ;;  %13337 = vmatprep.subr.bf16.mxu1 %v19235_v29  ;;  %v2111_v27 = vld [vmem:[%s21550_s14 + $0x3228] sm:$0xff]  ;;  %v19288_v28 = vcombine.low %v2098_v16, %v2102_v17  ;;  %v19290_v29 = vcombine.low %v2099_v18, %v2103_v19  ;;  %v2162_v16 = vld [vmem:[%s21550_s14 + $0x33c0] sm:$0xff] }
 0x3f3   : > { %v19299_v31 = vcombine.high %v2107_v26, %v2111_v27  ;;  %v2166_v17 = vld [vmem:[%s21550_s14 + $0x33e0] sm:$0xff]  ;;  %v2163_v18 = vld [vmem:[%s21550_s14 + $0x33c8] sm:$0xff] }
 0x3f4   : > { %12682 = vmatmul.mubr.bf16.vlgmr.msra.gmra.mrb[0].mxu0 %v20401_v32  ;;  %13327 = vmatmul.mubr.bf16.vlgmr.msra.gmra.mrb[0].mxu1 %v20401_v32  ;;  %v2114_v32 = vld [vmem:[%s21550_s14 + $0x3240] sm:$0xff]  ;;  %v2167_v19 = vld [vmem:[%s21550_s14 + $0x33e8] sm:$0xff] }
 0x3f5   : > { %12693 = vmatpush1.bf16.msra.mxu0 %v19232_v35  ;;  %13338 = vmatpush1.bf16.msra.mxu1 %v19234_v36  ;;  %v2119_v35 = vld [vmem:[%s21550_s14 + $0x3268] sm:$0xff]  ;;  %v19296_v36 = vcombine.low %v2106_v24, %v2110_v25  ;;  %v2170_v24 = vld [vmem:[%s21550_s14 + $0x3400] sm:$0xff] }
 0x3f6   : > { %12694 = vmatprep.subr.bf16.mxu0 %v19241_v37  ;;  %13339 = vmatprep.subr.bf16.mxu1 %v19243_v38  ;;  %v19298_v37 = vcombine.low %v2107_v26, %v2111_v27  ;;  %v19305_v38 = vcombine.high %v2114_v32, %v2118_v33  ;;  %v19307_v39 = vcombine.high %v2115_v34, %v2119_v35  ;;  %v2174_v25 = vld [vmem:[%s21550_s14 + $0x3420] sm:$0xff]  ;;  %v2171_v26 = vld [vmem:[%s21550_s14 + $0x3408] sm:$0xff] }
 0x3f7   : > { %12724 = vmatprep.mubr.bf16.mxu0 %v20402_v41  ;;  %13369 = vmatprep.mubr.bf16.mxu1 %v20402_v41  ;;  %v2126_v41 = vld [vmem:[%s21550_s14 + $0x32a0] sm:$0xff]  ;;  %v2175_v27 = vld [vmem:[%s21550_s14 + $0x3428] sm:$0xff] }
 0x3f9   : > { %12695 = vmatpush1.bf16.msra.mxu0 %v19240_v44  ;;  %13340 = vmatpush1.bf16.msra.mxu1 %v19242_v45  ;;  %v19304_v44 = vcombine.low %v2114_v32, %v2118_v33  ;;  %v19306_v45 = vcombine.low %v2115_v34, %v2119_v35  ;;  %v2178_v32 = vld [vmem:[%s21550_s14 + $0x3440] sm:$0xff]  ;;  %v2179_v35 = vld [vmem:[%s21550_s14 + $0x3448] sm:$0xff] }
 0x3fa   : > { %12696 = vmatprep.subr.bf16.mxu0 %v19249_v46  ;;  %13341 = vmatprep.subr.bf16.mxu1 %v19251_v47  ;;  %v19313_v46 = vcombine.high %v2122_v40, %v2126_v41  ;;  %v19315_v47 = vcombine.high %v2123_v42, %v2127_v43  ;;  %v2182_v33 = vld [vmem:[%s21550_s14 + $0x3460] sm:$0xff] }
 0x3fb   : > { %v20404_v34 = vld [vmem:[%s21606_s12 + $0x60] ss:$240 sps:$4 sm:$0xff]  }
 0x3fd   : > { %12697 = vmatpush1.bf16.msra.mxu0 %v19248_v52  ;;  %13342 = vmatpush1.bf16.msra.mxu1 %v19250_v53  ;;  %v19312_v52 = vcombine.low %v2122_v40, %v2126_v41  ;;  %v19314_v53 = vcombine.low %v2123_v42, %v2127_v43  ;;  %v2186_v41 = vld [vmem:[%s21550_s14 + $0x3480] sm:$0xff]  ;;  %v20405_v43 = vld [vmem:[%s21606_s12 + $0x6c] ss:$240 sps:$4 sm:$0xff]  }
 0x3fe   : > { %12698 = vmatprep.subr.bf16.mxu0 %v19257_v54  ;;  %13343 = vmatprep.subr.bf16.mxu1 %v19259_v55  ;;  %v19321_v54 = vcombine.high %v2130_v48, %v2134_v49  ;;  %v19323_v55 = vcombine.high %v2131_v50, %v2135_v51  ;;  %v2190_v42 = vld [vmem:[%s21550_s14 + $0x34a0] sm:$0xff] }
 0x401   : > { %12699 = vmatpush1.bf16.msra.mxu0 %v19256_v60  ;;  %13344 = vmatpush1.bf16.msra.mxu1 %v19258_v61  ;;  %v19320_v60 = vcombine.low %v2130_v48, %v2134_v49  ;;  %v19322_v61 = vcombine.low %v2131_v50, %v2135_v51  ;;  %v19377_v48 = vcombine.high %v2186_v41, %v2190_v42  ;;  %v2194_v50 = vld [vmem:[%s21550_s14 + $0x34c0] sm:$0xff] }
 0x402   : > { %12700 = vmatprep.subr.bf16.mxu0 %v19265_v62  ;;  %13345 = vmatprep.subr.bf16.mxu1 %v19267_v63  ;;  %v19329_v62 = vcombine.high %v2138_v56, %v2142_v57  ;;  %v19331_v63 = vcombine.high %v2139_v58, %v2143_v59  ;;  %v2198_v51 = vld [vmem:[%s21550_s14 + $0x34e0] sm:$0xff] }
 0x405   : > { %12701 = vmatpush1.bf16.msra.mxu0 %v19264_v4  ;;  %13346 = vmatpush1.bf16.msra.mxu1 %v19266_v5  ;;  %v19328_v4 = vcombine.low %v2138_v56, %v2142_v57  ;;  %v19330_v5 = vcombine.low %v2139_v58, %v2143_v59  ;;  %v19385_v56 = vcombine.high %v2194_v50, %v2198_v51  ;;  %v2202_v58 = vld [vmem:[%s21550_s14 + $0x3500] sm:$0xff] }
 0x406   : > { %12702 = vmatprep.subr.bf16.mxu0 %v19273_v6  ;;  %13347 = vmatprep.subr.bf16.mxu1 %v19275_v7  ;;  %v19337_v6 = vcombine.high %v2146_v0, %v2150_v1  ;;  %v19339_v7 = vcombine.high %v2147_v2, %v2151_v3  ;;  %v2206_v59 = vld [vmem:[%s21550_s14 + $0x3520] sm:$0xff] }
 0x409   : > { %12703 = vmatpush1.bf16.msra.mxu0 %v19272_v12  ;;  %13348 = vmatpush1.bf16.msra.mxu1 %v19274_v13  ;;  %v19336_v12 = vcombine.low %v2146_v0, %v2150_v1  ;;  %v19338_v13 = vcombine.low %v2147_v2, %v2151_v3  ;;  %v19393_v0 = vcombine.high %v2202_v58, %v2206_v59  ;;  %v2210_v2 = vld [vmem:[%s21550_s14 + $0x3540] sm:$0xff] }
 0x40a   : > { %12704 = vmatprep.subr.bf16.mxu0 %v19281_v14  ;;  %13349 = vmatprep.subr.bf16.mxu1 %v19283_v15  ;;  %v19345_v14 = vcombine.high %v2154_v8, %v2158_v9  ;;  %v19347_v15 = vcombine.high %v2155_v10, %v2159_v11  ;;  %v2214_v3 = vld [vmem:[%s21550_s14 + $0x3560] sm:$0xff] }
 0x40d   : > { %12705 = vmatpush1.bf16.msra.mxu0 %v19280_v20  ;;  %13350 = vmatpush1.bf16.msra.mxu1 %v19282_v21  ;;  %v19344_v20 = vcombine.low %v2154_v8, %v2158_v9  ;;  %v19346_v21 = vcombine.low %v2155_v10, %v2159_v11  ;;  %v19401_v8 = vcombine.high %v2210_v2, %v2214_v3  ;;  %v2218_v10 = vld [vmem:[%s21550_s14 + $0x3580] sm:$0xff] }
 0x40e   : > { %12706 = vmatprep.subr.bf16.mxu0 %v19289_v22  ;;  %13351 = vmatprep.subr.bf16.mxu1 %v19291_v23  ;;  %v19353_v22 = vcombine.high %v2162_v16, %v2166_v17  ;;  %v19355_v23 = vcombine.high %v2163_v18, %v2167_v19  ;;  %v2222_v11 = vld [vmem:[%s21550_s14 + $0x35a0] sm:$0xff] }
 0x411   : > { %12707 = vmatpush1.bf16.msra.mxu0 %v19288_v28  ;;  %13352 = vmatpush1.bf16.msra.mxu1 %v19290_v29  ;;  %v19352_v28 = vcombine.low %v2162_v16, %v2166_v17  ;;  %v19354_v29 = vcombine.low %v2163_v18, %v2167_v19  ;;  %v19409_v16 = vcombine.high %v2218_v10, %v2222_v11  ;;  %v2226_v18 = vld [vmem:[%s21550_s14 + $0x35c0] sm:$0xff] }
 0x412   : > { %12708 = vmatprep.subr.bf16.mxu0 %v19297_v30  ;;  %13353 = vmatprep.subr.bf16.mxu1 %v19299_v31  ;;  %v19361_v30 = vcombine.high %v2170_v24, %v2174_v25  ;;  %v19363_v31 = vcombine.high %v2171_v26, %v2175_v27  ;;  %v2230_v19 = vld [vmem:[%s21550_s14 + $0x35e0] sm:$0xff] }
 0x415   : > { %12709 = vmatpush1.bf16.msra.mxu0 %v19296_v36  ;;  %13354 = vmatpush1.bf16.msra.mxu1 %v19298_v37  ;;  %v2183_v36 = vld [vmem:[%s21550_s14 + $0x3468] sm:$0xff]  ;;  %v19360_v37 = vcombine.low %v2170_v24, %v2174_v25  ;;  %v19417_v24 = vcombine.high %v2226_v18, %v2230_v19 }
 0x416   : > { %12710 = vmatprep.subr.bf16.mxu0 %v19305_v38  ;;  %13355 = vmatprep.subr.bf16.mxu1 %v19307_v39  ;;  %v19362_v38 = vcombine.low %v2171_v26, %v2175_v27  ;;  %v19369_v39 = vcombine.high %v2178_v32, %v2182_v33  ;;  %v19371_v40 = vcombine.high %v2179_v35, %v2183_v36  ;;  %v2234_v26 = vld [vmem:[%s21550_s14 + $0x3600] sm:$0xff] }
 0x417   : > { %v2238_v27 = vld [vmem:[%s21550_s14 + $0x3620] sm:$0xff] }
 0x419   : > { %12711 = vmatpush1.bf16.msra.mxu0 %v19304_v44  ;;  %13356 = vmatpush1.bf16.msra.mxu1 %v19306_v45  ;;  %v2187_v44 = vld [vmem:[%s21550_s14 + $0x3488] sm:$0xff] }
 0x41a   : > { %12712 = vmatprep.subr.bf16.mxu0 %v19313_v46  ;;  %13357 = vmatprep.subr.bf16.mxu1 %v19315_v47  ;;  %v2191_v45 = vld [vmem:[%s21550_s14 + $0x34a8] sm:$0xff]  ;;  %v19368_v46 = vcombine.low %v2178_v32, %v2182_v33  ;;  %v19370_v47 = vcombine.low %v2179_v35, %v2183_v36  ;;  %v19425_v32 = vcombine.high %v2234_v26, %v2238_v27  ;;  %v2246_v35 = vld [vmem:[%s21550_s14 + $0x3660] sm:$0xff] }
 0x41b   : > { %v19379_v49 = vcombine.high %v2187_v44, %v2191_v45  ;;  %v2243_v36 = vld [vmem:[%s21550_s14 + $0x3648] sm:$0xff] }
 0x41d   : > { %12713 = vmatpush1.bf16.msra.mxu0 %v19312_v52  ;;  %13358 = vmatpush1.bf16.msra.mxu1 %v19314_v53  ;;  %v2195_v52 = vld [vmem:[%s21550_s14 + $0x34c8] sm:$0xff] }
 0x41e   : > { %12714 = vmatprep.subr.bf16.mxu0 %v19321_v54  ;;  %13359 = vmatprep.subr.bf16.mxu1 %v19323_v55  ;;  %v2199_v53 = vld [vmem:[%s21550_s14 + $0x34e8] sm:$0xff]  ;;  %v19376_v54 = vcombine.low %v2186_v41, %v2190_v42  ;;  %v19378_v55 = vcombine.low %v2187_v44, %v2191_v45  ;;  %v2250_v42 = vld [vmem:[%s21550_s14 + $0x3680] sm:$0xff] }
 0x41f   : > { %v19387_v57 = vcombine.high %v2195_v52, %v2199_v53  ;;  %v2251_v44 = vld [vmem:[%s21550_s14 + $0x3688] sm:$0xff] }
 0x420   : > { %v2255_v45 = vld [vmem:[%s21550_s14 + $0x36a8] sm:$0xff] }
 0x421   : > { %12715 = vmatpush1.bf16.msra.mxu0 %v19320_v60  ;;  %13360 = vmatpush1.bf16.msra.mxu1 %v19322_v61  ;;  %v2203_v60 = vld [vmem:[%s21550_s14 + $0x3508] sm:$0xff] }
 0x422   : > { %12716 = vmatprep.subr.bf16.mxu0 %v19329_v62  ;;  %13361 = vmatprep.subr.bf16.mxu1 %v19331_v63  ;;  %v2207_v61 = vld [vmem:[%s21550_s14 + $0x3528] sm:$0xff]  ;;  %v19384_v62 = vcombine.low %v2194_v50, %v2198_v51  ;;  %v19386_v63 = vcombine.low %v2195_v52, %v2199_v53  ;;  %v2258_v50 = vld [vmem:[%s21550_s14 + $0x36c0] sm:$0xff] }
 0x423   : > { %v19395_v1 = vcombine.high %v2203_v60, %v2207_v61  ;;  %v2262_v51 = vld [vmem:[%s21550_s14 + $0x36e0] sm:$0xff]  ;;  %v2259_v52 = vld [vmem:[%s21550_s14 + $0x36c8] sm:$0xff] }
 0x424   : > { %v2263_v53 = vld [vmem:[%s21550_s14 + $0x36e8] sm:$0xff] }
 0x425   : > { %12717 = vmatpush1.bf16.msra.mxu0 %v19328_v4  ;;  %13362 = vmatpush1.bf16.msra.mxu1 %v19330_v5  ;;  %v2211_v4 = vld [vmem:[%s21550_s14 + $0x3548] sm:$0xff] }
 0x426   : > { %12718 = vmatprep.subr.bf16.mxu0 %v19337_v6  ;;  %13363 = vmatprep.subr.bf16.mxu1 %v19339_v7  ;;  %v2215_v5 = vld [vmem:[%s21550_s14 + $0x3568] sm:$0xff]  ;;  %v19392_v6 = vcombine.low %v2202_v58, %v2206_v59  ;;  %v19394_v7 = vcombine.low %v2203_v60, %v2207_v61  ;;  %v2266_v58 = vld [vmem:[%s21550_s14 + $0x3700] sm:$0xff] }
 0x427   : > { %v19403_v9 = vcombine.high %v2211_v4, %v2215_v5  ;;  %v2270_v59 = vld [vmem:[%s21550_s14 + $0x3720] sm:$0xff]  ;;  %v2267_v60 = vld [vmem:[%s21550_s14 + $0x3708] sm:$0xff] }
 0x428   : > { %v2271_v61 = vld [vmem:[%s21550_s14 + $0x3728] sm:$0xff] }
 0x429   : > { %12719 = vmatpush1.bf16.msra.mxu0 %v19336_v12  ;;  %13364 = vmatpush1.bf16.msra.mxu1 %v19338_v13  ;;  %v2219_v12 = vld [vmem:[%s21550_s14 + $0x3588] sm:$0xff] }
 0x42a   : > { %12720 = vmatprep.subr.bf16.mxu0 %v19345_v14  ;;  %13365 = vmatprep.subr.bf16.mxu1 %v19347_v15  ;;  %v2223_v13 = vld [vmem:[%s21550_s14 + $0x35a8] sm:$0xff]  ;;  %v19400_v14 = vcombine.low %v2210_v2, %v2214_v3  ;;  %v19402_v15 = vcombine.low %v2211_v4, %v2215_v5  ;;  %v2274_v2 = vld [vmem:[%s21550_s14 + $0x3740] sm:$0xff] }
 0x42b   : > { %v19411_v17 = vcombine.high %v2219_v12, %v2223_v13  ;;  %v2278_v3 = vld [vmem:[%s21550_s14 + $0x3760] sm:$0xff]  ;;  %v2275_v4 = vld [vmem:[%s21550_s14 + $0x3748] sm:$0xff] }
 0x42c   : > { %v2279_v5 = vld [vmem:[%s21550_s14 + $0x3768] sm:$0xff] }
 0x42d   : > { %12721 = vmatpush1.bf16.msra.mxu0 %v19344_v20  ;;  %13366 = vmatpush1.bf16.msra.mxu1 %v19346_v21  ;;  %v2227_v20 = vld [vmem:[%s21550_s14 + $0x35c8] sm:$0xff] }
 0x42e   : > { %12722 = vmatprep.subr.bf16.mxu0 %v19353_v22  ;;  %13367 = vmatprep.subr.bf16.mxu1 %v19355_v23  ;;  %v2231_v21 = vld [vmem:[%s21550_s14 + $0x35e8] sm:$0xff]  ;;  %v19408_v22 = vcombine.low %v2218_v10, %v2222_v11  ;;  %v19410_v23 = vcombine.low %v2219_v12, %v2223_v13  ;;  %v2282_v10 = vld [vmem:[%s21550_s14 + $0x3780] sm:$0xff] }
 0x42f   : > { %v19419_v25 = vcombine.high %v2227_v20, %v2231_v21  ;;  %v2286_v11 = vld [vmem:[%s21550_s14 + $0x37a0] sm:$0xff]  ;;  %v2283_v12 = vld [vmem:[%s21550_s14 + $0x3788] sm:$0xff] }
 0x430   : > { %v2287_v13 = vld [vmem:[%s21550_s14 + $0x37a8] sm:$0xff] }
 0x431   : > { %12723 = vmatpush1.bf16.msra.mxu0 %v19352_v28  ;;  %13368 = vmatpush1.bf16.msra.mxu1 %v19354_v29  ;;  %v2235_v28 = vld [vmem:[%s21550_s14 + $0x3608] sm:$0xff] }
 0x432   : > { %12735 = vmatprep.subr.bf16.mxu0 %v19361_v30  ;;  %13380 = vmatprep.subr.bf16.mxu1 %v19363_v31  ;;  %v2239_v29 = vld [vmem:[%s21550_s14 + $0x3628] sm:$0xff]  ;;  %v19416_v30 = vcombine.low %v2226_v18, %v2230_v19  ;;  %v19418_v31 = vcombine.low %v2227_v20, %v2231_v21  ;;  %v2290_v18 = vld [vmem:[%s21550_s14 + $0x37c0] sm:$0xff] }
 0x433   : > { %v19427_v33 = vcombine.high %v2235_v28, %v2239_v29  ;;  %v2294_v19 = vld [vmem:[%s21550_s14 + $0x37e0] sm:$0xff]  ;;  %v2291_v20 = vld [vmem:[%s21550_s14 + $0x37c8] sm:$0xff] }
 0x434   : > { %12725 = vmatmul.mubr.bf16.vlgmr.msra.gmra.mrb[0].mxu0 %v20404_v34  ;;  %13370 = vmatmul.mubr.bf16.vlgmr.msra.gmra.mrb[0].mxu1 %v20404_v34  ;;  %v2242_v34 = vld [vmem:[%s21550_s14 + $0x3640] sm:$0xff]  ;;  %v2295_v21 = vld [vmem:[%s21550_s14 + $0x37e8] sm:$0xff] }
 0x435   : > { %12736 = vmatpush1.bf16.msra.mxu0 %v19360_v37  ;;  %13381 = vmatpush1.bf16.msra.mxu1 %v19362_v38  ;;  %v2247_v37 = vld [vmem:[%s21550_s14 + $0x3668] sm:$0xff]  ;;  %v19424_v38 = vcombine.low %v2234_v26, %v2238_v27  ;;  %v2298_v26 = vld [vmem:[%s21550_s14 + $0x3800] sm:$0xff] }
 0x436   : > { %12737 = vmatprep.subr.bf16.mxu0 %v19369_v39  ;;  %13382 = vmatprep.subr.bf16.mxu1 %v19371_v40  ;;  %v19426_v39 = vcombine.low %v2235_v28, %v2239_v29  ;;  %v19433_v40 = vcombine.high %v2242_v34, %v2246_v35  ;;  %v19435_v41 = vcombine.high %v2243_v36, %v2247_v37  ;;  %v2302_v27 = vld [vmem:[%s21550_s14 + $0x3820] sm:$0xff]  ;;  %v2299_v28 = vld [vmem:[%s21550_s14 + $0x3808] sm:$0xff] }
 0x437   : > { %12767 = vmatprep.mubr.bf16.mxu0 %v20405_v43  ;;  %13412 = vmatprep.mubr.bf16.mxu1 %v20405_v43  ;;  %v2254_v43 = vld [vmem:[%s21550_s14 + $0x36a0] sm:$0xff]  ;;  %v2303_v29 = vld [vmem:[%s21550_s14 + $0x3828] sm:$0xff] }
 0x439   : > { %12738 = vmatpush1.bf16.msra.mxu0 %v19368_v46  ;;  %13383 = vmatpush1.bf16.msra.mxu1 %v19370_v47  ;;  %v19432_v46 = vcombine.low %v2242_v34, %v2246_v35  ;;  %v19434_v47 = vcombine.low %v2243_v36, %v2247_v37  ;;  %v2306_v34 = vld [vmem:[%s21550_s14 + $0x3840] sm:$0xff]  ;;  %v20407_v36 = vld [vmem:[%s21606_s12 + $0x68] ss:$240 sps:$4 sm:$0xff]  }
 0x43a   : > { %12739 = vmatprep.subr.bf16.mxu0 %v19377_v48  ;;  %13384 = vmatprep.subr.bf16.mxu1 %v19379_v49  ;;  %v19441_v48 = vcombine.high %v2250_v42, %v2254_v43  ;;  %v19443_v49 = vcombine.high %v2251_v44, %v2255_v45  ;;  %v2310_v35 = vld [vmem:[%s21550_s14 + $0x3860] sm:$0xff]  ;;  %v2307_v37 = vld [vmem:[%s21550_s14 + $0x3848] sm:$0xff] }
 0x43d   : > { %12740 = vmatpush1.bf16.msra.mxu0 %v19376_v54  ;;  %13385 = vmatpush1.bf16.msra.mxu1 %v19378_v55  ;;  %v19440_v54 = vcombine.low %v2250_v42, %v2254_v43  ;;  %v19442_v55 = vcombine.low %v2251_v44, %v2255_v45  ;;  %v2314_v43 = vld [vmem:[%s21550_s14 + $0x3880] sm:$0xff] }
 0x43e   : > { %12741 = vmatprep.subr.bf16.mxu0 %v19385_v56  ;;  %13386 = vmatprep.subr.bf16.mxu1 %v19387_v57  ;;  %v19449_v56 = vcombine.high %v2258_v50, %v2262_v51  ;;  %v19451_v57 = vcombine.high %v2259_v52, %v2263_v53  ;;  %v2318_v44 = vld [vmem:[%s21550_s14 + $0x38a0] sm:$0xff] }
 0x43f   : > { %v20408_v45 = vld [vmem:[%s21606_s12 + $0x74] ss:$240 sps:$4 sm:$0xff]  }
 0x441   : > { %12742 = vmatpush1.bf16.msra.mxu0 %v19384_v62  ;;  %13387 = vmatpush1.bf16.msra.mxu1 %v19386_v63  ;;  %v19448_v62 = vcombine.low %v2258_v50, %v2262_v51  ;;  %v19450_v63 = vcombine.low %v2259_v52, %v2263_v53  ;;  %v19505_v50 = vcombine.high %v2314_v43, %v2318_v44  ;;  %v2322_v52 = vld [vmem:[%s21550_s14 + $0x38c0] sm:$0xff] }
 0x442   : > { %12743 = vmatprep.subr.bf16.mxu0 %v19393_v0  ;;  %13388 = vmatprep.subr.bf16.mxu1 %v19395_v1  ;;  %v19457_v0 = vcombine.high %v2266_v58, %v2270_v59  ;;  %v19459_v1 = vcombine.high %v2267_v60, %v2271_v61  ;;  %v2326_v53 = vld [vmem:[%s21550_s14 + $0x38e0] sm:$0xff] }
 0x445   : > { %12744 = vmatpush1.bf16.msra.mxu0 %v19392_v6  ;;  %13389 = vmatpush1.bf16.msra.mxu1 %v19394_v7  ;;  %v19456_v6 = vcombine.low %v2266_v58, %v2270_v59  ;;  %v19458_v7 = vcombine.low %v2267_v60, %v2271_v61  ;;  %v19513_v58 = vcombine.high %v2322_v52, %v2326_v53  ;;  %v2330_v60 = vld [vmem:[%s21550_s14 + $0x3900] sm:$0xff] }
 0x446   : > { %12745 = vmatprep.subr.bf16.mxu0 %v19401_v8  ;;  %13390 = vmatprep.subr.bf16.mxu1 %v19403_v9  ;;  %v19465_v8 = vcombine.high %v2274_v2, %v2278_v3  ;;  %v19467_v9 = vcombine.high %v2275_v4, %v2279_v5  ;;  %v2334_v61 = vld [vmem:[%s21550_s14 + $0x3920] sm:$0xff] }
 0x449   : > { %12746 = vmatpush1.bf16.msra.mxu0 %v19400_v14  ;;  %13391 = vmatpush1.bf16.msra.mxu1 %v19402_v15  ;;  %v19464_v14 = vcombine.low %v2274_v2, %v2278_v3  ;;  %v19466_v15 = vcombine.low %v2275_v4, %v2279_v5  ;;  %v19521_v2 = vcombine.high %v2330_v60, %v2334_v61  ;;  %v2338_v4 = vld [vmem:[%s21550_s14 + $0x3940] sm:$0xff] }
 0x44a   : > { %12747 = vmatprep.subr.bf16.mxu0 %v19409_v16  ;;  %13392 = vmatprep.subr.bf16.mxu1 %v19411_v17  ;;  %v19473_v16 = vcombine.high %v2282_v10, %v2286_v11  ;;  %v19475_v17 = vcombine.high %v2283_v12, %v2287_v13  ;;  %v2342_v5 = vld [vmem:[%s21550_s14 + $0x3960] sm:$0xff] }
 0x44d   : > { %12748 = vmatpush1.bf16.msra.mxu0 %v19408_v22  ;;  %13393 = vmatpush1.bf16.msra.mxu1 %v19410_v23  ;;  %v19472_v22 = vcombine.low %v2282_v10, %v2286_v11  ;;  %v19474_v23 = vcombine.low %v2283_v12, %v2287_v13  ;;  %v19529_v10 = vcombine.high %v2338_v4, %v2342_v5  ;;  %v2346_v12 = vld [vmem:[%s21550_s14 + $0x3980] sm:$0xff] }
 0x44e   : > { %12749 = vmatprep.subr.bf16.mxu0 %v19417_v24  ;;  %13394 = vmatprep.subr.bf16.mxu1 %v19419_v25  ;;  %v19481_v24 = vcombine.high %v2290_v18, %v2294_v19  ;;  %v19483_v25 = vcombine.high %v2291_v20, %v2295_v21  ;;  %v2350_v13 = vld [vmem:[%s21550_s14 + $0x39a0] sm:$0xff] }
 0x451   : > { %12750 = vmatpush1.bf16.msra.mxu0 %v19416_v30  ;;  %13395 = vmatpush1.bf16.msra.mxu1 %v19418_v31  ;;  %v19480_v30 = vcombine.low %v2290_v18, %v2294_v19  ;;  %v19482_v31 = vcombine.low %v2291_v20, %v2295_v21  ;;  %v19537_v18 = vcombine.high %v2346_v12, %v2350_v13  ;;  %v2354_v20 = vld [vmem:[%s21550_s14 + $0x39c0] sm:$0xff] }
 0x452   : > { %12751 = vmatprep.subr.bf16.mxu0 %v19425_v32  ;;  %13396 = vmatprep.subr.bf16.mxu1 %v19427_v33  ;;  %v19489_v32 = vcombine.high %v2298_v26, %v2302_v27  ;;  %v19491_v33 = vcombine.high %v2299_v28, %v2303_v29  ;;  %v2358_v21 = vld [vmem:[%s21550_s14 + $0x39e0] sm:$0xff] }
 0x455   : > { %12752 = vmatpush1.bf16.msra.mxu0 %v19424_v38  ;;  %13397 = vmatpush1.bf16.msra.mxu1 %v19426_v39  ;;  %v2311_v38 = vld [vmem:[%s21550_s14 + $0x3868] sm:$0xff]  ;;  %v19488_v39 = vcombine.low %v2298_v26, %v2302_v27  ;;  %v19545_v26 = vcombine.high %v2354_v20, %v2358_v21 }
 0x456   : > { %12753 = vmatprep.subr.bf16.mxu0 %v19433_v40  ;;  %13398 = vmatprep.subr.bf16.mxu1 %v19435_v41  ;;  %v19490_v40 = vcombine.low %v2299_v28, %v2303_v29  ;;  %v19497_v41 = vcombine.high %v2306_v34, %v2310_v35  ;;  %v19499_v42 = vcombine.high %v2307_v37, %v2311_v38  ;;  %v2362_v28 = vld [vmem:[%s21550_s14 + $0x3a00] sm:$0xff] }
 0x457   : > { %v2366_v29 = vld [vmem:[%s21550_s14 + $0x3a20] sm:$0xff] }
 0x459   : > { %12754 = vmatpush1.bf16.msra.mxu0 %v19432_v46  ;;  %13399 = vmatpush1.bf16.msra.mxu1 %v19434_v47  ;;  %v2315_v46 = vld [vmem:[%s21550_s14 + $0x3888] sm:$0xff] }
 0x45a   : > { %12755 = vmatprep.subr.bf16.mxu0 %v19441_v48  ;;  %13400 = vmatprep.subr.bf16.mxu1 %v19443_v49  ;;  %v2319_v47 = vld [vmem:[%s21550_s14 + $0x38a8] sm:$0xff]  ;;  %v19496_v48 = vcombine.low %v2306_v34, %v2310_v35  ;;  %v19498_v49 = vcombine.low %v2307_v37, %v2311_v38  ;;  %v19553_v34 = vcombine.high %v2362_v28, %v2366_v29  ;;  %v2374_v37 = vld [vmem:[%s21550_s14 + $0x3a60] sm:$0xff] }
 0x45b   : > { %v19507_v51 = vcombine.high %v2315_v46, %v2319_v47  ;;  %v2371_v38 = vld [vmem:[%s21550_s14 + $0x3a48] sm:$0xff] }
 0x45d   : > { %12756 = vmatpush1.bf16.msra.mxu0 %v19440_v54  ;;  %13401 = vmatpush1.bf16.msra.mxu1 %v19442_v55  ;;  %v2323_v54 = vld [vmem:[%s21550_s14 + $0x38c8] sm:$0xff] }
 0x45e   : > { %12757 = vmatprep.subr.bf16.mxu0 %v19449_v56  ;;  %13402 = vmatprep.subr.bf16.mxu1 %v19451_v57  ;;  %v2327_v55 = vld [vmem:[%s21550_s14 + $0x38e8] sm:$0xff]  ;;  %v19504_v56 = vcombine.low %v2314_v43, %v2318_v44  ;;  %v19506_v57 = vcombine.low %v2315_v46, %v2319_v47  ;;  %v2378_v44 = vld [vmem:[%s21550_s14 + $0x3a80] sm:$0xff] }
 0x45f   : > { %v19515_v59 = vcombine.high %v2323_v54, %v2327_v55  ;;  %v2379_v46 = vld [vmem:[%s21550_s14 + $0x3a88] sm:$0xff] }
 0x460   : > { %v2383_v47 = vld [vmem:[%s21550_s14 + $0x3aa8] sm:$0xff] }
 0x461   : > { %12758 = vmatpush1.bf16.msra.mxu0 %v19448_v62  ;;  %13403 = vmatpush1.bf16.msra.mxu1 %v19450_v63  ;;  %v2331_v62 = vld [vmem:[%s21550_s14 + $0x3908] sm:$0xff] }
 0x462   : > { %12759 = vmatprep.subr.bf16.mxu0 %v19457_v0  ;;  %13404 = vmatprep.subr.bf16.mxu1 %v19459_v1  ;;  %v2335_v63 = vld [vmem:[%s21550_s14 + $0x3928] sm:$0xff]  ;;  %v19512_v0 = vcombine.low %v2322_v52, %v2326_v53  ;;  %v19514_v1 = vcombine.low %v2323_v54, %v2327_v55  ;;  %v2386_v52 = vld [vmem:[%s21550_s14 + $0x3ac0] sm:$0xff] }
 0x463   : > { %v19523_v3 = vcombine.high %v2331_v62, %v2335_v63  ;;  %v2390_v53 = vld [vmem:[%s21550_s14 + $0x3ae0] sm:$0xff]  ;;  %v2387_v54 = vld [vmem:[%s21550_s14 + $0x3ac8] sm:$0xff] }
 0x464   : > { %v2391_v55 = vld [vmem:[%s21550_s14 + $0x3ae8] sm:$0xff] }
 0x465   : > { %12760 = vmatpush1.bf16.msra.mxu0 %v19456_v6  ;;  %13405 = vmatpush1.bf16.msra.mxu1 %v19458_v7  ;;  %v2339_v6 = vld [vmem:[%s21550_s14 + $0x3948] sm:$0xff] }
 0x466   : > { %12761 = vmatprep.subr.bf16.mxu0 %v19465_v8  ;;  %13406 = vmatprep.subr.bf16.mxu1 %v19467_v9  ;;  %v2343_v7 = vld [vmem:[%s21550_s14 + $0x3968] sm:$0xff]  ;;  %v19520_v8 = vcombine.low %v2330_v60, %v2334_v61  ;;  %v19522_v9 = vcombine.low %v2331_v62, %v2335_v63  ;;  %v2394_v60 = vld [vmem:[%s21550_s14 + $0x3b00] sm:$0xff] }
 0x467   : > { %v19531_v11 = vcombine.high %v2339_v6, %v2343_v7  ;;  %v2398_v61 = vld [vmem:[%s21550_s14 + $0x3b20] sm:$0xff]  ;;  %v2395_v62 = vld [vmem:[%s21550_s14 + $0x3b08] sm:$0xff] }
 0x468   : > { %v2399_v63 = vld [vmem:[%s21550_s14 + $0x3b28] sm:$0xff] }
 0x469   : > { %12762 = vmatpush1.bf16.msra.mxu0 %v19464_v14  ;;  %13407 = vmatpush1.bf16.msra.mxu1 %v19466_v15  ;;  %v2347_v14 = vld [vmem:[%s21550_s14 + $0x3988] sm:$0xff] }
 0x46a   : > { %12763 = vmatprep.subr.bf16.mxu0 %v19473_v16  ;;  %13408 = vmatprep.subr.bf16.mxu1 %v19475_v17  ;;  %v2351_v15 = vld [vmem:[%s21550_s14 + $0x39a8] sm:$0xff]  ;;  %v19528_v16 = vcombine.low %v2338_v4, %v2342_v5  ;;  %v19530_v17 = vcombine.low %v2339_v6, %v2343_v7  ;;  %v2402_v4 = vld [vmem:[%s21550_s14 + $0x3b40] sm:$0xff] }
 0x46b   : > { %v19539_v19 = vcombine.high %v2347_v14, %v2351_v15  ;;  %v2406_v5 = vld [vmem:[%s21550_s14 + $0x3b60] sm:$0xff]  ;;  %v2403_v6 = vld [vmem:[%s21550_s14 + $0x3b48] sm:$0xff] }
 0x46c   : > { %v2407_v7 = vld [vmem:[%s21550_s14 + $0x3b68] sm:$0xff] }
 0x46d   : > { %12764 = vmatpush1.bf16.msra.mxu0 %v19472_v22  ;;  %13409 = vmatpush1.bf16.msra.mxu1 %v19474_v23  ;;  %v2355_v22 = vld [vmem:[%s21550_s14 + $0x39c8] sm:$0xff] }
 0x46e   : > { %12765 = vmatprep.subr.bf16.mxu0 %v19481_v24  ;;  %13410 = vmatprep.subr.bf16.mxu1 %v19483_v25  ;;  %v2359_v23 = vld [vmem:[%s21550_s14 + $0x39e8] sm:$0xff]  ;;  %v19536_v24 = vcombine.low %v2346_v12, %v2350_v13  ;;  %v19538_v25 = vcombine.low %v2347_v14, %v2351_v15  ;;  %v2410_v12 = vld [vmem:[%s21550_s14 + $0x3b80] sm:$0xff] }
 0x46f   : > { %v19547_v27 = vcombine.high %v2355_v22, %v2359_v23  ;;  %v2414_v13 = vld [vmem:[%s21550_s14 + $0x3ba0] sm:$0xff]  ;;  %v2411_v14 = vld [vmem:[%s21550_s14 + $0x3b88] sm:$0xff] }
 0x470   : > { %v2415_v15 = vld [vmem:[%s21550_s14 + $0x3ba8] sm:$0xff] }
 0x471   : > { %12766 = vmatpush1.bf16.msra.mxu0 %v19480_v30  ;;  %13411 = vmatpush1.bf16.msra.mxu1 %v19482_v31  ;;  %v2363_v30 = vld [vmem:[%s21550_s14 + $0x3a08] sm:$0xff] }
 0x472   : > { %12778 = vmatprep.subr.bf16.mxu0 %v19489_v32  ;;  %13423 = vmatprep.subr.bf16.mxu1 %v19491_v33  ;;  %v2367_v31 = vld [vmem:[%s21550_s14 + $0x3a28] sm:$0xff]  ;;  %v19544_v32 = vcombine.low %v2354_v20, %v2358_v21  ;;  %v19546_v33 = vcombine.low %v2355_v22, %v2359_v23  ;;  %v2418_v20 = vld [vmem:[%s21550_s14 + $0x3bc0] sm:$0xff] }
 0x473   : > { %v19555_v35 = vcombine.high %v2363_v30, %v2367_v31  ;;  %v2422_v21 = vld [vmem:[%s21550_s14 + $0x3be0] sm:$0xff]  ;;  %v2419_v22 = vld [vmem:[%s21550_s14 + $0x3bc8] sm:$0xff] }
 0x474   : > { %12768 = vmatmul.mubr.bf16.vlgmr.msra.gmra.mrb[0].mxu0 %v20407_v36  ;;  %13413 = vmatmul.mubr.bf16.vlgmr.msra.gmra.mrb[0].mxu1 %v20407_v36  ;;  %v2370_v36 = vld [vmem:[%s21550_s14 + $0x3a40] sm:$0xff]  ;;  %v2423_v23 = vld [vmem:[%s21550_s14 + $0x3be8] sm:$0xff] }
 0x475   : > { %12779 = vmatpush1.bf16.msra.mxu0 %v19488_v39  ;;  %13424 = vmatpush1.bf16.msra.mxu1 %v19490_v40  ;;  %v2375_v39 = vld [vmem:[%s21550_s14 + $0x3a68] sm:$0xff]  ;;  %v19552_v40 = vcombine.low %v2362_v28, %v2366_v29  ;;  %v508_v28 = vld [vmem:[%s21550_s14 + $0x10] sm:$0xff] }
 0x476   : > { %12780 = vmatprep.subr.bf16.mxu0 %v19497_v41  ;;  %13425 = vmatprep.subr.bf16.mxu1 %v19499_v42  ;;  %v19554_v41 = vcombine.low %v2363_v30, %v2367_v31  ;;  %v19561_v42 = vcombine.high %v2370_v36, %v2374_v37  ;;  %v19563_v43 = vcombine.high %v2371_v38, %v2375_v39  ;;  %v512_v29 = vld [vmem:[%s21550_s14 + $0x30] sm:$0xff]  ;;  %v509_v30 = vld [vmem:[%s21550_s14 + $0x18] sm:$0xff] }
 0x477   : > { %12810 = vmatprep.mubr.bf16.mxu0 %v20408_v45  ;;  %13455 = vmatprep.mubr.bf16.mxu1 %v20408_v45  ;;  %v2382_v45 = vld [vmem:[%s21550_s14 + $0x3aa0] sm:$0xff]  ;;  %v513_v31 = vld [vmem:[%s21550_s14 + $0x38] sm:$0xff] }
 0x479   : > { %12781 = vmatpush1.bf16.msra.mxu0 %v19496_v48  ;;  %13426 = vmatpush1.bf16.msra.mxu1 %v19498_v49  ;;  %v19560_v48 = vcombine.low %v2370_v36, %v2374_v37  ;;  %v19562_v49 = vcombine.low %v2371_v38, %v2375_v39  ;;  %v516_v36 = vld [vmem:[%s21550_s14 + $0x50] sm:$0xff]  ;;  %v517_v39 = vld [vmem:[%s21550_s14 + $0x58] sm:$0xff] }
 0x47a   : > { %12782 = vmatprep.subr.bf16.mxu0 %v19505_v50  ;;  %13427 = vmatprep.subr.bf16.mxu1 %v19507_v51  ;;  %v19569_v50 = vcombine.high %v2378_v44, %v2382_v45  ;;  %v19571_v51 = vcombine.high %v2379_v46, %v2383_v47  ;;  %v520_v37 = vld [vmem:[%s21550_s14 + $0x70] sm:$0xff] }
 0x47b   : > { %v20410_v38 = vld [vmem:[%s21606_s12 + $0x70] ss:$240 sps:$4 sm:$0xff]  }
 0x47d   : > { %12783 = vmatpush1.bf16.msra.mxu0 %v19504_v56  ;;  %13428 = vmatpush1.bf16.msra.mxu1 %v19506_v57  ;;  %v19568_v56 = vcombine.low %v2378_v44, %v2382_v45  ;;  %v19570_v57 = vcombine.low %v2379_v46, %v2383_v47  ;;  %v524_v45 = vld [vmem:[%s21550_s14 + $0x90] sm:$0xff]  ;;  %v525_v47 = vld [vmem:[%s21550_s14 + $0x98] sm:$0xff] }
 0x47e   : > { %12784 = vmatprep.subr.bf16.mxu0 %v19513_v58  ;;  %13429 = vmatprep.subr.bf16.mxu1 %v19515_v59  ;;  %v19577_v58 = vcombine.high %v2386_v52, %v2390_v53  ;;  %v19579_v59 = vcombine.high %v2387_v54, %v2391_v55  ;;  %v528_v46 = vld [vmem:[%s21550_s14 + $0xb0] sm:$0xff] }
 0x481   : > { %12785 = vmatpush1.bf16.msra.mxu0 %v19512_v0  ;;  %13430 = vmatpush1.bf16.msra.mxu1 %v19514_v1  ;;  %v19576_v0 = vcombine.low %v2386_v52, %v2390_v53  ;;  %v19578_v1 = vcombine.low %v2387_v54, %v2391_v55  ;;  %v532_v53 = vld [vmem:[%s21550_s14 + $0xd0] sm:$0xff] }
 0x482   : > { %12786 = vmatprep.subr.bf16.mxu0 %v19521_v2  ;;  %13431 = vmatprep.subr.bf16.mxu1 %v19523_v3  ;;  %v19585_v2 = vcombine.high %v2394_v60, %v2398_v61  ;;  %v19587_v3 = vcombine.high %v2395_v62, %v2399_v63  ;;  %v536_v54 = vld [vmem:[%s21550_s14 + $0xf0] sm:$0xff] }
 0x483   : > { %v20411_v55 = vld [vmem:[%s21606_s12 + $0x4] ss:$240 sps:$4 sm:$0xff]  }
 0x485   : > { %12787 = vmatpush1.bf16.msra.mxu0 %v19520_v8  ;;  %13432 = vmatpush1.bf16.msra.mxu1 %v19522_v9  ;;  %v19584_v8 = vcombine.low %v2394_v60, %v2398_v61  ;;  %v19586_v9 = vcombine.low %v2395_v62, %v2399_v63  ;;  %v17725_v60 = vcombine.high %v532_v53, %v536_v54  ;;  %v540_v62 = vld [vmem:[%s21550_s14 + $0x110] sm:$0xff] }
 0x486   : > { %12788 = vmatprep.subr.bf16.mxu0 %v19529_v10  ;;  %13433 = vmatprep.subr.bf16.mxu1 %v19531_v11  ;;  %v19593_v10 = vcombine.high %v2402_v4, %v2406_v5  ;;  %v19595_v11 = vcombine.high %v2403_v6, %v2407_v7  ;;  %v544_v63 = vld [vmem:[%s21550_s14 + $0x130] sm:$0xff] }
 0x489   : > { %12789 = vmatpush1.bf16.msra.mxu0 %v19528_v16  ;;  %13434 = vmatpush1.bf16.msra.mxu1 %v19530_v17  ;;  %v19592_v16 = vcombine.low %v2402_v4, %v2406_v5  ;;  %v19594_v17 = vcombine.low %v2403_v6, %v2407_v7  ;;  %v17733_v4 = vcombine.high %v540_v62, %v544_v63  ;;  %v548_v6 = vld [vmem:[%s21550_s14 + $0x150] sm:$0xff] }
 0x48a   : > { %12790 = vmatprep.subr.bf16.mxu0 %v19537_v18  ;;  %13435 = vmatprep.subr.bf16.mxu1 %v19539_v19  ;;  %v19601_v18 = vcombine.high %v2410_v12, %v2414_v13  ;;  %v19603_v19 = vcombine.high %v2411_v14, %v2415_v15  ;;  %v552_v7 = vld [vmem:[%s21550_s14 + $0x170] sm:$0xff] }
 0x48d   : > { %12791 = vmatpush1.bf16.msra.mxu0 %v19536_v24  ;;  %13436 = vmatpush1.bf16.msra.mxu1 %v19538_v25  ;;  %v19600_v24 = vcombine.low %v2410_v12, %v2414_v13  ;;  %v19602_v25 = vcombine.low %v2411_v14, %v2415_v15  ;;  %v17741_v12 = vcombine.high %v548_v6, %v552_v7  ;;  %v556_v14 = vld [vmem:[%s21550_s14 + $0x190] sm:$0xff] }
 0x48e   : > { %12792 = vmatprep.subr.bf16.mxu0 %v19545_v26  ;;  %13437 = vmatprep.subr.bf16.mxu1 %v19547_v27  ;;  %v19609_v26 = vcombine.high %v2418_v20, %v2422_v21  ;;  %v19611_v27 = vcombine.high %v2419_v22, %v2423_v23  ;;  %v560_v15 = vld [vmem:[%s21550_s14 + $0x1b0] sm:$0xff] }
 0x491   : > { %12793 = vmatpush1.bf16.msra.mxu0 %v19544_v32  ;;  %13438 = vmatpush1.bf16.msra.mxu1 %v19546_v33  ;;  %v19608_v32 = vcombine.low %v2418_v20, %v2422_v21  ;;  %v19610_v33 = vcombine.low %v2419_v22, %v2423_v23  ;;  %v17749_v20 = vcombine.high %v556_v14, %v560_v15  ;;  %v564_v22 = vld [vmem:[%s21550_s14 + $0x1d0] sm:$0xff] }
 0x492   : > { %12794 = vmatprep.subr.bf16.mxu0 %v19553_v34  ;;  %13439 = vmatprep.subr.bf16.mxu1 %v19555_v35  ;;  %v17701_v34 = vcombine.high %v508_v28, %v512_v29  ;;  %v17703_v35 = vcombine.high %v509_v30, %v513_v31  ;;  %v568_v23 = vld [vmem:[%s21550_s14 + $0x1f0] sm:$0xff] }
 0x495   : > { %12795 = vmatpush1.bf16.msra.mxu0 %v19552_v40  ;;  %13440 = vmatpush1.bf16.msra.mxu1 %v19554_v41  ;;  %v521_v40 = vld [vmem:[%s21550_s14 + $0x78] sm:$0xff]  ;;  %v17700_v41 = vcombine.low %v508_v28, %v512_v29  ;;  %v17757_v28 = vcombine.high %v564_v22, %v568_v23 }
 0x496   : > { %12796 = vmatprep.subr.bf16.mxu0 %v19561_v42  ;;  %13441 = vmatprep.subr.bf16.mxu1 %v19563_v43  ;;  %v17702_v42 = vcombine.low %v509_v30, %v513_v31  ;;  %v17709_v43 = vcombine.high %v516_v36, %v520_v37  ;;  %v17711_v44 = vcombine.high %v517_v39, %v521_v40  ;;  %v572_v30 = vld [vmem:[%s21550_s14 + $0x210] sm:$0xff] }
 0x497   : > { %v576_v31 = vld [vmem:[%s21550_s14 + $0x230] sm:$0xff] }
 0x499   : > { %12797 = vmatpush1.bf16.msra.mxu0 %v19560_v48  ;;  %13442 = vmatpush1.bf16.msra.mxu1 %v19562_v49  ;;  %v529_v48 = vld [vmem:[%s21550_s14 + $0xb8] sm:$0xff]  ;;  %v17708_v49 = vcombine.low %v516_v36, %v520_v37  ;;  %v17765_v36 = vcombine.high %v572_v30, %v576_v31 }
 0x49a   : > { %12798 = vmatprep.subr.bf16.mxu0 %v19569_v50  ;;  %13443 = vmatprep.subr.bf16.mxu1 %v19571_v51  ;;  %v17710_v50 = vcombine.low %v517_v39, %v521_v40  ;;  %v17717_v51 = vcombine.high %v524_v45, %v528_v46  ;;  %v17719_v52 = vcombine.high %v525_v47, %v529_v48  ;;  %v584_v39 = vld [vmem:[%s21550_s14 + $0x270] sm:$0xff]  ;;  %v581_v40 = vld [vmem:[%s21550_s14 + $0x258] sm:$0xff] }
 0x49d   : > { %12799 = vmatpush1.bf16.msra.mxu0 %v19568_v56  ;;  %13444 = vmatpush1.bf16.msra.mxu1 %v19570_v57  ;;  %v533_v56 = vld [vmem:[%s21550_s14 + $0xd8] sm:$0xff] }
 0x49e   : > { %12800 = vmatprep.subr.bf16.mxu0 %v19577_v58  ;;  %13445 = vmatprep.subr.bf16.mxu1 %v19579_v59  ;;  %v537_v57 = vld [vmem:[%s21550_s14 + $0xf8] sm:$0xff]  ;;  %v17716_v58 = vcombine.low %v524_v45, %v528_v46  ;;  %v17718_v59 = vcombine.low %v525_v47, %v529_v48  ;;  %v588_v46 = vld [vmem:[%s21550_s14 + $0x290] sm:$0xff] }
 0x49f   : > { %v17727_v61 = vcombine.high %v533_v56, %v537_v57  ;;  %v592_v47 = vld [vmem:[%s21550_s14 + $0x2b0] sm:$0xff]  ;;  %v589_v48 = vld [vmem:[%s21550_s14 + $0x298] sm:$0xff] }
 0x4a1   : > { %12801 = vmatpush1.bf16.msra.mxu0 %v19576_v0  ;;  %13446 = vmatpush1.bf16.msra.mxu1 %v19578_v1  ;;  %v541_v0 = vld [vmem:[%s21550_s14 + $0x118] sm:$0xff] }
 0x4a2   : > { %12802 = vmatprep.subr.bf16.mxu0 %v19585_v2  ;;  %13447 = vmatprep.subr.bf16.mxu1 %v19587_v3  ;;  %v545_v1 = vld [vmem:[%s21550_s14 + $0x138] sm:$0xff]  ;;  %v17724_v2 = vcombine.low %v532_v53, %v536_v54  ;;  %v17726_v3 = vcombine.low %v533_v56, %v537_v57  ;;  %v596_v54 = vld [vmem:[%s21550_s14 + $0x2d0] sm:$0xff] }
 0x4a3   : > { %v17735_v5 = vcombine.high %v541_v0, %v545_v1  ;;  %v597_v56 = vld [vmem:[%s21550_s14 + $0x2d8] sm:$0xff] }
 0x4a4   : > { %v601_v57 = vld [vmem:[%s21550_s14 + $0x2f8] sm:$0xff] }
 0x4a5   : > { %12803 = vmatpush1.bf16.msra.mxu0 %v19584_v8  ;;  %13448 = vmatpush1.bf16.msra.mxu1 %v19586_v9  ;;  %v549_v8 = vld [vmem:[%s21550_s14 + $0x158] sm:$0xff] }
 0x4a6   : > { %12804 = vmatprep.subr.bf16.mxu0 %v19593_v10  ;;  %13449 = vmatprep.subr.bf16.mxu1 %v19595_v11  ;;  %v553_v9 = vld [vmem:[%s21550_s14 + $0x178] sm:$0xff]  ;;  %v17732_v10 = vcombine.low %v540_v62, %v544_v63  ;;  %v17734_v11 = vcombine.low %v541_v0, %v545_v1  ;;  %v604_v62 = vld [vmem:[%s21550_s14 + $0x310] sm:$0xff] }
 0x4a7   : > { %v17743_v13 = vcombine.high %v549_v8, %v553_v9  ;;  %v608_v63 = vld [vmem:[%s21550_s14 + $0x330] sm:$0xff]  ;;  %v605_v0 = vld [vmem:[%s21550_s14 + $0x318] sm:$0xff] }
 0x4a8   : > { %v609_v1 = vld [vmem:[%s21550_s14 + $0x338] sm:$0xff] }
 0x4a9   : > { %12805 = vmatpush1.bf16.msra.mxu0 %v19592_v16  ;;  %13450 = vmatpush1.bf16.msra.mxu1 %v19594_v17  ;;  %v557_v16 = vld [vmem:[%s21550_s14 + $0x198] sm:$0xff] }
 0x4aa   : > { %12806 = vmatprep.subr.bf16.mxu0 %v19601_v18  ;;  %13451 = vmatprep.subr.bf16.mxu1 %v19603_v19  ;;  %v561_v17 = vld [vmem:[%s21550_s14 + $0x1b8] sm:$0xff]  ;;  %v17740_v18 = vcombine.low %v548_v6, %v552_v7  ;;  %v17742_v19 = vcombine.low %v549_v8, %v553_v9  ;;  %v612_v6 = vld [vmem:[%s21550_s14 + $0x350] sm:$0xff] }
 0x4ab   : > { %v17751_v21 = vcombine.high %v557_v16, %v561_v17  ;;  %v616_v7 = vld [vmem:[%s21550_s14 + $0x370] sm:$0xff]  ;;  %v613_v8 = vld [vmem:[%s21550_s14 + $0x358] sm:$0xff] }
 0x4ac   : > { %v617_v9 = vld [vmem:[%s21550_s14 + $0x378] sm:$0xff] }
 0x4ad   : > { %12807 = vmatpush1.bf16.msra.mxu0 %v19600_v24  ;;  %13452 = vmatpush1.bf16.msra.mxu1 %v19602_v25  ;;  %v565_v24 = vld [vmem:[%s21550_s14 + $0x1d8] sm:$0xff] }
 0x4ae   : > { %12808 = vmatprep.subr.bf16.mxu0 %v19609_v26  ;;  %13453 = vmatprep.subr.bf16.mxu1 %v19611_v27  ;;  %v569_v25 = vld [vmem:[%s21550_s14 + $0x1f8] sm:$0xff]  ;;  %v17748_v26 = vcombine.low %v556_v14, %v560_v15  ;;  %v17750_v27 = vcombine.low %v557_v16, %v561_v17  ;;  %v620_v14 = vld [vmem:[%s21550_s14 + $0x390] sm:$0xff] }
 0x4af   : > { %v17759_v29 = vcombine.high %v565_v24, %v569_v25  ;;  %v624_v15 = vld [vmem:[%s21550_s14 + $0x3b0] sm:$0xff]  ;;  %v621_v16 = vld [vmem:[%s21550_s14 + $0x398] sm:$0xff] }
 0x4b0   : > { %v625_v17 = vld [vmem:[%s21550_s14 + $0x3b8] sm:$0xff] }
 0x4b1   : > { %12809 = vmatpush1.bf16.msra.mxu0 %v19608_v32  ;;  %13454 = vmatpush1.bf16.msra.mxu1 %v19610_v33  ;;  %v573_v32 = vld [vmem:[%s21550_s14 + $0x218] sm:$0xff] }
 0x4b2   : > { %13466 = vmatprep.subr.bf16.mxu0 %v17701_v34  ;;  %14111 = vmatprep.subr.bf16.mxu1 %v17703_v35  ;;  %v577_v33 = vld [vmem:[%s21550_s14 + $0x238] sm:$0xff]  ;;  %v17756_v34 = vcombine.low %v564_v22, %v568_v23  ;;  %v17758_v35 = vcombine.low %v565_v24, %v569_v25  ;;  %v628_v22 = vld [vmem:[%s21550_s14 + $0x3d0] sm:$0xff] }
 0x4b3   : > { %v17767_v37 = vcombine.high %v573_v32, %v577_v33  ;;  %v632_v23 = vld [vmem:[%s21550_s14 + $0x3f0] sm:$0xff]  ;;  %v629_v24 = vld [vmem:[%s21550_s14 + $0x3d8] sm:$0xff] }
 0x4b4   : > { %12811 = vmatmul.mubr.bf16.vlgmr.msra.gmra.mrb[0].mxu0 %v20410_v38  ;;  %13456 = vmatmul.mubr.bf16.vlgmr.msra.gmra.mrb[0].mxu1 %v20410_v38  ;;  %v580_v38 = vld [vmem:[%s21550_s14 + $0x250] sm:$0xff]  ;;  %v633_v25 = vld [vmem:[%s21550_s14 + $0x3f8] sm:$0xff] }
 0x4b5   : > { %13467 = vmatpush1.bf16.msra.mxu0 %v17700_v41  ;;  %14112 = vmatpush1.bf16.msra.mxu1 %v17702_v42  ;;  %v585_v41 = vld [vmem:[%s21550_s14 + $0x278] sm:$0xff]  ;;  %v17764_v42 = vcombine.low %v572_v30, %v576_v31  ;;  %v636_v30 = vld [vmem:[%s21550_s14 + $0x410] sm:$0xff] }
 0x4b6   : > { %13468 = vmatprep.subr.bf16.mxu0 %v17709_v43  ;;  %14113 = vmatprep.subr.bf16.mxu1 %v17711_v44  ;;  %v17766_v43 = vcombine.low %v573_v32, %v577_v33  ;;  %v17773_v44 = vcombine.high %v580_v38, %v584_v39  ;;  %v17775_v45 = vcombine.high %v581_v40, %v585_v41  ;;  %v640_v31 = vld [vmem:[%s21550_s14 + $0x430] sm:$0xff]  ;;  %v637_v32 = vld [vmem:[%s21550_s14 + $0x418] sm:$0xff] }
 0x4b7   : > { %13498 = vmatprep.mubr.bf16.mxu0 %v20411_v55  ;;  %14143 = vmatprep.mubr.bf16.mxu1 %v20411_v55  ;;  %v600_v55 = vld [vmem:[%s21550_s14 + $0x2f0] sm:$0xff]  ;;  %v641_v33 = vld [vmem:[%s21550_s14 + $0x438] sm:$0xff] }
 0x4b9   : > { %13469 = vmatpush1.bf16.msra.mxu0 %v17708_v49  ;;  %14114 = vmatpush1.bf16.msra.mxu1 %v17710_v50  ;;  %v593_v49 = vld [vmem:[%s21550_s14 + $0x2b8] sm:$0xff]  ;;  %v17772_v50 = vcombine.low %v580_v38, %v584_v39  ;;  %v644_v38 = vld [vmem:[%s21550_s14 + $0x450] sm:$0xff] }
 0x4ba   : > { %13470 = vmatprep.subr.bf16.mxu0 %v17717_v51  ;;  %14115 = vmatprep.subr.bf16.mxu1 %v17719_v52  ;;  %v17774_v51 = vcombine.low %v581_v40, %v585_v41  ;;  %v17781_v52 = vcombine.high %v588_v46, %v592_v47  ;;  %v17783_v53 = vcombine.high %v589_v48, %v593_v49  ;;  %v648_v39 = vld [vmem:[%s21550_s14 + $0x470] sm:$0xff]  ;;  %v645_v40 = vld [vmem:[%s21550_s14 + $0x458] sm:$0xff] }
 0x4bb   : > { %v649_v41 = vld [vmem:[%s21550_s14 + $0x478] sm:$0xff] }
 0x4bd   : > { %13471 = vmatpush1.bf16.msra.mxu0 %v17716_v58  ;;  %14116 = vmatpush1.bf16.msra.mxu1 %v17718_v59  ;;  %v17780_v58 = vcombine.low %v588_v46, %v592_v47  ;;  %v17782_v59 = vcombine.low %v589_v48, %v593_v49  ;;  %v652_v46 = vld [vmem:[%s21550_s14 + $0x490] sm:$0xff]  ;;  %v653_v49 = vld [vmem:[%s21550_s14 + $0x498] sm:$0xff] }
 0x4be   : > { %13472 = vmatprep.subr.bf16.mxu0 %v17725_v60  ;;  %14117 = vmatprep.subr.bf16.mxu1 %v17727_v61  ;;  %v17789_v60 = vcombine.high %v596_v54, %v600_v55  ;;  %v17791_v61 = vcombine.high %v597_v56, %v601_v57  ;;  %v656_v47 = vld [vmem:[%s21550_s14 + $0x4b0] sm:$0xff] }
 0x4bf   : > { %v20412_v48 = vld [vmem:[%s21606_s12] ss:$240 sps:$4 sm:$0xff]  }
 0x4c1   : > { %13473 = vmatpush1.bf16.msra.mxu0 %v17724_v2  ;;  %14118 = vmatpush1.bf16.msra.mxu1 %v17726_v3  ;;  %v17788_v2 = vcombine.low %v596_v54, %v600_v55  ;;  %v17790_v3 = vcombine.low %v597_v56, %v601_v57  ;;  %v660_v55 = vld [vmem:[%s21550_s14 + $0x4d0] sm:$0xff]  ;;  %v20413_v57 = vld [vmem:[%s21606_s12 + $0xc] ss:$240 sps:$4 sm:$0xff]  }
 0x4c2   : > { %13474 = vmatprep.subr.bf16.mxu0 %v17733_v4  ;;  %14119 = vmatprep.subr.bf16.mxu1 %v17735_v5  ;;  %v17797_v4 = vcombine.high %v604_v62, %v608_v63  ;;  %v17799_v5 = vcombine.high %v605_v0, %v609_v1  ;;  %v664_v56 = vld [vmem:[%s21550_s14 + $0x4f0] sm:$0xff] }
 0x4c5   : > { %13475 = vmatpush1.bf16.msra.mxu0 %v17732_v10  ;;  %14120 = vmatpush1.bf16.msra.mxu1 %v17734_v11  ;;  %v17796_v10 = vcombine.low %v604_v62, %v608_v63  ;;  %v17798_v11 = vcombine.low %v605_v0, %v609_v1  ;;  %v17853_v62 = vcombine.high %v660_v55, %v664_v56  ;;  %v668_v0 = vld [vmem:[%s21550_s14 + $0x510] sm:$0xff] }
 0x4c6   : > { %13476 = vmatprep.subr.bf16.mxu0 %v17741_v12  ;;  %14121 = vmatprep.subr.bf16.mxu1 %v17743_v13  ;;  %v17805_v12 = vcombine.high %v612_v6, %v616_v7  ;;  %v17807_v13 = vcombine.high %v613_v8, %v617_v9  ;;  %v672_v1 = vld [vmem:[%s21550_s14 + $0x530] sm:$0xff] }
 0x4c9   : > { %13477 = vmatpush1.bf16.msra.mxu0 %v17740_v18  ;;  %14122 = vmatpush1.bf16.msra.mxu1 %v17742_v19  ;;  %v17804_v18 = vcombine.low %v612_v6, %v616_v7  ;;  %v17806_v19 = vcombine.low %v613_v8, %v617_v9  ;;  %v17861_v6 = vcombine.high %v668_v0, %v672_v1  ;;  %v676_v8 = vld [vmem:[%s21550_s14 + $0x550] sm:$0xff] }
 0x4ca   : > { %13478 = vmatprep.subr.bf16.mxu0 %v17749_v20  ;;  %14123 = vmatprep.subr.bf16.mxu1 %v17751_v21  ;;  %v17813_v20 = vcombine.high %v620_v14, %v624_v15  ;;  %v17815_v21 = vcombine.high %v621_v16, %v625_v17  ;;  %v680_v9 = vld [vmem:[%s21550_s14 + $0x570] sm:$0xff] }
 0x4cd   : > { %13479 = vmatpush1.bf16.msra.mxu0 %v17748_v26  ;;  %14124 = vmatpush1.bf16.msra.mxu1 %v17750_v27  ;;  %v17812_v26 = vcombine.low %v620_v14, %v624_v15  ;;  %v17814_v27 = vcombine.low %v621_v16, %v625_v17  ;;  %v17869_v14 = vcombine.high %v676_v8, %v680_v9  ;;  %v684_v16 = vld [vmem:[%s21550_s14 + $0x590] sm:$0xff] }
 0x4ce   : > { %13480 = vmatprep.subr.bf16.mxu0 %v17757_v28  ;;  %14125 = vmatprep.subr.bf16.mxu1 %v17759_v29  ;;  %v17821_v28 = vcombine.high %v628_v22, %v632_v23  ;;  %v17823_v29 = vcombine.high %v629_v24, %v633_v25  ;;  %v688_v17 = vld [vmem:[%s21550_s14 + $0x5b0] sm:$0xff] }
 0x4d1   : > { %13481 = vmatpush1.bf16.msra.mxu0 %v17756_v34  ;;  %14126 = vmatpush1.bf16.msra.mxu1 %v17758_v35  ;;  %v17820_v34 = vcombine.low %v628_v22, %v632_v23  ;;  %v17822_v35 = vcombine.low %v629_v24, %v633_v25  ;;  %v17877_v22 = vcombine.high %v684_v16, %v688_v17  ;;  %v692_v24 = vld [vmem:[%s21550_s14 + $0x5d0] sm:$0xff] }
 0x4d2   : > { %13482 = vmatprep.subr.bf16.mxu0 %v17765_v36  ;;  %14127 = vmatprep.subr.bf16.mxu1 %v17767_v37  ;;  %v17829_v36 = vcombine.high %v636_v30, %v640_v31  ;;  %v17831_v37 = vcombine.high %v637_v32, %v641_v33  ;;  %v696_v25 = vld [vmem:[%s21550_s14 + $0x5f0] sm:$0xff] }
 0x4d5   : > { %13483 = vmatpush1.bf16.msra.mxu0 %v17764_v42  ;;  %14128 = vmatpush1.bf16.msra.mxu1 %v17766_v43  ;;  %v17828_v42 = vcombine.low %v636_v30, %v640_v31  ;;  %v17830_v43 = vcombine.low %v637_v32, %v641_v33  ;;  %v17885_v30 = vcombine.high %v692_v24, %v696_v25  ;;  %v700_v32 = vld [vmem:[%s21550_s14 + $0x610] sm:$0xff] }
 0x4d6   : > { %13484 = vmatprep.subr.bf16.mxu0 %v17773_v44  ;;  %14129 = vmatprep.subr.bf16.mxu1 %v17775_v45  ;;  %v17837_v44 = vcombine.high %v644_v38, %v648_v39  ;;  %v17839_v45 = vcombine.high %v645_v40, %v649_v41  ;;  %v704_v33 = vld [vmem:[%s21550_s14 + $0x630] sm:$0xff] }
 0x4d9   : > { %13485 = vmatpush1.bf16.msra.mxu0 %v17772_v50  ;;  %14130 = vmatpush1.bf16.msra.mxu1 %v17774_v51  ;;  %v657_v50 = vld [vmem:[%s21550_s14 + $0x4b8] sm:$0xff]  ;;  %v17836_v51 = vcombine.low %v644_v38, %v648_v39  ;;  %v17893_v38 = vcombine.high %v700_v32, %v704_v33 }
 0x4da   : > { %13486 = vmatprep.subr.bf16.mxu0 %v17781_v52  ;;  %14131 = vmatprep.subr.bf16.mxu1 %v17783_v53  ;;  %v17838_v52 = vcombine.low %v645_v40, %v649_v41  ;;  %v17845_v53 = vcombine.high %v652_v46, %v656_v47  ;;  %v17847_v54 = vcombine.high %v653_v49, %v657_v50  ;;  %v708_v40 = vld [vmem:[%s21550_s14 + $0x650] sm:$0xff] }
 0x4db   : > { %v712_v41 = vld [vmem:[%s21550_s14 + $0x670] sm:$0xff] }
 0x4dd   : > { %13487 = vmatpush1.bf16.msra.mxu0 %v17780_v58  ;;  %14132 = vmatpush1.bf16.msra.mxu1 %v17782_v59  ;;  %v661_v58 = vld [vmem:[%s21550_s14 + $0x4d8] sm:$0xff] }
 0x4de   : > { %13488 = vmatprep.subr.bf16.mxu0 %v17789_v60  ;;  %14133 = vmatprep.subr.bf16.mxu1 %v17791_v61  ;;  %v665_v59 = vld [vmem:[%s21550_s14 + $0x4f8] sm:$0xff]  ;;  %v17844_v60 = vcombine.low %v652_v46, %v656_v47  ;;  %v17846_v61 = vcombine.low %v653_v49, %v657_v50  ;;  %v17901_v46 = vcombine.high %v708_v40, %v712_v41  ;;  %v720_v49 = vld [vmem:[%s21550_s14 + $0x6b0] sm:$0xff] }
 0x4df   : > { %v17855_v63 = vcombine.high %v661_v58, %v665_v59  ;;  %v717_v50 = vld [vmem:[%s21550_s14 + $0x698] sm:$0xff] }
 0x4e1   : > { %13489 = vmatpush1.bf16.msra.mxu0 %v17788_v2  ;;  %14134 = vmatpush1.bf16.msra.mxu1 %v17790_v3  ;;  %v669_v2 = vld [vmem:[%s21550_s14 + $0x518] sm:$0xff] }
 0x4e2   : > { %13490 = vmatprep.subr.bf16.mxu0 %v17797_v4  ;;  %14135 = vmatprep.subr.bf16.mxu1 %v17799_v5  ;;  %v673_v3 = vld [vmem:[%s21550_s14 + $0x538] sm:$0xff]  ;;  %v17852_v4 = vcombine.low %v660_v55, %v664_v56  ;;  %v17854_v5 = vcombine.low %v661_v58, %v665_v59  ;;  %v724_v56 = vld [vmem:[%s21550_s14 + $0x6d0] sm:$0xff] }
 0x4e3   : > { %v17863_v7 = vcombine.high %v669_v2, %v673_v3  ;;  %v725_v58 = vld [vmem:[%s21550_s14 + $0x6d8] sm:$0xff] }
 0x4e4   : > { %v729_v59 = vld [vmem:[%s21550_s14 + $0x6f8] sm:$0xff] }
 0x4e5   : > { %13491 = vmatpush1.bf16.msra.mxu0 %v17796_v10  ;;  %14136 = vmatpush1.bf16.msra.mxu1 %v17798_v11  ;;  %v677_v10 = vld [vmem:[%s21550_s14 + $0x558] sm:$0xff] }
 0x4e6   : > { %13492 = vmatprep.subr.bf16.mxu0 %v17805_v12  ;;  %14137 = vmatprep.subr.bf16.mxu1 %v17807_v13  ;;  %v681_v11 = vld [vmem:[%s21550_s14 + $0x578] sm:$0xff]  ;;  %v17860_v12 = vcombine.low %v668_v0, %v672_v1  ;;  %v17862_v13 = vcombine.low %v669_v2, %v673_v3  ;;  %v732_v0 = vld [vmem:[%s21550_s14 + $0x710] sm:$0xff] }
 0x4e7   : > { %v17871_v15 = vcombine.high %v677_v10, %v681_v11  ;;  %v736_v1 = vld [vmem:[%s21550_s14 + $0x730] sm:$0xff]  ;;  %v733_v2 = vld [vmem:[%s21550_s14 + $0x718] sm:$0xff] }
 0x4e8   : > { %v737_v3 = vld [vmem:[%s21550_s14 + $0x738] sm:$0xff] }
 0x4e9   : > { %13493 = vmatpush1.bf16.msra.mxu0 %v17804_v18  ;;  %14138 = vmatpush1.bf16.msra.mxu1 %v17806_v19  ;;  %v685_v18 = vld [vmem:[%s21550_s14 + $0x598] sm:$0xff] }
 0x4ea   : > { %13494 = vmatprep.subr.bf16.mxu0 %v17813_v20  ;;  %14139 = vmatprep.subr.bf16.mxu1 %v17815_v21  ;;  %v689_v19 = vld [vmem:[%s21550_s14 + $0x5b8] sm:$0xff]  ;;  %v17868_v20 = vcombine.low %v676_v8, %v680_v9  ;;  %v17870_v21 = vcombine.low %v677_v10, %v681_v11  ;;  %v740_v8 = vld [vmem:[%s21550_s14 + $0x750] sm:$0xff] }
 0x4eb   : > { %v17879_v23 = vcombine.high %v685_v18, %v689_v19  ;;  %v744_v9 = vld [vmem:[%s21550_s14 + $0x770] sm:$0xff]  ;;  %v741_v10 = vld [vmem:[%s21550_s14 + $0x758] sm:$0xff] }
 0x4ec   : > { %v745_v11 = vld [vmem:[%s21550_s14 + $0x778] sm:$0xff] }
 0x4ed   : > { %13495 = vmatpush1.bf16.msra.mxu0 %v17812_v26  ;;  %14140 = vmatpush1.bf16.msra.mxu1 %v17814_v27  ;;  %v693_v26 = vld [vmem:[%s21550_s14 + $0x5d8] sm:$0xff] }
 0x4ee   : > { %13496 = vmatprep.subr.bf16.mxu0 %v17821_v28  ;;  %14141 = vmatprep.subr.bf16.mxu1 %v17823_v29  ;;  %v697_v27 = vld [vmem:[%s21550_s14 + $0x5f8] sm:$0xff]  ;;  %v17876_v28 = vcombine.low %v684_v16, %v688_v17  ;;  %v17878_v29 = vcombine.low %v685_v18, %v689_v19  ;;  %v748_v16 = vld [vmem:[%s21550_s14 + $0x790] sm:$0xff] }
 0x4ef   : > { %v17887_v31 = vcombine.high %v693_v26, %v697_v27  ;;  %v752_v17 = vld [vmem:[%s21550_s14 + $0x7b0] sm:$0xff]  ;;  %v749_v18 = vld [vmem:[%s21550_s14 + $0x798] sm:$0xff] }
 0x4f0   : > { %v753_v19 = vld [vmem:[%s21550_s14 + $0x7b8] sm:$0xff] }
 0x4f1   : > { %13497 = vmatpush1.bf16.msra.mxu0 %v17820_v34  ;;  %14142 = vmatpush1.bf16.msra.mxu1 %v17822_v35  ;;  %v701_v34 = vld [vmem:[%s21550_s14 + $0x618] sm:$0xff] }
 0x4f2   : > { %13509 = vmatprep.subr.bf16.mxu0 %v17829_v36  ;;  %14154 = vmatprep.subr.bf16.mxu1 %v17831_v37  ;;  %v705_v35 = vld [vmem:[%s21550_s14 + $0x638] sm:$0xff]  ;;  %v17884_v36 = vcombine.low %v692_v24, %v696_v25  ;;  %v17886_v37 = vcombine.low %v693_v26, %v697_v27  ;;  %v756_v24 = vld [vmem:[%s21550_s14 + $0x7d0] sm:$0xff] }
 0x4f3   : > { %v17895_v39 = vcombine.high %v701_v34, %v705_v35  ;;  %v760_v25 = vld [vmem:[%s21550_s14 + $0x7f0] sm:$0xff]  ;;  %v757_v26 = vld [vmem:[%s21550_s14 + $0x7d8] sm:$0xff] }
 0x4f4   : > { %13499 = vmatmul.mubr.bf16.vlgmr.msra.gmra.mrb[4].mxu0 %v20412_v48  ;;  %14144 = vmatmul.mubr.bf16.vlgmr.msra.gmra.mrb[4].mxu1 %v20412_v48  ;;  %v716_v48 = vld [vmem:[%s21550_s14 + $0x690] sm:$0xff]  ;;  %v761_v27 = vld [vmem:[%s21550_s14 + $0x7f8] sm:$0xff] }
 0x4f5   : > { %13510 = vmatpush1.bf16.msra.mxu0 %v17828_v42  ;;  %14155 = vmatpush1.bf16.msra.mxu1 %v17830_v43  ;;  %v709_v42 = vld [vmem:[%s21550_s14 + $0x658] sm:$0xff] }
 0x4f6   : > { %13511 = vmatprep.subr.bf16.mxu0 %v17837_v44  ;;  %14156 = vmatprep.subr.bf16.mxu1 %v17839_v45  ;;  %v713_v43 = vld [vmem:[%s21550_s14 + $0x678] sm:$0xff]  ;;  %v17892_v44 = vcombine.low %v700_v32, %v704_v33  ;;  %v17894_v45 = vcombine.low %v701_v34, %v705_v35  ;;  %v764_v32 = vld [vmem:[%s21550_s14 + $0x810] sm:$0xff] }
 0x4f7   : > { %13541 = vmatprep.mubr.bf16.mxu0 %v20413_v57  ;;  %14186 = vmatprep.mubr.bf16.mxu1 %v20413_v57  ;;  %v17903_v47 = vcombine.high %v709_v42, %v713_v43  ;;  %v728_v57 = vld [vmem:[%s21550_s14 + $0x6f0] sm:$0xff]  ;;  %v765_v34 = vld [vmem:[%s21550_s14 + $0x818] sm:$0xff] }
 0x4f8   : > { %v768_v33 = vld [vmem:[%s21550_s14 + $0x830] sm:$0xff]  ;;  %v769_v35 = vld [vmem:[%s21550_s14 + $0x838] sm:$0xff] }
 0x4f9   : > { %13512 = vmatpush1.bf16.msra.mxu0 %v17836_v51  ;;  %14157 = vmatpush1.bf16.msra.mxu1 %v17838_v52  ;;  %v721_v51 = vld [vmem:[%s21550_s14 + $0x6b8] sm:$0xff]  ;;  %v17900_v52 = vcombine.low %v708_v40, %v712_v41  ;;  %v772_v40 = vld [vmem:[%s21550_s14 + $0x850] sm:$0xff] }
 0x4fa   : > { %13513 = vmatprep.subr.bf16.mxu0 %v17845_v53  ;;  %14158 = vmatprep.subr.bf16.mxu1 %v17847_v54  ;;  %v17902_v53 = vcombine.low %v709_v42, %v713_v43  ;;  %v17909_v54 = vcombine.high %v716_v48, %v720_v49  ;;  %v17911_v55 = vcombine.high %v717_v50, %v721_v51  ;;  %v776_v41 = vld [vmem:[%s21550_s14 + $0x870] sm:$0xff]  ;;  %v773_v42 = vld [vmem:[%s21550_s14 + $0x858] sm:$0xff] }
 0x4fb   : > { %v777_v43 = vld [vmem:[%s21550_s14 + $0x878] sm:$0xff] }
 0x4fd   : > { %13514 = vmatpush1.bf16.msra.mxu0 %v17844_v60  ;;  %14159 = vmatpush1.bf16.msra.mxu1 %v17846_v61  ;;  %v17908_v60 = vcombine.low %v716_v48, %v720_v49  ;;  %v17910_v61 = vcombine.low %v717_v50, %v721_v51  ;;  %v780_v48 = vld [vmem:[%s21550_s14 + $0x890] sm:$0xff]  ;;  %v20414_v50 = vld [vmem:[%s21606_s12 + $0x8] ss:$240 sps:$4 sm:$0xff]  }
 0x4fe   : > { %13515 = vmatprep.subr.bf16.mxu0 %v17853_v62  ;;  %14160 = vmatprep.subr.bf16.mxu1 %v17855_v63  ;;  %v17917_v62 = vcombine.high %v724_v56, %v728_v57  ;;  %v17919_v63 = vcombine.high %v725_v58, %v729_v59  ;;  %v784_v49 = vld [vmem:[%s21550_s14 + $0x8b0] sm:$0xff]  ;;  %v781_v51 = vld [vmem:[%s21550_s14 + $0x898] sm:$0xff] }
 0x501   : > { %13516 = vmatpush1.bf16.msra.mxu0 %v17852_v4  ;;  %14161 = vmatpush1.bf16.msra.mxu1 %v17854_v5  ;;  %v17916_v4 = vcombine.low %v724_v56, %v728_v57  ;;  %v17918_v5 = vcombine.low %v725_v58, %v729_v59  ;;  %v788_v57 = vld [vmem:[%s21550_s14 + $0x8d0] sm:$0xff] }
 0x502   : > { %13517 = vmatprep.subr.bf16.mxu0 %v17861_v6  ;;  %14162 = vmatprep.subr.bf16.mxu1 %v17863_v7  ;;  %v17925_v6 = vcombine.high %v732_v0, %v736_v1  ;;  %v17927_v7 = vcombine.high %v733_v2, %v737_v3  ;;  %v792_v58 = vld [vmem:[%s21550_s14 + $0x8f0] sm:$0xff] }
 0x503   : > { %v20415_v59 = vld [vmem:[%s21606_s12 + $0x14] ss:$240 sps:$4 sm:$0xff]  }
 0x505   : > { %13518 = vmatpush1.bf16.msra.mxu0 %v17860_v12  ;;  %14163 = vmatpush1.bf16.msra.mxu1 %v17862_v13  ;;  %v17924_v12 = vcombine.low %v732_v0, %v736_v1  ;;  %v17926_v13 = vcombine.low %v733_v2, %v737_v3  ;;  %v17981_v0 = vcombine.high %v788_v57, %v792_v58  ;;  %v796_v2 = vld [vmem:[%s21550_s14 + $0x910] sm:$0xff] }
 0x506   : > { %13519 = vmatprep.subr.bf16.mxu0 %v17869_v14  ;;  %14164 = vmatprep.subr.bf16.mxu1 %v17871_v15  ;;  %v17933_v14 = vcombine.high %v740_v8, %v744_v9  ;;  %v17935_v15 = vcombine.high %v741_v10, %v745_v11  ;;  %v800_v3 = vld [vmem:[%s21550_s14 + $0x930] sm:$0xff] }
 0x509   : > { %13520 = vmatpush1.bf16.msra.mxu0 %v17868_v20  ;;  %14165 = vmatpush1.bf16.msra.mxu1 %v17870_v21  ;;  %v17932_v20 = vcombine.low %v740_v8, %v744_v9  ;;  %v17934_v21 = vcombine.low %v741_v10, %v745_v11  ;;  %v17989_v8 = vcombine.high %v796_v2, %v800_v3  ;;  %v804_v10 = vld [vmem:[%s21550_s14 + $0x950] sm:$0xff] }
 0x50a   : > { %13521 = vmatprep.subr.bf16.mxu0 %v17877_v22  ;;  %14166 = vmatprep.subr.bf16.mxu1 %v17879_v23  ;;  %v17941_v22 = vcombine.high %v748_v16, %v752_v17  ;;  %v17943_v23 = vcombine.high %v749_v18, %v753_v19  ;;  %v808_v11 = vld [vmem:[%s21550_s14 + $0x970] sm:$0xff] }
 0x50d   : > { %13522 = vmatpush1.bf16.msra.mxu0 %v17876_v28  ;;  %14167 = vmatpush1.bf16.msra.mxu1 %v17878_v29  ;;  %v17940_v28 = vcombine.low %v748_v16, %v752_v17  ;;  %v17942_v29 = vcombine.low %v749_v18, %v753_v19  ;;  %v17997_v16 = vcombine.high %v804_v10, %v808_v11  ;;  %v812_v18 = vld [vmem:[%s21550_s14 + $0x990] sm:$0xff] }
 0x50e   : > { %13523 = vmatprep.subr.bf16.mxu0 %v17885_v30  ;;  %14168 = vmatprep.subr.bf16.mxu1 %v17887_v31  ;;  %v17949_v30 = vcombine.high %v756_v24, %v760_v25  ;;  %v17951_v31 = vcombine.high %v757_v26, %v761_v27  ;;  %v816_v19 = vld [vmem:[%s21550_s14 + $0x9b0] sm:$0xff] }
 0x511   : > { %13524 = vmatpush1.bf16.msra.mxu0 %v17884_v36  ;;  %14169 = vmatpush1.bf16.msra.mxu1 %v17886_v37  ;;  %v17948_v36 = vcombine.low %v756_v24, %v760_v25  ;;  %v17950_v37 = vcombine.low %v757_v26, %v761_v27  ;;  %v18005_v24 = vcombine.high %v812_v18, %v816_v19  ;;  %v820_v26 = vld [vmem:[%s21550_s14 + $0x9d0] sm:$0xff] }
 0x512   : > { %13525 = vmatprep.subr.bf16.mxu0 %v17893_v38  ;;  %14170 = vmatprep.subr.bf16.mxu1 %v17895_v39  ;;  %v17957_v38 = vcombine.high %v764_v32, %v768_v33  ;;  %v17959_v39 = vcombine.high %v765_v34, %v769_v35  ;;  %v824_v27 = vld [vmem:[%s21550_s14 + $0x9f0] sm:$0xff] }
 0x515   : > { %13526 = vmatpush1.bf16.msra.mxu0 %v17892_v44  ;;  %14171 = vmatpush1.bf16.msra.mxu1 %v17894_v45  ;;  %v17956_v44 = vcombine.low %v764_v32, %v768_v33  ;;  %v17958_v45 = vcombine.low %v765_v34, %v769_v35  ;;  %v18013_v32 = vcombine.high %v820_v26, %v824_v27  ;;  %v828_v34 = vld [vmem:[%s21550_s14 + $0xa10] sm:$0xff] }
 0x516   : > { %13527 = vmatprep.subr.bf16.mxu0 %v17901_v46  ;;  %14172 = vmatprep.subr.bf16.mxu1 %v17903_v47  ;;  %v17965_v46 = vcombine.high %v772_v40, %v776_v41  ;;  %v17967_v47 = vcombine.high %v773_v42, %v777_v43  ;;  %v832_v35 = vld [vmem:[%s21550_s14 + $0xa30] sm:$0xff] }
 0x519   : > { %13528 = vmatpush1.bf16.msra.mxu0 %v17900_v52  ;;  %14173 = vmatpush1.bf16.msra.mxu1 %v17902_v53  ;;  %v785_v52 = vld [vmem:[%s21550_s14 + $0x8b8] sm:$0xff]  ;;  %v17964_v53 = vcombine.low %v772_v40, %v776_v41  ;;  %v18021_v40 = vcombine.high %v828_v34, %v832_v35 }
 0x51a   : > { %13529 = vmatprep.subr.bf16.mxu0 %v17909_v54  ;;  %14174 = vmatprep.subr.bf16.mxu1 %v17911_v55  ;;  %v17966_v54 = vcombine.low %v773_v42, %v777_v43  ;;  %v17973_v55 = vcombine.high %v780_v48, %v784_v49  ;;  %v17975_v56 = vcombine.high %v781_v51, %v785_v52  ;;  %v836_v42 = vld [vmem:[%s21550_s14 + $0xa50] sm:$0xff] }
 0x51b   : > { %v840_v43 = vld [vmem:[%s21550_s14 + $0xa70] sm:$0xff] }
 0x51d   : > { %13530 = vmatpush1.bf16.msra.mxu0 %v17908_v60  ;;  %14175 = vmatpush1.bf16.msra.mxu1 %v17910_v61  ;;  %v789_v60 = vld [vmem:[%s21550_s14 + $0x8d8] sm:$0xff] }
 0x51e   : > { %13531 = vmatprep.subr.bf16.mxu0 %v17917_v62  ;;  %14176 = vmatprep.subr.bf16.mxu1 %v17919_v63  ;;  %v793_v61 = vld [vmem:[%s21550_s14 + $0x8f8] sm:$0xff]  ;;  %v17972_v62 = vcombine.low %v780_v48, %v784_v49  ;;  %v17974_v63 = vcombine.low %v781_v51, %v785_v52  ;;  %v18029_v48 = vcombine.high %v836_v42, %v840_v43  ;;  %v848_v51 = vld [vmem:[%s21550_s14 + $0xab0] sm:$0xff] }
 0x51f   : > { %v17983_v1 = vcombine.high %v789_v60, %v793_v61  ;;  %v845_v52 = vld [vmem:[%s21550_s14 + $0xa98] sm:$0xff] }
 0x521   : > { %13532 = vmatpush1.bf16.msra.mxu0 %v17916_v4  ;;  %14177 = vmatpush1.bf16.msra.mxu1 %v17918_v5  ;;  %v797_v4 = vld [vmem:[%s21550_s14 + $0x918] sm:$0xff] }
 0x522   : > { %13533 = vmatprep.subr.bf16.mxu0 %v17925_v6  ;;  %14178 = vmatprep.subr.bf16.mxu1 %v17927_v7  ;;  %v801_v5 = vld [vmem:[%s21550_s14 + $0x938] sm:$0xff]  ;;  %v17980_v6 = vcombine.low %v788_v57, %v792_v58  ;;  %v17982_v7 = vcombine.low %v789_v60, %v793_v61  ;;  %v852_v58 = vld [vmem:[%s21550_s14 + $0xad0] sm:$0xff] }
 0x523   : > { %v17991_v9 = vcombine.high %v797_v4, %v801_v5  ;;  %v853_v60 = vld [vmem:[%s21550_s14 + $0xad8] sm:$0xff] }
 0x524   : > { %v857_v61 = vld [vmem:[%s21550_s14 + $0xaf8] sm:$0xff] }
 0x525   : > { %13534 = vmatpush1.bf16.msra.mxu0 %v17924_v12  ;;  %14179 = vmatpush1.bf16.msra.mxu1 %v17926_v13  ;;  %v805_v12 = vld [vmem:[%s21550_s14 + $0x958] sm:$0xff] }
 0x526   : > { %13535 = vmatprep.subr.bf16.mxu0 %v17933_v14  ;;  %14180 = vmatprep.subr.bf16.mxu1 %v17935_v15  ;;  %v809_v13 = vld [vmem:[%s21550_s14 + $0x978] sm:$0xff]  ;;  %v17988_v14 = vcombine.low %v796_v2, %v800_v3  ;;  %v17990_v15 = vcombine.low %v797_v4, %v801_v5  ;;  %v860_v2 = vld [vmem:[%s21550_s14 + $0xb10] sm:$0xff] }
 0x527   : > { %v17999_v17 = vcombine.high %v805_v12, %v809_v13  ;;  %v864_v3 = vld [vmem:[%s21550_s14 + $0xb30] sm:$0xff]  ;;  %v861_v4 = vld [vmem:[%s21550_s14 + $0xb18] sm:$0xff] }
 0x528   : > { %v865_v5 = vld [vmem:[%s21550_s14 + $0xb38] sm:$0xff] }
 0x529   : > { %13536 = vmatpush1.bf16.msra.mxu0 %v17932_v20  ;;  %14181 = vmatpush1.bf16.msra.mxu1 %v17934_v21  ;;  %v813_v20 = vld [vmem:[%s21550_s14 + $0x998] sm:$0xff] }
 0x52a   : > { %13537 = vmatprep.subr.bf16.mxu0 %v17941_v22  ;;  %14182 = vmatprep.subr.bf16.mxu1 %v17943_v23  ;;  %v817_v21 = vld [vmem:[%s21550_s14 + $0x9b8] sm:$0xff]  ;;  %v17996_v22 = vcombine.low %v804_v10, %v808_v11  ;;  %v17998_v23 = vcombine.low %v805_v12, %v809_v13  ;;  %v868_v10 = vld [vmem:[%s21550_s14 + $0xb50] sm:$0xff] }
 0x52b   : > { %v18007_v25 = vcombine.high %v813_v20, %v817_v21  ;;  %v872_v11 = vld [vmem:[%s21550_s14 + $0xb70] sm:$0xff]  ;;  %v869_v12 = vld [vmem:[%s21550_s14 + $0xb58] sm:$0xff] }
 0x52c   : > { %v873_v13 = vld [vmem:[%s21550_s14 + $0xb78] sm:$0xff] }
 0x52d   : > { %13538 = vmatpush1.bf16.msra.mxu0 %v17940_v28  ;;  %14183 = vmatpush1.bf16.msra.mxu1 %v17942_v29  ;;  %v821_v28 = vld [vmem:[%s21550_s14 + $0x9d8] sm:$0xff] }
 0x52e   : > { %13539 = vmatprep.subr.bf16.mxu0 %v17949_v30  ;;  %14184 = vmatprep.subr.bf16.mxu1 %v17951_v31  ;;  %v825_v29 = vld [vmem:[%s21550_s14 + $0x9f8] sm:$0xff]  ;;  %v18004_v30 = vcombine.low %v812_v18, %v816_v19  ;;  %v18006_v31 = vcombine.low %v813_v20, %v817_v21  ;;  %v876_v18 = vld [vmem:[%s21550_s14 + $0xb90] sm:$0xff] }
 0x52f   : > { %v18015_v33 = vcombine.high %v821_v28, %v825_v29  ;;  %v880_v19 = vld [vmem:[%s21550_s14 + $0xbb0] sm:$0xff]  ;;  %v877_v20 = vld [vmem:[%s21550_s14 + $0xb98] sm:$0xff] }
 0x530   : > { %v881_v21 = vld [vmem:[%s21550_s14 + $0xbb8] sm:$0xff] }
 0x531   : > { %13540 = vmatpush1.bf16.msra.mxu0 %v17948_v36  ;;  %14185 = vmatpush1.bf16.msra.mxu1 %v17950_v37  ;;  %v829_v36 = vld [vmem:[%s21550_s14 + $0xa18] sm:$0xff] }
 0x532   : > { %13552 = vmatprep.subr.bf16.mxu0 %v17957_v38  ;;  %14197 = vmatprep.subr.bf16.mxu1 %v17959_v39  ;;  %v833_v37 = vld [vmem:[%s21550_s14 + $0xa38] sm:$0xff]  ;;  %v18012_v38 = vcombine.low %v820_v26, %v824_v27  ;;  %v18014_v39 = vcombine.low %v821_v28, %v825_v29  ;;  %v884_v26 = vld [vmem:[%s21550_s14 + $0xbd0] sm:$0xff] }
 0x533   : > { %v18023_v41 = vcombine.high %v829_v36, %v833_v37  ;;  %v888_v27 = vld [vmem:[%s21550_s14 + $0xbf0] sm:$0xff]  ;;  %v885_v28 = vld [vmem:[%s21550_s14 + $0xbd8] sm:$0xff] }
 0x534   : > { %13542 = vmatmul.mubr.bf16.vlgmr.msra.gmra.mrb[4].mxu0 %v20414_v50  ;;  %14187 = vmatmul.mubr.bf16.vlgmr.msra.gmra.mrb[4].mxu1 %v20414_v50  ;;  %v844_v50 = vld [vmem:[%s21550_s14 + $0xa90] sm:$0xff]  ;;  %v889_v29 = vld [vmem:[%s21550_s14 + $0xbf8] sm:$0xff] }
 0x535   : > { %13553 = vmatpush1.bf16.msra.mxu0 %v17956_v44  ;;  %14198 = vmatpush1.bf16.msra.mxu1 %v17958_v45  ;;  %v837_v44 = vld [vmem:[%s21550_s14 + $0xa58] sm:$0xff] }
 0x536   : > { %13554 = vmatprep.subr.bf16.mxu0 %v17965_v46  ;;  %14199 = vmatprep.subr.bf16.mxu1 %v17967_v47  ;;  %v841_v45 = vld [vmem:[%s21550_s14 + $0xa78] sm:$0xff]  ;;  %v18020_v46 = vcombine.low %v828_v34, %v832_v35  ;;  %v18022_v47 = vcombine.low %v829_v36, %v833_v37  ;;  %v892_v34 = vld [vmem:[%s21550_s14 + $0xc10] sm:$0xff] }
 0x537   : > { %13584 = vmatprep.mubr.bf16.mxu0 %v20415_v59  ;;  %14229 = vmatprep.mubr.bf16.mxu1 %v20415_v59  ;;  %v18031_v49 = vcombine.high %v837_v44, %v841_v45  ;;  %v856_v59 = vld [vmem:[%s21550_s14 + $0xaf0] sm:$0xff]  ;;  %v893_v36 = vld [vmem:[%s21550_s14 + $0xc18] sm:$0xff] }
 0x538   : > { %v896_v35 = vld [vmem:[%s21550_s14 + $0xc30] sm:$0xff]  ;;  %v897_v37 = vld [vmem:[%s21550_s14 + $0xc38] sm:$0xff] }
 0x539   : > { %13555 = vmatpush1.bf16.msra.mxu0 %v17964_v53  ;;  %14200 = vmatpush1.bf16.msra.mxu1 %v17966_v54  ;;  %v849_v53 = vld [vmem:[%s21550_s14 + $0xab8] sm:$0xff]  ;;  %v18028_v54 = vcombine.low %v836_v42, %v840_v43  ;;  %v900_v42 = vld [vmem:[%s21550_s14 + $0xc50] sm:$0xff] }
 0x53a   : > { %13556 = vmatprep.subr.bf16.mxu0 %v17973_v55  ;;  %14201 = vmatprep.subr.bf16.mxu1 %v17975_v56  ;;  %v18030_v55 = vcombine.low %v837_v44, %v841_v45  ;;  %v18037_v56 = vcombine.high %v844_v50, %v848_v51  ;;  %v18039_v57 = vcombine.high %v845_v52, %v849_v53  ;;  %v904_v43 = vld [vmem:[%s21550_s14 + $0xc70] sm:$0xff]  ;;  %v901_v44 = vld [vmem:[%s21550_s14 + $0xc58] sm:$0xff] }
 0x53b   : > { %v905_v45 = vld [vmem:[%s21550_s14 + $0xc78] sm:$0xff] }
 0x53d   : > { %13557 = vmatpush1.bf16.msra.mxu0 %v17972_v62  ;;  %14202 = vmatpush1.bf16.msra.mxu1 %v17974_v63  ;;  %v18036_v62 = vcombine.low %v844_v50, %v848_v51  ;;  %v18038_v63 = vcombine.low %v845_v52, %v849_v53  ;;  %v908_v50 = vld [vmem:[%s21550_s14 + $0xc90] sm:$0xff]  ;;  %v909_v53 = vld [vmem:[%s21550_s14 + $0xc98] sm:$0xff] }
 0x53e   : > { %13558 = vmatprep.subr.bf16.mxu0 %v17981_v0  ;;  %14203 = vmatprep.subr.bf16.mxu1 %v17983_v1  ;;  %v18045_v0 = vcombine.high %v852_v58, %v856_v59  ;;  %v18047_v1 = vcombine.high %v853_v60, %v857_v61  ;;  %v912_v51 = vld [vmem:[%s21550_s14 + $0xcb0] sm:$0xff] }
 0x53f   : > { %v20416_v52 = vld [vmem:[%s21606_s12 + $0x10] ss:$240 sps:$4 sm:$0xff]  }
 0x541   : > { %13559 = vmatpush1.bf16.msra.mxu0 %v17980_v6  ;;  %14204 = vmatpush1.bf16.msra.mxu1 %v17982_v7  ;;  %v18044_v6 = vcombine.low %v852_v58, %v856_v59  ;;  %v18046_v7 = vcombine.low %v853_v60, %v857_v61  ;;  %v916_v59 = vld [vmem:[%s21550_s14 + $0xcd0] sm:$0xff]  ;;  %v20417_v61 = vld [vmem:[%s21606_s12 + $0x1c] ss:$240 sps:$4 sm:$0xff]  }
 0x542   : > { %13560 = vmatprep.subr.bf16.mxu0 %v17989_v8  ;;  %14205 = vmatprep.subr.bf16.mxu1 %v17991_v9  ;;  %v18053_v8 = vcombine.high %v860_v2, %v864_v3  ;;  %v18055_v9 = vcombine.high %v861_v4, %v865_v5  ;;  %v920_v60 = vld [vmem:[%s21550_s14 + $0xcf0] sm:$0xff] }
 0x545   : > { %13561 = vmatpush1.bf16.msra.mxu0 %v17988_v14  ;;  %14206 = vmatpush1.bf16.msra.mxu1 %v17990_v15  ;;  %v18052_v14 = vcombine.low %v860_v2, %v864_v3  ;;  %v18054_v15 = vcombine.low %v861_v4, %v865_v5  ;;  %v18109_v2 = vcombine.high %v916_v59, %v920_v60  ;;  %v924_v4 = vld [vmem:[%s21550_s14 + $0xd10] sm:$0xff] }
 0x546   : > { %13562 = vmatprep.subr.bf16.mxu0 %v17997_v16  ;;  %14207 = vmatprep.subr.bf16.mxu1 %v17999_v17  ;;  %v18061_v16 = vcombine.high %v868_v10, %v872_v11  ;;  %v18063_v17 = vcombine.high %v869_v12, %v873_v13  ;;  %v928_v5 = vld [vmem:[%s21550_s14 + $0xd30] sm:$0xff] }
 0x549   : > { %13563 = vmatpush1.bf16.msra.mxu0 %v17996_v22  ;;  %14208 = vmatpush1.bf16.msra.mxu1 %v17998_v23  ;;  %v18060_v22 = vcombine.low %v868_v10, %v872_v11  ;;  %v18062_v23 = vcombine.low %v869_v12, %v873_v13  ;;  %v18117_v10 = vcombine.high %v924_v4, %v928_v5  ;;  %v932_v12 = vld [vmem:[%s21550_s14 + $0xd50] sm:$0xff] }
 0x54a   : > { %13564 = vmatprep.subr.bf16.mxu0 %v18005_v24  ;;  %14209 = vmatprep.subr.bf16.mxu1 %v18007_v25  ;;  %v18069_v24 = vcombine.high %v876_v18, %v880_v19  ;;  %v18071_v25 = vcombine.high %v877_v20, %v881_v21  ;;  %v936_v13 = vld [vmem:[%s21550_s14 + $0xd70] sm:$0xff] }
 0x54d   : > { %13565 = vmatpush1.bf16.msra.mxu0 %v18004_v30  ;;  %14210 = vmatpush1.bf16.msra.mxu1 %v18006_v31  ;;  %v18068_v30 = vcombine.low %v876_v18, %v880_v19  ;;  %v18070_v31 = vcombine.low %v877_v20, %v881_v21  ;;  %v18125_v18 = vcombine.high %v932_v12, %v936_v13  ;;  %v940_v20 = vld [vmem:[%s21550_s14 + $0xd90] sm:$0xff] }
 0x54e   : > { %13566 = vmatprep.subr.bf16.mxu0 %v18013_v32  ;;  %14211 = vmatprep.subr.bf16.mxu1 %v18015_v33  ;;  %v18077_v32 = vcombine.high %v884_v26, %v888_v27  ;;  %v18079_v33 = vcombine.high %v885_v28, %v889_v29  ;;  %v944_v21 = vld [vmem:[%s21550_s14 + $0xdb0] sm:$0xff] }
 0x551   : > { %13567 = vmatpush1.bf16.msra.mxu0 %v18012_v38  ;;  %14212 = vmatpush1.bf16.msra.mxu1 %v18014_v39  ;;  %v18076_v38 = vcombine.low %v884_v26, %v888_v27  ;;  %v18078_v39 = vcombine.low %v885_v28, %v889_v29  ;;  %v18124_v26 = vcombine.low %v932_v12, %v936_v13  ;;  %v491_v27 = vld [vmem:[#allocation2 + $0x8] sm:$0xff]  ;;  %v493_v28 = vld [vmem:[#allocation2 + $0x18] sm:$0xff]  ;;  %v972_v12 = vld [vmem:[%s21550_s14 + $0xe90] sm:$0xff] }
 0x552   : > { %13568 = vmatprep.subr.bf16.mxu0 %v18021_v40  ;;  %14213 = vmatprep.subr.bf16.mxu1 %v18023_v41  ;;  %v18085_v40 = vcombine.high %v892_v34, %v896_v35  ;;  %v18087_v41 = vcombine.high %v893_v36, %v897_v37  ;;  %v976_v13 = vld [vmem:[%s21550_s14 + $0xeb0] sm:$0xff] }
 0x555   : > { %13569 = vmatpush1.bf16.msra.mxu0 %v18020_v46  ;;  %14214 = vmatpush1.bf16.msra.mxu1 %v18022_v47  ;;  %v18084_v46 = vcombine.low %v892_v34, %v896_v35  ;;  %v18086_v47 = vcombine.low %v893_v36, %v897_v37  ;;  %v948_v35 = vld [vmem:[%s21550_s14 + $0xdd0] sm:$0xff] }
 0x556   : > { %13570 = vmatprep.subr.bf16.mxu0 %v18029_v48  ;;  %14215 = vmatprep.subr.bf16.mxu1 %v18031_v49  ;;  %v18093_v48 = vcombine.high %v900_v42, %v904_v43  ;;  %v18095_v49 = vcombine.high %v901_v44, %v905_v45  ;;  %v952_v36 = vld [vmem:[%s21550_s14 + $0xdf0] sm:$0xff] }
 0x559   : > { %13571 = vmatpush1.bf16.msra.mxu0 %v18028_v54  ;;  %14216 = vmatpush1.bf16.msra.mxu1 %v18030_v55  ;;  %v913_v54 = vld [vmem:[%s21550_s14 + $0xcb8] sm:$0xff]  ;;  %v18092_v55 = vcombine.low %v900_v42, %v904_v43 }
 0x55a   : > { %13572 = vmatprep.subr.bf16.mxu0 %v18037_v56  ;;  %14217 = vmatprep.subr.bf16.mxu1 %v18039_v57  ;;  %v18094_v56 = vcombine.low %v901_v44, %v905_v45  ;;  %v18101_v57 = vcombine.high %v908_v50, %v912_v51  ;;  %v18103_v58 = vcombine.high %v909_v53, %v913_v54  ;;  %v953_v42 = vld [vmem:[%s21550_s14 + $0xdf8] sm:$0xff] }
 0x55d   : > { %13573 = vmatpush1.bf16.msra.mxu0 %v18036_v62  ;;  %14218 = vmatpush1.bf16.msra.mxu1 %v18038_v63  ;;  %v917_v62 = vld [vmem:[%s21550_s14 + $0xcd8] sm:$0xff] }
 0x55e   : > { %13574 = vmatprep.subr.bf16.mxu0 %v18045_v0  ;;  %14219 = vmatprep.subr.bf16.mxu1 %v18047_v1  ;;  %v921_v63 = vld [vmem:[%s21550_s14 + $0xcf8] sm:$0xff]  ;;  %v18100_v0 = vcombine.low %v908_v50, %v912_v51  ;;  %v18102_v1 = vcombine.low %v909_v53, %v913_v54  ;;  %v18141_v54 = vcombine.high %v948_v35, %v952_v36 }
 0x55f   : > { %v18111_v3 = vcombine.high %v917_v62, %v921_v63 }
 0x561   : > { %13575 = vmatpush1.bf16.msra.mxu0 %v18044_v6  ;;  %14220 = vmatpush1.bf16.msra.mxu1 %v18046_v7  ;;  %v925_v6 = vld [vmem:[%s21550_s14 + $0xd18] sm:$0xff] }
 0x562   : > { %13576 = vmatprep.subr.bf16.mxu0 %v18053_v8  ;;  %14221 = vmatprep.subr.bf16.mxu1 %v18055_v9  ;;  %v929_v7 = vld [vmem:[%s21550_s14 + $0xd38] sm:$0xff]  ;;  %v18108_v8 = vcombine.low %v916_v59, %v920_v60  ;;  %v18110_v9 = vcombine.low %v917_v62, %v921_v63  ;;  %v956_v59 = vld [vmem:[%s21550_s14 + $0xe10] sm:$0xff] }
 0x563   : > { %v18119_v11 = vcombine.high %v925_v6, %v929_v7  ;;  %v960_v60 = vld [vmem:[%s21550_s14 + $0xe30] sm:$0xff]  ;;  %v957_v62 = vld [vmem:[%s21550_s14 + $0xe18] sm:$0xff] }
 0x564   : > { %v961_v63 = vld [vmem:[%s21550_s14 + $0xe38] sm:$0xff] }
 0x565   : > { %13577 = vmatpush1.bf16.msra.mxu0 %v18052_v14  ;;  %14222 = vmatpush1.bf16.msra.mxu1 %v18054_v15  ;;  %v933_v14 = vld [vmem:[%s21550_s14 + $0xd58] sm:$0xff] }
 0x566   : > { %13578 = vmatprep.subr.bf16.mxu0 %v18061_v16  ;;  %14223 = vmatprep.subr.bf16.mxu1 %v18063_v17  ;;  %v937_v15 = vld [vmem:[%s21550_s14 + $0xd78] sm:$0xff]  ;;  %v18116_v16 = vcombine.low %v924_v4, %v928_v5  ;;  %v18118_v17 = vcombine.low %v925_v6, %v929_v7  ;;  %v964_v4 = vld [vmem:[%s21550_s14 + $0xe50] sm:$0xff] }
 0x567   : > { %v18127_v19 = vcombine.high %v933_v14, %v937_v15  ;;  %v18126_v29 = vcombine.low %v933_v14, %v937_v15  ;;  %v968_v5 = vld [vmem:[%s21550_s14 + $0xe70] sm:$0xff]  ;;  %v965_v6 = vld [vmem:[%s21550_s14 + $0xe58] sm:$0xff] }
 0x568   : > { %v969_v7 = vld [vmem:[%s21550_s14 + $0xe78] sm:$0xff] }
 0x569   : > { %13579 = vmatpush1.bf16.msra.mxu0 %v18060_v22  ;;  %14224 = vmatpush1.bf16.msra.mxu1 %v18062_v23  ;;  %v941_v22 = vld [vmem:[%s21550_s14 + $0xd98] sm:$0xff] }
 0x56a   : > { %13580 = vmatprep.subr.bf16.mxu0 %v18069_v24  ;;  %14225 = vmatprep.subr.bf16.mxu1 %v18071_v25  ;;  %v945_v23 = vld [vmem:[%s21550_s14 + $0xdb8] sm:$0xff]  ;;  %v490_v24 = vld [vmem:[#allocation2] sm:$0xff]  ;;  %v492_v25 = vld [vmem:[#allocation2 + $0x10] sm:$0xff] }
 0x56b   : > { %v18135_v34 = vcombine.high %v941_v22, %v945_v23  ;;  %v973_v14 = vld [vmem:[%s21550_s14 + $0xe98] sm:$0xff] }
 0x56c   : > { %v977_v15 = vld [vmem:[%s21550_s14 + $0xeb8] sm:$0xff] }
 0x56d   : > { %13581 = vmatpush1.bf16.msra.mxu0 %v18068_v30  ;;  %14226 = vmatpush1.bf16.msra.mxu1 %v18070_v31  ;;  %v498_v30 = vld [vmem:[#allocation2 + $0x40] sm:$0xff]  ;;  %v18133_v31 = vcombine.high %v940_v20, %v944_v21 }
 0x56e   : > { %13582 = vmatprep.subr.bf16.mxu0 %v18077_v32  ;;  %14227 = vmatprep.subr.bf16.mxu1 %v18079_v33  ;;  %v500_v33 = vld [vmem:[#allocation2 + $0x50] sm:$0xff] }
 0x571   : > { %13583 = vmatpush1.bf16.msra.mxu0 %v18076_v38  ;;  %14228 = vmatpush1.bf16.msra.mxu1 %v18078_v39 }
 0x572   : > { %13595 = vmatprep.subr.bf16.mxu0 %v18085_v40  ;;  %14240 = vmatprep.subr.bf16.mxu1 %v18087_v41  ;;  %v499_v40 = vld [vmem:[#allocation2 + $0x48] sm:$0xff]  ;;  %v949_v41 = vld [vmem:[%s21550_s14 + $0xdd8] sm:$0xff] }
 0x574   : > { %13585 = vmatmul.mubr.bf16.vlgmr.msra.gmra.mrb[4].mxu0 %v20416_v52  ;;  %14230 = vmatmul.mubr.bf16.vlgmr.msra.gmra.mrb[4].mxu1 %v20416_v52 }
 0x575   : > { %13596 = vmatpush1.bf16.msra.mxu0 %v18084_v46  ;;  %14241 = vmatpush1.bf16.msra.mxu1 %v18086_v47  ;;  %v501_v47 = vld [vmem:[#allocation2 + $0x58] sm:$0xff] }
 0x576   : > { %13597 = vmatprep.subr.bf16.mxu0 %v18093_v48  ;;  %14242 = vmatprep.subr.bf16.mxu1 %v18095_v49  ;;  %v18132_v48 = vcombine.low %v940_v20, %v944_v21  ;;  %v18134_v49 = vcombine.low %v941_v22, %v945_v23  ;;  %v980_v20 = vld [vmem:[%s21550_s14 + $0xed0] sm:$0xff]  ;;  %v981_v22 = vld [vmem:[%s21550_s14 + $0xed8] sm:$0xff] }
 0x577   : > { %13627 = vmatprep.mubr.bf16.mxu0 %v20417_v61  ;;  %14272 = vmatprep.mubr.bf16.mxu1 %v20417_v61  ;;  %v984_v21 = vld [vmem:[%s21550_s14 + $0xef0] sm:$0xff]  ;;  %v985_v23 = vld [vmem:[%s21550_s14 + $0xef8] sm:$0xff] }
 0x579   : > { %13598 = vmatpush1.bf16.msra.mxu0 %v18092_v55  ;;  %14243 = vmatpush1.bf16.msra.mxu1 %v18094_v56 }
 0x57a   : > { %13599 = vmatprep.subr.bf16.mxu0 %v18101_v57  ;;  %14244 = vmatprep.subr.bf16.mxu1 %v18103_v58  ;;  %v18143_v58 = vcombine.high %v949_v41, %v953_v42 }
 0x57d   : > { %13600 = vmatpush1.bf16.msra.mxu0 %v18100_v0  ;;  %14245 = vmatpush1.bf16.msra.mxu1 %v18102_v1  ;;  %v18140_v0 = vcombine.low %v948_v35, %v952_v36  ;;  %v18142_v1 = vcombine.low %v949_v41, %v953_v42  ;;  %v996_v36 = vld [vmem:[%s21550_s14 + $0xf50] sm:$0xff] }
 0x57e   : > { %13601 = vmatprep.subr.bf16.mxu0 %v18109_v2  ;;  %14246 = vmatprep.subr.bf16.mxu1 %v18111_v3  ;;  %v18149_v2 = vcombine.high %v956_v59, %v960_v60  ;;  %v18151_v3 = vcombine.high %v957_v62, %v961_v63 }
 0x581   : > { %13602 = vmatpush1.bf16.msra.mxu0 %v18108_v8  ;;  %14247 = vmatpush1.bf16.msra.mxu1 %v18110_v9  ;;  %v18148_v8 = vcombine.low %v956_v59, %v960_v60  ;;  %v18150_v9 = vcombine.low %v957_v62, %v961_v63  ;;  %v1020_v60 = vld [vmem:[%s21550_s14 + $0x1010] sm:$0xff]  ;;  %v1021_v62 = vld [vmem:[%s21550_s14 + $0x1018] sm:$0xff] }
 0x582   : > { %13603 = vmatprep.subr.bf16.mxu0 %v18117_v10  ;;  %14248 = vmatprep.subr.bf16.mxu1 %v18119_v11  ;;  %v18157_v10 = vcombine.high %v964_v4, %v968_v5  ;;  %v18159_v11 = vcombine.high %v965_v6, %v969_v7  ;;  %v1025_v63 = vld [vmem:[%s21550_s14 + $0x1038] sm:$0xff] }
 0x585   : > { %13604 = vmatpush1.bf16.msra.mxu0 %v18116_v16  ;;  %14249 = vmatpush1.bf16.msra.mxu1 %v18118_v17  ;;  %v18156_v16 = vcombine.low %v964_v4, %v968_v5  ;;  %v18158_v17 = vcombine.low %v965_v6, %v969_v7  ;;  %v1028_v4 = vld [vmem:[%s21550_s14 + $0x1050] sm:$0xff]  ;;  %v1029_v6 = vld [vmem:[%s21550_s14 + $0x1058] sm:$0xff] }
 0x586   : > { %13605 = vmatprep.subr.bf16.mxu0 %v18125_v18  ;;  %14250 = vmatprep.subr.bf16.mxu1 %v18127_v19  ;;  %v18165_v18 = vcombine.high %v972_v12, %v976_v13  ;;  %v18167_v19 = vcombine.high %v973_v14, %v977_v15  ;;  %v1032_v5 = vld [vmem:[%s21550_s14 + $0x1070] sm:$0xff]  ;;  %v1033_v7 = vld [vmem:[%s21550_s14 + $0x1078] sm:$0xff] }
 0x587   : > { %v12812_v32 = vpop.f32.mrb[0].mxu0  ;;  %v13457_v38 = vpop.f32.mrb[0].mxu1 }
 0x588   : > { %v14756_v37 = vadd.f32 %v12812_v32, %v490_v24  ;;  %v12814_v39 = vpop.f32.mrb[1].mxu0  ;;  %v14758_v43 = vadd.f32 %v13457_v38, %v492_v25  ;;  %v13459_v45 = vpop.f32.mrb[1].mxu1  ;;  %v18164_v24 = vcombine.low %v972_v12, %v976_v13  ;;  %v18166_v25 = vcombine.low %v973_v14, %v977_v15  ;;  %v997_v38 = vld [vmem:[%s21550_s14 + $0xf58] sm:$0xff]  ;;  %v1036_v12 = vld [vmem:[%s21550_s14 + $0x1090] sm:$0xff] }
 0x589   : > { %v14757_v44 = vadd.f32 %v12814_v39, %v491_v27  ;;  %v12816_v46 = vpop.f32.mrb[2].mxu0  ;;  %13606 = vmatpush1.bf16.msra.mxu0 %v18124_v26  ;;  %v14759_v50 = vadd.f32 %v13459_v45, %v493_v28  ;;  %v13461_v52 = vpop.f32.mrb[2].mxu1  ;;  %14251 = vmatpush1.bf16.msra.mxu1 %v18126_v29  ;;  %v18173_v26 = vcombine.high %v980_v20, %v984_v21  ;;  %v988_v28 = vld [vmem:[%s21550_s14 + $0xf10] sm:$0xff]  ;;  %v1001_v39 = vld [vmem:[%s21550_s14 + $0xf78] sm:$0xff] }
 0x58a   : > { %14772 = vst [vmem:[#allocation2] sm:$0xff] %v14756_v37  ;;  %v14764_v51 = vadd.f32 %v12816_v46, %v498_v30  ;;  %v12818_v53 = vpop.f32.mrb[3].mxu0  ;;  %13607 = vmatprep.subr.bf16.mxu0 %v18133_v31  ;;  %14774 = vst [vmem:[#allocation2 + $0x10] sm:$0xff] %v14758_v43  ;;  %v14766_v55 = vadd.f32 %v13461_v52, %v500_v33  ;;  %v13463_v57 = vpop.f32.mrb[3].mxu1  ;;  %14252 = vmatprep.subr.bf16.mxu1 %v18135_v34  ;;  %v992_v29 = vld [vmem:[%s21550_s14 + $0xf30] sm:$0xff]  ;;  %v989_v30 = vld [vmem:[%s21550_s14 + $0xf18] sm:$0xff] }
 0x58b   : > { %14773 = vst [vmem:[#allocation2 + $0x8] sm:$0xff] %v14757_v44  ;;  %v14765_v56 = vadd.f32 %v12818_v53, %v499_v40  ;;  %14775 = vst [vmem:[#allocation2 + $0x18] sm:$0xff] %v14759_v50  ;;  %v14767_v61 = vadd.f32 %v13463_v57, %v501_v47  ;;  %v18175_v27 = vcombine.high %v981_v22, %v985_v23  ;;  %v993_v31 = vld [vmem:[%s21550_s14 + $0xf38] sm:$0xff]  ;;  %v1000_v37 = vld [vmem:[%s21550_s14 + $0xf70] sm:$0xff] }
 0x58c   : > { %14780 = vst [vmem:[#allocation2 + $0x40] sm:$0xff] %v14764_v51  ;;  %14782 = vst [vmem:[#allocation2 + $0x50] sm:$0xff] %v14766_v55  ;;  %v18172_v32 = vcombine.low %v980_v20, %v984_v21  ;;  %v18174_v33 = vcombine.low %v981_v22, %v985_v23  ;;  %v18181_v34 = vcombine.high %v988_v28, %v992_v29  ;;  %v1004_v44 = vld [vmem:[%s21550_s14 + $0xf90] sm:$0xff]  ;;  %v1005_v46 = vld [vmem:[%s21550_s14 + $0xf98] sm:$0xff] }
 0x58d   : > { %14781 = vst [vmem:[#allocation2 + $0x48] sm:$0xff] %v14765_v56  ;;  %13608 = vmatpush1.bf16.msra.mxu0 %v18132_v48  ;;  %14783 = vst [vmem:[#allocation2 + $0x58] sm:$0xff] %v14767_v61  ;;  %14253 = vmatpush1.bf16.msra.mxu1 %v18134_v49  ;;  %v18183_v35 = vcombine.high %v989_v30, %v993_v31  ;;  %v18180_v40 = vcombine.low %v988_v28, %v992_v29  ;;  %v1008_v45 = vld [vmem:[%s21550_s14 + $0xfb0] sm:$0xff]  ;;  %v1009_v47 = vld [vmem:[%s21550_s14 + $0xfb8] sm:$0xff] }
 0x58e   : > { %13609 = vmatprep.subr.bf16.mxu0 %v18141_v54  ;;  %14254 = vmatprep.subr.bf16.mxu1 %v18143_v58  ;;  %v18182_v41 = vcombine.low %v989_v30, %v993_v31  ;;  %v18189_v42 = vcombine.high %v996_v36, %v1000_v37  ;;  %v18191_v43 = vcombine.high %v997_v38, %v1001_v39  ;;  %v1012_v52 = vld [vmem:[%s21550_s14 + $0xfd0] sm:$0xff]  ;;  %v1013_v54 = vld [vmem:[%s21550_s14 + $0xfd8] sm:$0xff] }
 0x58f   : > { %v18188_v48 = vcombine.low %v996_v36, %v1000_v37  ;;  %v18190_v49 = vcombine.low %v997_v38, %v1001_v39  ;;  %v18197_v50 = vcombine.high %v1004_v44, %v1008_v45  ;;  %v18199_v51 = vcombine.high %v1005_v46, %v1009_v47  ;;  %v1016_v53 = vld [vmem:[%s21550_s14 + $0xff0] sm:$0xff]  ;;  %v1017_v55 = vld [vmem:[%s21550_s14 + $0xff8] sm:$0xff] }
 0x590   : > { %v18196_v56 = vcombine.low %v1004_v44, %v1008_v45  ;;  %v18198_v57 = vcombine.low %v1005_v46, %v1009_v47  ;;  %v18205_v58 = vcombine.high %v1012_v52, %v1016_v53  ;;  %v18207_v59 = vcombine.high %v1013_v54, %v1017_v55  ;;  %v1024_v61 = vld [vmem:[%s21550_s14 + $0x1030] sm:$0xff]  ;;  %v20418_v14 = vld [vmem:[%s21606_s12 + $0x18] ss:$240 sps:$4 sm:$0xff]  }
 0x591   : > { %13610 = vmatpush1.bf16.msra.mxu0 %v18140_v0  ;;  %14255 = vmatpush1.bf16.msra.mxu1 %v18142_v1  ;;  %v18204_v0 = vcombine.low %v1012_v52, %v1016_v53  ;;  %v18206_v1 = vcombine.low %v1013_v54, %v1017_v55  ;;  %v1040_v13 = vld [vmem:[%s21550_s14 + $0x10b0] sm:$0xff]  ;;  %v1037_v15 = vld [vmem:[%s21550_s14 + $0x1098] sm:$0xff] }
 0x592   : > { %13611 = vmatprep.subr.bf16.mxu0 %v18149_v2  ;;  %14256 = vmatprep.subr.bf16.mxu1 %v18151_v3  ;;  %v18213_v2 = vcombine.high %v1020_v60, %v1024_v61  ;;  %v18215_v3 = vcombine.high %v1021_v62, %v1025_v63  ;;  %v1044_v21 = vld [vmem:[%s21550_s14 + $0x10d0] sm:$0xff] }
 0x593   : > { %v1048_v22 = vld [vmem:[%s21550_s14 + $0x10f0] sm:$0xff] }
 0x594   : > { %v20419_v23 = vld [vmem:[%s21606_s12 + $0x24] ss:$240 sps:$4 sm:$0xff]   ;;  %v18237_v28 = vcombine.high %v1044_v21, %v1048_v22 }
 0x595   : > { %13612 = vmatpush1.bf16.msra.mxu0 %v18148_v8  ;;  %14257 = vmatpush1.bf16.msra.mxu1 %v18150_v9  ;;  %v18212_v8 = vcombine.low %v1020_v60, %v1024_v61  ;;  %v18214_v9 = vcombine.low %v1021_v62, %v1025_v63  ;;  %v1052_v30 = vld [vmem:[%s21550_s14 + $0x1110] sm:$0xff] }
 0x596   : > { %13613 = vmatprep.subr.bf16.mxu0 %v18157_v10  ;;  %14258 = vmatprep.subr.bf16.mxu1 %v18159_v11  ;;  %v18221_v10 = vcombine.high %v1028_v4, %v1032_v5  ;;  %v18223_v11 = vcombine.high %v1029_v6, %v1033_v7  ;;  %v1056_v31 = vld [vmem:[%s21550_s14 + $0x1130] sm:$0xff] }
 0x597   : > { %v18245_v36 = vcombine.high %v1052_v30, %v1056_v31  ;;  %v1060_v38 = vld [vmem:[%s21550_s14 + $0x1150] sm:$0xff] }
 0x598   : > { %v1064_v39 = vld [vmem:[%s21550_s14 + $0x1170] sm:$0xff] }
 0x599   : > { %13614 = vmatpush1.bf16.msra.mxu0 %v18156_v16  ;;  %14259 = vmatpush1.bf16.msra.mxu1 %v18158_v17  ;;  %v1041_v16 = vld [vmem:[%s21550_s14 + $0x10b8] sm:$0xff]  ;;  %v18220_v17 = vcombine.low %v1028_v4, %v1032_v5  ;;  %v18253_v44 = vcombine.high %v1060_v38, %v1064_v39  ;;  %v1068_v46 = vld [vmem:[%s21550_s14 + $0x1190] sm:$0xff] }
 0x59a   : > { %13615 = vmatprep.subr.bf16.mxu0 %v18165_v18  ;;  %14260 = vmatprep.subr.bf16.mxu1 %v18167_v19  ;;  %v18222_v18 = vcombine.low %v1029_v6, %v1033_v7  ;;  %v18229_v19 = vcombine.high %v1036_v12, %v1040_v13  ;;  %v18231_v20 = vcombine.high %v1037_v15, %v1041_v16  ;;  %v1072_v47 = vld [vmem:[%s21550_s14 + $0x11b0] sm:$0xff] }
 0x59b   : > { %v18261_v52 = vcombine.high %v1068_v46, %v1072_v47  ;;  %v1076_v54 = vld [vmem:[%s21550_s14 + $0x11d0] sm:$0xff] }
 0x59c   : > { %v1080_v55 = vld [vmem:[%s21550_s14 + $0x11f0] sm:$0xff] }
 0x59d   : > { %13616 = vmatpush1.bf16.msra.mxu0 %v18164_v24  ;;  %14261 = vmatpush1.bf16.msra.mxu1 %v18166_v25  ;;  %v1045_v24 = vld [vmem:[%s21550_s14 + $0x10d8] sm:$0xff]  ;;  %v18269_v60 = vcombine.high %v1076_v54, %v1080_v55  ;;  %v1084_v62 = vld [vmem:[%s21550_s14 + $0x1210] sm:$0xff] }
 0x59e   : > { %13617 = vmatprep.subr.bf16.mxu0 %v18173_v26  ;;  %14262 = vmatprep.subr.bf16.mxu1 %v18175_v27  ;;  %v1049_v25 = vld [vmem:[%s21550_s14 + $0x10f8] sm:$0xff]  ;;  %v18228_v26 = vcombine.low %v1036_v12, %v1040_v13  ;;  %v18230_v27 = vcombine.low %v1037_v15, %v1041_v16  ;;  %v1088_v63 = vld [vmem:[%s21550_s14 + $0x1230] sm:$0xff] }
 0x59f   : > { %v18239_v29 = vcombine.high %v1045_v24, %v1049_v25  ;;  %v18277_v4 = vcombine.high %v1084_v62, %v1088_v63  ;;  %v1092_v6 = vld [vmem:[%s21550_s14 + $0x1250] sm:$0xff]  ;;  %v1101_v16 = vld [vmem:[%s21550_s14 + $0x1298] sm:$0xff] }
 0x5a0   : > { %v1096_v7 = vld [vmem:[%s21550_s14 + $0x1270] sm:$0xff] }
 0x5a1   : > { %13618 = vmatpush1.bf16.msra.mxu0 %v18172_v32  ;;  %14263 = vmatpush1.bf16.msra.mxu1 %v18174_v33  ;;  %v1053_v32 = vld [vmem:[%s21550_s14 + $0x1118] sm:$0xff]  ;;  %v18285_v12 = vcombine.high %v1092_v6, %v1096_v7  ;;  %v1104_v15 = vld [vmem:[%s21550_s14 + $0x12b0] sm:$0xff] }
 0x5a2   : > { %13619 = vmatprep.subr.bf16.mxu0 %v18181_v34  ;;  %14264 = vmatprep.subr.bf16.mxu1 %v18183_v35  ;;  %v1057_v33 = vld [vmem:[%s21550_s14 + $0x1138] sm:$0xff]  ;;  %v18236_v34 = vcombine.low %v1044_v21, %v1048_v22  ;;  %v18238_v35 = vcombine.low %v1045_v24, %v1049_v25  ;;  %v1108_v22 = vld [vmem:[%s21550_s14 + $0x12d0] sm:$0xff] }
 0x5a3   : > { %v18247_v37 = vcombine.high %v1053_v32, %v1057_v33  ;;  %v1109_v24 = vld [vmem:[%s21550_s14 + $0x12d8] sm:$0xff] }
 0x5a4   : > { %v1113_v25 = vld [vmem:[%s21550_s14 + $0x12f8] sm:$0xff] }
 0x5a5   : > { %13620 = vmatpush1.bf16.msra.mxu0 %v18180_v40  ;;  %14265 = vmatpush1.bf16.msra.mxu1 %v18182_v41  ;;  %v1061_v40 = vld [vmem:[%s21550_s14 + $0x1158] sm:$0xff] }
 0x5a6   : > { %13621 = vmatprep.subr.bf16.mxu0 %v18189_v42  ;;  %14266 = vmatprep.subr.bf16.mxu1 %v18191_v43  ;;  %v1065_v41 = vld [vmem:[%s21550_s14 + $0x1178] sm:$0xff]  ;;  %v18244_v42 = vcombine.low %v1052_v30, %v1056_v31  ;;  %v18246_v43 = vcombine.low %v1053_v32, %v1057_v33  ;;  %v1116_v30 = vld [vmem:[%s21550_s14 + $0x1310] sm:$0xff] }
 0x5a7   : > { %v18255_v45 = vcombine.high %v1061_v40, %v1065_v41  ;;  %v1120_v31 = vld [vmem:[%s21550_s14 + $0x1330] sm:$0xff]  ;;  %v1117_v32 = vld [vmem:[%s21550_s14 + $0x1318] sm:$0xff] }
 0x5a8   : > { %v1121_v33 = vld [vmem:[%s21550_s14 + $0x1338] sm:$0xff] }
 0x5a9   : > { %13622 = vmatpush1.bf16.msra.mxu0 %v18188_v48  ;;  %14267 = vmatpush1.bf16.msra.mxu1 %v18190_v49  ;;  %v1069_v48 = vld [vmem:[%s21550_s14 + $0x1198] sm:$0xff] }
 0x5aa   : > { %13623 = vmatprep.subr.bf16.mxu0 %v18197_v50  ;;  %14268 = vmatprep.subr.bf16.mxu1 %v18199_v51  ;;  %v1073_v49 = vld [vmem:[%s21550_s14 + $0x11b8] sm:$0xff]  ;;  %v18252_v50 = vcombine.low %v1060_v38, %v1064_v39  ;;  %v18254_v51 = vcombine.low %v1061_v40, %v1065_v41  ;;  %v1124_v38 = vld [vmem:[%s21550_s14 + $0x1350] sm:$0xff] }
 0x5ab   : > { %v18263_v53 = vcombine.high %v1069_v48, %v1073_v49  ;;  %v1128_v39 = vld [vmem:[%s21550_s14 + $0x1370] sm:$0xff]  ;;  %v1125_v40 = vld [vmem:[%s21550_s14 + $0x1358] sm:$0xff] }
 0x5ac   : > { %v1129_v41 = vld [vmem:[%s21550_s14 + $0x1378] sm:$0xff] }
 0x5ad   : > { %13624 = vmatpush1.bf16.msra.mxu0 %v18196_v56  ;;  %14269 = vmatpush1.bf16.msra.mxu1 %v18198_v57  ;;  %v1077_v56 = vld [vmem:[%s21550_s14 + $0x11d8] sm:$0xff] }
 0x5ae   : > { %13625 = vmatprep.subr.bf16.mxu0 %v18205_v58  ;;  %14270 = vmatprep.subr.bf16.mxu1 %v18207_v59  ;;  %v1081_v57 = vld [vmem:[%s21550_s14 + $0x11f8] sm:$0xff]  ;;  %v18260_v58 = vcombine.low %v1068_v46, %v1072_v47  ;;  %v18262_v59 = vcombine.low %v1069_v48, %v1073_v49  ;;  %v1132_v46 = vld [vmem:[%s21550_s14 + $0x1390] sm:$0xff] }
 0x5af   : > { %v18271_v61 = vcombine.high %v1077_v56, %v1081_v57  ;;  %v1136_v47 = vld [vmem:[%s21550_s14 + $0x13b0] sm:$0xff]  ;;  %v1133_v48 = vld [vmem:[%s21550_s14 + $0x1398] sm:$0xff] }
 0x5b0   : > { %v1137_v49 = vld [vmem:[%s21550_s14 + $0x13b8] sm:$0xff] }
 0x5b1   : > { %13626 = vmatpush1.bf16.msra.mxu0 %v18204_v0  ;;  %14271 = vmatpush1.bf16.msra.mxu1 %v18206_v1  ;;  %v1085_v0 = vld [vmem:[%s21550_s14 + $0x1218] sm:$0xff] }
 0x5b2   : > { %13638 = vmatprep.subr.bf16.mxu0 %v18213_v2  ;;  %14283 = vmatprep.subr.bf16.mxu1 %v18215_v3  ;;  %v1089_v1 = vld [vmem:[%s21550_s14 + $0x1238] sm:$0xff]  ;;  %v18268_v2 = vcombine.low %v1076_v54, %v1080_v55  ;;  %v18270_v3 = vcombine.low %v1077_v56, %v1081_v57  ;;  %v1140_v54 = vld [vmem:[%s21550_s14 + $0x13d0] sm:$0xff] }
 0x5b3   : > { %v18279_v5 = vcombine.high %v1085_v0, %v1089_v1  ;;  %v1144_v55 = vld [vmem:[%s21550_s14 + $0x13f0] sm:$0xff]  ;;  %v1141_v56 = vld [vmem:[%s21550_s14 + $0x13d8] sm:$0xff] }
 0x5b4   : > { %13628 = vmatmul.mubr.bf16.vlgmr.msra.gmra.mrb[4].mxu0 %v20418_v14  ;;  %14273 = vmatmul.mubr.bf16.vlgmr.msra.gmra.mrb[4].mxu1 %v20418_v14  ;;  %v1100_v14 = vld [vmem:[%s21550_s14 + $0x1290] sm:$0xff]  ;;  %v1145_v57 = vld [vmem:[%s21550_s14 + $0x13f8] sm:$0xff] }
 0x5b5   : > { %13639 = vmatpush1.bf16.msra.mxu0 %v18212_v8  ;;  %14284 = vmatpush1.bf16.msra.mxu1 %v18214_v9  ;;  %v1093_v8 = vld [vmem:[%s21550_s14 + $0x1258] sm:$0xff] }
 0x5b6   : > { %13640 = vmatprep.subr.bf16.mxu0 %v18221_v10  ;;  %14285 = vmatprep.subr.bf16.mxu1 %v18223_v11  ;;  %v1097_v9 = vld [vmem:[%s21550_s14 + $0x1278] sm:$0xff]  ;;  %v18276_v10 = vcombine.low %v1084_v62, %v1088_v63  ;;  %v18278_v11 = vcombine.low %v1085_v0, %v1089_v1  ;;  %v1148_v62 = vld [vmem:[%s21550_s14 + $0x1410] sm:$0xff] }
 0x5b7   : > { %13670 = vmatprep.mubr.bf16.mxu0 %v20419_v23  ;;  %14315 = vmatprep.mubr.bf16.mxu1 %v20419_v23  ;;  %v18287_v13 = vcombine.high %v1093_v8, %v1097_v9  ;;  %v1112_v23 = vld [vmem:[%s21550_s14 + $0x12f0] sm:$0xff]  ;;  %v1149_v0 = vld [vmem:[%s21550_s14 + $0x1418] sm:$0xff] }
 0x5b8   : > { %v1152_v63 = vld [vmem:[%s21550_s14 + $0x1430] sm:$0xff]  ;;  %v1153_v1 = vld [vmem:[%s21550_s14 + $0x1438] sm:$0xff] }
 0x5b9   : > { %13641 = vmatpush1.bf16.msra.mxu0 %v18220_v17  ;;  %14286 = vmatpush1.bf16.msra.mxu1 %v18222_v18  ;;  %v1105_v17 = vld [vmem:[%s21550_s14 + $0x12b8] sm:$0xff]  ;;  %v18284_v18 = vcombine.low %v1092_v6, %v1096_v7  ;;  %v1156_v6 = vld [vmem:[%s21550_s14 + $0x1450] sm:$0xff] }
 0x5ba   : > { %13642 = vmatprep.subr.bf16.mxu0 %v18229_v19  ;;  %14287 = vmatprep.subr.bf16.mxu1 %v18231_v20  ;;  %v18286_v19 = vcombine.low %v1093_v8, %v1097_v9  ;;  %v18293_v20 = vcombine.high %v1100_v14, %v1104_v15  ;;  %v18295_v21 = vcombine.high %v1101_v16, %v1105_v17  ;;  %v1160_v7 = vld [vmem:[%s21550_s14 + $0x1470] sm:$0xff]  ;;  %v1157_v8 = vld [vmem:[%s21550_s14 + $0x1458] sm:$0xff] }
 0x5bb   : > { %v1161_v9 = vld [vmem:[%s21550_s14 + $0x1478] sm:$0xff] }
 0x5bd   : > { %13643 = vmatpush1.bf16.msra.mxu0 %v18228_v26  ;;  %14288 = vmatpush1.bf16.msra.mxu1 %v18230_v27  ;;  %v18292_v26 = vcombine.low %v1100_v14, %v1104_v15  ;;  %v18294_v27 = vcombine.low %v1101_v16, %v1105_v17  ;;  %v1164_v14 = vld [vmem:[%s21550_s14 + $0x1490] sm:$0xff]  ;;  %v1165_v17 = vld [vmem:[%s21550_s14 + $0x1498] sm:$0xff] }
 0x5be   : > { %13644 = vmatprep.subr.bf16.mxu0 %v18237_v28  ;;  %14289 = vmatprep.subr.bf16.mxu1 %v18239_v29  ;;  %v18301_v28 = vcombine.high %v1108_v22, %v1112_v23  ;;  %v18303_v29 = vcombine.high %v1109_v24, %v1113_v25  ;;  %v1168_v15 = vld [vmem:[%s21550_s14 + $0x14b0] sm:$0xff] }
 0x5bf   : > { %v20420_v16 = vld [vmem:[%s21606_s12 + $0x20] ss:$240 sps:$4 sm:$0xff]  }
 0x5c1   : > { %13645 = vmatpush1.bf16.msra.mxu0 %v18236_v34  ;;  %14290 = vmatpush1.bf16.msra.mxu1 %v18238_v35  ;;  %v18300_v34 = vcombine.low %v1108_v22, %v1112_v23  ;;  %v18302_v35 = vcombine.low %v1109_v24, %v1113_v25  ;;  %v1172_v23 = vld [vmem:[%s21550_s14 + $0x14d0] sm:$0xff]  ;;  %v20421_v25 = vld [vmem:[%s21606_s12 + $0x2c] ss:$240 sps:$4 sm:$0xff]  }
 0x5c2   : > { %13646 = vmatprep.subr.bf16.mxu0 %v18245_v36  ;;  %14291 = vmatprep.subr.bf16.mxu1 %v18247_v37  ;;  %v18309_v36 = vcombine.high %v1116_v30, %v1120_v31  ;;  %v18311_v37 = vcombine.high %v1117_v32, %v1121_v33  ;;  %v1176_v24 = vld [vmem:[%s21550_s14 + $0x14f0] sm:$0xff] }
 0x5c5   : > { %13647 = vmatpush1.bf16.msra.mxu0 %v18244_v42  ;;  %14292 = vmatpush1.bf16.msra.mxu1 %v18246_v43  ;;  %v18308_v42 = vcombine.low %v1116_v30, %v1120_v31  ;;  %v18310_v43 = vcombine.low %v1117_v32, %v1121_v33  ;;  %v18365_v30 = vcombine.high %v1172_v23, %v1176_v24  ;;  %v1180_v32 = vld [vmem:[%s21550_s14 + $0x1510] sm:$0xff] }
 0x5c6   : > { %13648 = vmatprep.subr.bf16.mxu0 %v18253_v44  ;;  %14293 = vmatprep.subr.bf16.mxu1 %v18255_v45  ;;  %v18317_v44 = vcombine.high %v1124_v38, %v1128_v39  ;;  %v18319_v45 = vcombine.high %v1125_v40, %v1129_v41  ;;  %v1184_v33 = vld [vmem:[%s21550_s14 + $0x1530] sm:$0xff] }
 0x5c9   : > { %13649 = vmatpush1.bf16.msra.mxu0 %v18252_v50  ;;  %14294 = vmatpush1.bf16.msra.mxu1 %v18254_v51  ;;  %v18316_v50 = vcombine.low %v1124_v38, %v1128_v39  ;;  %v18318_v51 = vcombine.low %v1125_v40, %v1129_v41  ;;  %v18373_v38 = vcombine.high %v1180_v32, %v1184_v33  ;;  %v1188_v40 = vld [vmem:[%s21550_s14 + $0x1550] sm:$0xff] }
 0x5ca   : > { %13650 = vmatprep.subr.bf16.mxu0 %v18261_v52  ;;  %14295 = vmatprep.subr.bf16.mxu1 %v18263_v53  ;;  %v18325_v52 = vcombine.high %v1132_v46, %v1136_v47  ;;  %v18327_v53 = vcombine.high %v1133_v48, %v1137_v49  ;;  %v1192_v41 = vld [vmem:[%s21550_s14 + $0x1570] sm:$0xff] }
 0x5cd   : > { %13651 = vmatpush1.bf16.msra.mxu0 %v18260_v58  ;;  %14296 = vmatpush1.bf16.msra.mxu1 %v18262_v59  ;;  %v18324_v58 = vcombine.low %v1132_v46, %v1136_v47  ;;  %v18326_v59 = vcombine.low %v1133_v48, %v1137_v49  ;;  %v18381_v46 = vcombine.high %v1188_v40, %v1192_v41  ;;  %v1196_v48 = vld [vmem:[%s21550_s14 + $0x1590] sm:$0xff] }
 0x5ce   : > { %13652 = vmatprep.subr.bf16.mxu0 %v18269_v60  ;;  %14297 = vmatprep.subr.bf16.mxu1 %v18271_v61  ;;  %v18333_v60 = vcombine.high %v1140_v54, %v1144_v55  ;;  %v18335_v61 = vcombine.high %v1141_v56, %v1145_v57  ;;  %v1200_v49 = vld [vmem:[%s21550_s14 + $0x15b0] sm:$0xff] }
 0x5d1   : > { %13653 = vmatpush1.bf16.msra.mxu0 %v18268_v2  ;;  %14298 = vmatpush1.bf16.msra.mxu1 %v18270_v3  ;;  %v18332_v2 = vcombine.low %v1140_v54, %v1144_v55  ;;  %v18334_v3 = vcombine.low %v1141_v56, %v1145_v57  ;;  %v18389_v54 = vcombine.high %v1196_v48, %v1200_v49  ;;  %v1204_v56 = vld [vmem:[%s21550_s14 + $0x15d0] sm:$0xff] }
 0x5d2   : > { %13654 = vmatprep.subr.bf16.mxu0 %v18277_v4  ;;  %14299 = vmatprep.subr.bf16.mxu1 %v18279_v5  ;;  %v18341_v4 = vcombine.high %v1148_v62, %v1152_v63  ;;  %v18343_v5 = vcombine.high %v1149_v0, %v1153_v1  ;;  %v1208_v57 = vld [vmem:[%s21550_s14 + $0x15f0] sm:$0xff] }
 0x5d5   : > { %13655 = vmatpush1.bf16.msra.mxu0 %v18276_v10  ;;  %14300 = vmatpush1.bf16.msra.mxu1 %v18278_v11  ;;  %v18340_v10 = vcombine.low %v1148_v62, %v1152_v63  ;;  %v18342_v11 = vcombine.low %v1149_v0, %v1153_v1  ;;  %v18397_v62 = vcombine.high %v1204_v56, %v1208_v57  ;;  %v1212_v0 = vld [vmem:[%s21550_s14 + $0x1610] sm:$0xff] }
 0x5d6   : > { %13656 = vmatprep.subr.bf16.mxu0 %v18285_v12  ;;  %14301 = vmatprep.subr.bf16.mxu1 %v18287_v13  ;;  %v18349_v12 = vcombine.high %v1156_v6, %v1160_v7  ;;  %v18351_v13 = vcombine.high %v1157_v8, %v1161_v9  ;;  %v1216_v1 = vld [vmem:[%s21550_s14 + $0x1630] sm:$0xff] }
 0x5d9   : > { %13657 = vmatpush1.bf16.msra.mxu0 %v18284_v18  ;;  %14302 = vmatpush1.bf16.msra.mxu1 %v18286_v19  ;;  %v1169_v18 = vld [vmem:[%s21550_s14 + $0x14b8] sm:$0xff]  ;;  %v18348_v19 = vcombine.low %v1156_v6, %v1160_v7  ;;  %v18405_v6 = vcombine.high %v1212_v0, %v1216_v1 }
 0x5da   : > { %13658 = vmatprep.subr.bf16.mxu0 %v18293_v20  ;;  %14303 = vmatprep.subr.bf16.mxu1 %v18295_v21  ;;  %v18350_v20 = vcombine.low %v1157_v8, %v1161_v9  ;;  %v18357_v21 = vcombine.high %v1164_v14, %v1168_v15  ;;  %v18359_v22 = vcombine.high %v1165_v17, %v1169_v18  ;;  %v1220_v8 = vld [vmem:[%s21550_s14 + $0x1650] sm:$0xff] }
 0x5db   : > { %v1224_v9 = vld [vmem:[%s21550_s14 + $0x1670] sm:$0xff] }
 0x5dd   : > { %13659 = vmatpush1.bf16.msra.mxu0 %v18292_v26  ;;  %14304 = vmatpush1.bf16.msra.mxu1 %v18294_v27  ;;  %v1173_v26 = vld [vmem:[%s21550_s14 + $0x14d8] sm:$0xff] }
 0x5de   : > { %13660 = vmatprep.subr.bf16.mxu0 %v18301_v28  ;;  %14305 = vmatprep.subr.bf16.mxu1 %v18303_v29  ;;  %v1177_v27 = vld [vmem:[%s21550_s14 + $0x14f8] sm:$0xff]  ;;  %v18356_v28 = vcombine.low %v1164_v14, %v1168_v15  ;;  %v18358_v29 = vcombine.low %v1165_v17, %v1169_v18  ;;  %v18413_v14 = vcombine.high %v1220_v8, %v1224_v9  ;;  %v1232_v17 = vld [vmem:[%s21550_s14 + $0x16b0] sm:$0xff] }
 0x5df   : > { %v18367_v31 = vcombine.high %v1173_v26, %v1177_v27  ;;  %v1229_v18 = vld [vmem:[%s21550_s14 + $0x1698] sm:$0xff] }
 0x5e1   : > { %13661 = vmatpush1.bf16.msra.mxu0 %v18300_v34  ;;  %14306 = vmatpush1.bf16.msra.mxu1 %v18302_v35  ;;  %v1181_v34 = vld [vmem:[%s21550_s14 + $0x1518] sm:$0xff] }
 0x5e2   : > { %13662 = vmatprep.subr.bf16.mxu0 %v18309_v36  ;;  %14307 = vmatprep.subr.bf16.mxu1 %v18311_v37  ;;  %v1185_v35 = vld [vmem:[%s21550_s14 + $0x1538] sm:$0xff]  ;;  %v18364_v36 = vcombine.low %v1172_v23, %v1176_v24  ;;  %v18366_v37 = vcombine.low %v1173_v26, %v1177_v27  ;;  %v1236_v24 = vld [vmem:[%s21550_s14 + $0x16d0] sm:$0xff] }
 0x5e3   : > { %v18375_v39 = vcombine.high %v1181_v34, %v1185_v35  ;;  %v1237_v26 = vld [vmem:[%s21550_s14 + $0x16d8] sm:$0xff] }
 0x5e4   : > { %v1241_v27 = vld [vmem:[%s21550_s14 + $0x16f8] sm:$0xff] }
 0x5e5   : > { %13663 = vmatpush1.bf16.msra.mxu0 %v18308_v42  ;;  %14308 = vmatpush1.bf16.msra.mxu1 %v18310_v43  ;;  %v1189_v42 = vld [vmem:[%s21550_s14 + $0x1558] sm:$0xff] }
 0x5e6   : > { %13664 = vmatprep.subr.bf16.mxu0 %v18317_v44  ;;  %14309 = vmatprep.subr.bf16.mxu1 %v18319_v45  ;;  %v1193_v43 = vld [vmem:[%s21550_s14 + $0x1578] sm:$0xff]  ;;  %v18372_v44 = vcombine.low %v1180_v32, %v1184_v33  ;;  %v18374_v45 = vcombine.low %v1181_v34, %v1185_v35  ;;  %v1244_v32 = vld [vmem:[%s21550_s14 + $0x1710] sm:$0xff] }
 0x5e7   : > { %v18383_v47 = vcombine.high %v1189_v42, %v1193_v43  ;;  %v1248_v33 = vld [vmem:[%s21550_s14 + $0x1730] sm:$0xff]  ;;  %v1245_v34 = vld [vmem:[%s21550_s14 + $0x1718] sm:$0xff] }
 0x5e8   : > { %v1249_v35 = vld [vmem:[%s21550_s14 + $0x1738] sm:$0xff] }
 0x5e9   : > { %13665 = vmatpush1.bf16.msra.mxu0 %v18316_v50  ;;  %14310 = vmatpush1.bf16.msra.mxu1 %v18318_v51  ;;  %v1197_v50 = vld [vmem:[%s21550_s14 + $0x1598] sm:$0xff] }
 0x5ea   : > { %13666 = vmatprep.subr.bf16.mxu0 %v18325_v52  ;;  %14311 = vmatprep.subr.bf16.mxu1 %v18327_v53  ;;  %v1201_v51 = vld [vmem:[%s21550_s14 + $0x15b8] sm:$0xff]  ;;  %v18380_v52 = vcombine.low %v1188_v40, %v1192_v41  ;;  %v18382_v53 = vcombine.low %v1189_v42, %v1193_v43  ;;  %v1252_v40 = vld [vmem:[%s21550_s14 + $0x1750] sm:$0xff] }
 0x5eb   : > { %v18391_v55 = vcombine.high %v1197_v50, %v1201_v51  ;;  %v1256_v41 = vld [vmem:[%s21550_s14 + $0x1770] sm:$0xff]  ;;  %v1253_v42 = vld [vmem:[%s21550_s14 + $0x1758] sm:$0xff] }
 0x5ec   : > { %v1257_v43 = vld [vmem:[%s21550_s14 + $0x1778] sm:$0xff] }
 0x5ed   : > { %13667 = vmatpush1.bf16.msra.mxu0 %v18324_v58  ;;  %14312 = vmatpush1.bf16.msra.mxu1 %v18326_v59  ;;  %v1205_v58 = vld [vmem:[%s21550_s14 + $0x15d8] sm:$0xff] }
 0x5ee   : > { %13668 = vmatprep.subr.bf16.mxu0 %v18333_v60  ;;  %14313 = vmatprep.subr.bf16.mxu1 %v18335_v61  ;;  %v1209_v59 = vld [vmem:[%s21550_s14 + $0x15f8] sm:$0xff]  ;;  %v18388_v60 = vcombine.low %v1196_v48, %v1200_v49  ;;  %v18390_v61 = vcombine.low %v1197_v50, %v1201_v51  ;;  %v1260_v48 = vld [vmem:[%s21550_s14 + $0x1790] sm:$0xff] }
 0x5ef   : > { %v18399_v63 = vcombine.high %v1205_v58, %v1209_v59  ;;  %v1264_v49 = vld [vmem:[%s21550_s14 + $0x17b0] sm:$0xff]  ;;  %v1261_v50 = vld [vmem:[%s21550_s14 + $0x1798] sm:$0xff] }
 0x5f0   : > { %v1265_v51 = vld [vmem:[%s21550_s14 + $0x17b8] sm:$0xff] }
 0x5f1   : > { %13669 = vmatpush1.bf16.msra.mxu0 %v18332_v2  ;;  %14314 = vmatpush1.bf16.msra.mxu1 %v18334_v3  ;;  %v1213_v2 = vld [vmem:[%s21550_s14 + $0x1618] sm:$0xff] }
 0x5f2   : > { %13681 = vmatprep.subr.bf16.mxu0 %v18341_v4  ;;  %14326 = vmatprep.subr.bf16.mxu1 %v18343_v5  ;;  %v1217_v3 = vld [vmem:[%s21550_s14 + $0x1638] sm:$0xff]  ;;  %v18396_v4 = vcombine.low %v1204_v56, %v1208_v57  ;;  %v18398_v5 = vcombine.low %v1205_v58, %v1209_v59  ;;  %v1268_v56 = vld [vmem:[%s21550_s14 + $0x17d0] sm:$0xff] }
 0x5f3   : > { %v18407_v7 = vcombine.high %v1213_v2, %v1217_v3  ;;  %v1272_v57 = vld [vmem:[%s21550_s14 + $0x17f0] sm:$0xff]  ;;  %v1269_v58 = vld [vmem:[%s21550_s14 + $0x17d8] sm:$0xff] }
 0x5f4   : > { %13671 = vmatmul.mubr.bf16.vlgmr.msra.gmra.mrb[4].mxu0 %v20420_v16  ;;  %14316 = vmatmul.mubr.bf16.vlgmr.msra.gmra.mrb[4].mxu1 %v20420_v16  ;;  %v1228_v16 = vld [vmem:[%s21550_s14 + $0x1690] sm:$0xff]  ;;  %v1273_v59 = vld [vmem:[%s21550_s14 + $0x17f8] sm:$0xff] }
 0x5f5   : > { %13682 = vmatpush1.bf16.msra.mxu0 %v18340_v10  ;;  %14327 = vmatpush1.bf16.msra.mxu1 %v18342_v11  ;;  %v1221_v10 = vld [vmem:[%s21550_s14 + $0x1658] sm:$0xff] }
 0x5f6   : > { %13683 = vmatprep.subr.bf16.mxu0 %v18349_v12  ;;  %14328 = vmatprep.subr.bf16.mxu1 %v18351_v13  ;;  %v1225_v11 = vld [vmem:[%s21550_s14 + $0x1678] sm:$0xff]  ;;  %v18404_v12 = vcombine.low %v1212_v0, %v1216_v1  ;;  %v18406_v13 = vcombine.low %v1213_v2, %v1217_v3  ;;  %v1276_v0 = vld [vmem:[%s21550_s14 + $0x1810] sm:$0xff] }
 0x5f7   : > { %13713 = vmatprep.mubr.bf16.mxu0 %v20421_v25  ;;  %14358 = vmatprep.mubr.bf16.mxu1 %v20421_v25  ;;  %v18415_v15 = vcombine.high %v1221_v10, %v1225_v11  ;;  %v1240_v25 = vld [vmem:[%s21550_s14 + $0x16f0] sm:$0xff]  ;;  %v1277_v2 = vld [vmem:[%s21550_s14 + $0x1818] sm:$0xff] }
 0x5f8   : > { %v1280_v1 = vld [vmem:[%s21550_s14 + $0x1830] sm:$0xff]  ;;  %v1281_v3 = vld [vmem:[%s21550_s14 + $0x1838] sm:$0xff] }
 0x5f9   : > { %13684 = vmatpush1.bf16.msra.mxu0 %v18348_v19  ;;  %14329 = vmatpush1.bf16.msra.mxu1 %v18350_v20  ;;  %v1233_v19 = vld [vmem:[%s21550_s14 + $0x16b8] sm:$0xff]  ;;  %v18412_v20 = vcombine.low %v1220_v8, %v1224_v9  ;;  %v1284_v8 = vld [vmem:[%s21550_s14 + $0x1850] sm:$0xff] }
 0x5fa   : > { %13685 = vmatprep.subr.bf16.mxu0 %v18357_v21  ;;  %14330 = vmatprep.subr.bf16.mxu1 %v18359_v22  ;;  %v18414_v21 = vcombine.low %v1221_v10, %v1225_v11  ;;  %v18421_v22 = vcombine.high %v1228_v16, %v1232_v17  ;;  %v18423_v23 = vcombine.high %v1229_v18, %v1233_v19  ;;  %v1288_v9 = vld [vmem:[%s21550_s14 + $0x1870] sm:$0xff]  ;;  %v1285_v10 = vld [vmem:[%s21550_s14 + $0x1858] sm:$0xff] }
 0x5fb   : > { %v1289_v11 = vld [vmem:[%s21550_s14 + $0x1878] sm:$0xff] }
 0x5fd   : > { %13686 = vmatpush1.bf16.msra.mxu0 %v18356_v28  ;;  %14331 = vmatpush1.bf16.msra.mxu1 %v18358_v29  ;;  %v18420_v28 = vcombine.low %v1228_v16, %v1232_v17  ;;  %v18422_v29 = vcombine.low %v1229_v18, %v1233_v19  ;;  %v1292_v16 = vld [vmem:[%s21550_s14 + $0x1890] sm:$0xff]  ;;  %v20422_v18 = vld [vmem:[%s21606_s12 + $0x28] ss:$240 sps:$4 sm:$0xff]  }
 0x5fe   : > { %13687 = vmatprep.subr.bf16.mxu0 %v18365_v30  ;;  %14332 = vmatprep.subr.bf16.mxu1 %v18367_v31  ;;  %v18429_v30 = vcombine.high %v1236_v24, %v1240_v25  ;;  %v18431_v31 = vcombine.high %v1237_v26, %v1241_v27  ;;  %v1296_v17 = vld [vmem:[%s21550_s14 + $0x18b0] sm:$0xff]  ;;  %v1293_v19 = vld [vmem:[%s21550_s14 + $0x1898] sm:$0xff] }
 0x601   : > { %13688 = vmatpush1.bf16.msra.mxu0 %v18364_v36  ;;  %14333 = vmatpush1.bf16.msra.mxu1 %v18366_v37  ;;  %v18428_v36 = vcombine.low %v1236_v24, %v1240_v25  ;;  %v18430_v37 = vcombine.low %v1237_v26, %v1241_v27  ;;  %v1300_v25 = vld [vmem:[%s21550_s14 + $0x18d0] sm:$0xff] }
 0x602   : > { %13689 = vmatprep.subr.bf16.mxu0 %v18373_v38  ;;  %14334 = vmatprep.subr.bf16.mxu1 %v18375_v39  ;;  %v18437_v38 = vcombine.high %v1244_v32, %v1248_v33  ;;  %v18439_v39 = vcombine.high %v1245_v34, %v1249_v35  ;;  %v1304_v26 = vld [vmem:[%s21550_s14 + $0x18f0] sm:$0xff] }
 0x603   : > { %v20423_v27 = vld [vmem:[%s21606_s12 + $0x34] ss:$240 sps:$4 sm:$0xff]  }
 0x605   : > { %13690 = vmatpush1.bf16.msra.mxu0 %v18372_v44  ;;  %14335 = vmatpush1.bf16.msra.mxu1 %v18374_v45  ;;  %v18436_v44 = vcombine.low %v1244_v32, %v1248_v33  ;;  %v18438_v45 = vcombine.low %v1245_v34, %v1249_v35  ;;  %v18493_v32 = vcombine.high %v1300_v25, %v1304_v26  ;;  %v1308_v34 = vld [vmem:[%s21550_s14 + $0x1910] sm:$0xff] }
 0x606   : > { %13691 = vmatprep.subr.bf16.mxu0 %v18381_v46  ;;  %14336 = vmatprep.subr.bf16.mxu1 %v18383_v47  ;;  %v18445_v46 = vcombine.high %v1252_v40, %v1256_v41  ;;  %v18447_v47 = vcombine.high %v1253_v42, %v1257_v43  ;;  %v1312_v35 = vld [vmem:[%s21550_s14 + $0x1930] sm:$0xff] }
 0x609   : > { %13692 = vmatpush1.bf16.msra.mxu0 %v18380_v52  ;;  %14337 = vmatpush1.bf16.msra.mxu1 %v18382_v53  ;;  %v18444_v52 = vcombine.low %v1252_v40, %v1256_v41  ;;  %v18446_v53 = vcombine.low %v1253_v42, %v1257_v43  ;;  %v18501_v40 = vcombine.high %v1308_v34, %v1312_v35  ;;  %v1316_v42 = vld [vmem:[%s21550_s14 + $0x1950] sm:$0xff] }
 0x60a   : > { %13693 = vmatprep.subr.bf16.mxu0 %v18389_v54  ;;  %14338 = vmatprep.subr.bf16.mxu1 %v18391_v55  ;;  %v18453_v54 = vcombine.high %v1260_v48, %v1264_v49  ;;  %v18455_v55 = vcombine.high %v1261_v50, %v1265_v51  ;;  %v1320_v43 = vld [vmem:[%s21550_s14 + $0x1970] sm:$0xff] }
 0x60d   : > { %13694 = vmatpush1.bf16.msra.mxu0 %v18388_v60  ;;  %14339 = vmatpush1.bf16.msra.mxu1 %v18390_v61  ;;  %v18452_v60 = vcombine.low %v1260_v48, %v1264_v49  ;;  %v18454_v61 = vcombine.low %v1261_v50, %v1265_v51  ;;  %v18509_v48 = vcombine.high %v1316_v42, %v1320_v43  ;;  %v1324_v50 = vld [vmem:[%s21550_s14 + $0x1990] sm:$0xff] }
 0x60e   : > { %13695 = vmatprep.subr.bf16.mxu0 %v18397_v62  ;;  %14340 = vmatprep.subr.bf16.mxu1 %v18399_v63  ;;  %v18461_v62 = vcombine.high %v1268_v56, %v1272_v57  ;;  %v18463_v63 = vcombine.high %v1269_v58, %v1273_v59  ;;  %v1328_v51 = vld [vmem:[%s21550_s14 + $0x19b0] sm:$0xff] }
 0x611   : > { %13696 = vmatpush1.bf16.msra.mxu0 %v18396_v4  ;;  %14341 = vmatpush1.bf16.msra.mxu1 %v18398_v5  ;;  %v18460_v4 = vcombine.low %v1268_v56, %v1272_v57  ;;  %v18462_v5 = vcombine.low %v1269_v58, %v1273_v59  ;;  %v18517_v56 = vcombine.high %v1324_v50, %v1328_v51  ;;  %v1332_v58 = vld [vmem:[%s21550_s14 + $0x19d0] sm:$0xff] }
 0x612   : > { %13697 = vmatprep.subr.bf16.mxu0 %v18405_v6  ;;  %14342 = vmatprep.subr.bf16.mxu1 %v18407_v7  ;;  %v18469_v6 = vcombine.high %v1276_v0, %v1280_v1  ;;  %v18471_v7 = vcombine.high %v1277_v2, %v1281_v3  ;;  %v1336_v59 = vld [vmem:[%s21550_s14 + $0x19f0] sm:$0xff] }
 0x615   : > { %13698 = vmatpush1.bf16.msra.mxu0 %v18404_v12  ;;  %14343 = vmatpush1.bf16.msra.mxu1 %v18406_v13  ;;  %v18468_v12 = vcombine.low %v1276_v0, %v1280_v1  ;;  %v18470_v13 = vcombine.low %v1277_v2, %v1281_v3  ;;  %v18525_v0 = vcombine.high %v1332_v58, %v1336_v59  ;;  %v1340_v2 = vld [vmem:[%s21550_s14 + $0x1a10] sm:$0xff] }
 0x616   : > { %13699 = vmatprep.subr.bf16.mxu0 %v18413_v14  ;;  %14344 = vmatprep.subr.bf16.mxu1 %v18415_v15  ;;  %v18477_v14 = vcombine.high %v1284_v8, %v1288_v9  ;;  %v18479_v15 = vcombine.high %v1285_v10, %v1289_v11  ;;  %v1344_v3 = vld [vmem:[%s21550_s14 + $0x1a30] sm:$0xff] }
 0x619   : > { %13700 = vmatpush1.bf16.msra.mxu0 %v18412_v20  ;;  %14345 = vmatpush1.bf16.msra.mxu1 %v18414_v21  ;;  %v1297_v20 = vld [vmem:[%s21550_s14 + $0x18b8] sm:$0xff]  ;;  %v18476_v21 = vcombine.low %v1284_v8, %v1288_v9  ;;  %v18533_v8 = vcombine.high %v1340_v2, %v1344_v3 }
 0x61a   : > { %13701 = vmatprep.subr.bf16.mxu0 %v18421_v22  ;;  %14346 = vmatprep.subr.bf16.mxu1 %v18423_v23  ;;  %v18478_v22 = vcombine.low %v1285_v10, %v1289_v11  ;;  %v18485_v23 = vcombine.high %v1292_v16, %v1296_v17  ;;  %v18487_v24 = vcombine.high %v1293_v19, %v1297_v20  ;;  %v1348_v10 = vld [vmem:[%s21550_s14 + $0x1a50] sm:$0xff] }
 0x61b   : > { %v1352_v11 = vld [vmem:[%s21550_s14 + $0x1a70] sm:$0xff] }
 0x61d   : > { %13702 = vmatpush1.bf16.msra.mxu0 %v18420_v28  ;;  %14347 = vmatpush1.bf16.msra.mxu1 %v18422_v29  ;;  %v1301_v28 = vld [vmem:[%s21550_s14 + $0x18d8] sm:$0xff] }
 0x61e   : > { %13703 = vmatprep.subr.bf16.mxu0 %v18429_v30  ;;  %14348 = vmatprep.subr.bf16.mxu1 %v18431_v31  ;;  %v1305_v29 = vld [vmem:[%s21550_s14 + $0x18f8] sm:$0xff]  ;;  %v18484_v30 = vcombine.low %v1292_v16, %v1296_v17  ;;  %v18486_v31 = vcombine.low %v1293_v19, %v1297_v20  ;;  %v18541_v16 = vcombine.high %v1348_v10, %v1352_v11  ;;  %v1360_v19 = vld [vmem:[%s21550_s14 + $0x1ab0] sm:$0xff] }
 0x61f   : > { %v18495_v33 = vcombine.high %v1301_v28, %v1305_v29  ;;  %v1357_v20 = vld [vmem:[%s21550_s14 + $0x1a98] sm:$0xff] }
 0x621   : > { %13704 = vmatpush1.bf16.msra.mxu0 %v18428_v36  ;;  %14349 = vmatpush1.bf16.msra.mxu1 %v18430_v37  ;;  %v1309_v36 = vld [vmem:[%s21550_s14 + $0x1918] sm:$0xff] }
 0x622   : > { %13705 = vmatprep.subr.bf16.mxu0 %v18437_v38  ;;  %14350 = vmatprep.subr.bf16.mxu1 %v18439_v39  ;;  %v1313_v37 = vld [vmem:[%s21550_s14 + $0x1938] sm:$0xff]  ;;  %v18492_v38 = vcombine.low %v1300_v25, %v1304_v26  ;;  %v18494_v39 = vcombine.low %v1301_v28, %v1305_v29  ;;  %v1364_v26 = vld [vmem:[%s21550_s14 + $0x1ad0] sm:$0xff] }
 0x623   : > { %v18503_v41 = vcombine.high %v1309_v36, %v1313_v37  ;;  %v1365_v28 = vld [vmem:[%s21550_s14 + $0x1ad8] sm:$0xff] }
 0x624   : > { %v1369_v29 = vld [vmem:[%s21550_s14 + $0x1af8] sm:$0xff] }
 0x625   : > { %13706 = vmatpush1.bf16.msra.mxu0 %v18436_v44  ;;  %14351 = vmatpush1.bf16.msra.mxu1 %v18438_v45  ;;  %v1317_v44 = vld [vmem:[%s21550_s14 + $0x1958] sm:$0xff] }
 0x626   : > { %13707 = vmatprep.subr.bf16.mxu0 %v18445_v46  ;;  %14352 = vmatprep.subr.bf16.mxu1 %v18447_v47  ;;  %v1321_v45 = vld [vmem:[%s21550_s14 + $0x1978] sm:$0xff]  ;;  %v18500_v46 = vcombine.low %v1308_v34, %v1312_v35  ;;  %v18502_v47 = vcombine.low %v1309_v36, %v1313_v37  ;;  %v1372_v34 = vld [vmem:[%s21550_s14 + $0x1b10] sm:$0xff] }
 0x627   : > { %v18511_v49 = vcombine.high %v1317_v44, %v1321_v45  ;;  %v1376_v35 = vld [vmem:[%s21550_s14 + $0x1b30] sm:$0xff]  ;;  %v1373_v36 = vld [vmem:[%s21550_s14 + $0x1b18] sm:$0xff] }
 0x628   : > { %v1377_v37 = vld [vmem:[%s21550_s14 + $0x1b38] sm:$0xff] }
 0x629   : > { %13708 = vmatpush1.bf16.msra.mxu0 %v18444_v52  ;;  %14353 = vmatpush1.bf16.msra.mxu1 %v18446_v53  ;;  %v1325_v52 = vld [vmem:[%s21550_s14 + $0x1998] sm:$0xff] }
 0x62a   : > { %13709 = vmatprep.subr.bf16.mxu0 %v18453_v54  ;;  %14354 = vmatprep.subr.bf16.mxu1 %v18455_v55  ;;  %v1329_v53 = vld [vmem:[%s21550_s14 + $0x19b8] sm:$0xff]  ;;  %v18508_v54 = vcombine.low %v1316_v42, %v1320_v43  ;;  %v18510_v55 = vcombine.low %v1317_v44, %v1321_v45  ;;  %v1380_v42 = vld [vmem:[%s21550_s14 + $0x1b50] sm:$0xff] }
 0x62b   : > { %v18519_v57 = vcombine.high %v1325_v52, %v1329_v53  ;;  %v1384_v43 = vld [vmem:[%s21550_s14 + $0x1b70] sm:$0xff]  ;;  %v1381_v44 = vld [vmem:[%s21550_s14 + $0x1b58] sm:$0xff] }
 0x62c   : > { %v1385_v45 = vld [vmem:[%s21550_s14 + $0x1b78] sm:$0xff] }
 0x62d   : > { %13710 = vmatpush1.bf16.msra.mxu0 %v18452_v60  ;;  %14355 = vmatpush1.bf16.msra.mxu1 %v18454_v61  ;;  %v1333_v60 = vld [vmem:[%s21550_s14 + $0x19d8] sm:$0xff] }
 0x62e   : > { %13711 = vmatprep.subr.bf16.mxu0 %v18461_v62  ;;  %14356 = vmatprep.subr.bf16.mxu1 %v18463_v63  ;;  %v1337_v61 = vld [vmem:[%s21550_s14 + $0x19f8] sm:$0xff]  ;;  %v18516_v62 = vcombine.low %v1324_v50, %v1328_v51  ;;  %v18518_v63 = vcombine.low %v1325_v52, %v1329_v53  ;;  %v1388_v50 = vld [vmem:[%s21550_s14 + $0x1b90] sm:$0xff] }
 0x62f   : > { %v18527_v1 = vcombine.high %v1333_v60, %v1337_v61  ;;  %v1392_v51 = vld [vmem:[%s21550_s14 + $0x1bb0] sm:$0xff]  ;;  %v1389_v52 = vld [vmem:[%s21550_s14 + $0x1b98] sm:$0xff] }
 0x630   : > { %v1393_v53 = vld [vmem:[%s21550_s14 + $0x1bb8] sm:$0xff] }
 0x631   : > { %13712 = vmatpush1.bf16.msra.mxu0 %v18460_v4  ;;  %14357 = vmatpush1.bf16.msra.mxu1 %v18462_v5  ;;  %v1341_v4 = vld [vmem:[%s21550_s14 + $0x1a18] sm:$0xff] }
 0x632   : > { %13724 = vmatprep.subr.bf16.mxu0 %v18469_v6  ;;  %14369 = vmatprep.subr.bf16.mxu1 %v18471_v7  ;;  %v1345_v5 = vld [vmem:[%s21550_s14 + $0x1a38] sm:$0xff]  ;;  %v18524_v6 = vcombine.low %v1332_v58, %v1336_v59  ;;  %v18526_v7 = vcombine.low %v1333_v60, %v1337_v61  ;;  %v1396_v58 = vld [vmem:[%s21550_s14 + $0x1bd0] sm:$0xff] }
 0x633   : > { %v18535_v9 = vcombine.high %v1341_v4, %v1345_v5  ;;  %v1400_v59 = vld [vmem:[%s21550_s14 + $0x1bf0] sm:$0xff]  ;;  %v1397_v60 = vld [vmem:[%s21550_s14 + $0x1bd8] sm:$0xff] }
 0x634   : > { %13714 = vmatmul.mubr.bf16.vlgmr.msra.gmra.mrb[4].mxu0 %v20422_v18  ;;  %14359 = vmatmul.mubr.bf16.vlgmr.msra.gmra.mrb[4].mxu1 %v20422_v18  ;;  %v1356_v18 = vld [vmem:[%s21550_s14 + $0x1a90] sm:$0xff]  ;;  %v1401_v61 = vld [vmem:[%s21550_s14 + $0x1bf8] sm:$0xff] }
 0x635   : > { %13725 = vmatpush1.bf16.msra.mxu0 %v18468_v12  ;;  %14370 = vmatpush1.bf16.msra.mxu1 %v18470_v13  ;;  %v1349_v12 = vld [vmem:[%s21550_s14 + $0x1a58] sm:$0xff] }
 0x636   : > { %13726 = vmatprep.subr.bf16.mxu0 %v18477_v14  ;;  %14371 = vmatprep.subr.bf16.mxu1 %v18479_v15  ;;  %v1353_v13 = vld [vmem:[%s21550_s14 + $0x1a78] sm:$0xff]  ;;  %v18532_v14 = vcombine.low %v1340_v2, %v1344_v3  ;;  %v18534_v15 = vcombine.low %v1341_v4, %v1345_v5  ;;  %v1404_v2 = vld [vmem:[%s21550_s14 + $0x1c10] sm:$0xff] }
 0x637   : > { %13756 = vmatprep.mubr.bf16.mxu0 %v20423_v27  ;;  %14401 = vmatprep.mubr.bf16.mxu1 %v20423_v27  ;;  %v18543_v17 = vcombine.high %v1349_v12, %v1353_v13  ;;  %v1368_v27 = vld [vmem:[%s21550_s14 + $0x1af0] sm:$0xff]  ;;  %v1405_v4 = vld [vmem:[%s21550_s14 + $0x1c18] sm:$0xff] }
 0x638   : > { %v1408_v3 = vld [vmem:[%s21550_s14 + $0x1c30] sm:$0xff]  ;;  %v1409_v5 = vld [vmem:[%s21550_s14 + $0x1c38] sm:$0xff] }
 0x639   : > { %13727 = vmatpush1.bf16.msra.mxu0 %v18476_v21  ;;  %14372 = vmatpush1.bf16.msra.mxu1 %v18478_v22  ;;  %v1361_v21 = vld [vmem:[%s21550_s14 + $0x1ab8] sm:$0xff]  ;;  %v18540_v22 = vcombine.low %v1348_v10, %v1352_v11  ;;  %v1412_v10 = vld [vmem:[%s21550_s14 + $0x1c50] sm:$0xff] }
 0x63a   : > { %13728 = vmatprep.subr.bf16.mxu0 %v18485_v23  ;;  %14373 = vmatprep.subr.bf16.mxu1 %v18487_v24  ;;  %v18542_v23 = vcombine.low %v1349_v12, %v1353_v13  ;;  %v18549_v24 = vcombine.high %v1356_v18, %v1360_v19  ;;  %v18551_v25 = vcombine.high %v1357_v20, %v1361_v21  ;;  %v1416_v11 = vld [vmem:[%s21550_s14 + $0x1c70] sm:$0xff]  ;;  %v1413_v12 = vld [vmem:[%s21550_s14 + $0x1c58] sm:$0xff] }
 0x63b   : > { %v1417_v13 = vld [vmem:[%s21550_s14 + $0x1c78] sm:$0xff] }
 0x63d   : > { %13729 = vmatpush1.bf16.msra.mxu0 %v18484_v30  ;;  %14374 = vmatpush1.bf16.msra.mxu1 %v18486_v31  ;;  %v18548_v30 = vcombine.low %v1356_v18, %v1360_v19  ;;  %v18550_v31 = vcombine.low %v1357_v20, %v1361_v21  ;;  %v1420_v18 = vld [vmem:[%s21550_s14 + $0x1c90] sm:$0xff]  ;;  %v1421_v21 = vld [vmem:[%s21550_s14 + $0x1c98] sm:$0xff] }
 0x63e   : > { %13730 = vmatprep.subr.bf16.mxu0 %v18493_v32  ;;  %14375 = vmatprep.subr.bf16.mxu1 %v18495_v33  ;;  %v18557_v32 = vcombine.high %v1364_v26, %v1368_v27  ;;  %v18559_v33 = vcombine.high %v1365_v28, %v1369_v29  ;;  %v1424_v19 = vld [vmem:[%s21550_s14 + $0x1cb0] sm:$0xff] }
 0x63f   : > { %v20424_v20 = vld [vmem:[%s21606_s12 + $0x30] ss:$240 sps:$4 sm:$0xff]  }
 0x641   : > { %13731 = vmatpush1.bf16.msra.mxu0 %v18492_v38  ;;  %14376 = vmatpush1.bf16.msra.mxu1 %v18494_v39  ;;  %v18556_v38 = vcombine.low %v1364_v26, %v1368_v27  ;;  %v18558_v39 = vcombine.low %v1365_v28, %v1369_v29  ;;  %v1428_v27 = vld [vmem:[%s21550_s14 + $0x1cd0] sm:$0xff]  ;;  %v20425_v29 = vld [vmem:[%s21606_s12 + $0x3c] ss:$240 sps:$4 sm:$0xff]  }
 0x642   : > { %13732 = vmatprep.subr.bf16.mxu0 %v18501_v40  ;;  %14377 = vmatprep.subr.bf16.mxu1 %v18503_v41  ;;  %v18565_v40 = vcombine.high %v1372_v34, %v1376_v35  ;;  %v18567_v41 = vcombine.high %v1373_v36, %v1377_v37  ;;  %v1432_v28 = vld [vmem:[%s21550_s14 + $0x1cf0] sm:$0xff] }
 0x645   : > { %13733 = vmatpush1.bf16.msra.mxu0 %v18500_v46  ;;  %14378 = vmatpush1.bf16.msra.mxu1 %v18502_v47  ;;  %v18564_v46 = vcombine.low %v1372_v34, %v1376_v35  ;;  %v18566_v47 = vcombine.low %v1373_v36, %v1377_v37  ;;  %v18621_v34 = vcombine.high %v1428_v27, %v1432_v28  ;;  %v1436_v36 = vld [vmem:[%s21550_s14 + $0x1d10] sm:$0xff] }
 0x646   : > { %13734 = vmatprep.subr.bf16.mxu0 %v18509_v48  ;;  %14379 = vmatprep.subr.bf16.mxu1 %v18511_v49  ;;  %v18573_v48 = vcombine.high %v1380_v42, %v1384_v43  ;;  %v18575_v49 = vcombine.high %v1381_v44, %v1385_v45  ;;  %v1440_v37 = vld [vmem:[%s21550_s14 + $0x1d30] sm:$0xff] }
 0x649   : > { %13735 = vmatpush1.bf16.msra.mxu0 %v18508_v54  ;;  %14380 = vmatpush1.bf16.msra.mxu1 %v18510_v55  ;;  %v18572_v54 = vcombine.low %v1380_v42, %v1384_v43  ;;  %v18574_v55 = vcombine.low %v1381_v44, %v1385_v45  ;;  %v18629_v42 = vcombine.high %v1436_v36, %v1440_v37  ;;  %v1444_v44 = vld [vmem:[%s21550_s14 + $0x1d50] sm:$0xff] }
 0x64a   : > { %13736 = vmatprep.subr.bf16.mxu0 %v18517_v56  ;;  %14381 = vmatprep.subr.bf16.mxu1 %v18519_v57  ;;  %v18581_v56 = vcombine.high %v1388_v50, %v1392_v51  ;;  %v18583_v57 = vcombine.high %v1389_v52, %v1393_v53  ;;  %v1448_v45 = vld [vmem:[%s21550_s14 + $0x1d70] sm:$0xff] }
 0x64d   : > { %13737 = vmatpush1.bf16.msra.mxu0 %v18516_v62  ;;  %14382 = vmatpush1.bf16.msra.mxu1 %v18518_v63  ;;  %v18580_v62 = vcombine.low %v1388_v50, %v1392_v51  ;;  %v18582_v63 = vcombine.low %v1389_v52, %v1393_v53  ;;  %v18637_v50 = vcombine.high %v1444_v44, %v1448_v45  ;;  %v1452_v52 = vld [vmem:[%s21550_s14 + $0x1d90] sm:$0xff] }
 0x64e   : > { %13738 = vmatprep.subr.bf16.mxu0 %v18525_v0  ;;  %14383 = vmatprep.subr.bf16.mxu1 %v18527_v1  ;;  %v18589_v0 = vcombine.high %v1396_v58, %v1400_v59  ;;  %v18591_v1 = vcombine.high %v1397_v60, %v1401_v61  ;;  %v1456_v53 = vld [vmem:[%s21550_s14 + $0x1db0] sm:$0xff] }
 0x651   : > { %13739 = vmatpush1.bf16.msra.mxu0 %v18524_v6  ;;  %14384 = vmatpush1.bf16.msra.mxu1 %v18526_v7  ;;  %v18588_v6 = vcombine.low %v1396_v58, %v1400_v59  ;;  %v18590_v7 = vcombine.low %v1397_v60, %v1401_v61  ;;  %v18645_v58 = vcombine.high %v1452_v52, %v1456_v53  ;;  %v1460_v60 = vld [vmem:[%s21550_s14 + $0x1dd0] sm:$0xff] }
 0x652   : > { %13740 = vmatprep.subr.bf16.mxu0 %v18533_v8  ;;  %14385 = vmatprep.subr.bf16.mxu1 %v18535_v9  ;;  %v18597_v8 = vcombine.high %v1404_v2, %v1408_v3  ;;  %v18599_v9 = vcombine.high %v1405_v4, %v1409_v5  ;;  %v1464_v61 = vld [vmem:[%s21550_s14 + $0x1df0] sm:$0xff] }
 0x655   : > { %13741 = vmatpush1.bf16.msra.mxu0 %v18532_v14  ;;  %14386 = vmatpush1.bf16.msra.mxu1 %v18534_v15  ;;  %v18596_v14 = vcombine.low %v1404_v2, %v1408_v3  ;;  %v18598_v15 = vcombine.low %v1405_v4, %v1409_v5  ;;  %v18653_v2 = vcombine.high %v1460_v60, %v1464_v61  ;;  %v1468_v4 = vld [vmem:[%s21550_s14 + $0x1e10] sm:$0xff] }
 0x656   : > { %13742 = vmatprep.subr.bf16.mxu0 %v18541_v16  ;;  %14387 = vmatprep.subr.bf16.mxu1 %v18543_v17  ;;  %v18605_v16 = vcombine.high %v1412_v10, %v1416_v11  ;;  %v18607_v17 = vcombine.high %v1413_v12, %v1417_v13  ;;  %v1472_v5 = vld [vmem:[%s21550_s14 + $0x1e30] sm:$0xff] }
 0x659   : > { %13743 = vmatpush1.bf16.msra.mxu0 %v18540_v22  ;;  %14388 = vmatpush1.bf16.msra.mxu1 %v18542_v23  ;;  %v1425_v22 = vld [vmem:[%s21550_s14 + $0x1cb8] sm:$0xff]  ;;  %v18604_v23 = vcombine.low %v1412_v10, %v1416_v11  ;;  %v18661_v10 = vcombine.high %v1468_v4, %v1472_v5 }
 0x65a   : > { %13744 = vmatprep.subr.bf16.mxu0 %v18549_v24  ;;  %14389 = vmatprep.subr.bf16.mxu1 %v18551_v25  ;;  %v18606_v24 = vcombine.low %v1413_v12, %v1417_v13  ;;  %v18613_v25 = vcombine.high %v1420_v18, %v1424_v19  ;;  %v18615_v26 = vcombine.high %v1421_v21, %v1425_v22  ;;  %v1476_v12 = vld [vmem:[%s21550_s14 + $0x1e50] sm:$0xff] }
 0x65b   : > { %v1480_v13 = vld [vmem:[%s21550_s14 + $0x1e70] sm:$0xff] }
 0x65d   : > { %13745 = vmatpush1.bf16.msra.mxu0 %v18548_v30  ;;  %14390 = vmatpush1.bf16.msra.mxu1 %v18550_v31  ;;  %v1429_v30 = vld [vmem:[%s21550_s14 + $0x1cd8] sm:$0xff] }
 0x65e   : > { %13746 = vmatprep.subr.bf16.mxu0 %v18557_v32  ;;  %14391 = vmatprep.subr.bf16.mxu1 %v18559_v33  ;;  %v1433_v31 = vld [vmem:[%s21550_s14 + $0x1cf8] sm:$0xff]  ;;  %v18612_v32 = vcombine.low %v1420_v18, %v1424_v19  ;;  %v18614_v33 = vcombine.low %v1421_v21, %v1425_v22  ;;  %v18669_v18 = vcombine.high %v1476_v12, %v1480_v13  ;;  %v1488_v21 = vld [vmem:[%s21550_s14 + $0x1eb0] sm:$0xff] }
 0x65f   : > { %v18623_v35 = vcombine.high %v1429_v30, %v1433_v31  ;;  %v1485_v22 = vld [vmem:[%s21550_s14 + $0x1e98] sm:$0xff] }
 0x661   : > { %13747 = vmatpush1.bf16.msra.mxu0 %v18556_v38  ;;  %14392 = vmatpush1.bf16.msra.mxu1 %v18558_v39  ;;  %v1437_v38 = vld [vmem:[%s21550_s14 + $0x1d18] sm:$0xff] }
 0x662   : > { %13748 = vmatprep.subr.bf16.mxu0 %v18565_v40  ;;  %14393 = vmatprep.subr.bf16.mxu1 %v18567_v41  ;;  %v1441_v39 = vld [vmem:[%s21550_s14 + $0x1d38] sm:$0xff]  ;;  %v18620_v40 = vcombine.low %v1428_v27, %v1432_v28  ;;  %v18622_v41 = vcombine.low %v1429_v30, %v1433_v31  ;;  %v1492_v28 = vld [vmem:[%s21550_s14 + $0x1ed0] sm:$0xff] }
 0x663   : > { %v18631_v43 = vcombine.high %v1437_v38, %v1441_v39  ;;  %v1493_v30 = vld [vmem:[%s21550_s14 + $0x1ed8] sm:$0xff] }
 0x664   : > { %v1497_v31 = vld [vmem:[%s21550_s14 + $0x1ef8] sm:$0xff] }
 0x665   : > { %13749 = vmatpush1.bf16.msra.mxu0 %v18564_v46  ;;  %14394 = vmatpush1.bf16.msra.mxu1 %v18566_v47  ;;  %v1445_v46 = vld [vmem:[%s21550_s14 + $0x1d58] sm:$0xff] }
 0x666   : > { %13750 = vmatprep.subr.bf16.mxu0 %v18573_v48  ;;  %14395 = vmatprep.subr.bf16.mxu1 %v18575_v49  ;;  %v1449_v47 = vld [vmem:[%s21550_s14 + $0x1d78] sm:$0xff]  ;;  %v18628_v48 = vcombine.low %v1436_v36, %v1440_v37  ;;  %v18630_v49 = vcombine.low %v1437_v38, %v1441_v39  ;;  %v1500_v36 = vld [vmem:[%s21550_s14 + $0x1f10] sm:$0xff] }
 0x667   : > { %v18639_v51 = vcombine.high %v1445_v46, %v1449_v47  ;;  %v1504_v37 = vld [vmem:[%s21550_s14 + $0x1f30] sm:$0xff]  ;;  %v1501_v38 = vld [vmem:[%s21550_s14 + $0x1f18] sm:$0xff] }
 0x668   : > { %v1505_v39 = vld [vmem:[%s21550_s14 + $0x1f38] sm:$0xff] }
 0x669   : > { %13751 = vmatpush1.bf16.msra.mxu0 %v18572_v54  ;;  %14396 = vmatpush1.bf16.msra.mxu1 %v18574_v55  ;;  %v1453_v54 = vld [vmem:[%s21550_s14 + $0x1d98] sm:$0xff] }
 0x66a   : > { %13752 = vmatprep.subr.bf16.mxu0 %v18581_v56  ;;  %14397 = vmatprep.subr.bf16.mxu1 %v18583_v57  ;;  %v1457_v55 = vld [vmem:[%s21550_s14 + $0x1db8] sm:$0xff]  ;;  %v18636_v56 = vcombine.low %v1444_v44, %v1448_v45  ;;  %v18638_v57 = vcombine.low %v1445_v46, %v1449_v47  ;;  %v1508_v44 = vld [vmem:[%s21550_s14 + $0x1f50] sm:$0xff] }
 0x66b   : > { %v18647_v59 = vcombine.high %v1453_v54, %v1457_v55  ;;  %v1512_v45 = vld [vmem:[%s21550_s14 + $0x1f70] sm:$0xff]  ;;  %v1509_v46 = vld [vmem:[%s21550_s14 + $0x1f58] sm:$0xff] }
 0x66c   : > { %v1513_v47 = vld [vmem:[%s21550_s14 + $0x1f78] sm:$0xff] }
 0x66d   : > { %13753 = vmatpush1.bf16.msra.mxu0 %v18580_v62  ;;  %14398 = vmatpush1.bf16.msra.mxu1 %v18582_v63  ;;  %v1461_v62 = vld [vmem:[%s21550_s14 + $0x1dd8] sm:$0xff] }
 0x66e   : > { %13754 = vmatprep.subr.bf16.mxu0 %v18589_v0  ;;  %14399 = vmatprep.subr.bf16.mxu1 %v18591_v1  ;;  %v1465_v63 = vld [vmem:[%s21550_s14 + $0x1df8] sm:$0xff]  ;;  %v18644_v0 = vcombine.low %v1452_v52, %v1456_v53  ;;  %v18646_v1 = vcombine.low %v1453_v54, %v1457_v55  ;;  %v1516_v52 = vld [vmem:[%s21550_s14 + $0x1f90] sm:$0xff] }
 0x66f   : > { %v18655_v3 = vcombine.high %v1461_v62, %v1465_v63  ;;  %v1520_v53 = vld [vmem:[%s21550_s14 + $0x1fb0] sm:$0xff]  ;;  %v1517_v54 = vld [vmem:[%s21550_s14 + $0x1f98] sm:$0xff] }
 0x670   : > { %v1521_v55 = vld [vmem:[%s21550_s14 + $0x1fb8] sm:$0xff] }
 0x671   : > { %13755 = vmatpush1.bf16.msra.mxu0 %v18588_v6  ;;  %14400 = vmatpush1.bf16.msra.mxu1 %v18590_v7  ;;  %v1469_v6 = vld [vmem:[%s21550_s14 + $0x1e18] sm:$0xff] }
 0x672   : > { %13767 = vmatprep.subr.bf16.mxu0 %v18597_v8  ;;  %14412 = vmatprep.subr.bf16.mxu1 %v18599_v9  ;;  %v1473_v7 = vld [vmem:[%s21550_s14 + $0x1e38] sm:$0xff]  ;;  %v18652_v8 = vcombine.low %v1460_v60, %v1464_v61  ;;  %v18654_v9 = vcombine.low %v1461_v62, %v1465_v63  ;;  %v1524_v60 = vld [vmem:[%s21550_s14 + $0x1fd0] sm:$0xff] }
 0x673   : > { %v18663_v11 = vcombine.high %v1469_v6, %v1473_v7  ;;  %v1528_v61 = vld [vmem:[%s21550_s14 + $0x1ff0] sm:$0xff]  ;;  %v1525_v62 = vld [vmem:[%s21550_s14 + $0x1fd8] sm:$0xff] }
 0x674   : > { %13757 = vmatmul.mubr.bf16.vlgmr.msra.gmra.mrb[4].mxu0 %v20424_v20  ;;  %14402 = vmatmul.mubr.bf16.vlgmr.msra.gmra.mrb[4].mxu1 %v20424_v20  ;;  %v1484_v20 = vld [vmem:[%s21550_s14 + $0x1e90] sm:$0xff]  ;;  %v1529_v63 = vld [vmem:[%s21550_s14 + $0x1ff8] sm:$0xff] }
 0x675   : > { %13768 = vmatpush1.bf16.msra.mxu0 %v18596_v14  ;;  %14413 = vmatpush1.bf16.msra.mxu1 %v18598_v15  ;;  %v1477_v14 = vld [vmem:[%s21550_s14 + $0x1e58] sm:$0xff] }
 0x676   : > { %13769 = vmatprep.subr.bf16.mxu0 %v18605_v16  ;;  %14414 = vmatprep.subr.bf16.mxu1 %v18607_v17  ;;  %v1481_v15 = vld [vmem:[%s21550_s14 + $0x1e78] sm:$0xff]  ;;  %v18660_v16 = vcombine.low %v1468_v4, %v1472_v5  ;;  %v18662_v17 = vcombine.low %v1469_v6, %v1473_v7  ;;  %v1532_v4 = vld [vmem:[%s21550_s14 + $0x2010] sm:$0xff] }
 0x677   : > { %13799 = vmatprep.mubr.bf16.mxu0 %v20425_v29  ;;  %14444 = vmatprep.mubr.bf16.mxu1 %v20425_v29  ;;  %v18671_v19 = vcombine.high %v1477_v14, %v1481_v15  ;;  %v1496_v29 = vld [vmem:[%s21550_s14 + $0x1ef0] sm:$0xff]  ;;  %v1533_v6 = vld [vmem:[%s21550_s14 + $0x2018] sm:$0xff] }
 0x678   : > { %v1536_v5 = vld [vmem:[%s21550_s14 + $0x2030] sm:$0xff]  ;;  %v1537_v7 = vld [vmem:[%s21550_s14 + $0x2038] sm:$0xff] }
 0x679   : > { %13770 = vmatpush1.bf16.msra.mxu0 %v18604_v23  ;;  %14415 = vmatpush1.bf16.msra.mxu1 %v18606_v24  ;;  %v1489_v23 = vld [vmem:[%s21550_s14 + $0x1eb8] sm:$0xff]  ;;  %v18668_v24 = vcombine.low %v1476_v12, %v1480_v13  ;;  %v1540_v12 = vld [vmem:[%s21550_s14 + $0x2050] sm:$0xff] }
 0x67a   : > { %13771 = vmatprep.subr.bf16.mxu0 %v18613_v25  ;;  %14416 = vmatprep.subr.bf16.mxu1 %v18615_v26  ;;  %v18670_v25 = vcombine.low %v1477_v14, %v1481_v15  ;;  %v18677_v26 = vcombine.high %v1484_v20, %v1488_v21  ;;  %v18679_v27 = vcombine.high %v1485_v22, %v1489_v23  ;;  %v1544_v13 = vld [vmem:[%s21550_s14 + $0x2070] sm:$0xff]  ;;  %v1541_v14 = vld [vmem:[%s21550_s14 + $0x2058] sm:$0xff] }
 0x67b   : > { %v1545_v15 = vld [vmem:[%s21550_s14 + $0x2078] sm:$0xff] }
 0x67d   : > { %13772 = vmatpush1.bf16.msra.mxu0 %v18612_v32  ;;  %14417 = vmatpush1.bf16.msra.mxu1 %v18614_v33  ;;  %v18676_v32 = vcombine.low %v1484_v20, %v1488_v21  ;;  %v18678_v33 = vcombine.low %v1485_v22, %v1489_v23  ;;  %v1548_v20 = vld [vmem:[%s21550_s14 + $0x2090] sm:$0xff]  ;;  %v20426_v22 = vld [vmem:[%s21606_s12 + $0x38] ss:$240 sps:$4 sm:$0xff]  }
 0x67e   : > { %13773 = vmatprep.subr.bf16.mxu0 %v18621_v34  ;;  %14418 = vmatprep.subr.bf16.mxu1 %v18623_v35  ;;  %v18685_v34 = vcombine.high %v1492_v28, %v1496_v29  ;;  %v18687_v35 = vcombine.high %v1493_v30, %v1497_v31  ;;  %v1552_v21 = vld [vmem:[%s21550_s14 + $0x20b0] sm:$0xff]  ;;  %v1549_v23 = vld [vmem:[%s21550_s14 + $0x2098] sm:$0xff] }
 0x681   : > { %13774 = vmatpush1.bf16.msra.mxu0 %v18620_v40  ;;  %14419 = vmatpush1.bf16.msra.mxu1 %v18622_v41  ;;  %v18684_v40 = vcombine.low %v1492_v28, %v1496_v29  ;;  %v18686_v41 = vcombine.low %v1493_v30, %v1497_v31  ;;  %v1556_v29 = vld [vmem:[%s21550_s14 + $0x20d0] sm:$0xff] }
 0x682   : > { %13775 = vmatprep.subr.bf16.mxu0 %v18629_v42  ;;  %14420 = vmatprep.subr.bf16.mxu1 %v18631_v43  ;;  %v18693_v42 = vcombine.high %v1500_v36, %v1504_v37  ;;  %v18695_v43 = vcombine.high %v1501_v38, %v1505_v39  ;;  %v1560_v30 = vld [vmem:[%s21550_s14 + $0x20f0] sm:$0xff] }
 0x683   : > { %v20427_v31 = vld [vmem:[%s21606_s12 + $0x44] ss:$240 sps:$4 sm:$0xff]  }
 0x685   : > { %13776 = vmatpush1.bf16.msra.mxu0 %v18628_v48  ;;  %14421 = vmatpush1.bf16.msra.mxu1 %v18630_v49  ;;  %v18692_v48 = vcombine.low %v1500_v36, %v1504_v37  ;;  %v18694_v49 = vcombine.low %v1501_v38, %v1505_v39  ;;  %v18749_v36 = vcombine.high %v1556_v29, %v1560_v30  ;;  %v1564_v38 = vld [vmem:[%s21550_s14 + $0x2110] sm:$0xff] }
 0x686   : > { %13777 = vmatprep.subr.bf16.mxu0 %v18637_v50  ;;  %14422 = vmatprep.subr.bf16.mxu1 %v18639_v51  ;;  %v18701_v50 = vcombine.high %v1508_v44, %v1512_v45  ;;  %v18703_v51 = vcombine.high %v1509_v46, %v1513_v47  ;;  %v1568_v39 = vld [vmem:[%s21550_s14 + $0x2130] sm:$0xff] }
 0x689   : > { %13778 = vmatpush1.bf16.msra.mxu0 %v18636_v56  ;;  %14423 = vmatpush1.bf16.msra.mxu1 %v18638_v57  ;;  %v18700_v56 = vcombine.low %v1508_v44, %v1512_v45  ;;  %v18702_v57 = vcombine.low %v1509_v46, %v1513_v47  ;;  %v18757_v44 = vcombine.high %v1564_v38, %v1568_v39  ;;  %v1572_v46 = vld [vmem:[%s21550_s14 + $0x2150] sm:$0xff] }
 0x68a   : > { %13779 = vmatprep.subr.bf16.mxu0 %v18645_v58  ;;  %14424 = vmatprep.subr.bf16.mxu1 %v18647_v59  ;;  %v18709_v58 = vcombine.high %v1516_v52, %v1520_v53  ;;  %v18711_v59 = vcombine.high %v1517_v54, %v1521_v55  ;;  %v1576_v47 = vld [vmem:[%s21550_s14 + $0x2170] sm:$0xff] }
 0x68d   : > { %13780 = vmatpush1.bf16.msra.mxu0 %v18644_v0  ;;  %14425 = vmatpush1.bf16.msra.mxu1 %v18646_v1  ;;  %v18708_v0 = vcombine.low %v1516_v52, %v1520_v53  ;;  %v18710_v1 = vcombine.low %v1517_v54, %v1521_v55  ;;  %v18765_v52 = vcombine.high %v1572_v46, %v1576_v47  ;;  %v1580_v54 = vld [vmem:[%s21550_s14 + $0x2190] sm:$0xff] }
 0x68e   : > { %13781 = vmatprep.subr.bf16.mxu0 %v18653_v2  ;;  %14426 = vmatprep.subr.bf16.mxu1 %v18655_v3  ;;  %v18717_v2 = vcombine.high %v1524_v60, %v1528_v61  ;;  %v18719_v3 = vcombine.high %v1525_v62, %v1529_v63  ;;  %v1584_v55 = vld [vmem:[%s21550_s14 + $0x21b0] sm:$0xff] }
 0x691   : > { %13782 = vmatpush1.bf16.msra.mxu0 %v18652_v8  ;;  %14427 = vmatpush1.bf16.msra.mxu1 %v18654_v9  ;;  %v18716_v8 = vcombine.low %v1524_v60, %v1528_v61  ;;  %v18718_v9 = vcombine.low %v1525_v62, %v1529_v63  ;;  %v18773_v60 = vcombine.high %v1580_v54, %v1584_v55  ;;  %v1588_v62 = vld [vmem:[%s21550_s14 + $0x21d0] sm:$0xff] }
 0x692   : > { %13783 = vmatprep.subr.bf16.mxu0 %v18661_v10  ;;  %14428 = vmatprep.subr.bf16.mxu1 %v18663_v11  ;;  %v18725_v10 = vcombine.high %v1532_v4, %v1536_v5  ;;  %v18727_v11 = vcombine.high %v1533_v6, %v1537_v7  ;;  %v1592_v63 = vld [vmem:[%s21550_s14 + $0x21f0] sm:$0xff] }
 0x695   : > { %13784 = vmatpush1.bf16.msra.mxu0 %v18660_v16  ;;  %14429 = vmatpush1.bf16.msra.mxu1 %v18662_v17  ;;  %v18724_v16 = vcombine.low %v1532_v4, %v1536_v5  ;;  %v18726_v17 = vcombine.low %v1533_v6, %v1537_v7  ;;  %v18781_v4 = vcombine.high %v1588_v62, %v1592_v63  ;;  %v1596_v6 = vld [vmem:[%s21550_s14 + $0x2210] sm:$0xff] }
 0x696   : > { %13785 = vmatprep.subr.bf16.mxu0 %v18669_v18  ;;  %14430 = vmatprep.subr.bf16.mxu1 %v18671_v19  ;;  %v18733_v18 = vcombine.high %v1540_v12, %v1544_v13  ;;  %v18735_v19 = vcombine.high %v1541_v14, %v1545_v15  ;;  %v1600_v7 = vld [vmem:[%s21550_s14 + $0x2230] sm:$0xff] }
 0x699   : > { %13786 = vmatpush1.bf16.msra.mxu0 %v18668_v24  ;;  %14431 = vmatpush1.bf16.msra.mxu1 %v18670_v25  ;;  %v1553_v24 = vld [vmem:[%s21550_s14 + $0x20b8] sm:$0xff]  ;;  %v18732_v25 = vcombine.low %v1540_v12, %v1544_v13  ;;  %v18789_v12 = vcombine.high %v1596_v6, %v1600_v7 }
 0x69a   : > { %13787 = vmatprep.subr.bf16.mxu0 %v18677_v26  ;;  %14432 = vmatprep.subr.bf16.mxu1 %v18679_v27  ;;  %v18734_v26 = vcombine.low %v1541_v14, %v1545_v15  ;;  %v18741_v27 = vcombine.high %v1548_v20, %v1552_v21  ;;  %v18743_v28 = vcombine.high %v1549_v23, %v1553_v24  ;;  %v1604_v14 = vld [vmem:[%s21550_s14 + $0x2250] sm:$0xff] }
 0x69b   : > { %v1608_v15 = vld [vmem:[%s21550_s14 + $0x2270] sm:$0xff] }
 0x69d   : > { %13788 = vmatpush1.bf16.msra.mxu0 %v18676_v32  ;;  %14433 = vmatpush1.bf16.msra.mxu1 %v18678_v33  ;;  %v1557_v32 = vld [vmem:[%s21550_s14 + $0x20d8] sm:$0xff] }
 0x69e   : > { %13789 = vmatprep.subr.bf16.mxu0 %v18685_v34  ;;  %14434 = vmatprep.subr.bf16.mxu1 %v18687_v35  ;;  %v1561_v33 = vld [vmem:[%s21550_s14 + $0x20f8] sm:$0xff]  ;;  %v18740_v34 = vcombine.low %v1548_v20, %v1552_v21  ;;  %v18742_v35 = vcombine.low %v1549_v23, %v1553_v24  ;;  %v18797_v20 = vcombine.high %v1604_v14, %v1608_v15  ;;  %v1616_v23 = vld [vmem:[%s21550_s14 + $0x22b0] sm:$0xff] }
 0x69f   : > { %v18751_v37 = vcombine.high %v1557_v32, %v1561_v33  ;;  %v1613_v24 = vld [vmem:[%s21550_s14 + $0x2298] sm:$0xff] }
 0x6a1   : > { %13790 = vmatpush1.bf16.msra.mxu0 %v18684_v40  ;;  %14435 = vmatpush1.bf16.msra.mxu1 %v18686_v41  ;;  %v1565_v40 = vld [vmem:[%s21550_s14 + $0x2118] sm:$0xff] }
 0x6a2   : > { %13791 = vmatprep.subr.bf16.mxu0 %v18693_v42  ;;  %14436 = vmatprep.subr.bf16.mxu1 %v18695_v43  ;;  %v1569_v41 = vld [vmem:[%s21550_s14 + $0x2138] sm:$0xff]  ;;  %v18748_v42 = vcombine.low %v1556_v29, %v1560_v30  ;;  %v18750_v43 = vcombine.low %v1557_v32, %v1561_v33  ;;  %v1620_v30 = vld [vmem:[%s21550_s14 + $0x22d0] sm:$0xff] }
 0x6a3   : > { %v18759_v45 = vcombine.high %v1565_v40, %v1569_v41  ;;  %v1621_v32 = vld [vmem:[%s21550_s14 + $0x22d8] sm:$0xff] }
 0x6a4   : > { %v1625_v33 = vld [vmem:[%s21550_s14 + $0x22f8] sm:$0xff] }
 0x6a5   : > { %13792 = vmatpush1.bf16.msra.mxu0 %v18692_v48  ;;  %14437 = vmatpush1.bf16.msra.mxu1 %v18694_v49  ;;  %v1573_v48 = vld [vmem:[%s21550_s14 + $0x2158] sm:$0xff] }
 0x6a6   : > { %13793 = vmatprep.subr.bf16.mxu0 %v18701_v50  ;;  %14438 = vmatprep.subr.bf16.mxu1 %v18703_v51  ;;  %v1577_v49 = vld [vmem:[%s21550_s14 + $0x2178] sm:$0xff]  ;;  %v18756_v50 = vcombine.low %v1564_v38, %v1568_v39  ;;  %v18758_v51 = vcombine.low %v1565_v40, %v1569_v41  ;;  %v1628_v38 = vld [vmem:[%s21550_s14 + $0x2310] sm:$0xff] }
 0x6a7   : > { %v18767_v53 = vcombine.high %v1573_v48, %v1577_v49  ;;  %v1632_v39 = vld [vmem:[%s21550_s14 + $0x2330] sm:$0xff]  ;;  %v1629_v40 = vld [vmem:[%s21550_s14 + $0x2318] sm:$0xff] }
 0x6a8   : > { %v1633_v41 = vld [vmem:[%s21550_s14 + $0x2338] sm:$0xff] }
 0x6a9   : > { %13794 = vmatpush1.bf16.msra.mxu0 %v18700_v56  ;;  %14439 = vmatpush1.bf16.msra.mxu1 %v18702_v57  ;;  %v1581_v56 = vld [vmem:[%s21550_s14 + $0x2198] sm:$0xff] }
 0x6aa   : > { %13795 = vmatprep.subr.bf16.mxu0 %v18709_v58  ;;  %14440 = vmatprep.subr.bf16.mxu1 %v18711_v59  ;;  %v1585_v57 = vld [vmem:[%s21550_s14 + $0x21b8] sm:$0xff]  ;;  %v18764_v58 = vcombine.low %v1572_v46, %v1576_v47  ;;  %v18766_v59 = vcombine.low %v1573_v48, %v1577_v49  ;;  %v1636_v46 = vld [vmem:[%s21550_s14 + $0x2350] sm:$0xff] }
 0x6ab   : > { %v18775_v61 = vcombine.high %v1581_v56, %v1585_v57  ;;  %v1640_v47 = vld [vmem:[%s21550_s14 + $0x2370] sm:$0xff]  ;;  %v1637_v48 = vld [vmem:[%s21550_s14 + $0x2358] sm:$0xff] }
 0x6ac   : > { %v1641_v49 = vld [vmem:[%s21550_s14 + $0x2378] sm:$0xff] }
 0x6ad   : > { %13796 = vmatpush1.bf16.msra.mxu0 %v18708_v0  ;;  %14441 = vmatpush1.bf16.msra.mxu1 %v18710_v1  ;;  %v1589_v0 = vld [vmem:[%s21550_s14 + $0x21d8] sm:$0xff] }
 0x6ae   : > { %13797 = vmatprep.subr.bf16.mxu0 %v18717_v2  ;;  %14442 = vmatprep.subr.bf16.mxu1 %v18719_v3  ;;  %v1593_v1 = vld [vmem:[%s21550_s14 + $0x21f8] sm:$0xff]  ;;  %v18772_v2 = vcombine.low %v1580_v54, %v1584_v55  ;;  %v18774_v3 = vcombine.low %v1581_v56, %v1585_v57  ;;  %v1644_v54 = vld [vmem:[%s21550_s14 + $0x2390] sm:$0xff] }
 0x6af   : > { %v18783_v5 = vcombine.high %v1589_v0, %v1593_v1  ;;  %v1648_v55 = vld [vmem:[%s21550_s14 + $0x23b0] sm:$0xff]  ;;  %v1645_v56 = vld [vmem:[%s21550_s14 + $0x2398] sm:$0xff] }
 0x6b0   : > { %v1649_v57 = vld [vmem:[%s21550_s14 + $0x23b8] sm:$0xff] }
 0x6b1   : > { %13798 = vmatpush1.bf16.msra.mxu0 %v18716_v8  ;;  %14443 = vmatpush1.bf16.msra.mxu1 %v18718_v9  ;;  %v1597_v8 = vld [vmem:[%s21550_s14 + $0x2218] sm:$0xff] }
 0x6b2   : > { %13810 = vmatprep.subr.bf16.mxu0 %v18725_v10  ;;  %14455 = vmatprep.subr.bf16.mxu1 %v18727_v11  ;;  %v1601_v9 = vld [vmem:[%s21550_s14 + $0x2238] sm:$0xff]  ;;  %v18780_v10 = vcombine.low %v1588_v62, %v1592_v63  ;;  %v18782_v11 = vcombine.low %v1589_v0, %v1593_v1  ;;  %v1652_v62 = vld [vmem:[%s21550_s14 + $0x23d0] sm:$0xff] }
 0x6b3   : > { %v18791_v13 = vcombine.high %v1597_v8, %v1601_v9  ;;  %v1656_v63 = vld [vmem:[%s21550_s14 + $0x23f0] sm:$0xff]  ;;  %v1653_v0 = vld [vmem:[%s21550_s14 + $0x23d8] sm:$0xff] }
 0x6b4   : > { %13800 = vmatmul.mubr.bf16.vlgmr.msra.gmra.mrb[4].mxu0 %v20426_v22  ;;  %14445 = vmatmul.mubr.bf16.vlgmr.msra.gmra.mrb[4].mxu1 %v20426_v22  ;;  %v1612_v22 = vld [vmem:[%s21550_s14 + $0x2290] sm:$0xff]  ;;  %v1657_v1 = vld [vmem:[%s21550_s14 + $0x23f8] sm:$0xff] }
 0x6b5   : > { %13811 = vmatpush1.bf16.msra.mxu0 %v18724_v16  ;;  %14456 = vmatpush1.bf16.msra.mxu1 %v18726_v17  ;;  %v1605_v16 = vld [vmem:[%s21550_s14 + $0x2258] sm:$0xff] }
 0x6b6   : > { %13812 = vmatprep.subr.bf16.mxu0 %v18733_v18  ;;  %14457 = vmatprep.subr.bf16.mxu1 %v18735_v19  ;;  %v1609_v17 = vld [vmem:[%s21550_s14 + $0x2278] sm:$0xff]  ;;  %v18788_v18 = vcombine.low %v1596_v6, %v1600_v7  ;;  %v18790_v19 = vcombine.low %v1597_v8, %v1601_v9  ;;  %v1660_v6 = vld [vmem:[%s21550_s14 + $0x2410] sm:$0xff] }
 0x6b7   : > { %13842 = vmatprep.mubr.bf16.mxu0 %v20427_v31  ;;  %14487 = vmatprep.mubr.bf16.mxu1 %v20427_v31  ;;  %v18799_v21 = vcombine.high %v1605_v16, %v1609_v17  ;;  %v1624_v31 = vld [vmem:[%s21550_s14 + $0x22f0] sm:$0xff]  ;;  %v1661_v8 = vld [vmem:[%s21550_s14 + $0x2418] sm:$0xff] }
 0x6b8   : > { %v1664_v7 = vld [vmem:[%s21550_s14 + $0x2430] sm:$0xff]  ;;  %v1665_v9 = vld [vmem:[%s21550_s14 + $0x2438] sm:$0xff] }
 0x6b9   : > { %13813 = vmatpush1.bf16.msra.mxu0 %v18732_v25  ;;  %14458 = vmatpush1.bf16.msra.mxu1 %v18734_v26  ;;  %v1617_v25 = vld [vmem:[%s21550_s14 + $0x22b8] sm:$0xff]  ;;  %v18796_v26 = vcombine.low %v1604_v14, %v1608_v15  ;;  %v1668_v14 = vld [vmem:[%s21550_s14 + $0x2450] sm:$0xff] }
 0x6ba   : > { %13814 = vmatprep.subr.bf16.mxu0 %v18741_v27  ;;  %14459 = vmatprep.subr.bf16.mxu1 %v18743_v28  ;;  %v18798_v27 = vcombine.low %v1605_v16, %v1609_v17  ;;  %v18805_v28 = vcombine.high %v1612_v22, %v1616_v23  ;;  %v18807_v29 = vcombine.high %v1613_v24, %v1617_v25  ;;  %v1672_v15 = vld [vmem:[%s21550_s14 + $0x2470] sm:$0xff]  ;;  %v1669_v16 = vld [vmem:[%s21550_s14 + $0x2458] sm:$0xff] }
 0x6bb   : > { %v1673_v17 = vld [vmem:[%s21550_s14 + $0x2478] sm:$0xff] }
 0x6bd   : > { %13815 = vmatpush1.bf16.msra.mxu0 %v18740_v34  ;;  %14460 = vmatpush1.bf16.msra.mxu1 %v18742_v35  ;;  %v18804_v34 = vcombine.low %v1612_v22, %v1616_v23  ;;  %v18806_v35 = vcombine.low %v1613_v24, %v1617_v25  ;;  %v1676_v22 = vld [vmem:[%s21550_s14 + $0x2490] sm:$0xff]  ;;  %v1677_v25 = vld [vmem:[%s21550_s14 + $0x2498] sm:$0xff] }
 0x6be   : > { %13816 = vmatprep.subr.bf16.mxu0 %v18749_v36  ;;  %14461 = vmatprep.subr.bf16.mxu1 %v18751_v37  ;;  %v18813_v36 = vcombine.high %v1620_v30, %v1624_v31  ;;  %v18815_v37 = vcombine.high %v1621_v32, %v1625_v33  ;;  %v1680_v23 = vld [vmem:[%s21550_s14 + $0x24b0] sm:$0xff] }
 0x6bf   : > { %v20428_v24 = vld [vmem:[%s21606_s12 + $0x40] ss:$240 sps:$4 sm:$0xff]  }
 0x6c1   : > { %13817 = vmatpush1.bf16.msra.mxu0 %v18748_v42  ;;  %14462 = vmatpush1.bf16.msra.mxu1 %v18750_v43  ;;  %v18812_v42 = vcombine.low %v1620_v30, %v1624_v31  ;;  %v18814_v43 = vcombine.low %v1621_v32, %v1625_v33  ;;  %v1684_v31 = vld [vmem:[%s21550_s14 + $0x24d0] sm:$0xff]  ;;  %v20429_v33 = vld [vmem:[%s21606_s12 + $0x4c] ss:$240 sps:$4 sm:$0xff]  }
 0x6c2   : > { %13818 = vmatprep.subr.bf16.mxu0 %v18757_v44  ;;  %14463 = vmatprep.subr.bf16.mxu1 %v18759_v45  ;;  %v18821_v44 = vcombine.high %v1628_v38, %v1632_v39  ;;  %v18823_v45 = vcombine.high %v1629_v40, %v1633_v41  ;;  %v1688_v32 = vld [vmem:[%s21550_s14 + $0x24f0] sm:$0xff] }
 0x6c5   : > { %13819 = vmatpush1.bf16.msra.mxu0 %v18756_v50  ;;  %14464 = vmatpush1.bf16.msra.mxu1 %v18758_v51  ;;  %v18820_v50 = vcombine.low %v1628_v38, %v1632_v39  ;;  %v18822_v51 = vcombine.low %v1629_v40, %v1633_v41  ;;  %v18877_v38 = vcombine.high %v1684_v31, %v1688_v32  ;;  %v1692_v40 = vld [vmem:[%s21550_s14 + $0x2510] sm:$0xff] }
 0x6c6   : > { %13820 = vmatprep.subr.bf16.mxu0 %v18765_v52  ;;  %14465 = vmatprep.subr.bf16.mxu1 %v18767_v53  ;;  %v18829_v52 = vcombine.high %v1636_v46, %v1640_v47  ;;  %v18831_v53 = vcombine.high %v1637_v48, %v1641_v49  ;;  %v1696_v41 = vld [vmem:[%s21550_s14 + $0x2530] sm:$0xff] }
 0x6c9   : > { %13821 = vmatpush1.bf16.msra.mxu0 %v18764_v58  ;;  %14466 = vmatpush1.bf16.msra.mxu1 %v18766_v59  ;;  %v18828_v58 = vcombine.low %v1636_v46, %v1640_v47  ;;  %v18830_v59 = vcombine.low %v1637_v48, %v1641_v49  ;;  %v18885_v46 = vcombine.high %v1692_v40, %v1696_v41  ;;  %v1700_v48 = vld [vmem:[%s21550_s14 + $0x2550] sm:$0xff] }
 0x6ca   : > { %13822 = vmatprep.subr.bf16.mxu0 %v18773_v60  ;;  %14467 = vmatprep.subr.bf16.mxu1 %v18775_v61  ;;  %v18837_v60 = vcombine.high %v1644_v54, %v1648_v55  ;;  %v18839_v61 = vcombine.high %v1645_v56, %v1649_v57  ;;  %v1704_v49 = vld [vmem:[%s21550_s14 + $0x2570] sm:$0xff] }
 0x6cd   : > { %13823 = vmatpush1.bf16.msra.mxu0 %v18772_v2  ;;  %14468 = vmatpush1.bf16.msra.mxu1 %v18774_v3  ;;  %v18836_v2 = vcombine.low %v1644_v54, %v1648_v55  ;;  %v18838_v3 = vcombine.low %v1645_v56, %v1649_v57  ;;  %v18893_v54 = vcombine.high %v1700_v48, %v1704_v49  ;;  %v1708_v56 = vld [vmem:[%s21550_s14 + $0x2590] sm:$0xff] }
 0x6ce   : > { %13824 = vmatprep.subr.bf16.mxu0 %v18781_v4  ;;  %14469 = vmatprep.subr.bf16.mxu1 %v18783_v5  ;;  %v18845_v4 = vcombine.high %v1652_v62, %v1656_v63  ;;  %v18847_v5 = vcombine.high %v1653_v0, %v1657_v1  ;;  %v1712_v57 = vld [vmem:[%s21550_s14 + $0x25b0] sm:$0xff] }
 0x6d1   : > { %13825 = vmatpush1.bf16.msra.mxu0 %v18780_v10  ;;  %14470 = vmatpush1.bf16.msra.mxu1 %v18782_v11  ;;  %v18844_v10 = vcombine.low %v1652_v62, %v1656_v63  ;;  %v18846_v11 = vcombine.low %v1653_v0, %v1657_v1  ;;  %v18901_v62 = vcombine.high %v1708_v56, %v1712_v57  ;;  %v1716_v0 = vld [vmem:[%s21550_s14 + $0x25d0] sm:$0xff] }
 0x6d2   : > { %13826 = vmatprep.subr.bf16.mxu0 %v18789_v12  ;;  %14471 = vmatprep.subr.bf16.mxu1 %v18791_v13  ;;  %v18853_v12 = vcombine.high %v1660_v6, %v1664_v7  ;;  %v18855_v13 = vcombine.high %v1661_v8, %v1665_v9  ;;  %v1720_v1 = vld [vmem:[%s21550_s14 + $0x25f0] sm:$0xff] }
 0x6d5   : > { %13827 = vmatpush1.bf16.msra.mxu0 %v18788_v18  ;;  %14472 = vmatpush1.bf16.msra.mxu1 %v18790_v19  ;;  %v18852_v18 = vcombine.low %v1660_v6, %v1664_v7  ;;  %v18854_v19 = vcombine.low %v1661_v8, %v1665_v9  ;;  %v18909_v6 = vcombine.high %v1716_v0, %v1720_v1  ;;  %v1724_v8 = vld [vmem:[%s21550_s14 + $0x2610] sm:$0xff] }
 0x6d6   : > { %13828 = vmatprep.subr.bf16.mxu0 %v18797_v20  ;;  %14473 = vmatprep.subr.bf16.mxu1 %v18799_v21  ;;  %v18861_v20 = vcombine.high %v1668_v14, %v1672_v15  ;;  %v18863_v21 = vcombine.high %v1669_v16, %v1673_v17  ;;  %v1728_v9 = vld [vmem:[%s21550_s14 + $0x2630] sm:$0xff] }
 0x6d9   : > { %13829 = vmatpush1.bf16.msra.mxu0 %v18796_v26  ;;  %14474 = vmatpush1.bf16.msra.mxu1 %v18798_v27  ;;  %v1681_v26 = vld [vmem:[%s21550_s14 + $0x24b8] sm:$0xff]  ;;  %v18860_v27 = vcombine.low %v1668_v14, %v1672_v15  ;;  %v18917_v14 = vcombine.high %v1724_v8, %v1728_v9 }
 0x6da   : > { %13830 = vmatprep.subr.bf16.mxu0 %v18805_v28  ;;  %14475 = vmatprep.subr.bf16.mxu1 %v18807_v29  ;;  %v18862_v28 = vcombine.low %v1669_v16, %v1673_v17  ;;  %v18869_v29 = vcombine.high %v1676_v22, %v1680_v23  ;;  %v18871_v30 = vcombine.high %v1677_v25, %v1681_v26  ;;  %v1732_v16 = vld [vmem:[%s21550_s14 + $0x2650] sm:$0xff] }
 0x6db   : > { %v1736_v17 = vld [vmem:[%s21550_s14 + $0x2670] sm:$0xff] }
 0x6dd   : > { %13831 = vmatpush1.bf16.msra.mxu0 %v18804_v34  ;;  %14476 = vmatpush1.bf16.msra.mxu1 %v18806_v35  ;;  %v1685_v34 = vld [vmem:[%s21550_s14 + $0x24d8] sm:$0xff] }
 0x6de   : > { %13832 = vmatprep.subr.bf16.mxu0 %v18813_v36  ;;  %14477 = vmatprep.subr.bf16.mxu1 %v18815_v37  ;;  %v1689_v35 = vld [vmem:[%s21550_s14 + $0x24f8] sm:$0xff]  ;;  %v18868_v36 = vcombine.low %v1676_v22, %v1680_v23  ;;  %v18870_v37 = vcombine.low %v1677_v25, %v1681_v26  ;;  %v18925_v22 = vcombine.high %v1732_v16, %v1736_v17  ;;  %v1744_v25 = vld [vmem:[%s21550_s14 + $0x26b0] sm:$0xff] }
 0x6df   : > { %v18879_v39 = vcombine.high %v1685_v34, %v1689_v35  ;;  %v1741_v26 = vld [vmem:[%s21550_s14 + $0x2698] sm:$0xff] }
 0x6e1   : > { %13833 = vmatpush1.bf16.msra.mxu0 %v18812_v42  ;;  %14478 = vmatpush1.bf16.msra.mxu1 %v18814_v43  ;;  %v1693_v42 = vld [vmem:[%s21550_s14 + $0x2518] sm:$0xff] }
 0x6e2   : > { %13834 = vmatprep.subr.bf16.mxu0 %v18821_v44  ;;  %14479 = vmatprep.subr.bf16.mxu1 %v18823_v45  ;;  %v1697_v43 = vld [vmem:[%s21550_s14 + $0x2538] sm:$0xff]  ;;  %v18876_v44 = vcombine.low %v1684_v31, %v1688_v32  ;;  %v18878_v45 = vcombine.low %v1685_v34, %v1689_v35  ;;  %v1748_v32 = vld [vmem:[%s21550_s14 + $0x26d0] sm:$0xff] }
 0x6e3   : > { %v18887_v47 = vcombine.high %v1693_v42, %v1697_v43  ;;  %v1749_v34 = vld [vmem:[%s21550_s14 + $0x26d8] sm:$0xff] }
 0x6e4   : > { %v1753_v35 = vld [vmem:[%s21550_s14 + $0x26f8] sm:$0xff] }
 0x6e5   : > { %13835 = vmatpush1.bf16.msra.mxu0 %v18820_v50  ;;  %14480 = vmatpush1.bf16.msra.mxu1 %v18822_v51  ;;  %v1701_v50 = vld [vmem:[%s21550_s14 + $0x2558] sm:$0xff] }
 0x6e6   : > { %13836 = vmatprep.subr.bf16.mxu0 %v18829_v52  ;;  %14481 = vmatprep.subr.bf16.mxu1 %v18831_v53  ;;  %v1705_v51 = vld [vmem:[%s21550_s14 + $0x2578] sm:$0xff]  ;;  %v18884_v52 = vcombine.low %v1692_v40, %v1696_v41  ;;  %v18886_v53 = vcombine.low %v1693_v42, %v1697_v43  ;;  %v1756_v40 = vld [vmem:[%s21550_s14 + $0x2710] sm:$0xff] }
 0x6e7   : > { %v18895_v55 = vcombine.high %v1701_v50, %v1705_v51  ;;  %v1760_v41 = vld [vmem:[%s21550_s14 + $0x2730] sm:$0xff]  ;;  %v1757_v42 = vld [vmem:[%s21550_s14 + $0x2718] sm:$0xff] }
 0x6e8   : > { %v1761_v43 = vld [vmem:[%s21550_s14 + $0x2738] sm:$0xff] }
 0x6e9   : > { %13837 = vmatpush1.bf16.msra.mxu0 %v18828_v58  ;;  %14482 = vmatpush1.bf16.msra.mxu1 %v18830_v59  ;;  %v1709_v58 = vld [vmem:[%s21550_s14 + $0x2598] sm:$0xff] }
 0x6ea   : > { %13838 = vmatprep.subr.bf16.mxu0 %v18837_v60  ;;  %14483 = vmatprep.subr.bf16.mxu1 %v18839_v61  ;;  %v1713_v59 = vld [vmem:[%s21550_s14 + $0x25b8] sm:$0xff]  ;;  %v18892_v60 = vcombine.low %v1700_v48, %v1704_v49  ;;  %v18894_v61 = vcombine.low %v1701_v50, %v1705_v51  ;;  %v1764_v48 = vld [vmem:[%s21550_s14 + $0x2750] sm:$0xff] }
 0x6eb   : > { %v18903_v63 = vcombine.high %v1709_v58, %v1713_v59  ;;  %v1768_v49 = vld [vmem:[%s21550_s14 + $0x2770] sm:$0xff]  ;;  %v1765_v50 = vld [vmem:[%s21550_s14 + $0x2758] sm:$0xff] }
 0x6ec   : > { %v1769_v51 = vld [vmem:[%s21550_s14 + $0x2778] sm:$0xff] }
 0x6ed   : > { %13839 = vmatpush1.bf16.msra.mxu0 %v18836_v2  ;;  %14484 = vmatpush1.bf16.msra.mxu1 %v18838_v3  ;;  %v1717_v2 = vld [vmem:[%s21550_s14 + $0x25d8] sm:$0xff] }
 0x6ee   : > { %13840 = vmatprep.subr.bf16.mxu0 %v18845_v4  ;;  %14485 = vmatprep.subr.bf16.mxu1 %v18847_v5  ;;  %v1721_v3 = vld [vmem:[%s21550_s14 + $0x25f8] sm:$0xff]  ;;  %v18900_v4 = vcombine.low %v1708_v56, %v1712_v57  ;;  %v18902_v5 = vcombine.low %v1709_v58, %v1713_v59  ;;  %v1772_v56 = vld [vmem:[%s21550_s14 + $0x2790] sm:$0xff] }
 0x6ef   : > { %v18911_v7 = vcombine.high %v1717_v2, %v1721_v3  ;;  %v1776_v57 = vld [vmem:[%s21550_s14 + $0x27b0] sm:$0xff]  ;;  %v1773_v58 = vld [vmem:[%s21550_s14 + $0x2798] sm:$0xff] }
 0x6f0   : > { %v1777_v59 = vld [vmem:[%s21550_s14 + $0x27b8] sm:$0xff] }
 0x6f1   : > { %13841 = vmatpush1.bf16.msra.mxu0 %v18844_v10  ;;  %14486 = vmatpush1.bf16.msra.mxu1 %v18846_v11  ;;  %v1725_v10 = vld [vmem:[%s21550_s14 + $0x2618] sm:$0xff] }
 0x6f2   : > { %13853 = vmatprep.subr.bf16.mxu0 %v18853_v12  ;;  %14498 = vmatprep.subr.bf16.mxu1 %v18855_v13  ;;  %v1729_v11 = vld [vmem:[%s21550_s14 + $0x2638] sm:$0xff]  ;;  %v18908_v12 = vcombine.low %v1716_v0, %v1720_v1  ;;  %v18910_v13 = vcombine.low %v1717_v2, %v1721_v3  ;;  %v1780_v0 = vld [vmem:[%s21550_s14 + $0x27d0] sm:$0xff] }
 0x6f3   : > { %v18919_v15 = vcombine.high %v1725_v10, %v1729_v11  ;;  %v1784_v1 = vld [vmem:[%s21550_s14 + $0x27f0] sm:$0xff]  ;;  %v1781_v2 = vld [vmem:[%s21550_s14 + $0x27d8] sm:$0xff] }
 0x6f4   : > { %13843 = vmatmul.mubr.bf16.vlgmr.msra.gmra.mrb[4].mxu0 %v20428_v24  ;;  %14488 = vmatmul.mubr.bf16.vlgmr.msra.gmra.mrb[4].mxu1 %v20428_v24  ;;  %v1740_v24 = vld [vmem:[%s21550_s14 + $0x2690] sm:$0xff]  ;;  %v1785_v3 = vld [vmem:[%s21550_s14 + $0x27f8] sm:$0xff] }
 0x6f5   : > { %13854 = vmatpush1.bf16.msra.mxu0 %v18852_v18  ;;  %14499 = vmatpush1.bf16.msra.mxu1 %v18854_v19  ;;  %v1733_v18 = vld [vmem:[%s21550_s14 + $0x2658] sm:$0xff] }
 0x6f6   : > { %13855 = vmatprep.subr.bf16.mxu0 %v18861_v20  ;;  %14500 = vmatprep.subr.bf16.mxu1 %v18863_v21  ;;  %v1737_v19 = vld [vmem:[%s21550_s14 + $0x2678] sm:$0xff]  ;;  %v18916_v20 = vcombine.low %v1724_v8, %v1728_v9  ;;  %v18918_v21 = vcombine.low %v1725_v10, %v1729_v11  ;;  %v1788_v8 = vld [vmem:[%s21550_s14 + $0x2810] sm:$0xff] }
 0x6f7   : > { %13885 = vmatprep.mubr.bf16.mxu0 %v20429_v33  ;;  %14530 = vmatprep.mubr.bf16.mxu1 %v20429_v33  ;;  %v18927_v23 = vcombine.high %v1733_v18, %v1737_v19  ;;  %v1752_v33 = vld [vmem:[%s21550_s14 + $0x26f0] sm:$0xff]  ;;  %v1789_v10 = vld [vmem:[%s21550_s14 + $0x2818] sm:$0xff] }
 0x6f8   : > { %v1792_v9 = vld [vmem:[%s21550_s14 + $0x2830] sm:$0xff]  ;;  %v1793_v11 = vld [vmem:[%s21550_s14 + $0x2838] sm:$0xff] }
 0x6f9   : > { %13856 = vmatpush1.bf16.msra.mxu0 %v18860_v27  ;;  %14501 = vmatpush1.bf16.msra.mxu1 %v18862_v28  ;;  %v1745_v27 = vld [vmem:[%s21550_s14 + $0x26b8] sm:$0xff]  ;;  %v18924_v28 = vcombine.low %v1732_v16, %v1736_v17  ;;  %v1796_v16 = vld [vmem:[%s21550_s14 + $0x2850] sm:$0xff] }
 0x6fa   : > { %13857 = vmatprep.subr.bf16.mxu0 %v18869_v29  ;;  %14502 = vmatprep.subr.bf16.mxu1 %v18871_v30  ;;  %v18926_v29 = vcombine.low %v1733_v18, %v1737_v19  ;;  %v18933_v30 = vcombine.high %v1740_v24, %v1744_v25  ;;  %v18935_v31 = vcombine.high %v1741_v26, %v1745_v27  ;;  %v1800_v17 = vld [vmem:[%s21550_s14 + $0x2870] sm:$0xff]  ;;  %v1797_v18 = vld [vmem:[%s21550_s14 + $0x2858] sm:$0xff] }
 0x6fb   : > { %v1801_v19 = vld [vmem:[%s21550_s14 + $0x2878] sm:$0xff] }
 0x6fd   : > { %13858 = vmatpush1.bf16.msra.mxu0 %v18868_v36  ;;  %14503 = vmatpush1.bf16.msra.mxu1 %v18870_v37  ;;  %v18932_v36 = vcombine.low %v1740_v24, %v1744_v25  ;;  %v18934_v37 = vcombine.low %v1741_v26, %v1745_v27  ;;  %v1804_v24 = vld [vmem:[%s21550_s14 + $0x2890] sm:$0xff]  ;;  %v20430_v26 = vld [vmem:[%s21606_s12 + $0x48] ss:$240 sps:$4 sm:$0xff]  }
 0x6fe   : > { %13859 = vmatprep.subr.bf16.mxu0 %v18877_v38  ;;  %14504 = vmatprep.subr.bf16.mxu1 %v18879_v39  ;;  %v18941_v38 = vcombine.high %v1748_v32, %v1752_v33  ;;  %v18943_v39 = vcombine.high %v1749_v34, %v1753_v35  ;;  %v1808_v25 = vld [vmem:[%s21550_s14 + $0x28b0] sm:$0xff]  ;;  %v1805_v27 = vld [vmem:[%s21550_s14 + $0x2898] sm:$0xff] }
 0x701   : > { %13860 = vmatpush1.bf16.msra.mxu0 %v18876_v44  ;;  %14505 = vmatpush1.bf16.msra.mxu1 %v18878_v45  ;;  %v18940_v44 = vcombine.low %v1748_v32, %v1752_v33  ;;  %v18942_v45 = vcombine.low %v1749_v34, %v1753_v35  ;;  %v1812_v33 = vld [vmem:[%s21550_s14 + $0x28d0] sm:$0xff] }
 0x702   : > { %13861 = vmatprep.subr.bf16.mxu0 %v18885_v46  ;;  %14506 = vmatprep.subr.bf16.mxu1 %v18887_v47  ;;  %v18949_v46 = vcombine.high %v1756_v40, %v1760_v41  ;;  %v18951_v47 = vcombine.high %v1757_v42, %v1761_v43  ;;  %v1816_v34 = vld [vmem:[%s21550_s14 + $0x28f0] sm:$0xff] }
 0x703   : > { %v20431_v35 = vld [vmem:[%s21606_s12 + $0x54] ss:$240 sps:$4 sm:$0xff]  }
 0x705   : > { %13862 = vmatpush1.bf16.msra.mxu0 %v18884_v52  ;;  %14507 = vmatpush1.bf16.msra.mxu1 %v18886_v53  ;;  %v18948_v52 = vcombine.low %v1756_v40, %v1760_v41  ;;  %v18950_v53 = vcombine.low %v1757_v42, %v1761_v43  ;;  %v19005_v40 = vcombine.high %v1812_v33, %v1816_v34  ;;  %v1820_v42 = vld [vmem:[%s21550_s14 + $0x2910] sm:$0xff] }
 0x706   : > { %13863 = vmatprep.subr.bf16.mxu0 %v18893_v54  ;;  %14508 = vmatprep.subr.bf16.mxu1 %v18895_v55  ;;  %v18957_v54 = vcombine.high %v1764_v48, %v1768_v49  ;;  %v18959_v55 = vcombine.high %v1765_v50, %v1769_v51  ;;  %v1824_v43 = vld [vmem:[%s21550_s14 + $0x2930] sm:$0xff] }
 0x709   : > { %13864 = vmatpush1.bf16.msra.mxu0 %v18892_v60  ;;  %14509 = vmatpush1.bf16.msra.mxu1 %v18894_v61  ;;  %v18956_v60 = vcombine.low %v1764_v48, %v1768_v49  ;;  %v18958_v61 = vcombine.low %v1765_v50, %v1769_v51  ;;  %v19013_v48 = vcombine.high %v1820_v42, %v1824_v43  ;;  %v1828_v50 = vld [vmem:[%s21550_s14 + $0x2950] sm:$0xff] }
 0x70a   : > { %13865 = vmatprep.subr.bf16.mxu0 %v18901_v62  ;;  %14510 = vmatprep.subr.bf16.mxu1 %v18903_v63  ;;  %v18965_v62 = vcombine.high %v1772_v56, %v1776_v57  ;;  %v18967_v63 = vcombine.high %v1773_v58, %v1777_v59  ;;  %v1832_v51 = vld [vmem:[%s21550_s14 + $0x2970] sm:$0xff] }
 0x70d   : > { %13866 = vmatpush1.bf16.msra.mxu0 %v18900_v4  ;;  %14511 = vmatpush1.bf16.msra.mxu1 %v18902_v5  ;;  %v18964_v4 = vcombine.low %v1772_v56, %v1776_v57  ;;  %v18966_v5 = vcombine.low %v1773_v58, %v1777_v59  ;;  %v19021_v56 = vcombine.high %v1828_v50, %v1832_v51  ;;  %v1836_v58 = vld [vmem:[%s21550_s14 + $0x2990] sm:$0xff] }
 0x70e   : > { %13867 = vmatprep.subr.bf16.mxu0 %v18909_v6  ;;  %14512 = vmatprep.subr.bf16.mxu1 %v18911_v7  ;;  %v18973_v6 = vcombine.high %v1780_v0, %v1784_v1  ;;  %v18975_v7 = vcombine.high %v1781_v2, %v1785_v3  ;;  %v1840_v59 = vld [vmem:[%s21550_s14 + $0x29b0] sm:$0xff] }
 0x711   : > { %13868 = vmatpush1.bf16.msra.mxu0 %v18908_v12  ;;  %14513 = vmatpush1.bf16.msra.mxu1 %v18910_v13  ;;  %v18972_v12 = vcombine.low %v1780_v0, %v1784_v1  ;;  %v18974_v13 = vcombine.low %v1781_v2, %v1785_v3  ;;  %v19029_v0 = vcombine.high %v1836_v58, %v1840_v59  ;;  %v1844_v2 = vld [vmem:[%s21550_s14 + $0x29d0] sm:$0xff] }
 0x712   : > { %13869 = vmatprep.subr.bf16.mxu0 %v18917_v14  ;;  %14514 = vmatprep.subr.bf16.mxu1 %v18919_v15  ;;  %v18981_v14 = vcombine.high %v1788_v8, %v1792_v9  ;;  %v18983_v15 = vcombine.high %v1789_v10, %v1793_v11  ;;  %v1848_v3 = vld [vmem:[%s21550_s14 + $0x29f0] sm:$0xff] }
 0x715   : > { %13870 = vmatpush1.bf16.msra.mxu0 %v18916_v20  ;;  %14515 = vmatpush1.bf16.msra.mxu1 %v18918_v21  ;;  %v18980_v20 = vcombine.low %v1788_v8, %v1792_v9  ;;  %v18982_v21 = vcombine.low %v1789_v10, %v1793_v11  ;;  %v19037_v8 = vcombine.high %v1844_v2, %v1848_v3  ;;  %v1852_v10 = vld [vmem:[%s21550_s14 + $0x2a10] sm:$0xff] }
 0x716   : > { %13871 = vmatprep.subr.bf16.mxu0 %v18925_v22  ;;  %14516 = vmatprep.subr.bf16.mxu1 %v18927_v23  ;;  %v18989_v22 = vcombine.high %v1796_v16, %v1800_v17  ;;  %v18991_v23 = vcombine.high %v1797_v18, %v1801_v19  ;;  %v1856_v11 = vld [vmem:[%s21550_s14 + $0x2a30] sm:$0xff] }
 0x719   : > { %13872 = vmatpush1.bf16.msra.mxu0 %v18924_v28  ;;  %14517 = vmatpush1.bf16.msra.mxu1 %v18926_v29  ;;  %v1809_v28 = vld [vmem:[%s21550_s14 + $0x28b8] sm:$0xff]  ;;  %v18988_v29 = vcombine.low %v1796_v16, %v1800_v17  ;;  %v19045_v16 = vcombine.high %v1852_v10, %v1856_v11 }
 0x71a   : > { %13873 = vmatprep.subr.bf16.mxu0 %v18933_v30  ;;  %14518 = vmatprep.subr.bf16.mxu1 %v18935_v31  ;;  %v18990_v30 = vcombine.low %v1797_v18, %v1801_v19  ;;  %v18997_v31 = vcombine.high %v1804_v24, %v1808_v25  ;;  %v18999_v32 = vcombine.high %v1805_v27, %v1809_v28  ;;  %v1860_v18 = vld [vmem:[%s21550_s14 + $0x2a50] sm:$0xff] }
 0x71b   : > { %v1864_v19 = vld [vmem:[%s21550_s14 + $0x2a70] sm:$0xff] }
 0x71d   : > { %13874 = vmatpush1.bf16.msra.mxu0 %v18932_v36  ;;  %14519 = vmatpush1.bf16.msra.mxu1 %v18934_v37  ;;  %v1813_v36 = vld [vmem:[%s21550_s14 + $0x28d8] sm:$0xff] }
 0x71e   : > { %13875 = vmatprep.subr.bf16.mxu0 %v18941_v38  ;;  %14520 = vmatprep.subr.bf16.mxu1 %v18943_v39  ;;  %v1817_v37 = vld [vmem:[%s21550_s14 + $0x28f8] sm:$0xff]  ;;  %v18996_v38 = vcombine.low %v1804_v24, %v1808_v25  ;;  %v18998_v39 = vcombine.low %v1805_v27, %v1809_v28  ;;  %v19053_v24 = vcombine.high %v1860_v18, %v1864_v19  ;;  %v1872_v27 = vld [vmem:[%s21550_s14 + $0x2ab0] sm:$0xff] }
 0x71f   : > { %v19007_v41 = vcombine.high %v1813_v36, %v1817_v37  ;;  %v1869_v28 = vld [vmem:[%s21550_s14 + $0x2a98] sm:$0xff] }
 0x721   : > { %13876 = vmatpush1.bf16.msra.mxu0 %v18940_v44  ;;  %14521 = vmatpush1.bf16.msra.mxu1 %v18942_v45  ;;  %v1821_v44 = vld [vmem:[%s21550_s14 + $0x2918] sm:$0xff] }
 0x722   : > { %13877 = vmatprep.subr.bf16.mxu0 %v18949_v46  ;;  %14522 = vmatprep.subr.bf16.mxu1 %v18951_v47  ;;  %v1825_v45 = vld [vmem:[%s21550_s14 + $0x2938] sm:$0xff]  ;;  %v19004_v46 = vcombine.low %v1812_v33, %v1816_v34  ;;  %v19006_v47 = vcombine.low %v1813_v36, %v1817_v37  ;;  %v1876_v34 = vld [vmem:[%s21550_s14 + $0x2ad0] sm:$0xff] }
 0x723   : > { %v19015_v49 = vcombine.high %v1821_v44, %v1825_v45  ;;  %v1877_v36 = vld [vmem:[%s21550_s14 + $0x2ad8] sm:$0xff] }
 0x724   : > { %v1881_v37 = vld [vmem:[%s21550_s14 + $0x2af8] sm:$0xff] }
 0x725   : > { %13878 = vmatpush1.bf16.msra.mxu0 %v18948_v52  ;;  %14523 = vmatpush1.bf16.msra.mxu1 %v18950_v53  ;;  %v1829_v52 = vld [vmem:[%s21550_s14 + $0x2958] sm:$0xff] }
 0x726   : > { %13879 = vmatprep.subr.bf16.mxu0 %v18957_v54  ;;  %14524 = vmatprep.subr.bf16.mxu1 %v18959_v55  ;;  %v1833_v53 = vld [vmem:[%s21550_s14 + $0x2978] sm:$0xff]  ;;  %v19012_v54 = vcombine.low %v1820_v42, %v1824_v43  ;;  %v19014_v55 = vcombine.low %v1821_v44, %v1825_v45  ;;  %v1884_v42 = vld [vmem:[%s21550_s14 + $0x2b10] sm:$0xff] }
 0x727   : > { %v19023_v57 = vcombine.high %v1829_v52, %v1833_v53  ;;  %v1888_v43 = vld [vmem:[%s21550_s14 + $0x2b30] sm:$0xff]  ;;  %v1885_v44 = vld [vmem:[%s21550_s14 + $0x2b18] sm:$0xff] }
 0x728   : > { %v1889_v45 = vld [vmem:[%s21550_s14 + $0x2b38] sm:$0xff] }
 0x729   : > { %13880 = vmatpush1.bf16.msra.mxu0 %v18956_v60  ;;  %14525 = vmatpush1.bf16.msra.mxu1 %v18958_v61  ;;  %v1837_v60 = vld [vmem:[%s21550_s14 + $0x2998] sm:$0xff] }
 0x72a   : > { %13881 = vmatprep.subr.bf16.mxu0 %v18965_v62  ;;  %14526 = vmatprep.subr.bf16.mxu1 %v18967_v63  ;;  %v1841_v61 = vld [vmem:[%s21550_s14 + $0x29b8] sm:$0xff]  ;;  %v19020_v62 = vcombine.low %v1828_v50, %v1832_v51  ;;  %v19022_v63 = vcombine.low %v1829_v52, %v1833_v53  ;;  %v1892_v50 = vld [vmem:[%s21550_s14 + $0x2b50] sm:$0xff] }
 0x72b   : > { %v19031_v1 = vcombine.high %v1837_v60, %v1841_v61  ;;  %v1896_v51 = vld [vmem:[%s21550_s14 + $0x2b70] sm:$0xff]  ;;  %v1893_v52 = vld [vmem:[%s21550_s14 + $0x2b58] sm:$0xff] }
 0x72c   : > { %v1897_v53 = vld [vmem:[%s21550_s14 + $0x2b78] sm:$0xff] }
 0x72d   : > { %13882 = vmatpush1.bf16.msra.mxu0 %v18964_v4  ;;  %14527 = vmatpush1.bf16.msra.mxu1 %v18966_v5  ;;  %v1845_v4 = vld [vmem:[%s21550_s14 + $0x29d8] sm:$0xff] }
 0x72e   : > { %13883 = vmatprep.subr.bf16.mxu0 %v18973_v6  ;;  %14528 = vmatprep.subr.bf16.mxu1 %v18975_v7  ;;  %v1849_v5 = vld [vmem:[%s21550_s14 + $0x29f8] sm:$0xff]  ;;  %v19028_v6 = vcombine.low %v1836_v58, %v1840_v59  ;;  %v19030_v7 = vcombine.low %v1837_v60, %v1841_v61  ;;  %v1900_v58 = vld [vmem:[%s21550_s14 + $0x2b90] sm:$0xff] }
 0x72f   : > { %v19039_v9 = vcombine.high %v1845_v4, %v1849_v5  ;;  %v1904_v59 = vld [vmem:[%s21550_s14 + $0x2bb0] sm:$0xff]  ;;  %v1901_v60 = vld [vmem:[%s21550_s14 + $0x2b98] sm:$0xff] }
 0x730   : > { %v1905_v61 = vld [vmem:[%s21550_s14 + $0x2bb8] sm:$0xff] }
 0x731   : > { %13884 = vmatpush1.bf16.msra.mxu0 %v18972_v12  ;;  %14529 = vmatpush1.bf16.msra.mxu1 %v18974_v13  ;;  %v1853_v12 = vld [vmem:[%s21550_s14 + $0x2a18] sm:$0xff] }
 0x732   : > { %13896 = vmatprep.subr.bf16.mxu0 %v18981_v14  ;;  %14541 = vmatprep.subr.bf16.mxu1 %v18983_v15  ;;  %v1857_v13 = vld [vmem:[%s21550_s14 + $0x2a38] sm:$0xff]  ;;  %v19036_v14 = vcombine.low %v1844_v2, %v1848_v3  ;;  %v19038_v15 = vcombine.low %v1845_v4, %v1849_v5  ;;  %v1908_v2 = vld [vmem:[%s21550_s14 + $0x2bd0] sm:$0xff] }
 0x733   : > { %v19047_v17 = vcombine.high %v1853_v12, %v1857_v13  ;;  %v1912_v3 = vld [vmem:[%s21550_s14 + $0x2bf0] sm:$0xff]  ;;  %v1909_v4 = vld [vmem:[%s21550_s14 + $0x2bd8] sm:$0xff] }
 0x734   : > { %13886 = vmatmul.mubr.bf16.vlgmr.msra.gmra.mrb[4].mxu0 %v20430_v26  ;;  %14531 = vmatmul.mubr.bf16.vlgmr.msra.gmra.mrb[4].mxu1 %v20430_v26  ;;  %v1868_v26 = vld [vmem:[%s21550_s14 + $0x2a90] sm:$0xff]  ;;  %v1913_v5 = vld [vmem:[%s21550_s14 + $0x2bf8] sm:$0xff] }
 0x735   : > { %13897 = vmatpush1.bf16.msra.mxu0 %v18980_v20  ;;  %14542 = vmatpush1.bf16.msra.mxu1 %v18982_v21  ;;  %v1861_v20 = vld [vmem:[%s21550_s14 + $0x2a58] sm:$0xff] }
 0x736   : > { %13898 = vmatprep.subr.bf16.mxu0 %v18989_v22  ;;  %14543 = vmatprep.subr.bf16.mxu1 %v18991_v23  ;;  %v1865_v21 = vld [vmem:[%s21550_s14 + $0x2a78] sm:$0xff]  ;;  %v19044_v22 = vcombine.low %v1852_v10, %v1856_v11  ;;  %v19046_v23 = vcombine.low %v1853_v12, %v1857_v13  ;;  %v1916_v10 = vld [vmem:[%s21550_s14 + $0x2c10] sm:$0xff] }
 0x737   : > { %13928 = vmatprep.mubr.bf16.mxu0 %v20431_v35  ;;  %14573 = vmatprep.mubr.bf16.mxu1 %v20431_v35  ;;  %v19055_v25 = vcombine.high %v1861_v20, %v1865_v21  ;;  %v1880_v35 = vld [vmem:[%s21550_s14 + $0x2af0] sm:$0xff]  ;;  %v1917_v12 = vld [vmem:[%s21550_s14 + $0x2c18] sm:$0xff] }
 0x738   : > { %v1920_v11 = vld [vmem:[%s21550_s14 + $0x2c30] sm:$0xff]  ;;  %v1921_v13 = vld [vmem:[%s21550_s14 + $0x2c38] sm:$0xff] }
 0x739   : > { %13899 = vmatpush1.bf16.msra.mxu0 %v18988_v29  ;;  %14544 = vmatpush1.bf16.msra.mxu1 %v18990_v30  ;;  %v1873_v29 = vld [vmem:[%s21550_s14 + $0x2ab8] sm:$0xff]  ;;  %v19052_v30 = vcombine.low %v1860_v18, %v1864_v19  ;;  %v1924_v18 = vld [vmem:[%s21550_s14 + $0x2c50] sm:$0xff] }
 0x73a   : > { %13900 = vmatprep.subr.bf16.mxu0 %v18997_v31  ;;  %14545 = vmatprep.subr.bf16.mxu1 %v18999_v32  ;;  %v19054_v31 = vcombine.low %v1861_v20, %v1865_v21  ;;  %v19061_v32 = vcombine.high %v1868_v26, %v1872_v27  ;;  %v19063_v33 = vcombine.high %v1869_v28, %v1873_v29  ;;  %v1928_v19 = vld [vmem:[%s21550_s14 + $0x2c70] sm:$0xff]  ;;  %v1925_v20 = vld [vmem:[%s21550_s14 + $0x2c58] sm:$0xff] }
 0x73b   : > { %v1929_v21 = vld [vmem:[%s21550_s14 + $0x2c78] sm:$0xff] }
 0x73d   : > { %13901 = vmatpush1.bf16.msra.mxu0 %v18996_v38  ;;  %14546 = vmatpush1.bf16.msra.mxu1 %v18998_v39  ;;  %v19060_v38 = vcombine.low %v1868_v26, %v1872_v27  ;;  %v19062_v39 = vcombine.low %v1869_v28, %v1873_v29  ;;  %v1932_v26 = vld [vmem:[%s21550_s14 + $0x2c90] sm:$0xff]  ;;  %v1933_v29 = vld [vmem:[%s21550_s14 + $0x2c98] sm:$0xff] }
 0x73e   : > { %13902 = vmatprep.subr.bf16.mxu0 %v19005_v40  ;;  %14547 = vmatprep.subr.bf16.mxu1 %v19007_v41  ;;  %v19069_v40 = vcombine.high %v1876_v34, %v1880_v35  ;;  %v19071_v41 = vcombine.high %v1877_v36, %v1881_v37  ;;  %v1936_v27 = vld [vmem:[%s21550_s14 + $0x2cb0] sm:$0xff] }
 0x73f   : > { %v20432_v28 = vld [vmem:[%s21606_s12 + $0x50] ss:$240 sps:$4 sm:$0xff]  }
 0x741   : > { %13903 = vmatpush1.bf16.msra.mxu0 %v19004_v46  ;;  %14548 = vmatpush1.bf16.msra.mxu1 %v19006_v47  ;;  %v19068_v46 = vcombine.low %v1876_v34, %v1880_v35  ;;  %v19070_v47 = vcombine.low %v1877_v36, %v1881_v37  ;;  %v1940_v35 = vld [vmem:[%s21550_s14 + $0x2cd0] sm:$0xff]  ;;  %v20433_v37 = vld [vmem:[%s21606_s12 + $0x5c] ss:$240 sps:$4 sm:$0xff]  }
 0x742   : > { %13904 = vmatprep.subr.bf16.mxu0 %v19013_v48  ;;  %14549 = vmatprep.subr.bf16.mxu1 %v19015_v49  ;;  %v19077_v48 = vcombine.high %v1884_v42, %v1888_v43  ;;  %v19079_v49 = vcombine.high %v1885_v44, %v1889_v45  ;;  %v1944_v36 = vld [vmem:[%s21550_s14 + $0x2cf0] sm:$0xff] }
 0x745   : > { %13905 = vmatpush1.bf16.msra.mxu0 %v19012_v54  ;;  %14550 = vmatpush1.bf16.msra.mxu1 %v19014_v55  ;;  %v19076_v54 = vcombine.low %v1884_v42, %v1888_v43  ;;  %v19078_v55 = vcombine.low %v1885_v44, %v1889_v45  ;;  %v19133_v42 = vcombine.high %v1940_v35, %v1944_v36  ;;  %v1948_v44 = vld [vmem:[%s21550_s14 + $0x2d10] sm:$0xff] }
 0x746   : > { %13906 = vmatprep.subr.bf16.mxu0 %v19021_v56  ;;  %14551 = vmatprep.subr.bf16.mxu1 %v19023_v57  ;;  %v19085_v56 = vcombine.high %v1892_v50, %v1896_v51  ;;  %v19087_v57 = vcombine.high %v1893_v52, %v1897_v53  ;;  %v1952_v45 = vld [vmem:[%s21550_s14 + $0x2d30] sm:$0xff] }
 0x749   : > { %13907 = vmatpush1.bf16.msra.mxu0 %v19020_v62  ;;  %14552 = vmatpush1.bf16.msra.mxu1 %v19022_v63  ;;  %v19084_v62 = vcombine.low %v1892_v50, %v1896_v51  ;;  %v19086_v63 = vcombine.low %v1893_v52, %v1897_v53  ;;  %v19141_v50 = vcombine.high %v1948_v44, %v1952_v45  ;;  %v1956_v52 = vld [vmem:[%s21550_s14 + $0x2d50] sm:$0xff] }
 0x74a   : > { %13908 = vmatprep.subr.bf16.mxu0 %v19029_v0  ;;  %14553 = vmatprep.subr.bf16.mxu1 %v19031_v1  ;;  %v19093_v0 = vcombine.high %v1900_v58, %v1904_v59  ;;  %v19095_v1 = vcombine.high %v1901_v60, %v1905_v61  ;;  %v1960_v53 = vld [vmem:[%s21550_s14 + $0x2d70] sm:$0xff] }
 0x74d   : > { %13909 = vmatpush1.bf16.msra.mxu0 %v19028_v6  ;;  %14554 = vmatpush1.bf16.msra.mxu1 %v19030_v7  ;;  %v19092_v6 = vcombine.low %v1900_v58, %v1904_v59  ;;  %v19094_v7 = vcombine.low %v1901_v60, %v1905_v61  ;;  %v19149_v58 = vcombine.high %v1956_v52, %v1960_v53  ;;  %v1964_v60 = vld [vmem:[%s21550_s14 + $0x2d90] sm:$0xff] }
 0x74e   : > { %13910 = vmatprep.subr.bf16.mxu0 %v19037_v8  ;;  %14555 = vmatprep.subr.bf16.mxu1 %v19039_v9  ;;  %v19101_v8 = vcombine.high %v1908_v2, %v1912_v3  ;;  %v19103_v9 = vcombine.high %v1909_v4, %v1913_v5  ;;  %v1968_v61 = vld [vmem:[%s21550_s14 + $0x2db0] sm:$0xff] }
 0x751   : > { %13911 = vmatpush1.bf16.msra.mxu0 %v19036_v14  ;;  %14556 = vmatpush1.bf16.msra.mxu1 %v19038_v15  ;;  %v19100_v14 = vcombine.low %v1908_v2, %v1912_v3  ;;  %v19102_v15 = vcombine.low %v1909_v4, %v1913_v5  ;;  %v19157_v2 = vcombine.high %v1964_v60, %v1968_v61  ;;  %v1972_v4 = vld [vmem:[%s21550_s14 + $0x2dd0] sm:$0xff] }
 0x752   : > { %13912 = vmatprep.subr.bf16.mxu0 %v19045_v16  ;;  %14557 = vmatprep.subr.bf16.mxu1 %v19047_v17  ;;  %v19109_v16 = vcombine.high %v1916_v10, %v1920_v11  ;;  %v19111_v17 = vcombine.high %v1917_v12, %v1921_v13  ;;  %v1976_v5 = vld [vmem:[%s21550_s14 + $0x2df0] sm:$0xff] }
 0x755   : > { %13913 = vmatpush1.bf16.msra.mxu0 %v19044_v22  ;;  %14558 = vmatpush1.bf16.msra.mxu1 %v19046_v23  ;;  %v19108_v22 = vcombine.low %v1916_v10, %v1920_v11  ;;  %v19110_v23 = vcombine.low %v1917_v12, %v1921_v13  ;;  %v19165_v10 = vcombine.high %v1972_v4, %v1976_v5  ;;  %v1980_v12 = vld [vmem:[%s21550_s14 + $0x2e10] sm:$0xff] }
 0x756   : > { %13914 = vmatprep.subr.bf16.mxu0 %v19053_v24  ;;  %14559 = vmatprep.subr.bf16.mxu1 %v19055_v25  ;;  %v19117_v24 = vcombine.high %v1924_v18, %v1928_v19  ;;  %v19119_v25 = vcombine.high %v1925_v20, %v1929_v21  ;;  %v1984_v13 = vld [vmem:[%s21550_s14 + $0x2e30] sm:$0xff] }
 0x759   : > { %13915 = vmatpush1.bf16.msra.mxu0 %v19052_v30  ;;  %14560 = vmatpush1.bf16.msra.mxu1 %v19054_v31  ;;  %v1937_v30 = vld [vmem:[%s21550_s14 + $0x2cb8] sm:$0xff]  ;;  %v19116_v31 = vcombine.low %v1924_v18, %v1928_v19  ;;  %v19173_v18 = vcombine.high %v1980_v12, %v1984_v13 }
 0x75a   : > { %13916 = vmatprep.subr.bf16.mxu0 %v19061_v32  ;;  %14561 = vmatprep.subr.bf16.mxu1 %v19063_v33  ;;  %v19118_v32 = vcombine.low %v1925_v20, %v1929_v21  ;;  %v19125_v33 = vcombine.high %v1932_v26, %v1936_v27  ;;  %v19127_v34 = vcombine.high %v1933_v29, %v1937_v30  ;;  %v1988_v20 = vld [vmem:[%s21550_s14 + $0x2e50] sm:$0xff] }
 0x75b   : > { %v1992_v21 = vld [vmem:[%s21550_s14 + $0x2e70] sm:$0xff] }
 0x75d   : > { %13917 = vmatpush1.bf16.msra.mxu0 %v19060_v38  ;;  %14562 = vmatpush1.bf16.msra.mxu1 %v19062_v39  ;;  %v1941_v38 = vld [vmem:[%s21550_s14 + $0x2cd8] sm:$0xff] }
 0x75e   : > { %13918 = vmatprep.subr.bf16.mxu0 %v19069_v40  ;;  %14563 = vmatprep.subr.bf16.mxu1 %v19071_v41  ;;  %v1945_v39 = vld [vmem:[%s21550_s14 + $0x2cf8] sm:$0xff]  ;;  %v19124_v40 = vcombine.low %v1932_v26, %v1936_v27  ;;  %v19126_v41 = vcombine.low %v1933_v29, %v1937_v30  ;;  %v19181_v26 = vcombine.high %v1988_v20, %v1992_v21  ;;  %v2000_v29 = vld [vmem:[%s21550_s14 + $0x2eb0] sm:$0xff] }
 0x75f   : > { %v19135_v43 = vcombine.high %v1941_v38, %v1945_v39  ;;  %v1997_v30 = vld [vmem:[%s21550_s14 + $0x2e98] sm:$0xff] }
 0x761   : > { %13919 = vmatpush1.bf16.msra.mxu0 %v19068_v46  ;;  %14564 = vmatpush1.bf16.msra.mxu1 %v19070_v47  ;;  %v1949_v46 = vld [vmem:[%s21550_s14 + $0x2d18] sm:$0xff] }
 0x762   : > { %13920 = vmatprep.subr.bf16.mxu0 %v19077_v48  ;;  %14565 = vmatprep.subr.bf16.mxu1 %v19079_v49  ;;  %v1953_v47 = vld [vmem:[%s21550_s14 + $0x2d38] sm:$0xff]  ;;  %v19132_v48 = vcombine.low %v1940_v35, %v1944_v36  ;;  %v19134_v49 = vcombine.low %v1941_v38, %v1945_v39  ;;  %v2004_v36 = vld [vmem:[%s21550_s14 + $0x2ed0] sm:$0xff] }
 0x763   : > { %v19143_v51 = vcombine.high %v1949_v46, %v1953_v47  ;;  %v2005_v38 = vld [vmem:[%s21550_s14 + $0x2ed8] sm:$0xff] }
 0x764   : > { %v2009_v39 = vld [vmem:[%s21550_s14 + $0x2ef8] sm:$0xff] }
 0x765   : > { %13921 = vmatpush1.bf16.msra.mxu0 %v19076_v54  ;;  %14566 = vmatpush1.bf16.msra.mxu1 %v19078_v55  ;;  %v1957_v54 = vld [vmem:[%s21550_s14 + $0x2d58] sm:$0xff] }
 0x766   : > { %13922 = vmatprep.subr.bf16.mxu0 %v19085_v56  ;;  %14567 = vmatprep.subr.bf16.mxu1 %v19087_v57  ;;  %v1961_v55 = vld [vmem:[%s21550_s14 + $0x2d78] sm:$0xff]  ;;  %v19140_v56 = vcombine.low %v1948_v44, %v1952_v45  ;;  %v19142_v57 = vcombine.low %v1949_v46, %v1953_v47  ;;  %v2012_v44 = vld [vmem:[%s21550_s14 + $0x2f10] sm:$0xff] }
 0x767   : > { %v19151_v59 = vcombine.high %v1957_v54, %v1961_v55  ;;  %v2016_v45 = vld [vmem:[%s21550_s14 + $0x2f30] sm:$0xff]  ;;  %v2013_v46 = vld [vmem:[%s21550_s14 + $0x2f18] sm:$0xff] }
 0x768   : > { %v2017_v47 = vld [vmem:[%s21550_s14 + $0x2f38] sm:$0xff] }
 0x769   : > { %13923 = vmatpush1.bf16.msra.mxu0 %v19084_v62  ;;  %14568 = vmatpush1.bf16.msra.mxu1 %v19086_v63  ;;  %v1965_v62 = vld [vmem:[%s21550_s14 + $0x2d98] sm:$0xff] }
 0x76a   : > { %13924 = vmatprep.subr.bf16.mxu0 %v19093_v0  ;;  %14569 = vmatprep.subr.bf16.mxu1 %v19095_v1  ;;  %v1969_v63 = vld [vmem:[%s21550_s14 + $0x2db8] sm:$0xff]  ;;  %v19148_v0 = vcombine.low %v1956_v52, %v1960_v53  ;;  %v19150_v1 = vcombine.low %v1957_v54, %v1961_v55  ;;  %v2020_v52 = vld [vmem:[%s21550_s14 + $0x2f50] sm:$0xff] }
 0x76b   : > { %v19159_v3 = vcombine.high %v1965_v62, %v1969_v63  ;;  %v2024_v53 = vld [vmem:[%s21550_s14 + $0x2f70] sm:$0xff]  ;;  %v2021_v54 = vld [vmem:[%s21550_s14 + $0x2f58] sm:$0xff] }
 0x76c   : > { %v2025_v55 = vld [vmem:[%s21550_s14 + $0x2f78] sm:$0xff] }
 0x76d   : > { %13925 = vmatpush1.bf16.msra.mxu0 %v19092_v6  ;;  %14570 = vmatpush1.bf16.msra.mxu1 %v19094_v7  ;;  %v1973_v6 = vld [vmem:[%s21550_s14 + $0x2dd8] sm:$0xff] }
 0x76e   : > { %13926 = vmatprep.subr.bf16.mxu0 %v19101_v8  ;;  %14571 = vmatprep.subr.bf16.mxu1 %v19103_v9  ;;  %v1977_v7 = vld [vmem:[%s21550_s14 + $0x2df8] sm:$0xff]  ;;  %v19156_v8 = vcombine.low %v1964_v60, %v1968_v61  ;;  %v19158_v9 = vcombine.low %v1965_v62, %v1969_v63  ;;  %v2028_v60 = vld [vmem:[%s21550_s14 + $0x2f90] sm:$0xff] }
 0x76f   : > { %v19167_v11 = vcombine.high %v1973_v6, %v1977_v7  ;;  %v2032_v61 = vld [vmem:[%s21550_s14 + $0x2fb0] sm:$0xff]  ;;  %v2029_v62 = vld [vmem:[%s21550_s14 + $0x2f98] sm:$0xff] }
 0x770   : > { %v2033_v63 = vld [vmem:[%s21550_s14 + $0x2fb8] sm:$0xff] }
 0x771   : > { %13927 = vmatpush1.bf16.msra.mxu0 %v19100_v14  ;;  %14572 = vmatpush1.bf16.msra.mxu1 %v19102_v15  ;;  %v1981_v14 = vld [vmem:[%s21550_s14 + $0x2e18] sm:$0xff] }
 0x772   : > { %13939 = vmatprep.subr.bf16.mxu0 %v19109_v16  ;;  %14584 = vmatprep.subr.bf16.mxu1 %v19111_v17  ;;  %v1985_v15 = vld [vmem:[%s21550_s14 + $0x2e38] sm:$0xff]  ;;  %v19164_v16 = vcombine.low %v1972_v4, %v1976_v5  ;;  %v19166_v17 = vcombine.low %v1973_v6, %v1977_v7  ;;  %v2036_v4 = vld [vmem:[%s21550_s14 + $0x2fd0] sm:$0xff] }
 0x773   : > { %v19175_v19 = vcombine.high %v1981_v14, %v1985_v15  ;;  %v2040_v5 = vld [vmem:[%s21550_s14 + $0x2ff0] sm:$0xff]  ;;  %v2037_v6 = vld [vmem:[%s21550_s14 + $0x2fd8] sm:$0xff] }
 0x774   : > { %13929 = vmatmul.mubr.bf16.vlgmr.msra.gmra.mrb[4].mxu0 %v20432_v28  ;;  %14574 = vmatmul.mubr.bf16.vlgmr.msra.gmra.mrb[4].mxu1 %v20432_v28  ;;  %v1996_v28 = vld [vmem:[%s21550_s14 + $0x2e90] sm:$0xff]  ;;  %v2041_v7 = vld [vmem:[%s21550_s14 + $0x2ff8] sm:$0xff] }
 0x775   : > { %13940 = vmatpush1.bf16.msra.mxu0 %v19108_v22  ;;  %14585 = vmatpush1.bf16.msra.mxu1 %v19110_v23  ;;  %v1989_v22 = vld [vmem:[%s21550_s14 + $0x2e58] sm:$0xff] }
 0x776   : > { %13941 = vmatprep.subr.bf16.mxu0 %v19117_v24  ;;  %14586 = vmatprep.subr.bf16.mxu1 %v19119_v25  ;;  %v1993_v23 = vld [vmem:[%s21550_s14 + $0x2e78] sm:$0xff]  ;;  %v19172_v24 = vcombine.low %v1980_v12, %v1984_v13  ;;  %v19174_v25 = vcombine.low %v1981_v14, %v1985_v15  ;;  %v2044_v12 = vld [vmem:[%s21550_s14 + $0x3010] sm:$0xff] }
 0x777   : > { %13971 = vmatprep.mubr.bf16.mxu0 %v20433_v37  ;;  %14616 = vmatprep.mubr.bf16.mxu1 %v20433_v37  ;;  %v19183_v27 = vcombine.high %v1989_v22, %v1993_v23  ;;  %v2008_v37 = vld [vmem:[%s21550_s14 + $0x2ef0] sm:$0xff]  ;;  %v2045_v14 = vld [vmem:[%s21550_s14 + $0x3018] sm:$0xff] }
 0x778   : > { %v2048_v13 = vld [vmem:[%s21550_s14 + $0x3030] sm:$0xff]  ;;  %v2049_v15 = vld [vmem:[%s21550_s14 + $0x3038] sm:$0xff] }
 0x779   : > { %13942 = vmatpush1.bf16.msra.mxu0 %v19116_v31  ;;  %14587 = vmatpush1.bf16.msra.mxu1 %v19118_v32  ;;  %v2001_v31 = vld [vmem:[%s21550_s14 + $0x2eb8] sm:$0xff]  ;;  %v19180_v32 = vcombine.low %v1988_v20, %v1992_v21  ;;  %v2052_v20 = vld [vmem:[%s21550_s14 + $0x3050] sm:$0xff] }
 0x77a   : > { %13943 = vmatprep.subr.bf16.mxu0 %v19125_v33  ;;  %14588 = vmatprep.subr.bf16.mxu1 %v19127_v34  ;;  %v19182_v33 = vcombine.low %v1989_v22, %v1993_v23  ;;  %v19189_v34 = vcombine.high %v1996_v28, %v2000_v29  ;;  %v19191_v35 = vcombine.high %v1997_v30, %v2001_v31  ;;  %v2056_v21 = vld [vmem:[%s21550_s14 + $0x3070] sm:$0xff]  ;;  %v2053_v22 = vld [vmem:[%s21550_s14 + $0x3058] sm:$0xff] }
 0x77b   : > { %v2057_v23 = vld [vmem:[%s21550_s14 + $0x3078] sm:$0xff] }
 0x77d   : > { %13944 = vmatpush1.bf16.msra.mxu0 %v19124_v40  ;;  %14589 = vmatpush1.bf16.msra.mxu1 %v19126_v41  ;;  %v19188_v40 = vcombine.low %v1996_v28, %v2000_v29  ;;  %v19190_v41 = vcombine.low %v1997_v30, %v2001_v31  ;;  %v2060_v28 = vld [vmem:[%s21550_s14 + $0x3090] sm:$0xff]  ;;  %v20434_v30 = vld [vmem:[%s21606_s12 + $0x58] ss:$240 sps:$4 sm:$0xff]  }
 0x77e   : > { %13945 = vmatprep.subr.bf16.mxu0 %v19133_v42  ;;  %14590 = vmatprep.subr.bf16.mxu1 %v19135_v43  ;;  %v19197_v42 = vcombine.high %v2004_v36, %v2008_v37  ;;  %v19199_v43 = vcombine.high %v2005_v38, %v2009_v39  ;;  %v2064_v29 = vld [vmem:[%s21550_s14 + $0x30b0] sm:$0xff]  ;;  %v2061_v31 = vld [vmem:[%s21550_s14 + $0x3098] sm:$0xff] }
 0x781   : > { %13946 = vmatpush1.bf16.msra.mxu0 %v19132_v48  ;;  %14591 = vmatpush1.bf16.msra.mxu1 %v19134_v49  ;;  %v19196_v48 = vcombine.low %v2004_v36, %v2008_v37  ;;  %v19198_v49 = vcombine.low %v2005_v38, %v2009_v39  ;;  %v2068_v37 = vld [vmem:[%s21550_s14 + $0x30d0] sm:$0xff] }
 0x782   : > { %13947 = vmatprep.subr.bf16.mxu0 %v19141_v50  ;;  %14592 = vmatprep.subr.bf16.mxu1 %v19143_v51  ;;  %v19205_v50 = vcombine.high %v2012_v44, %v2016_v45  ;;  %v19207_v51 = vcombine.high %v2013_v46, %v2017_v47  ;;  %v2072_v38 = vld [vmem:[%s21550_s14 + $0x30f0] sm:$0xff] }
 0x783   : > { %v20435_v39 = vld [vmem:[%s21606_s12 + $0x64] ss:$240 sps:$4 sm:$0xff]  }
 0x785   : > { %13948 = vmatpush1.bf16.msra.mxu0 %v19140_v56  ;;  %14593 = vmatpush1.bf16.msra.mxu1 %v19142_v57  ;;  %v19204_v56 = vcombine.low %v2012_v44, %v2016_v45  ;;  %v19206_v57 = vcombine.low %v2013_v46, %v2017_v47  ;;  %v19261_v44 = vcombine.high %v2068_v37, %v2072_v38  ;;  %v2076_v46 = vld [vmem:[%s21550_s14 + $0x3110] sm:$0xff] }
 0x786   : > { %13949 = vmatprep.subr.bf16.mxu0 %v19149_v58  ;;  %14594 = vmatprep.subr.bf16.mxu1 %v19151_v59  ;;  %v19213_v58 = vcombine.high %v2020_v52, %v2024_v53  ;;  %v19215_v59 = vcombine.high %v2021_v54, %v2025_v55  ;;  %v2080_v47 = vld [vmem:[%s21550_s14 + $0x3130] sm:$0xff] }
 0x789   : > { %13950 = vmatpush1.bf16.msra.mxu0 %v19148_v0  ;;  %14595 = vmatpush1.bf16.msra.mxu1 %v19150_v1  ;;  %v19212_v0 = vcombine.low %v2020_v52, %v2024_v53  ;;  %v19214_v1 = vcombine.low %v2021_v54, %v2025_v55  ;;  %v19269_v52 = vcombine.high %v2076_v46, %v2080_v47  ;;  %v2084_v54 = vld [vmem:[%s21550_s14 + $0x3150] sm:$0xff] }
 0x78a   : > { %13951 = vmatprep.subr.bf16.mxu0 %v19157_v2  ;;  %14596 = vmatprep.subr.bf16.mxu1 %v19159_v3  ;;  %v19221_v2 = vcombine.high %v2028_v60, %v2032_v61  ;;  %v19223_v3 = vcombine.high %v2029_v62, %v2033_v63  ;;  %v2088_v55 = vld [vmem:[%s21550_s14 + $0x3170] sm:$0xff] }
 0x78d   : > { %13952 = vmatpush1.bf16.msra.mxu0 %v19156_v8  ;;  %14597 = vmatpush1.bf16.msra.mxu1 %v19158_v9  ;;  %v19220_v8 = vcombine.low %v2028_v60, %v2032_v61  ;;  %v19222_v9 = vcombine.low %v2029_v62, %v2033_v63  ;;  %v19277_v60 = vcombine.high %v2084_v54, %v2088_v55  ;;  %v2092_v62 = vld [vmem:[%s21550_s14 + $0x3190] sm:$0xff] }
 0x78e   : > { %13953 = vmatprep.subr.bf16.mxu0 %v19165_v10  ;;  %14598 = vmatprep.subr.bf16.mxu1 %v19167_v11  ;;  %v19229_v10 = vcombine.high %v2036_v4, %v2040_v5  ;;  %v19231_v11 = vcombine.high %v2037_v6, %v2041_v7  ;;  %v2096_v63 = vld [vmem:[%s21550_s14 + $0x31b0] sm:$0xff] }
 0x791   : > { %13954 = vmatpush1.bf16.msra.mxu0 %v19164_v16  ;;  %14599 = vmatpush1.bf16.msra.mxu1 %v19166_v17  ;;  %v19228_v16 = vcombine.low %v2036_v4, %v2040_v5  ;;  %v19230_v17 = vcombine.low %v2037_v6, %v2041_v7  ;;  %v19285_v4 = vcombine.high %v2092_v62, %v2096_v63  ;;  %v2100_v6 = vld [vmem:[%s21550_s14 + $0x31d0] sm:$0xff] }
 0x792   : > { %13955 = vmatprep.subr.bf16.mxu0 %v19173_v18  ;;  %14600 = vmatprep.subr.bf16.mxu1 %v19175_v19  ;;  %v19237_v18 = vcombine.high %v2044_v12, %v2048_v13  ;;  %v19239_v19 = vcombine.high %v2045_v14, %v2049_v15  ;;  %v2104_v7 = vld [vmem:[%s21550_s14 + $0x31f0] sm:$0xff] }
 0x795   : > { %13956 = vmatpush1.bf16.msra.mxu0 %v19172_v24  ;;  %14601 = vmatpush1.bf16.msra.mxu1 %v19174_v25  ;;  %v19236_v24 = vcombine.low %v2044_v12, %v2048_v13  ;;  %v19238_v25 = vcombine.low %v2045_v14, %v2049_v15  ;;  %v19293_v12 = vcombine.high %v2100_v6, %v2104_v7  ;;  %v2108_v14 = vld [vmem:[%s21550_s14 + $0x3210] sm:$0xff] }
 0x796   : > { %13957 = vmatprep.subr.bf16.mxu0 %v19181_v26  ;;  %14602 = vmatprep.subr.bf16.mxu1 %v19183_v27  ;;  %v19245_v26 = vcombine.high %v2052_v20, %v2056_v21  ;;  %v19247_v27 = vcombine.high %v2053_v22, %v2057_v23  ;;  %v2112_v15 = vld [vmem:[%s21550_s14 + $0x3230] sm:$0xff] }
 0x799   : > { %13958 = vmatpush1.bf16.msra.mxu0 %v19180_v32  ;;  %14603 = vmatpush1.bf16.msra.mxu1 %v19182_v33  ;;  %v2065_v32 = vld [vmem:[%s21550_s14 + $0x30b8] sm:$0xff]  ;;  %v19244_v33 = vcombine.low %v2052_v20, %v2056_v21  ;;  %v19301_v20 = vcombine.high %v2108_v14, %v2112_v15 }
 0x79a   : > { %13959 = vmatprep.subr.bf16.mxu0 %v19189_v34  ;;  %14604 = vmatprep.subr.bf16.mxu1 %v19191_v35  ;;  %v19246_v34 = vcombine.low %v2053_v22, %v2057_v23  ;;  %v19253_v35 = vcombine.high %v2060_v28, %v2064_v29  ;;  %v19255_v36 = vcombine.high %v2061_v31, %v2065_v32  ;;  %v2116_v22 = vld [vmem:[%s21550_s14 + $0x3250] sm:$0xff] }
 0x79b   : > { %v2120_v23 = vld [vmem:[%s21550_s14 + $0x3270] sm:$0xff] }
 0x79d   : > { %13960 = vmatpush1.bf16.msra.mxu0 %v19188_v40  ;;  %14605 = vmatpush1.bf16.msra.mxu1 %v19190_v41  ;;  %v2069_v40 = vld [vmem:[%s21550_s14 + $0x30d8] sm:$0xff] }
 0x79e   : > { %13961 = vmatprep.subr.bf16.mxu0 %v19197_v42  ;;  %14606 = vmatprep.subr.bf16.mxu1 %v19199_v43  ;;  %v2073_v41 = vld [vmem:[%s21550_s14 + $0x30f8] sm:$0xff]  ;;  %v19252_v42 = vcombine.low %v2060_v28, %v2064_v29  ;;  %v19254_v43 = vcombine.low %v2061_v31, %v2065_v32  ;;  %v19309_v28 = vcombine.high %v2116_v22, %v2120_v23  ;;  %v2128_v31 = vld [vmem:[%s21550_s14 + $0x32b0] sm:$0xff] }
 0x79f   : > { %v19263_v45 = vcombine.high %v2069_v40, %v2073_v41  ;;  %v2125_v32 = vld [vmem:[%s21550_s14 + $0x3298] sm:$0xff] }
 0x7a1   : > { %13962 = vmatpush1.bf16.msra.mxu0 %v19196_v48  ;;  %14607 = vmatpush1.bf16.msra.mxu1 %v19198_v49  ;;  %v2077_v48 = vld [vmem:[%s21550_s14 + $0x3118] sm:$0xff] }
 0x7a2   : > { %13963 = vmatprep.subr.bf16.mxu0 %v19205_v50  ;;  %14608 = vmatprep.subr.bf16.mxu1 %v19207_v51  ;;  %v2081_v49 = vld [vmem:[%s21550_s14 + $0x3138] sm:$0xff]  ;;  %v19260_v50 = vcombine.low %v2068_v37, %v2072_v38  ;;  %v19262_v51 = vcombine.low %v2069_v40, %v2073_v41  ;;  %v2132_v38 = vld [vmem:[%s21550_s14 + $0x32d0] sm:$0xff] }
 0x7a3   : > { %v19271_v53 = vcombine.high %v2077_v48, %v2081_v49  ;;  %v2133_v40 = vld [vmem:[%s21550_s14 + $0x32d8] sm:$0xff] }
 0x7a4   : > { %v2137_v41 = vld [vmem:[%s21550_s14 + $0x32f8] sm:$0xff] }
 0x7a5   : > { %13964 = vmatpush1.bf16.msra.mxu0 %v19204_v56  ;;  %14609 = vmatpush1.bf16.msra.mxu1 %v19206_v57  ;;  %v2085_v56 = vld [vmem:[%s21550_s14 + $0x3158] sm:$0xff] }
 0x7a6   : > { %13965 = vmatprep.subr.bf16.mxu0 %v19213_v58  ;;  %14610 = vmatprep.subr.bf16.mxu1 %v19215_v59  ;;  %v2089_v57 = vld [vmem:[%s21550_s14 + $0x3178] sm:$0xff]  ;;  %v19268_v58 = vcombine.low %v2076_v46, %v2080_v47  ;;  %v19270_v59 = vcombine.low %v2077_v48, %v2081_v49  ;;  %v2140_v46 = vld [vmem:[%s21550_s14 + $0x3310] sm:$0xff] }
 0x7a7   : > { %v19279_v61 = vcombine.high %v2085_v56, %v2089_v57  ;;  %v2144_v47 = vld [vmem:[%s21550_s14 + $0x3330] sm:$0xff]  ;;  %v2141_v48 = vld [vmem:[%s21550_s14 + $0x3318] sm:$0xff] }
 0x7a8   : > { %v2145_v49 = vld [vmem:[%s21550_s14 + $0x3338] sm:$0xff] }
 0x7a9   : > { %13966 = vmatpush1.bf16.msra.mxu0 %v19212_v0  ;;  %14611 = vmatpush1.bf16.msra.mxu1 %v19214_v1  ;;  %v2093_v0 = vld [vmem:[%s21550_s14 + $0x3198] sm:$0xff] }
 0x7aa   : > { %13967 = vmatprep.subr.bf16.mxu0 %v19221_v2  ;;  %14612 = vmatprep.subr.bf16.mxu1 %v19223_v3  ;;  %v2097_v1 = vld [vmem:[%s21550_s14 + $0x31b8] sm:$0xff]  ;;  %v19276_v2 = vcombine.low %v2084_v54, %v2088_v55  ;;  %v19278_v3 = vcombine.low %v2085_v56, %v2089_v57  ;;  %v2148_v54 = vld [vmem:[%s21550_s14 + $0x3350] sm:$0xff] }
 0x7ab   : > { %v19287_v5 = vcombine.high %v2093_v0, %v2097_v1  ;;  %v2152_v55 = vld [vmem:[%s21550_s14 + $0x3370] sm:$0xff]  ;;  %v2149_v56 = vld [vmem:[%s21550_s14 + $0x3358] sm:$0xff] }
 0x7ac   : > { %v2153_v57 = vld [vmem:[%s21550_s14 + $0x3378] sm:$0xff] }
 0x7ad   : > { %13968 = vmatpush1.bf16.msra.mxu0 %v19220_v8  ;;  %14613 = vmatpush1.bf16.msra.mxu1 %v19222_v9  ;;  %v2101_v8 = vld [vmem:[%s21550_s14 + $0x31d8] sm:$0xff] }
 0x7ae   : > { %13969 = vmatprep.subr.bf16.mxu0 %v19229_v10  ;;  %14614 = vmatprep.subr.bf16.mxu1 %v19231_v11  ;;  %v2105_v9 = vld [vmem:[%s21550_s14 + $0x31f8] sm:$0xff]  ;;  %v19284_v10 = vcombine.low %v2092_v62, %v2096_v63  ;;  %v19286_v11 = vcombine.low %v2093_v0, %v2097_v1  ;;  %v2156_v62 = vld [vmem:[%s21550_s14 + $0x3390] sm:$0xff] }
 0x7af   : > { %v19295_v13 = vcombine.high %v2101_v8, %v2105_v9  ;;  %v2160_v63 = vld [vmem:[%s21550_s14 + $0x33b0] sm:$0xff]  ;;  %v2157_v0 = vld [vmem:[%s21550_s14 + $0x3398] sm:$0xff] }
 0x7b0   : > { %v2161_v1 = vld [vmem:[%s21550_s14 + $0x33b8] sm:$0xff] }
 0x7b1   : > { %13970 = vmatpush1.bf16.msra.mxu0 %v19228_v16  ;;  %14615 = vmatpush1.bf16.msra.mxu1 %v19230_v17  ;;  %v2109_v16 = vld [vmem:[%s21550_s14 + $0x3218] sm:$0xff] }
 0x7b2   : > { %13982 = vmatprep.subr.bf16.mxu0 %v19237_v18  ;;  %14627 = vmatprep.subr.bf16.mxu1 %v19239_v19  ;;  %v2113_v17 = vld [vmem:[%s21550_s14 + $0x3238] sm:$0xff]  ;;  %v19292_v18 = vcombine.low %v2100_v6, %v2104_v7  ;;  %v19294_v19 = vcombine.low %v2101_v8, %v2105_v9  ;;  %v2164_v6 = vld [vmem:[%s21550_s14 + $0x33d0] sm:$0xff] }
 0x7b3   : > { %v19303_v21 = vcombine.high %v2109_v16, %v2113_v17  ;;  %v2168_v7 = vld [vmem:[%s21550_s14 + $0x33f0] sm:$0xff]  ;;  %v2165_v8 = vld [vmem:[%s21550_s14 + $0x33d8] sm:$0xff] }
 0x7b4   : > { %13972 = vmatmul.mubr.bf16.vlgmr.msra.gmra.mrb[4].mxu0 %v20434_v30  ;;  %14617 = vmatmul.mubr.bf16.vlgmr.msra.gmra.mrb[4].mxu1 %v20434_v30  ;;  %v2124_v30 = vld [vmem:[%s21550_s14 + $0x3290] sm:$0xff]  ;;  %v2169_v9 = vld [vmem:[%s21550_s14 + $0x33f8] sm:$0xff] }
 0x7b5   : > { %13983 = vmatpush1.bf16.msra.mxu0 %v19236_v24  ;;  %14628 = vmatpush1.bf16.msra.mxu1 %v19238_v25  ;;  %v2117_v24 = vld [vmem:[%s21550_s14 + $0x3258] sm:$0xff] }
 0x7b6   : > { %13984 = vmatprep.subr.bf16.mxu0 %v19245_v26  ;;  %14629 = vmatprep.subr.bf16.mxu1 %v19247_v27  ;;  %v2121_v25 = vld [vmem:[%s21550_s14 + $0x3278] sm:$0xff]  ;;  %v19300_v26 = vcombine.low %v2108_v14, %v2112_v15  ;;  %v19302_v27 = vcombine.low %v2109_v16, %v2113_v17  ;;  %v2172_v14 = vld [vmem:[%s21550_s14 + $0x3410] sm:$0xff] }
 0x7b7   : > { %14014 = vmatprep.mubr.bf16.mxu0 %v20435_v39  ;;  %14659 = vmatprep.mubr.bf16.mxu1 %v20435_v39  ;;  %v19311_v29 = vcombine.high %v2117_v24, %v2121_v25  ;;  %v2136_v39 = vld [vmem:[%s21550_s14 + $0x32f0] sm:$0xff]  ;;  %v2173_v16 = vld [vmem:[%s21550_s14 + $0x3418] sm:$0xff] }
 0x7b8   : > { %v2176_v15 = vld [vmem:[%s21550_s14 + $0x3430] sm:$0xff]  ;;  %v2177_v17 = vld [vmem:[%s21550_s14 + $0x3438] sm:$0xff] }
 0x7b9   : > { %13985 = vmatpush1.bf16.msra.mxu0 %v19244_v33  ;;  %14630 = vmatpush1.bf16.msra.mxu1 %v19246_v34  ;;  %v2129_v33 = vld [vmem:[%s21550_s14 + $0x32b8] sm:$0xff]  ;;  %v19308_v34 = vcombine.low %v2116_v22, %v2120_v23  ;;  %v2180_v22 = vld [vmem:[%s21550_s14 + $0x3450] sm:$0xff] }
 0x7ba   : > { %13986 = vmatprep.subr.bf16.mxu0 %v19253_v35  ;;  %14631 = vmatprep.subr.bf16.mxu1 %v19255_v36  ;;  %v19310_v35 = vcombine.low %v2117_v24, %v2121_v25  ;;  %v19317_v36 = vcombine.high %v2124_v30, %v2128_v31  ;;  %v19319_v37 = vcombine.high %v2125_v32, %v2129_v33  ;;  %v2184_v23 = vld [vmem:[%s21550_s14 + $0x3470] sm:$0xff]  ;;  %v2181_v24 = vld [vmem:[%s21550_s14 + $0x3458] sm:$0xff] }
 0x7bb   : > { %v2185_v25 = vld [vmem:[%s21550_s14 + $0x3478] sm:$0xff] }
 0x7bd   : > { %13987 = vmatpush1.bf16.msra.mxu0 %v19252_v42  ;;  %14632 = vmatpush1.bf16.msra.mxu1 %v19254_v43  ;;  %v19316_v42 = vcombine.low %v2124_v30, %v2128_v31  ;;  %v19318_v43 = vcombine.low %v2125_v32, %v2129_v33  ;;  %v2188_v30 = vld [vmem:[%s21550_s14 + $0x3490] sm:$0xff]  ;;  %v2189_v33 = vld [vmem:[%s21550_s14 + $0x3498] sm:$0xff] }
 0x7be   : > { %13988 = vmatprep.subr.bf16.mxu0 %v19261_v44  ;;  %14633 = vmatprep.subr.bf16.mxu1 %v19263_v45  ;;  %v19325_v44 = vcombine.high %v2132_v38, %v2136_v39  ;;  %v19327_v45 = vcombine.high %v2133_v40, %v2137_v41  ;;  %v2192_v31 = vld [vmem:[%s21550_s14 + $0x34b0] sm:$0xff] }
 0x7bf   : > { %v20436_v32 = vld [vmem:[%s21606_s12 + $0x60] ss:$240 sps:$4 sm:$0xff]  }
 0x7c1   : > { %13989 = vmatpush1.bf16.msra.mxu0 %v19260_v50  ;;  %14634 = vmatpush1.bf16.msra.mxu1 %v19262_v51  ;;  %v19324_v50 = vcombine.low %v2132_v38, %v2136_v39  ;;  %v19326_v51 = vcombine.low %v2133_v40, %v2137_v41  ;;  %v2196_v39 = vld [vmem:[%s21550_s14 + $0x34d0] sm:$0xff]  ;;  %v20437_v41 = vld [vmem:[%s21606_s12 + $0x6c] ss:$240 sps:$4 sm:$0xff]  }
 0x7c2   : > { %13990 = vmatprep.subr.bf16.mxu0 %v19269_v52  ;;  %14635 = vmatprep.subr.bf16.mxu1 %v19271_v53  ;;  %v19333_v52 = vcombine.high %v2140_v46, %v2144_v47  ;;  %v19335_v53 = vcombine.high %v2141_v48, %v2145_v49  ;;  %v2200_v40 = vld [vmem:[%s21550_s14 + $0x34f0] sm:$0xff] }
 0x7c5   : > { %13991 = vmatpush1.bf16.msra.mxu0 %v19268_v58  ;;  %14636 = vmatpush1.bf16.msra.mxu1 %v19270_v59  ;;  %v19332_v58 = vcombine.low %v2140_v46, %v2144_v47  ;;  %v19334_v59 = vcombine.low %v2141_v48, %v2145_v49  ;;  %v19389_v46 = vcombine.high %v2196_v39, %v2200_v40  ;;  %v2204_v48 = vld [vmem:[%s21550_s14 + $0x3510] sm:$0xff] }
 0x7c6   : > { %13992 = vmatprep.subr.bf16.mxu0 %v19277_v60  ;;  %14637 = vmatprep.subr.bf16.mxu1 %v19279_v61  ;;  %v19341_v60 = vcombine.high %v2148_v54, %v2152_v55  ;;  %v19343_v61 = vcombine.high %v2149_v56, %v2153_v57  ;;  %v2208_v49 = vld [vmem:[%s21550_s14 + $0x3530] sm:$0xff] }
 0x7c9   : > { %13993 = vmatpush1.bf16.msra.mxu0 %v19276_v2  ;;  %14638 = vmatpush1.bf16.msra.mxu1 %v19278_v3  ;;  %v19340_v2 = vcombine.low %v2148_v54, %v2152_v55  ;;  %v19342_v3 = vcombine.low %v2149_v56, %v2153_v57  ;;  %v19397_v54 = vcombine.high %v2204_v48, %v2208_v49  ;;  %v2212_v56 = vld [vmem:[%s21550_s14 + $0x3550] sm:$0xff] }
 0x7ca   : > { %13994 = vmatprep.subr.bf16.mxu0 %v19285_v4  ;;  %14639 = vmatprep.subr.bf16.mxu1 %v19287_v5  ;;  %v19349_v4 = vcombine.high %v2156_v62, %v2160_v63  ;;  %v19351_v5 = vcombine.high %v2157_v0, %v2161_v1  ;;  %v2216_v57 = vld [vmem:[%s21550_s14 + $0x3570] sm:$0xff] }
 0x7cd   : > { %13995 = vmatpush1.bf16.msra.mxu0 %v19284_v10  ;;  %14640 = vmatpush1.bf16.msra.mxu1 %v19286_v11  ;;  %v19348_v10 = vcombine.low %v2156_v62, %v2160_v63  ;;  %v19350_v11 = vcombine.low %v2157_v0, %v2161_v1  ;;  %v19405_v62 = vcombine.high %v2212_v56, %v2216_v57  ;;  %v2220_v0 = vld [vmem:[%s21550_s14 + $0x3590] sm:$0xff] }
 0x7ce   : > { %13996 = vmatprep.subr.bf16.mxu0 %v19293_v12  ;;  %14641 = vmatprep.subr.bf16.mxu1 %v19295_v13  ;;  %v19357_v12 = vcombine.high %v2164_v6, %v2168_v7  ;;  %v19359_v13 = vcombine.high %v2165_v8, %v2169_v9  ;;  %v2224_v1 = vld [vmem:[%s21550_s14 + $0x35b0] sm:$0xff] }
 0x7d1   : > { %13997 = vmatpush1.bf16.msra.mxu0 %v19292_v18  ;;  %14642 = vmatpush1.bf16.msra.mxu1 %v19294_v19  ;;  %v19356_v18 = vcombine.low %v2164_v6, %v2168_v7  ;;  %v19358_v19 = vcombine.low %v2165_v8, %v2169_v9  ;;  %v19413_v6 = vcombine.high %v2220_v0, %v2224_v1  ;;  %v2228_v8 = vld [vmem:[%s21550_s14 + $0x35d0] sm:$0xff] }
 0x7d2   : > { %13998 = vmatprep.subr.bf16.mxu0 %v19301_v20  ;;  %14643 = vmatprep.subr.bf16.mxu1 %v19303_v21  ;;  %v19365_v20 = vcombine.high %v2172_v14, %v2176_v15  ;;  %v19367_v21 = vcombine.high %v2173_v16, %v2177_v17  ;;  %v2232_v9 = vld [vmem:[%s21550_s14 + $0x35f0] sm:$0xff] }
 0x7d5   : > { %13999 = vmatpush1.bf16.msra.mxu0 %v19300_v26  ;;  %14644 = vmatpush1.bf16.msra.mxu1 %v19302_v27  ;;  %v19364_v26 = vcombine.low %v2172_v14, %v2176_v15  ;;  %v19366_v27 = vcombine.low %v2173_v16, %v2177_v17  ;;  %v19421_v14 = vcombine.high %v2228_v8, %v2232_v9  ;;  %v2236_v16 = vld [vmem:[%s21550_s14 + $0x3610] sm:$0xff] }
 0x7d6   : > { %14000 = vmatprep.subr.bf16.mxu0 %v19309_v28  ;;  %14645 = vmatprep.subr.bf16.mxu1 %v19311_v29  ;;  %v19373_v28 = vcombine.high %v2180_v22, %v2184_v23  ;;  %v19375_v29 = vcombine.high %v2181_v24, %v2185_v25  ;;  %v2240_v17 = vld [vmem:[%s21550_s14 + $0x3630] sm:$0xff] }
 0x7d9   : > { %14001 = vmatpush1.bf16.msra.mxu0 %v19308_v34  ;;  %14646 = vmatpush1.bf16.msra.mxu1 %v19310_v35  ;;  %v2193_v34 = vld [vmem:[%s21550_s14 + $0x34b8] sm:$0xff]  ;;  %v19372_v35 = vcombine.low %v2180_v22, %v2184_v23  ;;  %v19429_v22 = vcombine.high %v2236_v16, %v2240_v17 }
 0x7da   : > { %14002 = vmatprep.subr.bf16.mxu0 %v19317_v36  ;;  %14647 = vmatprep.subr.bf16.mxu1 %v19319_v37  ;;  %v19374_v36 = vcombine.low %v2181_v24, %v2185_v25  ;;  %v19381_v37 = vcombine.high %v2188_v30, %v2192_v31  ;;  %v19383_v38 = vcombine.high %v2189_v33, %v2193_v34  ;;  %v2244_v24 = vld [vmem:[%s21550_s14 + $0x3650] sm:$0xff] }
 0x7db   : > { %v2248_v25 = vld [vmem:[%s21550_s14 + $0x3670] sm:$0xff] }
 0x7dd   : > { %14003 = vmatpush1.bf16.msra.mxu0 %v19316_v42  ;;  %14648 = vmatpush1.bf16.msra.mxu1 %v19318_v43  ;;  %v2197_v42 = vld [vmem:[%s21550_s14 + $0x34d8] sm:$0xff] }
 0x7de   : > { %14004 = vmatprep.subr.bf16.mxu0 %v19325_v44  ;;  %14649 = vmatprep.subr.bf16.mxu1 %v19327_v45  ;;  %v2201_v43 = vld [vmem:[%s21550_s14 + $0x34f8] sm:$0xff]  ;;  %v19380_v44 = vcombine.low %v2188_v30, %v2192_v31  ;;  %v19382_v45 = vcombine.low %v2189_v33, %v2193_v34  ;;  %v19437_v30 = vcombine.high %v2244_v24, %v2248_v25  ;;  %v2256_v33 = vld [vmem:[%s21550_s14 + $0x36b0] sm:$0xff] }
 0x7df   : > { %v19391_v47 = vcombine.high %v2197_v42, %v2201_v43  ;;  %v2253_v34 = vld [vmem:[%s21550_s14 + $0x3698] sm:$0xff] }
 0x7e1   : > { %14005 = vmatpush1.bf16.msra.mxu0 %v19324_v50  ;;  %14650 = vmatpush1.bf16.msra.mxu1 %v19326_v51  ;;  %v2205_v50 = vld [vmem:[%s21550_s14 + $0x3518] sm:$0xff] }
 0x7e2   : > { %14006 = vmatprep.subr.bf16.mxu0 %v19333_v52  ;;  %14651 = vmatprep.subr.bf16.mxu1 %v19335_v53  ;;  %v2209_v51 = vld [vmem:[%s21550_s14 + $0x3538] sm:$0xff]  ;;  %v19388_v52 = vcombine.low %v2196_v39, %v2200_v40  ;;  %v19390_v53 = vcombine.low %v2197_v42, %v2201_v43  ;;  %v2260_v40 = vld [vmem:[%s21550_s14 + $0x36d0] sm:$0xff] }
 0x7e3   : > { %v19399_v55 = vcombine.high %v2205_v50, %v2209_v51  ;;  %v2261_v42 = vld [vmem:[%s21550_s14 + $0x36d8] sm:$0xff] }
 0x7e4   : > { %v2265_v43 = vld [vmem:[%s21550_s14 + $0x36f8] sm:$0xff] }
 0x7e5   : > { %14007 = vmatpush1.bf16.msra.mxu0 %v19332_v58  ;;  %14652 = vmatpush1.bf16.msra.mxu1 %v19334_v59  ;;  %v2213_v58 = vld [vmem:[%s21550_s14 + $0x3558] sm:$0xff] }
 0x7e6   : > { %14008 = vmatprep.subr.bf16.mxu0 %v19341_v60  ;;  %14653 = vmatprep.subr.bf16.mxu1 %v19343_v61  ;;  %v2217_v59 = vld [vmem:[%s21550_s14 + $0x3578] sm:$0xff]  ;;  %v19396_v60 = vcombine.low %v2204_v48, %v2208_v49  ;;  %v19398_v61 = vcombine.low %v2205_v50, %v2209_v51  ;;  %v2268_v48 = vld [vmem:[%s21550_s14 + $0x3710] sm:$0xff] }
 0x7e7   : > { %v19407_v63 = vcombine.high %v2213_v58, %v2217_v59  ;;  %v2272_v49 = vld [vmem:[%s21550_s14 + $0x3730] sm:$0xff]  ;;  %v2269_v50 = vld [vmem:[%s21550_s14 + $0x3718] sm:$0xff] }
 0x7e8   : > { %v2273_v51 = vld [vmem:[%s21550_s14 + $0x3738] sm:$0xff] }
 0x7e9   : > { %14009 = vmatpush1.bf16.msra.mxu0 %v19340_v2  ;;  %14654 = vmatpush1.bf16.msra.mxu1 %v19342_v3  ;;  %v2221_v2 = vld [vmem:[%s21550_s14 + $0x3598] sm:$0xff] }
 0x7ea   : > { %14010 = vmatprep.subr.bf16.mxu0 %v19349_v4  ;;  %14655 = vmatprep.subr.bf16.mxu1 %v19351_v5  ;;  %v2225_v3 = vld [vmem:[%s21550_s14 + $0x35b8] sm:$0xff]  ;;  %v19404_v4 = vcombine.low %v2212_v56, %v2216_v57  ;;  %v19406_v5 = vcombine.low %v2213_v58, %v2217_v59  ;;  %v2276_v56 = vld [vmem:[%s21550_s14 + $0x3750] sm:$0xff] }
 0x7eb   : > { %v19415_v7 = vcombine.high %v2221_v2, %v2225_v3  ;;  %v2280_v57 = vld [vmem:[%s21550_s14 + $0x3770] sm:$0xff]  ;;  %v2277_v58 = vld [vmem:[%s21550_s14 + $0x3758] sm:$0xff] }
 0x7ec   : > { %v2281_v59 = vld [vmem:[%s21550_s14 + $0x3778] sm:$0xff] }
 0x7ed   : > { %14011 = vmatpush1.bf16.msra.mxu0 %v19348_v10  ;;  %14656 = vmatpush1.bf16.msra.mxu1 %v19350_v11  ;;  %v2229_v10 = vld [vmem:[%s21550_s14 + $0x35d8] sm:$0xff] }
 0x7ee   : > { %14012 = vmatprep.subr.bf16.mxu0 %v19357_v12  ;;  %14657 = vmatprep.subr.bf16.mxu1 %v19359_v13  ;;  %v2233_v11 = vld [vmem:[%s21550_s14 + $0x35f8] sm:$0xff]  ;;  %v19412_v12 = vcombine.low %v2220_v0, %v2224_v1  ;;  %v19414_v13 = vcombine.low %v2221_v2, %v2225_v3  ;;  %v2284_v0 = vld [vmem:[%s21550_s14 + $0x3790] sm:$0xff] }
 0x7ef   : > { %v19423_v15 = vcombine.high %v2229_v10, %v2233_v11  ;;  %v2288_v1 = vld [vmem:[%s21550_s14 + $0x37b0] sm:$0xff]  ;;  %v2285_v2 = vld [vmem:[%s21550_s14 + $0x3798] sm:$0xff] }
 0x7f0   : > { %v2289_v3 = vld [vmem:[%s21550_s14 + $0x37b8] sm:$0xff] }
 0x7f1   : > { %14013 = vmatpush1.bf16.msra.mxu0 %v19356_v18  ;;  %14658 = vmatpush1.bf16.msra.mxu1 %v19358_v19  ;;  %v2237_v18 = vld [vmem:[%s21550_s14 + $0x3618] sm:$0xff] }
 0x7f2   : > { %14025 = vmatprep.subr.bf16.mxu0 %v19365_v20  ;;  %14670 = vmatprep.subr.bf16.mxu1 %v19367_v21  ;;  %v2241_v19 = vld [vmem:[%s21550_s14 + $0x3638] sm:$0xff]  ;;  %v19420_v20 = vcombine.low %v2228_v8, %v2232_v9  ;;  %v19422_v21 = vcombine.low %v2229_v10, %v2233_v11  ;;  %v2292_v8 = vld [vmem:[%s21550_s14 + $0x37d0] sm:$0xff] }
 0x7f3   : > { %v19431_v23 = vcombine.high %v2237_v18, %v2241_v19  ;;  %v2296_v9 = vld [vmem:[%s21550_s14 + $0x37f0] sm:$0xff]  ;;  %v2293_v10 = vld [vmem:[%s21550_s14 + $0x37d8] sm:$0xff] }
 0x7f4   : > { %14015 = vmatmul.mubr.bf16.vlgmr.msra.gmra.mrb[4].mxu0 %v20436_v32  ;;  %14660 = vmatmul.mubr.bf16.vlgmr.msra.gmra.mrb[4].mxu1 %v20436_v32  ;;  %v2252_v32 = vld [vmem:[%s21550_s14 + $0x3690] sm:$0xff]  ;;  %v2297_v11 = vld [vmem:[%s21550_s14 + $0x37f8] sm:$0xff] }
 0x7f5   : > { %14026 = vmatpush1.bf16.msra.mxu0 %v19364_v26  ;;  %14671 = vmatpush1.bf16.msra.mxu1 %v19366_v27  ;;  %v2245_v26 = vld [vmem:[%s21550_s14 + $0x3658] sm:$0xff] }
 0x7f6   : > { %14027 = vmatprep.subr.bf16.mxu0 %v19373_v28  ;;  %14672 = vmatprep.subr.bf16.mxu1 %v19375_v29  ;;  %v2249_v27 = vld [vmem:[%s21550_s14 + $0x3678] sm:$0xff]  ;;  %v19428_v28 = vcombine.low %v2236_v16, %v2240_v17  ;;  %v19430_v29 = vcombine.low %v2237_v18, %v2241_v19  ;;  %v2300_v16 = vld [vmem:[%s21550_s14 + $0x3810] sm:$0xff] }
 0x7f7   : > { %14057 = vmatprep.mubr.bf16.mxu0 %v20437_v41  ;;  %14702 = vmatprep.mubr.bf16.mxu1 %v20437_v41  ;;  %v19439_v31 = vcombine.high %v2245_v26, %v2249_v27  ;;  %v2264_v41 = vld [vmem:[%s21550_s14 + $0x36f0] sm:$0xff]  ;;  %v2301_v18 = vld [vmem:[%s21550_s14 + $0x3818] sm:$0xff] }
 0x7f8   : > { %v2304_v17 = vld [vmem:[%s21550_s14 + $0x3830] sm:$0xff]  ;;  %v2305_v19 = vld [vmem:[%s21550_s14 + $0x3838] sm:$0xff] }
 0x7f9   : > { %14028 = vmatpush1.bf16.msra.mxu0 %v19372_v35  ;;  %14673 = vmatpush1.bf16.msra.mxu1 %v19374_v36  ;;  %v2257_v35 = vld [vmem:[%s21550_s14 + $0x36b8] sm:$0xff]  ;;  %v19436_v36 = vcombine.low %v2244_v24, %v2248_v25  ;;  %v2308_v24 = vld [vmem:[%s21550_s14 + $0x3850] sm:$0xff] }
 0x7fa   : > { %14029 = vmatprep.subr.bf16.mxu0 %v19381_v37  ;;  %14674 = vmatprep.subr.bf16.mxu1 %v19383_v38  ;;  %v19438_v37 = vcombine.low %v2245_v26, %v2249_v27  ;;  %v19445_v38 = vcombine.high %v2252_v32, %v2256_v33  ;;  %v19447_v39 = vcombine.high %v2253_v34, %v2257_v35  ;;  %v2312_v25 = vld [vmem:[%s21550_s14 + $0x3870] sm:$0xff]  ;;  %v2309_v26 = vld [vmem:[%s21550_s14 + $0x3858] sm:$0xff] }
 0x7fb   : > { %v2313_v27 = vld [vmem:[%s21550_s14 + $0x3878] sm:$0xff] }
 0x7fd   : > { %14030 = vmatpush1.bf16.msra.mxu0 %v19380_v44  ;;  %14675 = vmatpush1.bf16.msra.mxu1 %v19382_v45  ;;  %v19444_v44 = vcombine.low %v2252_v32, %v2256_v33  ;;  %v19446_v45 = vcombine.low %v2253_v34, %v2257_v35  ;;  %v2316_v32 = vld [vmem:[%s21550_s14 + $0x3890] sm:$0xff]  ;;  %v20438_v34 = vld [vmem:[%s21606_s12 + $0x68] ss:$240 sps:$4 sm:$0xff]  }
 0x7fe   : > { %14031 = vmatprep.subr.bf16.mxu0 %v19389_v46  ;;  %14676 = vmatprep.subr.bf16.mxu1 %v19391_v47  ;;  %v19453_v46 = vcombine.high %v2260_v40, %v2264_v41  ;;  %v19455_v47 = vcombine.high %v2261_v42, %v2265_v43  ;;  %v2320_v33 = vld [vmem:[%s21550_s14 + $0x38b0] sm:$0xff]  ;;  %v2317_v35 = vld [vmem:[%s21550_s14 + $0x3898] sm:$0xff] }
 0x801   : > { %14032 = vmatpush1.bf16.msra.mxu0 %v19388_v52  ;;  %14677 = vmatpush1.bf16.msra.mxu1 %v19390_v53  ;;  %v19452_v52 = vcombine.low %v2260_v40, %v2264_v41  ;;  %v19454_v53 = vcombine.low %v2261_v42, %v2265_v43  ;;  %v2324_v41 = vld [vmem:[%s21550_s14 + $0x38d0] sm:$0xff] }
 0x802   : > { %14033 = vmatprep.subr.bf16.mxu0 %v19397_v54  ;;  %14678 = vmatprep.subr.bf16.mxu1 %v19399_v55  ;;  %v19461_v54 = vcombine.high %v2268_v48, %v2272_v49  ;;  %v19463_v55 = vcombine.high %v2269_v50, %v2273_v51  ;;  %v2328_v42 = vld [vmem:[%s21550_s14 + $0x38f0] sm:$0xff] }
 0x803   : > { %v20439_v43 = vld [vmem:[%s21606_s12 + $0x74] ss:$240 sps:$4 sm:$0xff]  }
 0x805   : > { %14034 = vmatpush1.bf16.msra.mxu0 %v19396_v60  ;;  %14679 = vmatpush1.bf16.msra.mxu1 %v19398_v61  ;;  %v19460_v60 = vcombine.low %v2268_v48, %v2272_v49  ;;  %v19462_v61 = vcombine.low %v2269_v50, %v2273_v51  ;;  %v19517_v48 = vcombine.high %v2324_v41, %v2328_v42  ;;  %v2332_v50 = vld [vmem:[%s21550_s14 + $0x3910] sm:$0xff] }
 0x806   : > { %14035 = vmatprep.subr.bf16.mxu0 %v19405_v62  ;;  %14680 = vmatprep.subr.bf16.mxu1 %v19407_v63  ;;  %v19469_v62 = vcombine.high %v2276_v56, %v2280_v57  ;;  %v19471_v63 = vcombine.high %v2277_v58, %v2281_v59  ;;  %v2336_v51 = vld [vmem:[%s21550_s14 + $0x3930] sm:$0xff] }
 0x809   : > { %14036 = vmatpush1.bf16.msra.mxu0 %v19404_v4  ;;  %14681 = vmatpush1.bf16.msra.mxu1 %v19406_v5  ;;  %v19468_v4 = vcombine.low %v2276_v56, %v2280_v57  ;;  %v19470_v5 = vcombine.low %v2277_v58, %v2281_v59  ;;  %v19525_v56 = vcombine.high %v2332_v50, %v2336_v51  ;;  %v2340_v58 = vld [vmem:[%s21550_s14 + $0x3950] sm:$0xff] }
 0x80a   : > { %14037 = vmatprep.subr.bf16.mxu0 %v19413_v6  ;;  %14682 = vmatprep.subr.bf16.mxu1 %v19415_v7  ;;  %v19477_v6 = vcombine.high %v2284_v0, %v2288_v1  ;;  %v19479_v7 = vcombine.high %v2285_v2, %v2289_v3  ;;  %v2344_v59 = vld [vmem:[%s21550_s14 + $0x3970] sm:$0xff] }
 0x80d   : > { %14038 = vmatpush1.bf16.msra.mxu0 %v19412_v12  ;;  %14683 = vmatpush1.bf16.msra.mxu1 %v19414_v13  ;;  %v19476_v12 = vcombine.low %v2284_v0, %v2288_v1  ;;  %v19478_v13 = vcombine.low %v2285_v2, %v2289_v3  ;;  %v19533_v0 = vcombine.high %v2340_v58, %v2344_v59  ;;  %v2348_v2 = vld [vmem:[%s21550_s14 + $0x3990] sm:$0xff] }
 0x80e   : > { %14039 = vmatprep.subr.bf16.mxu0 %v19421_v14  ;;  %14684 = vmatprep.subr.bf16.mxu1 %v19423_v15  ;;  %v19485_v14 = vcombine.high %v2292_v8, %v2296_v9  ;;  %v19487_v15 = vcombine.high %v2293_v10, %v2297_v11  ;;  %v2352_v3 = vld [vmem:[%s21550_s14 + $0x39b0] sm:$0xff] }
 0x811   : > { %14040 = vmatpush1.bf16.msra.mxu0 %v19420_v20  ;;  %14685 = vmatpush1.bf16.msra.mxu1 %v19422_v21  ;;  %v19484_v20 = vcombine.low %v2292_v8, %v2296_v9  ;;  %v19486_v21 = vcombine.low %v2293_v10, %v2297_v11  ;;  %v19541_v8 = vcombine.high %v2348_v2, %v2352_v3  ;;  %v2356_v10 = vld [vmem:[%s21550_s14 + $0x39d0] sm:$0xff] }
 0x812   : > { %14041 = vmatprep.subr.bf16.mxu0 %v19429_v22  ;;  %14686 = vmatprep.subr.bf16.mxu1 %v19431_v23  ;;  %v19493_v22 = vcombine.high %v2300_v16, %v2304_v17  ;;  %v19495_v23 = vcombine.high %v2301_v18, %v2305_v19  ;;  %v2360_v11 = vld [vmem:[%s21550_s14 + $0x39f0] sm:$0xff] }
 0x815   : > { %14042 = vmatpush1.bf16.msra.mxu0 %v19428_v28  ;;  %14687 = vmatpush1.bf16.msra.mxu1 %v19430_v29  ;;  %v19492_v28 = vcombine.low %v2300_v16, %v2304_v17  ;;  %v19494_v29 = vcombine.low %v2301_v18, %v2305_v19  ;;  %v19549_v16 = vcombine.high %v2356_v10, %v2360_v11  ;;  %v2364_v18 = vld [vmem:[%s21550_s14 + $0x3a10] sm:$0xff] }
 0x816   : > { %14043 = vmatprep.subr.bf16.mxu0 %v19437_v30  ;;  %14688 = vmatprep.subr.bf16.mxu1 %v19439_v31  ;;  %v19501_v30 = vcombine.high %v2308_v24, %v2312_v25  ;;  %v19503_v31 = vcombine.high %v2309_v26, %v2313_v27  ;;  %v2368_v19 = vld [vmem:[%s21550_s14 + $0x3a30] sm:$0xff] }
 0x819   : > { %14044 = vmatpush1.bf16.msra.mxu0 %v19436_v36  ;;  %14689 = vmatpush1.bf16.msra.mxu1 %v19438_v37  ;;  %v2321_v36 = vld [vmem:[%s21550_s14 + $0x38b8] sm:$0xff]  ;;  %v19500_v37 = vcombine.low %v2308_v24, %v2312_v25  ;;  %v19557_v24 = vcombine.high %v2364_v18, %v2368_v19 }
 0x81a   : > { %14045 = vmatprep.subr.bf16.mxu0 %v19445_v38  ;;  %14690 = vmatprep.subr.bf16.mxu1 %v19447_v39  ;;  %v19502_v38 = vcombine.low %v2309_v26, %v2313_v27  ;;  %v19509_v39 = vcombine.high %v2316_v32, %v2320_v33  ;;  %v19511_v40 = vcombine.high %v2317_v35, %v2321_v36  ;;  %v2372_v26 = vld [vmem:[%s21550_s14 + $0x3a50] sm:$0xff] }
 0x81b   : > { %v2376_v27 = vld [vmem:[%s21550_s14 + $0x3a70] sm:$0xff] }
 0x81d   : > { %14046 = vmatpush1.bf16.msra.mxu0 %v19444_v44  ;;  %14691 = vmatpush1.bf16.msra.mxu1 %v19446_v45  ;;  %v2325_v44 = vld [vmem:[%s21550_s14 + $0x38d8] sm:$0xff] }
 0x81e   : > { %14047 = vmatprep.subr.bf16.mxu0 %v19453_v46  ;;  %14692 = vmatprep.subr.bf16.mxu1 %v19455_v47  ;;  %v2329_v45 = vld [vmem:[%s21550_s14 + $0x38f8] sm:$0xff]  ;;  %v19508_v46 = vcombine.low %v2316_v32, %v2320_v33  ;;  %v19510_v47 = vcombine.low %v2317_v35, %v2321_v36  ;;  %v19565_v32 = vcombine.high %v2372_v26, %v2376_v27  ;;  %v2384_v35 = vld [vmem:[%s21550_s14 + $0x3ab0] sm:$0xff] }
 0x81f   : > { %v19519_v49 = vcombine.high %v2325_v44, %v2329_v45  ;;  %v2381_v36 = vld [vmem:[%s21550_s14 + $0x3a98] sm:$0xff] }
 0x821   : > { %14048 = vmatpush1.bf16.msra.mxu0 %v19452_v52  ;;  %14693 = vmatpush1.bf16.msra.mxu1 %v19454_v53  ;;  %v2333_v52 = vld [vmem:[%s21550_s14 + $0x3918] sm:$0xff] }
 0x822   : > { %14049 = vmatprep.subr.bf16.mxu0 %v19461_v54  ;;  %14694 = vmatprep.subr.bf16.mxu1 %v19463_v55  ;;  %v2337_v53 = vld [vmem:[%s21550_s14 + $0x3938] sm:$0xff]  ;;  %v19516_v54 = vcombine.low %v2324_v41, %v2328_v42  ;;  %v19518_v55 = vcombine.low %v2325_v44, %v2329_v45  ;;  %v2388_v42 = vld [vmem:[%s21550_s14 + $0x3ad0] sm:$0xff] }
 0x823   : > { %v19527_v57 = vcombine.high %v2333_v52, %v2337_v53  ;;  %v2389_v44 = vld [vmem:[%s21550_s14 + $0x3ad8] sm:$0xff] }
 0x824   : > { %v2393_v45 = vld [vmem:[%s21550_s14 + $0x3af8] sm:$0xff] }
 0x825   : > { %14050 = vmatpush1.bf16.msra.mxu0 %v19460_v60  ;;  %14695 = vmatpush1.bf16.msra.mxu1 %v19462_v61  ;;  %v2341_v60 = vld [vmem:[%s21550_s14 + $0x3958] sm:$0xff] }
 0x826   : > { %14051 = vmatprep.subr.bf16.mxu0 %v19469_v62  ;;  %14696 = vmatprep.subr.bf16.mxu1 %v19471_v63  ;;  %v2345_v61 = vld [vmem:[%s21550_s14 + $0x3978] sm:$0xff]  ;;  %v19524_v62 = vcombine.low %v2332_v50, %v2336_v51  ;;  %v19526_v63 = vcombine.low %v2333_v52, %v2337_v53  ;;  %v2396_v50 = vld [vmem:[%s21550_s14 + $0x3b10] sm:$0xff] }
 0x827   : > { %v19535_v1 = vcombine.high %v2341_v60, %v2345_v61  ;;  %v2400_v51 = vld [vmem:[%s21550_s14 + $0x3b30] sm:$0xff]  ;;  %v2397_v52 = vld [vmem:[%s21550_s14 + $0x3b18] sm:$0xff] }
 0x828   : > { %v2401_v53 = vld [vmem:[%s21550_s14 + $0x3b38] sm:$0xff] }
 0x829   : > { %14052 = vmatpush1.bf16.msra.mxu0 %v19468_v4  ;;  %14697 = vmatpush1.bf16.msra.mxu1 %v19470_v5  ;;  %v2349_v4 = vld [vmem:[%s21550_s14 + $0x3998] sm:$0xff] }
 0x82a   : > { %14053 = vmatprep.subr.bf16.mxu0 %v19477_v6  ;;  %14698 = vmatprep.subr.bf16.mxu1 %v19479_v7  ;;  %v2353_v5 = vld [vmem:[%s21550_s14 + $0x39b8] sm:$0xff]  ;;  %v19532_v6 = vcombine.low %v2340_v58, %v2344_v59  ;;  %v19534_v7 = vcombine.low %v2341_v60, %v2345_v61  ;;  %v2404_v58 = vld [vmem:[%s21550_s14 + $0x3b50] sm:$0xff] }
 0x82b   : > { %v19543_v9 = vcombine.high %v2349_v4, %v2353_v5  ;;  %v2408_v59 = vld [vmem:[%s21550_s14 + $0x3b70] sm:$0xff]  ;;  %v2405_v60 = vld [vmem:[%s21550_s14 + $0x3b58] sm:$0xff] }
 0x82c   : > { %v2409_v61 = vld [vmem:[%s21550_s14 + $0x3b78] sm:$0xff] }
 0x82d   : > { %14054 = vmatpush1.bf16.msra.mxu0 %v19476_v12  ;;  %14699 = vmatpush1.bf16.msra.mxu1 %v19478_v13  ;;  %v2357_v12 = vld [vmem:[%s21550_s14 + $0x39d8] sm:$0xff] }
 0x82e   : > { %14055 = vmatprep.subr.bf16.mxu0 %v19485_v14  ;;  %14700 = vmatprep.subr.bf16.mxu1 %v19487_v15  ;;  %v2361_v13 = vld [vmem:[%s21550_s14 + $0x39f8] sm:$0xff]  ;;  %v19540_v14 = vcombine.low %v2348_v2, %v2352_v3  ;;  %v19542_v15 = vcombine.low %v2349_v4, %v2353_v5  ;;  %v2412_v2 = vld [vmem:[%s21550_s14 + $0x3b90] sm:$0xff] }
 0x82f   : > { %v19551_v17 = vcombine.high %v2357_v12, %v2361_v13  ;;  %v2416_v3 = vld [vmem:[%s21550_s14 + $0x3bb0] sm:$0xff]  ;;  %v2413_v4 = vld [vmem:[%s21550_s14 + $0x3b98] sm:$0xff] }
 0x830   : > { %v2417_v5 = vld [vmem:[%s21550_s14 + $0x3bb8] sm:$0xff] }
 0x831   : > { %14056 = vmatpush1.bf16.msra.mxu0 %v19484_v20  ;;  %14701 = vmatpush1.bf16.msra.mxu1 %v19486_v21  ;;  %v2365_v20 = vld [vmem:[%s21550_s14 + $0x3a18] sm:$0xff] }
 0x832   : > { %14068 = vmatprep.subr.bf16.mxu0 %v19493_v22  ;;  %14713 = vmatprep.subr.bf16.mxu1 %v19495_v23  ;;  %v2369_v21 = vld [vmem:[%s21550_s14 + $0x3a38] sm:$0xff]  ;;  %v19548_v22 = vcombine.low %v2356_v10, %v2360_v11  ;;  %v19550_v23 = vcombine.low %v2357_v12, %v2361_v13  ;;  %v2420_v10 = vld [vmem:[%s21550_s14 + $0x3bd0] sm:$0xff] }
 0x833   : > { %v19559_v25 = vcombine.high %v2365_v20, %v2369_v21  ;;  %v2424_v11 = vld [vmem:[%s21550_s14 + $0x3bf0] sm:$0xff]  ;;  %v2421_v12 = vld [vmem:[%s21550_s14 + $0x3bd8] sm:$0xff] }
 0x834   : > { %14058 = vmatmul.mubr.bf16.vlgmr.msra.gmra.mrb[4].mxu0 %v20438_v34  ;;  %14703 = vmatmul.mubr.bf16.vlgmr.msra.gmra.mrb[4].mxu1 %v20438_v34  ;;  %v2380_v34 = vld [vmem:[%s21550_s14 + $0x3a90] sm:$0xff]  ;;  %v2425_v13 = vld [vmem:[%s21550_s14 + $0x3bf8] sm:$0xff] }
 0x835   : > { %14069 = vmatpush1.bf16.msra.mxu0 %v19492_v28  ;;  %14714 = vmatpush1.bf16.msra.mxu1 %v19494_v29  ;;  %v2373_v28 = vld [vmem:[%s21550_s14 + $0x3a58] sm:$0xff] }
 0x836   : > { %14070 = vmatprep.subr.bf16.mxu0 %v19501_v30  ;;  %14715 = vmatprep.subr.bf16.mxu1 %v19503_v31  ;;  %v2377_v29 = vld [vmem:[%s21550_s14 + $0x3a78] sm:$0xff]  ;;  %v19556_v30 = vcombine.low %v2364_v18, %v2368_v19  ;;  %v19558_v31 = vcombine.low %v2365_v20, %v2369_v21  ;;  %v19612_v18 = vcombine.low %v2420_v10, %v2424_v11  ;;  %v20440_v20 = vld [vmem:[%s21606_s12 + $0x70] ss:$240 sps:$4 sm:$0xff]  }
 0x837   : > { %14100 = vmatprep.mubr.bf16.mxu0 %v20439_v43  ;;  %14745 = vmatprep.mubr.bf16.mxu1 %v20439_v43  ;;  %v19567_v33 = vcombine.high %v2373_v28, %v2377_v29  ;;  %v2392_v43 = vld [vmem:[%s21550_s14 + $0x3af0] sm:$0xff]  ;;  %v19614_v19 = vcombine.low %v2421_v12, %v2425_v13  ;;  %v494_v21 = vld [vmem:[#allocation2 + $0x20] sm:$0xff] }
 0x839   : > { %14071 = vmatpush1.bf16.msra.mxu0 %v19500_v37  ;;  %14716 = vmatpush1.bf16.msra.mxu1 %v19502_v38  ;;  %v2385_v37 = vld [vmem:[%s21550_s14 + $0x3ab8] sm:$0xff]  ;;  %v19564_v38 = vcombine.low %v2372_v26, %v2376_v27  ;;  %v502_v26 = vld [vmem:[#allocation2 + $0x60] sm:$0xff] }
 0x83a   : > { %14072 = vmatprep.subr.bf16.mxu0 %v19509_v39  ;;  %14717 = vmatprep.subr.bf16.mxu1 %v19511_v40  ;;  %v19566_v39 = vcombine.low %v2373_v28, %v2377_v29  ;;  %v19573_v40 = vcombine.high %v2380_v34, %v2384_v35  ;;  %v19575_v41 = vcombine.high %v2381_v36, %v2385_v37 }
 0x83d   : > { %14073 = vmatpush1.bf16.msra.mxu0 %v19508_v46  ;;  %14718 = vmatpush1.bf16.msra.mxu1 %v19510_v47  ;;  %v19572_v46 = vcombine.low %v2380_v34, %v2384_v35  ;;  %v19574_v47 = vcombine.low %v2381_v36, %v2385_v37  ;;  %v505_v36 = vld [vmem:[#allocation2 + $0x78] sm:$0xff] }
 0x83e   : > { %14074 = vmatprep.subr.bf16.mxu0 %v19517_v48  ;;  %14719 = vmatprep.subr.bf16.mxu1 %v19519_v49  ;;  %v19581_v48 = vcombine.high %v2388_v42, %v2392_v43  ;;  %v19583_v49 = vcombine.high %v2389_v44, %v2393_v45 }
 0x841   : > { %14075 = vmatpush1.bf16.msra.mxu0 %v19516_v54  ;;  %14720 = vmatpush1.bf16.msra.mxu1 %v19518_v55  ;;  %v19580_v54 = vcombine.low %v2388_v42, %v2392_v43  ;;  %v19582_v55 = vcombine.low %v2389_v44, %v2393_v45  ;;  %v20441_v45 = vld [vmem:[#allocation7 + $0x4] ss:$16 sps:$4 sm:$0xff] (!%p19616_p3)  }
 0x842   : > { %14076 = vmatprep.subr.bf16.mxu0 %v19525_v56  ;;  %14721 = vmatprep.subr.bf16.mxu1 %v19527_v57  ;;  %v19589_v56 = vcombine.high %v2396_v50, %v2400_v51  ;;  %v19591_v57 = vcombine.high %v2397_v52, %v2401_v53 }
 0x845   : > { %14077 = vmatpush1.bf16.msra.mxu0 %v19524_v62  ;;  %14722 = vmatpush1.bf16.msra.mxu1 %v19526_v63  ;;  %v19588_v62 = vcombine.low %v2396_v50, %v2400_v51  ;;  %v19590_v63 = vcombine.low %v2397_v52, %v2401_v53  ;;  %v20449_v50 = vld [vmem:[#allocation7 + $0x224] ss:$16 sps:$4 sm:$0xff] (!%p19616_p3)   ;;  %v20451_v51 = vld [vmem:[#allocation7 + $0x20] ss:$16 sps:$4 sm:$0xff] (!%p19616_p3)  }
 0x846   : > { %14078 = vmatprep.subr.bf16.mxu0 %v19533_v0  ;;  %14723 = vmatprep.subr.bf16.mxu1 %v19535_v1  ;;  %v19597_v0 = vcombine.high %v2404_v58, %v2408_v59  ;;  %v19599_v1 = vcombine.high %v2405_v60, %v2409_v61  ;;  %v20452_v52 = vld [vmem:[#allocation7 + $0x220] ss:$16 sps:$4 sm:$0xff] (!%p19616_p3)   ;;  %v20453_v53 = vld [vmem:[#allocation7 + $0x44] ss:$16 sps:$4 sm:$0xff] (!%p19616_p3)  }
 0x849   : > { %14079 = vmatpush1.bf16.msra.mxu0 %v19532_v6  ;;  %14724 = vmatpush1.bf16.msra.mxu1 %v19534_v7  ;;  %v19596_v6 = vcombine.low %v2404_v58, %v2408_v59  ;;  %v19598_v7 = vcombine.low %v2405_v60, %v2409_v61  ;;  %v20461_v58 = vld [vmem:[#allocation7 + $0x264] ss:$16 sps:$4 sm:$0xff] (!%p19616_p3)   ;;  %v20463_v59 = vld [vmem:[#allocation7 + $0x60] ss:$16 sps:$4 sm:$0xff] (!%p19616_p3)  }
 0x84a   : > { %14080 = vmatprep.subr.bf16.mxu0 %v19541_v8  ;;  %14725 = vmatprep.subr.bf16.mxu1 %v19543_v9  ;;  %v19605_v8 = vcombine.high %v2412_v2, %v2416_v3  ;;  %v19607_v9 = vcombine.high %v2413_v4, %v2417_v5  ;;  %v20464_v60 = vld [vmem:[#allocation7 + $0x260] ss:$16 sps:$4 sm:$0xff] (!%p19616_p3)   ;;  %v20465_v61 = vld [vmem:[#allocation7 + $0x84] ss:$16 sps:$4 sm:$0xff] (!%p19616_p3)  }
 0x84d   : > { %14081 = vmatpush1.bf16.msra.mxu0 %v19540_v14  ;;  %14726 = vmatpush1.bf16.msra.mxu1 %v19542_v15  ;;  %v19604_v14 = vcombine.low %v2412_v2, %v2416_v3  ;;  %v19606_v15 = vcombine.low %v2413_v4, %v2417_v5  ;;  %v20473_v2 = vld [vmem:[#allocation7 + $0x2a4] ss:$16 sps:$4 sm:$0xff] (!%p19616_p3)   ;;  %v20475_v3 = vld [vmem:[#allocation7 + $0xa0] ss:$16 sps:$4 sm:$0xff] (!%p19616_p3)  }
 0x84e   : > { %14082 = vmatprep.subr.bf16.mxu0 %v19549_v16  ;;  %14727 = vmatprep.subr.bf16.mxu1 %v19551_v17  ;;  %v19613_v16 = vcombine.high %v2420_v10, %v2424_v11  ;;  %v19615_v17 = vcombine.high %v2421_v12, %v2425_v13  ;;  %v20476_v4 = vld [vmem:[#allocation7 + $0x2a0] ss:$16 sps:$4 sm:$0xff] (!%p19616_p3)   ;;  %v20477_v5 = vld [vmem:[#allocation7 + $0xc4] ss:$16 sps:$4 sm:$0xff] (!%p19616_p3)  }
 0x84f   : > { %v20485_v10 = vld [vmem:[#allocation7 + $0x2e4] ss:$16 sps:$4 sm:$0xff] (!%p19616_p3)   ;;  %v20487_v11 = vld [vmem:[#allocation7 + $0xe0] ss:$16 sps:$4 sm:$0xff] (!%p19616_p3)  }
 0x850   : > { %v20488_v12 = vld [vmem:[#allocation7 + $0x2e0] ss:$16 sps:$4 sm:$0xff] (!%p19616_p3)   ;;  %v20489_v13 = vld [vmem:[#allocation7 + $0x104] ss:$16 sps:$4 sm:$0xff] (!%p19616_p3)  }
 0x851   : > { %14083 = vmatpush1.bf16.msra.mxu0 %v19548_v22  ;;  %14728 = vmatpush1.bf16.msra.mxu1 %v19550_v23  ;;  %v496_v22 = vld [vmem:[#allocation2 + $0x30] sm:$0xff]  ;;  %v495_v23 = vld [vmem:[#allocation2 + $0x28] sm:$0xff] }
 0x852   : > { %14084 = vmatprep.subr.bf16.mxu0 %v19557_v24  ;;  %14729 = vmatprep.subr.bf16.mxu1 %v19559_v25  ;;  %v497_v25 = vld [vmem:[#allocation2 + $0x38] sm:$0xff] }
 0x855   : > { %14085 = vmatpush1.bf16.msra.mxu0 %v19556_v30  ;;  %14730 = vmatpush1.bf16.msra.mxu1 %v19558_v31  ;;  %v504_v30 = vld [vmem:[#allocation2 + $0x70] sm:$0xff]  ;;  %v503_v31 = vld [vmem:[#allocation2 + $0x68] sm:$0xff] }
 0x856   : > { %14086 = vmatprep.subr.bf16.mxu0 %v19565_v32  ;;  %14731 = vmatprep.subr.bf16.mxu1 %v19567_v33 }
 0x859   : > { %14087 = vmatpush1.bf16.msra.mxu0 %v19564_v38  ;;  %14732 = vmatpush1.bf16.msra.mxu1 %v19566_v39 }
 0x85a   : > { %14088 = vmatprep.subr.bf16.mxu0 %v19573_v40  ;;  %14733 = vmatprep.subr.bf16.mxu1 %v19575_v41 }
 0x85d   : > { %14089 = vmatpush1.bf16.msra.mxu0 %v19572_v46  ;;  %14734 = vmatpush1.bf16.msra.mxu1 %v19574_v47  ;;  %v20443_v46 = vld [vmem:[#allocation7 + $0x204] ss:$16 sps:$4 sm:$0xff] (!%p19616_p3)   ;;  %v20445_v47 = vld [vmem:[#allocation7] ss:$16 sps:$4 sm:$0xff] (!%p19616_p3)  }
 0x85e   : > { %14090 = vmatprep.subr.bf16.mxu0 %v19581_v48  ;;  %14735 = vmatprep.subr.bf16.mxu1 %v19583_v49  ;;  %v20446_v48 = vld [vmem:[#allocation7 + $0x200] ss:$16 sps:$4 sm:$0xff] (!%p19616_p3)   ;;  %v20447_v49 = vld [vmem:[#allocation7 + $0x24] ss:$16 sps:$4 sm:$0xff] (!%p19616_p3)  }
 0x861   : > { %14091 = vmatpush1.bf16.msra.mxu0 %v19580_v54  ;;  %14736 = vmatpush1.bf16.msra.mxu1 %v19582_v55  ;;  %v20455_v54 = vld [vmem:[#allocation7 + $0x244] ss:$16 sps:$4 sm:$0xff] (!%p19616_p3)   ;;  %v20457_v55 = vld [vmem:[#allocation7 + $0x40] ss:$16 sps:$4 sm:$0xff] (!%p19616_p3)  }
 0x862   : > { %14092 = vmatprep.subr.bf16.mxu0 %v19589_v56  ;;  %14737 = vmatprep.subr.bf16.mxu1 %v19591_v57  ;;  %v20458_v56 = vld [vmem:[#allocation7 + $0x240] ss:$16 sps:$4 sm:$0xff] (!%p19616_p3)   ;;  %v20459_v57 = vld [vmem:[#allocation7 + $0x64] ss:$16 sps:$4 sm:$0xff] (!%p19616_p3)  }
 0x865   : > { %14093 = vmatpush1.bf16.msra.mxu0 %v19588_v62  ;;  %14738 = vmatpush1.bf16.msra.mxu1 %v19590_v63  ;;  %v20467_v62 = vld [vmem:[#allocation7 + $0x284] ss:$16 sps:$4 sm:$0xff] (!%p19616_p3)   ;;  %v20469_v63 = vld [vmem:[#allocation7 + $0x80] ss:$16 sps:$4 sm:$0xff] (!%p19616_p3)  }
 0x866   : > { %14094 = vmatprep.subr.bf16.mxu0 %v19597_v0  ;;  %14739 = vmatprep.subr.bf16.mxu1 %v19599_v1  ;;  %v20470_v0 = vld [vmem:[#allocation7 + $0x280] ss:$16 sps:$4 sm:$0xff] (!%p19616_p3)   ;;  %v20471_v1 = vld [vmem:[#allocation7 + $0xa4] ss:$16 sps:$4 sm:$0xff] (!%p19616_p3)  }
 0x869   : > { %14095 = vmatpush1.bf16.msra.mxu0 %v19596_v6  ;;  %14740 = vmatpush1.bf16.msra.mxu1 %v19598_v7  ;;  %v20479_v6 = vld [vmem:[#allocation7 + $0x2c4] ss:$16 sps:$4 sm:$0xff] (!%p19616_p3)   ;;  %v20481_v7 = vld [vmem:[#allocation7 + $0xc0] ss:$16 sps:$4 sm:$0xff] (!%p19616_p3)  }
 0x86a   : > { %14096 = vmatprep.subr.bf16.mxu0 %v19605_v8  ;;  %14741 = vmatprep.subr.bf16.mxu1 %v19607_v9  ;;  %v20482_v8 = vld [vmem:[#allocation7 + $0x2c0] ss:$16 sps:$4 sm:$0xff] (!%p19616_p3)   ;;  %v20483_v9 = vld [vmem:[#allocation7 + $0xe4] ss:$16 sps:$4 sm:$0xff] (!%p19616_p3)  }
 0x86d   : > { %14097 = vmatpush1.bf16.msra.mxu0 %v19604_v14  ;;  %14742 = vmatpush1.bf16.msra.mxu1 %v19606_v15  ;;  %v20491_v14 = vld [vmem:[#allocation7 + $0x304] ss:$16 sps:$4 sm:$0xff] (!%p19616_p3)   ;;  %v20493_v15 = vld [vmem:[#allocation7 + $0x100] ss:$16 sps:$4 sm:$0xff] (!%p19616_p3)  }
 0x86e   : > { %14098 = vmatprep.subr.bf16.mxu0 %v19613_v16  ;;  %14743 = vmatprep.subr.bf16.mxu1 %v19615_v17  ;;  %v20494_v16 = vld [vmem:[#allocation7 + $0x300] ss:$16 sps:$4 sm:$0xff] (!%p19616_p3)   ;;  %v20495_v17 = vld [vmem:[#allocation7 + $0x124] ss:$16 sps:$4 sm:$0xff] (!%p19616_p3)  }
 0x871   : > { %14099 = vmatpush1.bf16.msra.mxu0 %v19612_v18  ;;  %14744 = vmatpush1.bf16.msra.mxu1 %v19614_v19  ;;  %v14810_v18 = vlaneseq (!%p19616_p3)  ;;  %v20497_v19 = vld [vmem:[#allocation7 + $0x324] ss:$16 sps:$4 sm:$0xff] (!%p19616_p3)  }
 0x872   : > { %16480 = vmatprep.subr.bf16.mxu1 (!%p19616_p3), %v20441_v45  ;;  %16523 = vmatprep.subr.bf16.mxu0 (!%p19616_p3), %v20443_v46  ;;  %v20517_v46 = vld [vmem:[#allocation7 + $0x180] ss:$16 sps:$4 sm:$0xff] (!%p19616_p3)  }
 0x874   : > { %14101 = vmatmul.mubr.bf16.vlgmr.msra.gmra.mrb[4].mxu0 %v20440_v20  ;;  %14746 = vmatmul.mubr.bf16.vlgmr.msra.gmra.mrb[4].mxu1 %v20440_v20  ;;  %v20499_v20 = vld [vmem:[#allocation7 + $0x120] ss:$16 sps:$4 sm:$0xff] (!%p19616_p3)  }
 0x875   : > { %16481 = vmatpush1.bf16.msra.mxu1 (!%p19616_p3), %v20445_v47  ;;  %16524 = vmatpush1.bf16.msra.mxu0 (!%p19616_p3), %v20446_v48 }
 0x876   : > { %16482 = vmatprep.subr.bf16.mxu1 (!%p19616_p3), %v20447_v49  ;;  %16525 = vmatprep.subr.bf16.mxu0 (!%p19616_p3), %v20449_v50  ;;  %v20518_v50 = vld [vmem:[#allocation7 + $0x380] ss:$16 sps:$4 sm:$0xff] (!%p19616_p3)  }
 0x879   : > { %16483 = vmatpush1.bf16.msra.mxu1 (!%p19616_p3), %v20451_v51  ;;  %16526 = vmatpush1.bf16.msra.mxu0 (!%p19616_p3), %v20452_v52  ;;  %v14792_v51 = vld [vmem:[#allocation2] sm:$0xff] (!%p19616_p3) }
 0x87a   : > { %16484 = vmatprep.subr.bf16.mxu1 (!%p19616_p3), %v20453_v53  ;;  %16527 = vmatprep.subr.bf16.mxu0 (!%p19616_p3), %v20455_v54  ;;  %v14800_v52 = vld [vmem:[#allocation2 + $0x40] sm:$0xff] (!%p19616_p3) }
 0x87d   : > { %16485 = vmatpush1.bf16.msra.mxu1 (!%p19616_p3), %v20457_v55  ;;  %16528 = vmatpush1.bf16.msra.mxu0 (!%p19616_p3), %v20458_v56 }
 0x87e   : > { %16486 = vmatprep.subr.bf16.mxu1 (!%p19616_p3), %v20459_v57  ;;  %16529 = vmatprep.subr.bf16.mxu0 (!%p19616_p3), %v20461_v58  ;;  %v20519_v58 = vld [vmem:[#allocation7 + $0x1a4] ss:$16 sps:$4 sm:$0xff] (!%p19616_p3)  }
 0x881   : > { %16487 = vmatpush1.bf16.msra.mxu1 (!%p19616_p3), %v20463_v59  ;;  %16530 = vmatpush1.bf16.msra.mxu0 (!%p19616_p3), %v20464_v60  ;;  %v20521_v59 = vld [vmem:[#allocation7 + $0x3a4] ss:$16 sps:$4 sm:$0xff] (!%p19616_p3)   ;;  %v14794_v60 = vld [vmem:[#allocation2 + $0x10] sm:$0xff] (!%p19616_p3) }
 0x882   : > { %16488 = vmatprep.subr.bf16.mxu1 (!%p19616_p3), %v20465_v61  ;;  %16531 = vmatprep.subr.bf16.mxu0 (!%p19616_p3), %v20467_v62  ;;  %v20523_v61 = vld [vmem:[#allocation7 + $0x1a0] ss:$16 sps:$4 sm:$0xff] (!%p19616_p3)  }
 0x885   : > { %16489 = vmatpush1.bf16.msra.mxu1 (!%p19616_p3), %v20469_v63  ;;  %16532 = vmatpush1.bf16.msra.mxu0 (!%p19616_p3), %v20470_v0 }
 0x886   : > { %16490 = vmatprep.subr.bf16.mxu1 (!%p19616_p3), %v20471_v1  ;;  %16533 = vmatprep.subr.bf16.mxu0 (!%p19616_p3), %v20473_v2  ;;  %v14802_v1 = vld [vmem:[#allocation2 + $0x50] sm:$0xff] (!%p19616_p3)  ;;  %v20524_v2 = vld [vmem:[#allocation7 + $0x3a0] ss:$16 sps:$4 sm:$0xff] (!%p19616_p3)  }
 0x889   : > { %16491 = vmatpush1.bf16.msra.mxu1 (!%p19616_p3), %v20475_v3  ;;  %16534 = vmatpush1.bf16.msra.mxu0 (!%p19616_p3), %v20476_v4 }
 0x88a   : > { %16492 = vmatprep.subr.bf16.mxu1 (!%p19616_p3), %v20477_v5  ;;  %16535 = vmatprep.subr.bf16.mxu0 (!%p19616_p3), %v20479_v6  ;;  %v20525_v6 = vld [vmem:[#allocation7 + $0x1c4] ss:$16 sps:$4 sm:$0xff] (!%p19616_p3)  }
 0x88d   : > { %16493 = vmatpush1.bf16.msra.mxu1 (!%p19616_p3), %v20481_v7  ;;  %16536 = vmatpush1.bf16.msra.mxu0 (!%p19616_p3), %v20482_v8 }
 0x88e   : > { %16494 = vmatprep.subr.bf16.mxu1 (!%p19616_p3), %v20483_v9  ;;  %16537 = vmatprep.subr.bf16.mxu0 (!%p19616_p3), %v20485_v10  ;;  %v20527_v10 = vld [vmem:[#allocation7 + $0x3c4] ss:$16 sps:$4 sm:$0xff] (!%p19616_p3)  }
 0x891   : > { %16495 = vmatpush1.bf16.msra.mxu1 (!%p19616_p3), %v20487_v11  ;;  %16538 = vmatpush1.bf16.msra.mxu0 (!%p19616_p3), %v20488_v12  ;;  %v20529_v12 = vld [vmem:[#allocation7 + $0x1c0] ss:$16 sps:$4 sm:$0xff] (!%p19616_p3)  }
 0x892   : > { %16496 = vmatprep.subr.bf16.mxu1 (!%p19616_p3), %v20489_v13  ;;  %16539 = vmatprep.subr.bf16.mxu0 (!%p19616_p3), %v20491_v14  ;;  %v20530_v13 = vld [vmem:[#allocation7 + $0x3c0] ss:$16 sps:$4 sm:$0xff] (!%p19616_p3)  }
 0x895   : > { %16497 = vmatpush1.bf16.msra.mxu1 (!%p19616_p3), %v20493_v15  ;;  %16540 = vmatpush1.bf16.msra.mxu0 (!%p19616_p3), %v20494_v16  ;;  %v20531_v15 = vld [vmem:[#allocation7 + $0x1e4] ss:$16 sps:$4 sm:$0xff] (!%p19616_p3)  }
 0x896   : > { %16498 = vmatprep.subr.bf16.mxu1 (!%p19616_p3), %v20495_v17  ;;  %16541 = vmatprep.subr.bf16.mxu0 (!%p19616_p3), %v20497_v19  ;;  %v20533_v16 = vld [vmem:[#allocation7 + $0x3e4] ss:$16 sps:$4 sm:$0xff] (!%p19616_p3)  }
 0x899   : > { %16499 = vmatpush1.bf16.msra.mxu1 (!%p19616_p3), %v20499_v20 }
 0x947   : > { %v14102_v24 = vpop.f32.mrb[4].mxu0  ;;  %v14747_v28 = vpop.f32.mrb[4].mxu1  ;;  %14791 = sbr.rel (%p19616_p3) target bundleno = 3352 (0xd18), region = 96 }
 0x948   : > { %v14760_v27 = vadd.f32 %v14102_v24, %v494_v21  ;;  %v14104_v29 = vpop.f32.mrb[5].mxu0  ;;  %v14762_v32 = vadd.f32 %v14747_v28, %v496_v22  ;;  %v14749_v34 = vpop.f32.mrb[5].mxu1  ;;  %v20500_v21 = vld [vmem:[#allocation7 + $0x320] ss:$16 sps:$4 sm:$0xff] (!%p19616_p3)   ;;  %v20501_v22 = vld [vmem:[#allocation7 + $0x144] ss:$16 sps:$4 sm:$0xff] (!%p19616_p3)  }
 0x949   : > { %v14761_v33 = vadd.f32 %v14104_v29, %v495_v23  ;;  %v14106_v35 = vpop.f32.mrb[6].mxu0  ;;  %v14763_v37 = vadd.f32 %v14749_v34, %v497_v25  ;;  %v14751_v39 = vpop.f32.mrb[6].mxu1  ;;  %v23561_v23 = vshrl.u32 (!%p19616_p3), %v14810_v18, 7  ;;  %v20503_v24 = vld [vmem:[#allocation7 + $0x344] ss:$16 sps:$4 sm:$0xff] (!%p19616_p3)   ;;  %16542 = vmatpush1.bf16.msra.mxu0 (!%p19616_p3), %v20500_v21  ;;  %16500 = vmatprep.subr.bf16.mxu1 (!%p19616_p3), %v20501_v22 }
 0x94a   : > { %14776 = vst [vmem:[#allocation2 + $0x20] sm:$0xff] %v14760_v27  ;;  %v14768_v38 = vadd.f32 %v14106_v35, %v502_v26  ;;  %v14108_v40 = vpop.f32.mrb[7].mxu0  ;;  %14778 = vst [vmem:[#allocation2 + $0x30] sm:$0xff] %v14762_v32  ;;  %v14770_v41 = vadd.f32 %v14751_v39, %v504_v30  ;;  %v14753_v43 = vpop.f32.mrb[7].mxu1  ;;  %v20505_v25 = vld [vmem:[#allocation7 + $0x140] ss:$16 sps:$4 sm:$0xff] (!%p19616_p3)   ;;  %16543 = vmatprep.subr.bf16.mxu0 (!%p19616_p3), %v20503_v24 }
 0x94b   : > { %14777 = vst [vmem:[#allocation2 + $0x28] sm:$0xff] %v14761_v33  ;;  %v14769_v42 = vadd.f32 %v14108_v40, %v503_v31  ;;  %14779 = vst [vmem:[#allocation2 + $0x38] sm:$0xff] %v14763_v37  ;;  %v14771_v44 = vadd.f32 %v14753_v43, %v505_v36  ;;  %v20506_v26 = vld [vmem:[#allocation7 + $0x340] ss:$16 sps:$4 sm:$0xff] (!%p19616_p3)   ;;  %v20507_v27 = vld [vmem:[#allocation7 + $0x164] ss:$16 sps:$4 sm:$0xff] (!%p19616_p3)   ;;  %16501 = vmatpush1.bf16.msra.mxu1 (!%p19616_p3), %v20505_v25 }
 0x94c   : > { %14784 = vst [vmem:[#allocation2 + $0x60] sm:$0xff] %v14768_v38  ;;  %14786 = vst [vmem:[#allocation2 + $0x70] sm:$0xff] %v14770_v41  ;;  %v23564_v28 = vsub.s32 (!%p19616_p3), 1, %v23561_v23  ;;  %v14824_v29 = vsub.s32 (!%p19616_p3), 3, %v23561_v23  ;;  %v20509_v30 = vld [vmem:[#allocation7 + $0x364] ss:$16 sps:$4 sm:$0xff] (!%p19616_p3)   ;;  %16502 = vmatprep.subr.bf16.mxu1 (!%p19616_p3), %v20507_v27 }
 0x94d   : > { %14785 = vst [vmem:[#allocation2 + $0x68] sm:$0xff] %v14769_v42  ;;  %14787 = vst [vmem:[#allocation2 + $0x78] sm:$0xff] %v14771_v44  ;;  %v14828_v31 = vsub.s32 (!%p19616_p3), 4, %v23561_v23  ;;  %v20511_v32 = vld [vmem:[#allocation7 + $0x160] ss:$16 sps:$4 sm:$0xff] (!%p19616_p3)   ;;  %v23569_v34 = vsub.s32 (!%p19616_p3), 0, %v23561_v23  ;;  %16544 = vmatpush1.bf16.msra.mxu0 (!%p19616_p3), %v20506_v26 }
 0x94e   : > { %v20512_v33 = vld [vmem:[#allocation7 + $0x360] ss:$16 sps:$4 sm:$0xff]   ;;  %v23571_v37 = vld [vmem:[#allocation5] sm:$0xff]  ;;  %v14820_v38 = vsub.s32 2, %v23561_v23  ;;  %v20513_v39 = vld [vmem:[#allocation7 + $0x184] ss:$16 sps:$4 sm:$0xff]   ;;  %16545 = vmatprep.subr.bf16.mxu0 %v20509_v30 }
 0x94f   : > { %v14793_v35 = vld [vmem:[#allocation2 + $0x8] sm:$0xff]  ;;  %v14817_v40 = vrot.slane %v23571_v37, %v23564_v28  ;;  %v14795_v41 = vld [vmem:[#allocation2 + $0x18] sm:$0xff]  ;;  %v14825_v43 = vrot.slane %v23571_v37, %v14824_v29  ;;  %v23580_v45 = vrot.slane %v23571_v37, %v14828_v31  ;;  %v14813_v49 = vrot.slane %v23571_v37, %v23569_v34  ;;  %16503 = vmatpush1.bf16.msra.mxu1 %v20511_v32 }
 0x950   : > { %v14801_v36 = vld [vmem:[#allocation2 + $0x48] sm:$0xff]  ;;  %v14803_v42 = vld [vmem:[#allocation2 + $0x58] sm:$0xff]  ;;  %v14821_v55 = vrot.slane %v23571_v37, %v14820_v38  ;;  %16504 = vmatprep.subr.bf16.mxu1 %v20513_v39  ;;  %v14840_v22 = vsub.s32 7, %v23561_v23  ;;  %v14836_v24 = vsub.s32 6, %v23561_v23  ;;  %v20542_v39 = vld [vmem:[#allocation7 + $0xc] ss:$16 sps:$4 sm:$0xff]  }
 0x951   : > { %v20515_v44 = vld [vmem:[#allocation7 + $0x384] ss:$16 sps:$4 sm:$0xff]   ;;  %v14851_v47 = vadd.f32 %v14817_v40, %v14793_v35  ;;  %v14859_v48 = vadd.f32 %v14817_v40, %v14801_v36  ;;  %v14853_v53 = vadd.f32 %v14825_v43, %v14795_v41  ;;  %v14861_v54 = vadd.f32 %v14825_v43, %v14803_v42  ;;  %16546 = vmatpush1.bf16.msra.mxu0 %v20512_v33  ;;  %v20535_v30 = vld [vmem:[#allocation7 + $0x1e0] ss:$16 sps:$4 sm:$0xff]   ;;  %v20540_v43 = vld [vmem:[#allocation7 + $0x8] ss:$16 sps:$4 sm:$0xff]  }
 0x952   : > { %16547 = vmatprep.subr.bf16.mxu0 %v20515_v44  ;;  %v14850_v0 = vadd.f32 %v14813_v49, %v14792_v51  ;;  %v14858_v4 = vadd.f32 %v14813_v49, %v14800_v52  ;;  %v14852_v8 = vadd.f32 %v14821_v55, %v14794_v60  ;;  %v14860_v9 = vadd.f32 %v14821_v55, %v14802_v1  ;;  %v20536_v31 = vld [vmem:[#allocation7 + $0x3e0] ss:$16 sps:$4 sm:$0xff]   ;;  %v20539_v36 = vld [vmem:[#allocation7 + $0x404] ss:$16 sps:$4 sm:$0xff]   ;;  %v20552_v52 = vld [vmem:[#allocation7 + $0x48] ss:$16 sps:$4 sm:$0xff]  }
 0x953   : > { %vm14867_vm0 = vcmp.gt.f32.partialorder %v14851_v47, 0.0  ;;  %vm14875_vm1 = vcmp.gt.f32.partialorder %v14859_v48, 0.0  ;;  %v14883_v56 = vmul.f32 0.2, %v14851_v47  ;;  %v14891_v57 = vmul.f32 0.2, %v14859_v48  ;;  %16505 = vmatpush1.bf16.msra.mxu1 %v20517_v46 }
 0x954   : > { %vm14869_vm2 = vcmp.gt.f32.partialorder %v14853_v53, 0.0  ;;  %vm14877_vm3 = vcmp.gt.f32.partialorder %v14861_v54, 0.0  ;;  %v14885_v5 = vmul.f32 0.2, %v14853_v53  ;;  %v14893_v7 = vmul.f32 0.2, %v14861_v54  ;;  %16506 = vmatprep.subr.bf16.mxu1 %v20519_v58 }
 0x955   : > { %v14899_v62 = vsel %vm14867_vm0, %v14851_v47, %v14883_v56  ;;  %v14907_v63 = vsel %vm14875_vm1, %v14859_v48, %v14891_v57  ;;  %16548 = vmatpush1.bf16.msra.mxu0 %v20518_v50  ;;  %vm14866_vm4 = vcmp.gt.f32.partialorder %v14850_v0, 0.0  ;;  %v14882_v17 = vmul.f32 0.2, %v14850_v0  ;;  %v20537_v42 = vld [vmem:[#allocation7 + $0x400] ss:$16 sps:$4 sm:$0xff]  }
 0x956   : > { %v23587_v3 = vpack.c.bf16 %v14907_v63, %v14899_v62  ;;  %16549 = vmatprep.subr.bf16.mxu0 %v20521_v59  ;;  %v14901_v11 = vsel %vm14869_vm2, %v14853_v53, %v14885_v5  ;;  %v14909_v14 = vsel %vm14877_vm3, %v14861_v54, %v14893_v7  ;;  %v14890_v18 = vmul.f32 0.2, %v14858_v4  ;;  %v20545_v44 = vld [vmem:[#allocation7 + $0x424] ss:$16 sps:$4 sm:$0xff]   ;;  %v20548_v46 = vld [vmem:[#allocation7 + $0x2c] ss:$16 sps:$4 sm:$0xff]  }
 0x957   : > { %v23592_v19 = vpack.c.bf16 %v14909_v14, %v14901_v11  ;;  %16507 = vmatpush1.bf16.msra.mxu1 %v20523_v61  ;;  %v14884_v20 = vmul.f32 0.2, %v14852_v8  ;;  %v14892_v21 = vmul.f32 0.2, %v14860_v9  ;;  %vm14874_vm5 = vcmp.gt.f32.partialorder %v14858_v4, 0.0  ;;  %v14797_v11 = vld [vmem:[#allocation2 + $0x28] sm:$0xff] }
 0x958   : > { %16512 = vmatprep.mubr.bf16.mxu1 %v23587_v3  ;;  %16508 = vmatprep.subr.bf16.mxu1 %v20525_v6  ;;  %vm14868_vm6 = vcmp.gt.f32.partialorder %v14852_v8, 0.0  ;;  %vm14876_vm7 = vcmp.gt.f32.partialorder %v14860_v9, 0.0  ;;  %v23598_v25 = vrot.slane %v23571_v37, %v14840_v22  ;;  %v14898_v26 = vsel %vm14866_vm4, %v14850_v0, %v14882_v17  ;;  %v20543_v47 = vld [vmem:[#allocation7 + $0x420] ss:$16 sps:$4 sm:$0xff]   ;;  %v20546_v48 = vld [vmem:[#allocation7 + $0x28] ss:$16 sps:$4 sm:$0xff]  }
 0x959   : > { %16550 = vmatpush1.bf16.msra.mxu0 %v20524_v2  ;;  %16555 = vmatprep.mubr.bf16.mxu0 %v23592_v19  ;;  %v23602_v27 = vrot.slane %v23571_v37, %v14836_v24  ;;  %v14906_v32 = vsel %vm14874_vm5, %v14858_v4, %v14890_v18  ;;  %v14900_v33 = vsel %vm14868_vm6, %v14852_v8, %v14884_v20  ;;  %v20551_v49 = vld [vmem:[#allocation7 + $0x444] ss:$16 sps:$4 sm:$0xff]   ;;  %v20554_v50 = vld [vmem:[#allocation7 + $0x4c] ss:$16 sps:$4 sm:$0xff]   ;;  %v20549_v51 = vld [vmem:[#allocation7 + $0x440] ss:$16 sps:$4 sm:$0xff]  }
 0x95a   : > { %16551 = vmatprep.subr.bf16.mxu0 %v20527_v10  ;;  %v14908_v35 = vsel %vm14876_vm7, %v14860_v9, %v14892_v21  ;;  %v23604_v40 = vpack.c.bf16 %v14906_v32, %v14898_v26  ;;  %v20557_v53 = vld [vmem:[#allocation7 + $0x464] ss:$16 sps:$4 sm:$0xff]   ;;  %v20560_v54 = vld [vmem:[#allocation7 + $0x6c] ss:$16 sps:$4 sm:$0xff]   ;;  %v20555_v55 = vld [vmem:[#allocation7 + $0x460] ss:$16 sps:$4 sm:$0xff]  }
 0x95b   : > { %16509 = vmatpush1.bf16.msra.mxu1 %v20529_v12  ;;  %v23606_v41 = vpack.c.bf16 %v14908_v35, %v14900_v33  ;;  %v20558_v56 = vld [vmem:[#allocation7 + $0x68] ss:$16 sps:$4 sm:$0xff]   ;;  %v20563_v57 = vld [vmem:[#allocation7 + $0x484] ss:$16 sps:$4 sm:$0xff]   ;;  %v20566_v58 = vld [vmem:[#allocation7 + $0x8c] ss:$16 sps:$4 sm:$0xff]  }
 0x95c   : > { %16510 = vmatprep.subr.bf16.mxu1 %v20531_v15  ;;  %v20561_v59 = vld [vmem:[#allocation7 + $0x480] ss:$16 sps:$4 sm:$0xff]   ;;  %v20564_v60 = vld [vmem:[#allocation7 + $0x88] ss:$16 sps:$4 sm:$0xff]   ;;  %v20569_v61 = vld [vmem:[#allocation7 + $0x4a4] ss:$16 sps:$4 sm:$0xff]  }
 0x95d   : > { %16552 = vmatpush1.bf16.msra.mxu0 %v20530_v13  ;;  %v20572_v62 = vld [vmem:[#allocation7 + $0xac] ss:$16 sps:$4 sm:$0xff]   ;;  %v20567_v63 = vld [vmem:[#allocation7 + $0x4a0] ss:$16 sps:$4 sm:$0xff]   ;;  %v20570_v0 = vld [vmem:[#allocation7 + $0xa8] ss:$16 sps:$4 sm:$0xff]  }
 0x95e   : > { %16553 = vmatprep.subr.bf16.mxu0 %v20533_v16  ;;  %v14832_v1 = vsub.s32 5, %v23561_v23  ;;  %v20575_v2 = vld [vmem:[#allocation7 + $0x4c4] ss:$16 sps:$4 sm:$0xff]   ;;  %v20573_v4 = vld [vmem:[#allocation7 + $0x4c0] ss:$16 sps:$4 sm:$0xff]  }
 0x95f   : > { %16511 = vmatpush1.bf16.msra.mxu1 %v20535_v30  ;;  %v20576_v5 = vld [vmem:[#allocation7 + $0xc8] ss:$16 sps:$4 sm:$0xff]   ;;  %v20581_v7 = vld [vmem:[#allocation7 + $0x4e4] ss:$16 sps:$4 sm:$0xff]   ;;  %v20584_v8 = vld [vmem:[#allocation7 + $0xec] ss:$16 sps:$4 sm:$0xff]  }
 0x960   : > { %16652 = vmatprep.subr.bf16.mxu1 %v20542_v39  ;;  %v14833_v6 = vrot.slane %v23571_v37, %v14832_v1  ;;  %v20579_v9 = vld [vmem:[#allocation7 + $0x4e0] ss:$16 sps:$4 sm:$0xff]   ;;  %v20582_v10 = vld [vmem:[#allocation7 + $0xe8] ss:$16 sps:$4 sm:$0xff]   ;;  %v20587_v13 = vld [vmem:[#allocation7 + $0x504] ss:$16 sps:$4 sm:$0xff]  }
 0x961   : > { %16554 = vmatpush1.bf16.msra.mxu0 %v20536_v31  ;;  %v14805_v12 = vld [vmem:[#allocation2 + $0x68] sm:$0xff]  ;;  %v20590_v16 = vld [vmem:[#allocation7 + $0x10c] ss:$16 sps:$4 sm:$0xff]   ;;  %v20588_v20 = vld [vmem:[#allocation7 + $0x108] ss:$16 sps:$4 sm:$0xff]  }
 0x962   : > { %16566 = vmatprep.subr.bf16.mxu0 %v20539_v36  ;;  %16513 = vmatmul.mubr.bf16.vlgmr.msra.gmra.mrb[0].mxu1 %v23604_v40  ;;  %v14855_v14 = vadd.f32 %v14833_v6, %v14797_v11  ;;  %v14863_v15 = vadd.f32 %v14833_v6, %v14805_v12  ;;  %v20585_v18 = vld [vmem:[#allocation7 + $0x500] ss:$16 sps:$4 sm:$0xff]   ;;  %v20593_v24 = vld [vmem:[#allocation7 + $0x524] ss:$16 sps:$4 sm:$0xff]   ;;  %v20596_v26 = vld [vmem:[#allocation7 + $0x12c] ss:$16 sps:$4 sm:$0xff]  }
 0x963   : > { %16653 = vmatpush1.bf16.msra.mxu1 %v20540_v43  ;;  %16684 = vmatprep.mubr.bf16.mxu1 %v23587_v3  ;;  %v20578_v3 = vld [vmem:[#allocation7 + $0xcc] ss:$16 sps:$4 sm:$0xff]   ;;  %v20591_v31 = vld [vmem:[#allocation7 + $0x520] ss:$16 sps:$4 sm:$0xff]   ;;  %v20594_v32 = vld [vmem:[#allocation7 + $0x128] ss:$16 sps:$4 sm:$0xff]  }
 0x964   : > { %16556 = vmatmul.mubr.bf16.vlgmr.msra.gmra.mrb[0].mxu0 %v23606_v41  ;;  %16654 = vmatprep.subr.bf16.mxu1 %v20548_v46  ;;  %vm14871_vm8 = vcmp.gt.f32.partialorder %v14855_v14, 0.0  ;;  %vm14879_vm9 = vcmp.gt.f32.partialorder %v14863_v15, 0.0  ;;  %v14887_v17 = vmul.f32 0.2, %v14855_v14  ;;  %v14895_v37 = vmul.f32 0.2, %v14863_v15 }
 0x965   : > { %16567 = vmatpush1.bf16.msra.mxu0 %v20537_v42  ;;  %v20599_v33 = vld [vmem:[#allocation7 + $0x544] ss:$16 sps:$4 sm:$0xff]   ;;  %v20602_v35 = vld [vmem:[#allocation7 + $0x14c] ss:$16 sps:$4 sm:$0xff]   ;;  %v20597_v36 = vld [vmem:[#allocation7 + $0x540] ss:$16 sps:$4 sm:$0xff]  }
 0x966   : > { %16568 = vmatprep.subr.bf16.mxu0 %v20545_v44  ;;  %v14903_v21 = vsel %vm14871_vm8, %v14855_v14, %v14887_v17  ;;  %v14911_v22 = vsel %vm14879_vm9, %v14863_v15, %v14895_v37  ;;  %v20600_v39 = vld [vmem:[#allocation7 + $0x148] ss:$16 sps:$4 sm:$0xff]   ;;  %v20605_v42 = vld [vmem:[#allocation7 + $0x564] ss:$16 sps:$4 sm:$0xff]   ;;  %v20608_v43 = vld [vmem:[#allocation7 + $0x16c] ss:$16 sps:$4 sm:$0xff]  }
 0x967   : > { %16655 = vmatpush1.bf16.msra.mxu1 %v20546_v48  ;;  %v23613_v30 = vpack.c.bf16 %v14911_v22, %v14903_v21  ;;  %v20603_v44 = vld [vmem:[#allocation7 + $0x560] ss:$16 sps:$4 sm:$0xff]   ;;  %v20606_v46 = vld [vmem:[#allocation7 + $0x168] ss:$16 sps:$4 sm:$0xff]   ;;  %v20614_v48 = vld [vmem:[#allocation7 + $0x18c] ss:$16 sps:$4 sm:$0xff]  }
 0x968   : > { %16656 = vmatprep.subr.bf16.mxu1 %v20554_v50  ;;  %v20612_v50 = vld [vmem:[#allocation7 + $0x188] ss:$16 sps:$4 sm:$0xff]   ;;  %v20641_v11 = vld [vmem:[#allocation7 + $0x624] ss:$16 sps:$4 sm:$0xff]   ;;  %v20644_v12 = vld [vmem:[#allocation7 + $0x22c] ss:$16 sps:$4 sm:$0xff]  }
 0x969   : > { %16569 = vmatpush1.bf16.msra.mxu0 %v20543_v47  ;;  %16598 = vmatprep.mubr.bf16.mxu0 %v23613_v30  ;;  %v20611_v47 = vld [vmem:[#allocation7 + $0x584] ss:$16 sps:$4 sm:$0xff]   ;;  %v20642_v14 = vld [vmem:[#allocation7 + $0x228] ss:$16 sps:$4 sm:$0xff]   ;;  %v20645_v17 = vld [vmem:[#allocation7 + $0x640] ss:$16 sps:$4 sm:$0xff]  }
 0x96a   : > { %16570 = vmatprep.subr.bf16.mxu0 %v20551_v49  ;;  %v20609_v49 = vld [vmem:[#allocation7 + $0x580] ss:$16 sps:$4 sm:$0xff]   ;;  %v20647_v15 = vld [vmem:[#allocation7 + $0x644] ss:$16 sps:$4 sm:$0xff]   ;;  %v20648_v37 = vld [vmem:[#allocation7 + $0x248] ss:$16 sps:$4 sm:$0xff]  }
 0x96b   : > { %16657 = vmatpush1.bf16.msra.mxu1 %v20552_v52  ;;  %v20620_v52 = vld [vmem:[#allocation7 + $0x1ac] ss:$16 sps:$4 sm:$0xff]   ;;  %v14799_v21 = vld [vmem:[#allocation2 + $0x38] sm:$0xff] }
 0x96c   : > { %16658 = vmatprep.subr.bf16.mxu1 %v20560_v54  ;;  %v14804_v54 = vld [vmem:[#allocation2 + $0x60] sm:$0xff]  ;;  %v14857_v22 = vadd.f32 %v23598_v25, %v14799_v21 }
 0x96d   : > { %16571 = vmatpush1.bf16.msra.mxu0 %v20549_v51  ;;  %v20617_v51 = vld [vmem:[#allocation7 + $0x5a4] ss:$16 sps:$4 sm:$0xff]  }
 0x96e   : > { %16572 = vmatprep.subr.bf16.mxu0 %v20557_v53  ;;  %v14796_v53 = vld [vmem:[#allocation2 + $0x20] sm:$0xff]  ;;  %vm14873_vm12 = vcmp.gt.f32.partialorder %v14857_v22, 0.0 }
 0x96f   : > { %16659 = vmatpush1.bf16.msra.mxu1 %v20558_v56  ;;  %v20618_v56 = vld [vmem:[#allocation7 + $0x1a8] ss:$16 sps:$4 sm:$0xff]  }
 0x970   : > { %16660 = vmatprep.subr.bf16.mxu1 %v20566_v58  ;;  %v14854_v58 = vadd.f32 %v23580_v45, %v14796_v53  ;;  %v20677_v53 = vld [vmem:[#allocation7 + $0x6e4] ss:$16 sps:$4 sm:$0xff]  }
 0x971   : > { %16573 = vmatpush1.bf16.msra.mxu0 %v20555_v55  ;;  %v20615_v55 = vld [vmem:[#allocation7 + $0x5a0] ss:$16 sps:$4 sm:$0xff]  }
 0x972   : > { %16574 = vmatprep.subr.bf16.mxu0 %v20563_v57  ;;  %v20623_v57 = vld [vmem:[#allocation7 + $0x5c4] ss:$16 sps:$4 sm:$0xff]   ;;  %vm14870_vm10 = vcmp.gt.f32.partialorder %v14854_v58, 0.0 }
 0x973   : > { %16661 = vmatpush1.bf16.msra.mxu1 %v20564_v60  ;;  %v20626_v60 = vld [vmem:[#allocation7 + $0x1cc] ss:$16 sps:$4 sm:$0xff]  }
 0x974   : > { %16662 = vmatprep.subr.bf16.mxu1 %v20572_v62  ;;  %v20624_v62 = vld [vmem:[#allocation7 + $0x1c8] ss:$16 sps:$4 sm:$0xff]  }
 0x975   : > { %16575 = vmatpush1.bf16.msra.mxu0 %v20561_v59  ;;  %v14862_v59 = vadd.f32 %v23580_v45, %v14804_v54  ;;  %v20635_v45 = vld [vmem:[#allocation7 + $0x604] ss:$16 sps:$4 sm:$0xff]   ;;  %v20680_v54 = vld [vmem:[#allocation7 + $0x2ec] ss:$16 sps:$4 sm:$0xff]  }
 0x976   : > { %16576 = vmatprep.subr.bf16.mxu0 %v20569_v61  ;;  %v20621_v61 = vld [vmem:[#allocation7 + $0x5c0] ss:$16 sps:$4 sm:$0xff]  }
 0x977   : > { %16663 = vmatpush1.bf16.msra.mxu1 %v20570_v0  ;;  %v14886_v0 = vmul.f32 0.2, %v14854_v58  ;;  %v14894_v1 = vmul.f32 0.2, %v14862_v59  ;;  %vm14878_vm11 = vcmp.gt.f32.partialorder %v14862_v59, 0.0 }
 0x978   : > { %16664 = vmatprep.subr.bf16.mxu1 %v20578_v3  ;;  %v20627_v3 = vld [vmem:[#allocation7 + $0x5e0] ss:$16 sps:$4 sm:$0xff]  }
 0x979   : > { %16577 = vmatpush1.bf16.msra.mxu0 %v20567_v63  ;;  %v20629_v63 = vld [vmem:[#allocation7 + $0x5e4] ss:$16 sps:$4 sm:$0xff]   ;;  %v14910_v6 = vsel %vm14878_vm11, %v14862_v59, %v14894_v1  ;;  %v20681_v59 = vld [vmem:[#allocation7 + $0x700] ss:$16 sps:$4 sm:$0xff]  }
 0x97a   : > { %16578 = vmatprep.subr.bf16.mxu0 %v20575_v2  ;;  %v20632_v2 = vld [vmem:[#allocation7 + $0x1ec] ss:$16 sps:$4 sm:$0xff]   ;;  %v20695_v1 = vld [vmem:[#allocation7 + $0x744] ss:$16 sps:$4 sm:$0xff]  }
 0x97b   : > { %16665 = vmatpush1.bf16.msra.mxu1 %v20576_v5  ;;  %v14902_v5 = vsel %vm14870_vm10, %v14854_v58, %v14886_v0  ;;  %v20686_v58 = vld [vmem:[#allocation7 + $0x30c] ss:$16 sps:$4 sm:$0xff]   ;;  %v20690_v0 = vld [vmem:[#allocation7 + $0x328] ss:$16 sps:$4 sm:$0xff]  }
 0x97c   : > { %16666 = vmatprep.subr.bf16.mxu1 %v20584_v8  ;;  %v20633_v8 = vld [vmem:[#allocation7 + $0x600] ss:$16 sps:$4 sm:$0xff]  }
 0x97d   : > { %16579 = vmatpush1.bf16.msra.mxu0 %v20573_v4  ;;  %v20630_v4 = vld [vmem:[#allocation7 + $0x1e8] ss:$16 sps:$4 sm:$0xff]  }
 0x97e   : > { %16580 = vmatprep.subr.bf16.mxu0 %v20581_v7  ;;  %v20638_v7 = vld [vmem:[#allocation7 + $0x20c] ss:$16 sps:$4 sm:$0xff]  }
 0x97f   : > { %16667 = vmatpush1.bf16.msra.mxu1 %v20582_v10  ;;  %v20636_v10 = vld [vmem:[#allocation7 + $0x208] ss:$16 sps:$4 sm:$0xff]  }
 0x980   : > { %16668 = vmatprep.subr.bf16.mxu1 %v20590_v16  ;;  %v20650_v16 = vld [vmem:[#allocation7 + $0x24c] ss:$16 sps:$4 sm:$0xff]  }
 0x981   : > { %16581 = vmatpush1.bf16.msra.mxu0 %v20579_v9  ;;  %v23618_v9 = vpack.c.bf16 %v14910_v6, %v14902_v5  ;;  %v20704_v5 = vld [vmem:[#allocation7 + $0x36c] ss:$16 sps:$4 sm:$0xff]   ;;  %v20699_v6 = vld [vmem:[#allocation7 + $0x760] ss:$16 sps:$4 sm:$0xff]  }
 0x982   : > { %16582 = vmatprep.subr.bf16.mxu0 %v20587_v13  ;;  %v20639_v13 = vld [vmem:[#allocation7 + $0x620] ss:$16 sps:$4 sm:$0xff]  }
 0x983   : > { %16669 = vmatpush1.bf16.msra.mxu1 %v20588_v20  ;;  %v20656_v20 = vld [vmem:[#allocation7 + $0x26c] ss:$16 sps:$4 sm:$0xff]  }
 0x984   : > { %16670 = vmatprep.subr.bf16.mxu1 %v20596_v26  ;;  %v20651_v26 = vld [vmem:[#allocation7 + $0x660] ss:$16 sps:$4 sm:$0xff]  }
 0x985   : > { %16583 = vmatpush1.bf16.msra.mxu0 %v20585_v18  ;;  %v20653_v18 = vld [vmem:[#allocation7 + $0x664] ss:$16 sps:$4 sm:$0xff]  }
 0x986   : > { %16584 = vmatprep.subr.bf16.mxu0 %v20593_v24 }
 0x987   : > { %16671 = vmatpush1.bf16.msra.mxu1 %v20594_v32 }
 0x988   : > { %16672 = vmatprep.subr.bf16.mxu1 %v20602_v35  ;;  %v20662_v35 = vld [vmem:[#allocation7 + $0x28c] ss:$16 sps:$4 sm:$0xff]  }
 0x989   : > { %16585 = vmatpush1.bf16.msra.mxu0 %v20591_v31  ;;  %v20654_v31 = vld [vmem:[#allocation7 + $0x268] ss:$16 sps:$4 sm:$0xff]  }
 0x98a   : > { %16586 = vmatprep.subr.bf16.mxu0 %v20599_v33  ;;  %v20659_v33 = vld [vmem:[#allocation7 + $0x684] ss:$16 sps:$4 sm:$0xff]  }
 0x98b   : > { %16673 = vmatpush1.bf16.msra.mxu1 %v20600_v39 }
 0x98c   : > { %16674 = vmatprep.subr.bf16.mxu1 %v20608_v43 }
 0x98d   : > { %16587 = vmatpush1.bf16.msra.mxu0 %v20597_v36 }
 0x98e   : > { %16588 = vmatprep.subr.bf16.mxu0 %v20605_v42  ;;  %v20657_v42 = vld [vmem:[#allocation7 + $0x680] ss:$16 sps:$4 sm:$0xff]  }
 0x98f   : > { %16675 = vmatpush1.bf16.msra.mxu1 %v20606_v46  ;;  %v20668_v46 = vld [vmem:[#allocation7 + $0x2ac] ss:$16 sps:$4 sm:$0xff]  }
 0x990   : > { %16676 = vmatprep.subr.bf16.mxu1 %v20614_v48  ;;  %v20666_v48 = vld [vmem:[#allocation7 + $0x2a8] ss:$16 sps:$4 sm:$0xff]  }
 0x991   : > { %16589 = vmatpush1.bf16.msra.mxu0 %v20603_v44  ;;  %v20665_v44 = vld [vmem:[#allocation7 + $0x6a4] ss:$16 sps:$4 sm:$0xff]  }
 0x992   : > { %16590 = vmatprep.subr.bf16.mxu0 %v20611_v47  ;;  %v20663_v47 = vld [vmem:[#allocation7 + $0x6a0] ss:$16 sps:$4 sm:$0xff]  }
 0x993   : > { %16677 = vmatpush1.bf16.msra.mxu1 %v20612_v50  ;;  %v20674_v50 = vld [vmem:[#allocation7 + $0x2cc] ss:$16 sps:$4 sm:$0xff]  }
 0x994   : > { %16678 = vmatprep.subr.bf16.mxu1 %v20620_v52  ;;  %v20672_v52 = vld [vmem:[#allocation7 + $0x2c8] ss:$16 sps:$4 sm:$0xff]  }
 0x995   : > { %16591 = vmatpush1.bf16.msra.mxu0 %v20609_v49  ;;  %v20671_v49 = vld [vmem:[#allocation7 + $0x6c4] ss:$16 sps:$4 sm:$0xff]  }
 0x996   : > { %16592 = vmatprep.subr.bf16.mxu0 %v20617_v51  ;;  %v20669_v51 = vld [vmem:[#allocation7 + $0x6c0] ss:$16 sps:$4 sm:$0xff]  }
 0x997   : > { %16679 = vmatpush1.bf16.msra.mxu1 %v20618_v56  ;;  %v20678_v56 = vld [vmem:[#allocation7 + $0x2e8] ss:$16 sps:$4 sm:$0xff]  }
 0x998   : > { %16680 = vmatprep.subr.bf16.mxu1 %v20626_v60  ;;  %v20684_v60 = vld [vmem:[#allocation7 + $0x308] ss:$16 sps:$4 sm:$0xff]  }
 0x999   : > { %16593 = vmatpush1.bf16.msra.mxu0 %v20615_v55  ;;  %v20675_v55 = vld [vmem:[#allocation7 + $0x6e0] ss:$16 sps:$4 sm:$0xff]  }
 0x99a   : > { %16594 = vmatprep.subr.bf16.mxu0 %v20623_v57  ;;  %v20683_v57 = vld [vmem:[#allocation7 + $0x704] ss:$16 sps:$4 sm:$0xff]  }
 0x99b   : > { %16681 = vmatpush1.bf16.msra.mxu1 %v20624_v62  ;;  %v20692_v62 = vld [vmem:[#allocation7 + $0x32c] ss:$16 sps:$4 sm:$0xff]  }
 0x99c   : > { %16682 = vmatprep.subr.bf16.mxu1 %v20632_v2  ;;  %v20698_v2 = vld [vmem:[#allocation7 + $0x34c] ss:$16 sps:$4 sm:$0xff]  }
 0x99d   : > { %16595 = vmatpush1.bf16.msra.mxu0 %v20621_v61  ;;  %v20689_v61 = vld [vmem:[#allocation7 + $0x724] ss:$16 sps:$4 sm:$0xff]  }
 0x99e   : > { %16596 = vmatprep.subr.bf16.mxu0 %v20629_v63  ;;  %v20687_v63 = vld [vmem:[#allocation7 + $0x720] ss:$16 sps:$4 sm:$0xff]  }
 0x99f   : > { %16683 = vmatpush1.bf16.msra.mxu1 %v20630_v4  ;;  %v20696_v4 = vld [vmem:[#allocation7 + $0x348] ss:$16 sps:$4 sm:$0xff]  }
 0x9a0   : > { %16695 = vmatprep.subr.bf16.mxu1 %v20638_v7  ;;  %v20702_v7 = vld [vmem:[#allocation7 + $0x368] ss:$16 sps:$4 sm:$0xff]  }
 0x9a1   : > { %16597 = vmatpush1.bf16.msra.mxu0 %v20627_v3  ;;  %v20693_v3 = vld [vmem:[#allocation7 + $0x740] ss:$16 sps:$4 sm:$0xff]  }
 0x9a2   : > { %16609 = vmatprep.subr.bf16.mxu0 %v20635_v45  ;;  %16685 = vmatmul.mubr.bf16.vlgmr.msra.gmra.mrb[4].mxu1 %v23604_v40  ;;  %v14807_v40 = vld [vmem:[#allocation2 + $0x78] sm:$0xff] }
 0x9a3   : > { %16696 = vmatpush1.bf16.msra.mxu1 %v20636_v10  ;;  %16727 = vmatprep.mubr.bf16.mxu1 %v23592_v19  ;;  %v14865_v24 = vadd.f32 %v23598_v25, %v14807_v40  ;;  %v14889_v19 = vmul.f32 0.2, %v14857_v22  ;;  %v20660_v25 = vld [vmem:[#allocation7 + $0x288] ss:$16 sps:$4 sm:$0xff]   ;;  %v20701_v45 = vld [vmem:[#allocation7 + $0x764] ss:$16 sps:$4 sm:$0xff]  }
 0x9a4   : > { %16599 = vmatmul.mubr.bf16.vlgmr.msra.gmra.mrb[0].mxu0 %v23618_v9  ;;  %16697 = vmatprep.subr.bf16.mxu1 %v20644_v12  ;;  %v20710_v10 = vld [vmem:[#allocation7 + $0x38c] ss:$16 sps:$4 sm:$0xff]   ;;  %v20708_v12 = vld [vmem:[#allocation7 + $0x388] ss:$16 sps:$4 sm:$0xff]  }
 0x9a5   : > { %16610 = vmatpush1.bf16.msra.mxu0 %v20633_v8  ;;  %vm14881_vm13 = vcmp.gt.f32.partialorder %v14865_v24, 0.0  ;;  %v14897_v32 = vmul.f32 0.2, %v14865_v24  ;;  %v14905_v36 = vsel %vm14873_vm12, %v14857_v22, %v14889_v19  ;;  %v20707_v8 = vld [vmem:[#allocation7 + $0x784] ss:$16 sps:$4 sm:$0xff]  }
 0x9a6   : > { %16611 = vmatprep.subr.bf16.mxu0 %v20641_v11  ;;  %v20705_v11 = vld [vmem:[#allocation7 + $0x780] ss:$16 sps:$4 sm:$0xff]  }
 0x9a7   : > { %16698 = vmatpush1.bf16.msra.mxu1 %v20642_v14  ;;  %v14913_v39 = vsel %vm14881_vm13, %v14865_v24, %v14897_v32  ;;  %v20716_v14 = vld [vmem:[#allocation7 + $0x3ac] ss:$16 sps:$4 sm:$0xff]   ;;  %v20717_v22 = vld [vmem:[#allocation7 + $0x7c0] ss:$16 sps:$4 sm:$0xff]   ;;  %v20720_v24 = vld [vmem:[#allocation7 + $0x3c8] ss:$16 sps:$4 sm:$0xff]  }
 0x9a8   : > { %16699 = vmatprep.subr.bf16.mxu1 %v20650_v16  ;;  %v23625_v43 = vpack.c.bf16 %v14913_v39, %v14905_v36  ;;  %v14806_v16 = vld [vmem:[#allocation2 + $0x70] sm:$0xff] }
 0x9a9   : > { %16612 = vmatpush1.bf16.msra.mxu0 %v20639_v13  ;;  %v20713_v13 = vld [vmem:[#allocation7 + $0x7a4] ss:$16 sps:$4 sm:$0xff]   ;;  %v14864_v40 = vadd.f32 %v23602_v27, %v14806_v16  ;;  %v20731_v39 = vld [vmem:[#allocation7 + $0x40c] ss:$16 sps:$4 sm:$0xff]  }
 0x9aa   : > { %16613 = vmatprep.subr.bf16.mxu0 %v20647_v15  ;;  %16641 = vmatprep.mubr.bf16.mxu0 %v23625_v43  ;;  %v14798_v15 = vld [vmem:[#allocation2 + $0x30] sm:$0xff] }
 0x9ab   : > { %16700 = vmatpush1.bf16.msra.mxu1 %v20648_v37  ;;  %v20714_v37 = vld [vmem:[#allocation7 + $0x3a8] ss:$16 sps:$4 sm:$0xff]   ;;  %v14856_v21 = vadd.f32 %v23602_v27, %v14798_v15  ;;  %v14896_v32 = vmul.f32 0.2, %v14864_v40  ;;  %vm14880_vm15 = vcmp.gt.f32.partialorder %v14864_v40, 0.0 }
 0x9ac   : > { %16701 = vmatprep.subr.bf16.mxu1 %v20656_v20  ;;  %v20722_v20 = vld [vmem:[#allocation7 + $0x3cc] ss:$16 sps:$4 sm:$0xff]   ;;  %v20756_v15 = vld [vmem:[#allocation7 + $0x528] ss:$16 sps:$4 sm:$0xff]  }
 0x9ad   : > { %16614 = vmatpush1.bf16.msra.mxu0 %v20645_v17  ;;  %v20711_v17 = vld [vmem:[#allocation7 + $0x7a0] ss:$16 sps:$4 sm:$0xff]   ;;  %v14888_v19 = vmul.f32 0.2, %v14856_v21  ;;  %vm14872_vm14 = vcmp.gt.f32.partialorder %v14856_v21, 0.0  ;;  %v14912_v27 = vsel %vm14880_vm15, %v14864_v40, %v14896_v32 }
 0x9ae   : > { %16615 = vmatprep.subr.bf16.mxu0 %v20653_v18  ;;  %v20719_v18 = vld [vmem:[#allocation7 + $0x7c4] ss:$16 sps:$4 sm:$0xff]   ;;  %v20761_v16 = vld [vmem:[#allocation7 + $0x54c] ss:$16 sps:$4 sm:$0xff]   ;;  %v20860_v40 = vld [vmem:[#allocation10 + $0xb4] ss:$8 sps:$4 sm:$0xff]  }
 0x9af   : > { %16702 = vmatpush1.bf16.msra.mxu1 %v20654_v31  ;;  %v20728_v31 = vld [vmem:[#allocation7 + $0x3ec] ss:$16 sps:$4 sm:$0xff]   ;;  %v14904_v36 = vsel %vm14872_vm14, %v14856_v21, %v14888_v19  ;;  %v20765_v19 = vld [vmem:[#allocation7 + $0x588] ss:$16 sps:$4 sm:$0xff]  }
 0x9b0   : > { %16703 = vmatprep.subr.bf16.mxu1 %v20662_v35  ;;  %v20726_v35 = vld [vmem:[#allocation7 + $0x3e8] ss:$16 sps:$4 sm:$0xff]   ;;  %v20855_v21 = vld [vmem:[#allocation10 + $0xa0] ss:$8 sps:$4 sm:$0xff]  }
 0x9b1   : > { %16616 = vmatpush1.bf16.msra.mxu0 %v20651_v26  ;;  %v20725_v26 = vld [vmem:[#allocation7 + $0x7e4] ss:$16 sps:$4 sm:$0xff]   ;;  %v20770_v32 = vld [vmem:[#allocation7 + $0x5ac] ss:$16 sps:$4 sm:$0xff]  }
 0x9b2   : > { %16617 = vmatprep.subr.bf16.mxu0 %v20659_v33  ;;  %v20723_v33 = vld [vmem:[#allocation7 + $0x7e0] ss:$16 sps:$4 sm:$0xff]  }
 0x9b3   : > { %16704 = vmatpush1.bf16.msra.mxu1 %v20660_v25  ;;  %v23630_v25 = vpack.c.bf16 %v14912_v27, %v14904_v36  ;;  %v20773_v36 = vld [vmem:[#allocation7 + $0x5cc] ss:$16 sps:$4 sm:$0xff]   ;;  %v20771_v27 = vld [vmem:[#allocation7 + $0x5c8] ss:$16 sps:$4 sm:$0xff]  }
 0x9b4   : > { %16705 = vmatprep.subr.bf16.mxu1 %v20668_v46  ;;  %v20825_v46 = vld [vmem:[#allocation10] ss:$8 sps:$4 sm:$0xff]  }
 0x9b5   : > { %16618 = vmatpush1.bf16.msra.mxu0 %v20657_v42  ;;  %v20729_v42 = vld [vmem:[#allocation7 + $0x408] ss:$16 sps:$4 sm:$0xff]  }
 0x9b6   : > { %16619 = vmatprep.subr.bf16.mxu0 %v20665_v44  ;;  %v20734_v44 = vld [vmem:[#allocation7 + $0x42c] ss:$16 sps:$4 sm:$0xff]  }
 0x9b7   : > { %16706 = vmatpush1.bf16.msra.mxu1 %v20666_v48  ;;  %v20732_v48 = vld [vmem:[#allocation7 + $0x428] ss:$16 sps:$4 sm:$0xff]  }
 0x9b8   : > { %16707 = vmatprep.subr.bf16.mxu1 %v20674_v50  ;;  %v20737_v50 = vld [vmem:[#allocation7 + $0x44c] ss:$16 sps:$4 sm:$0xff]  }
 0x9b9   : > { %16620 = vmatpush1.bf16.msra.mxu0 %v20663_v47  ;;  %v20827_v47 = vld [vmem:[#allocation10 + $0x4] ss:$8 sps:$4 sm:$0xff]  }
 0x9ba   : > { %16621 = vmatprep.subr.bf16.mxu0 %v20671_v49  ;;  %v20830_v49 = vld [vmem:[#allocation10 + $0x14] ss:$8 sps:$4 sm:$0xff]  }
 0x9bb   : > { %16708 = vmatpush1.bf16.msra.mxu1 %v20672_v52  ;;  %v20833_v52 = vld [vmem:[#allocation10 + $0x24] ss:$8 sps:$4 sm:$0xff]  }
 0x9bc   : > { %16709 = vmatprep.subr.bf16.mxu1 %v20680_v54  ;;  %v20740_v54 = vld [vmem:[#allocation7 + $0x46c] ss:$16 sps:$4 sm:$0xff]  }
 0x9bd   : > { %16622 = vmatpush1.bf16.msra.mxu0 %v20669_v51  ;;  %v20828_v51 = vld [vmem:[#allocation10 + $0x10] ss:$8 sps:$4 sm:$0xff]  }
 0x9be   : > { %16623 = vmatprep.subr.bf16.mxu0 %v20677_v53  ;;  %v20735_v53 = vld [vmem:[#allocation7 + $0x448] ss:$16 sps:$4 sm:$0xff]  }
 0x9bf   : > { %16710 = vmatpush1.bf16.msra.mxu1 %v20678_v56  ;;  %v20743_v56 = vld [vmem:[#allocation7 + $0x48c] ss:$16 sps:$4 sm:$0xff]  }
 0x9c0   : > { %16711 = vmatprep.subr.bf16.mxu1 %v20686_v58  ;;  %v20839_v58 = vld [vmem:[#allocation10 + $0x44] ss:$8 sps:$4 sm:$0xff]  }
 0x9c1   : > { %16624 = vmatpush1.bf16.msra.mxu0 %v20675_v55  ;;  %v20738_v55 = vld [vmem:[#allocation7 + $0x468] ss:$16 sps:$4 sm:$0xff]  }
 0x9c2   : > { %16625 = vmatprep.subr.bf16.mxu0 %v20683_v57  ;;  %v20836_v57 = vld [vmem:[#allocation10 + $0x34] ss:$8 sps:$4 sm:$0xff]  }
 0x9c3   : > { %16712 = vmatpush1.bf16.msra.mxu1 %v20684_v60  ;;  %v20746_v60 = vld [vmem:[#allocation7 + $0x4ac] ss:$16 sps:$4 sm:$0xff]  }
 0x9c4   : > { %16713 = vmatprep.subr.bf16.mxu1 %v20692_v62  ;;  %v20842_v62 = vld [vmem:[#allocation10 + $0x54] ss:$8 sps:$4 sm:$0xff]  }
 0x9c5   : > { %16626 = vmatpush1.bf16.msra.mxu0 %v20681_v59  ;;  %v20741_v59 = vld [vmem:[#allocation7 + $0x488] ss:$16 sps:$4 sm:$0xff]  }
 0x9c6   : > { %16627 = vmatprep.subr.bf16.mxu0 %v20689_v61  ;;  %v20837_v61 = vld [vmem:[#allocation10 + $0x40] ss:$8 sps:$4 sm:$0xff]  }
 0x9c7   : > { %16714 = vmatpush1.bf16.msra.mxu1 %v20690_v0  ;;  %v20749_v0 = vld [vmem:[#allocation7 + $0x4cc] ss:$16 sps:$4 sm:$0xff]  }
 0x9c8   : > { %16715 = vmatprep.subr.bf16.mxu1 %v20698_v2  ;;  %v20845_v2 = vld [vmem:[#allocation10 + $0x64] ss:$8 sps:$4 sm:$0xff]  }
 0x9c9   : > { %16628 = vmatpush1.bf16.msra.mxu0 %v20687_v63  ;;  %v20744_v63 = vld [vmem:[#allocation7 + $0x4a8] ss:$16 sps:$4 sm:$0xff]  }
 0x9ca   : > { %16629 = vmatprep.subr.bf16.mxu0 %v20695_v1  ;;  %v20840_v1 = vld [vmem:[#allocation10 + $0x50] ss:$8 sps:$4 sm:$0xff]  }
 0x9cb   : > { %16716 = vmatpush1.bf16.msra.mxu1 %v20696_v4  ;;  %v20752_v4 = vld [vmem:[#allocation7 + $0x4ec] ss:$16 sps:$4 sm:$0xff]  }
 0x9cc   : > { %16717 = vmatprep.subr.bf16.mxu1 %v20704_v5  ;;  %v20848_v5 = vld [vmem:[#allocation10 + $0x74] ss:$8 sps:$4 sm:$0xff]  }
 0x9cd   : > { %16630 = vmatpush1.bf16.msra.mxu0 %v20693_v3  ;;  %v20747_v3 = vld [vmem:[#allocation7 + $0x4c8] ss:$16 sps:$4 sm:$0xff]  }
 0x9ce   : > { %16631 = vmatprep.subr.bf16.mxu0 %v20701_v45  ;;  %v20843_v45 = vld [vmem:[#allocation10 + $0x60] ss:$8 sps:$4 sm:$0xff]  }
 0x9cf   : > { %16718 = vmatpush1.bf16.msra.mxu1 %v20702_v7  ;;  %v20755_v7 = vld [vmem:[#allocation7 + $0x50c] ss:$16 sps:$4 sm:$0xff]  }
 0x9d0   : > { %16719 = vmatprep.subr.bf16.mxu1 %v20710_v10  ;;  %v20851_v10 = vld [vmem:[#allocation10 + $0x84] ss:$8 sps:$4 sm:$0xff]  }
 0x9d1   : > { %16632 = vmatpush1.bf16.msra.mxu0 %v20699_v6  ;;  %v20750_v6 = vld [vmem:[#allocation7 + $0x4e8] ss:$16 sps:$4 sm:$0xff]  }
 0x9d2   : > { %16633 = vmatprep.subr.bf16.mxu0 %v20707_v8  ;;  %v20846_v8 = vld [vmem:[#allocation10 + $0x70] ss:$8 sps:$4 sm:$0xff]  }
 0x9d3   : > { %16720 = vmatpush1.bf16.msra.mxu1 %v20708_v12  ;;  %v20758_v12 = vld [vmem:[#allocation7 + $0x52c] ss:$16 sps:$4 sm:$0xff]  }
 0x9d4   : > { %16721 = vmatprep.subr.bf16.mxu1 %v20716_v14  ;;  %v20854_v14 = vld [vmem:[#allocation10 + $0x94] ss:$8 sps:$4 sm:$0xff]  }
 0x9d5   : > { %16634 = vmatpush1.bf16.msra.mxu0 %v20705_v11  ;;  %v20753_v11 = vld [vmem:[#allocation7 + $0x508] ss:$16 sps:$4 sm:$0xff]  }
 0x9d6   : > { %16635 = vmatprep.subr.bf16.mxu0 %v20713_v13  ;;  %v20849_v13 = vld [vmem:[#allocation10 + $0x80] ss:$8 sps:$4 sm:$0xff]  }
 0x9d7   : > { %16722 = vmatpush1.bf16.msra.mxu1 %v20714_v37  ;;  %v20857_v37 = vld [vmem:[#allocation10 + $0xa4] ss:$8 sps:$4 sm:$0xff]  }
 0x9d8   : > { %16723 = vmatprep.subr.bf16.mxu1 %v20722_v20  ;;  %v20764_v20 = vld [vmem:[#allocation7 + $0x56c] ss:$16 sps:$4 sm:$0xff]  }
 0x9d9   : > { %16636 = vmatpush1.bf16.msra.mxu0 %v20711_v17  ;;  %v20852_v17 = vld [vmem:[#allocation10 + $0x90] ss:$8 sps:$4 sm:$0xff]  }
 0x9da   : > { %16637 = vmatprep.subr.bf16.mxu0 %v20719_v18  ;;  %v20759_v18 = vld [vmem:[#allocation7 + $0x548] ss:$16 sps:$4 sm:$0xff]  }
 0x9db   : > { %16724 = vmatpush1.bf16.msra.mxu1 %v20720_v24  ;;  %v20767_v24 = vld [vmem:[#allocation7 + $0x58c] ss:$16 sps:$4 sm:$0xff]  }
 0x9dc   : > { %16725 = vmatprep.subr.bf16.mxu1 %v20728_v31  ;;  %v20863_v31 = vld [vmem:[#allocation10 + $0xc4] ss:$8 sps:$4 sm:$0xff]  }
 0x9dd   : > { %16638 = vmatpush1.bf16.msra.mxu0 %v20717_v22  ;;  %v20762_v22 = vld [vmem:[#allocation7 + $0x568] ss:$16 sps:$4 sm:$0xff]  }
 0x9de   : > { %16639 = vmatprep.subr.bf16.mxu0 %v20725_v26  ;;  %v20858_v26 = vld [vmem:[#allocation10 + $0xb0] ss:$8 sps:$4 sm:$0xff]  }
 0x9df   : > { %16726 = vmatpush1.bf16.msra.mxu1 %v20726_v35  ;;  %v20768_v35 = vld [vmem:[#allocation7 + $0x5a8] ss:$16 sps:$4 sm:$0xff]  }
 0x9e0   : > { %16738 = vmatprep.subr.bf16.mxu1 %v20731_v39  ;;  %v20776_v39 = vld [vmem:[#allocation7 + $0x5ec] ss:$16 sps:$4 sm:$0xff]  }
 0x9e1   : > { %16640 = vmatpush1.bf16.msra.mxu0 %v20723_v33  ;;  %v20861_v33 = vld [vmem:[#allocation10 + $0xc0] ss:$8 sps:$4 sm:$0xff]  }
 0x9e2   : > { %16728 = vmatmul.mubr.bf16.vlgmr.msra.gmra.mrb[4].mxu1 %v23606_v41  ;;  %17248 = vmatprep.subr.bf16.mxu0 %v20827_v47  ;;  %v20831_v41 = vld [vmem:[#allocation10 + $0x20] ss:$8 sps:$4 sm:$0xff]  }
 0x9e3   : > { %16739 = vmatpush1.bf16.msra.mxu1 %v20729_v42  ;;  %16770 = vmatprep.mubr.bf16.mxu1 %v23613_v30  ;;  %v20834_v30 = vld [vmem:[#allocation10 + $0x30] ss:$8 sps:$4 sm:$0xff]   ;;  %v20774_v42 = vld [vmem:[#allocation7 + $0x5e8] ss:$16 sps:$4 sm:$0xff]  }
 0x9e4   : > { %16642 = vmatmul.mubr.bf16.vlgmr.msra.gmra.mrb[0].mxu0 %v23630_v25  ;;  %16740 = vmatprep.subr.bf16.mxu1 %v20734_v44  ;;  %v20779_v44 = vld [vmem:[#allocation7 + $0x60c] ss:$16 sps:$4 sm:$0xff]  }
 0x9e5   : > { %17249 = vmatpush1.bf16.msra.mxu0 %v20825_v46  ;;  %v20777_v46 = vld [vmem:[#allocation7 + $0x608] ss:$16 sps:$4 sm:$0xff]   ;;  %v20782_v47 = vld [vmem:[#allocation7 + $0x62c] ss:$16 sps:$4 sm:$0xff]  }
 0x9e6   : > { %17250 = vmatprep.subr.bf16.mxu0 %v20830_v49  ;;  %v20785_v49 = vld [vmem:[#allocation7 + $0x64c] ss:$16 sps:$4 sm:$0xff]  }
 0x9e7   : > { %16741 = vmatpush1.bf16.msra.mxu1 %v20732_v48  ;;  %v20780_v48 = vld [vmem:[#allocation7 + $0x628] ss:$16 sps:$4 sm:$0xff]  }
 0x9e8   : > { %16742 = vmatprep.subr.bf16.mxu1 %v20737_v50  ;;  %v20783_v50 = vld [vmem:[#allocation7 + $0x648] ss:$16 sps:$4 sm:$0xff]  }
 0x9e9   : > { %17251 = vmatpush1.bf16.msra.mxu0 %v20828_v51  ;;  %v20788_v51 = vld [vmem:[#allocation7 + $0x66c] ss:$16 sps:$4 sm:$0xff]  }
 0x9ea   : > { %17252 = vmatprep.subr.bf16.mxu0 %v20833_v52  ;;  %v20786_v52 = vld [vmem:[#allocation7 + $0x668] ss:$16 sps:$4 sm:$0xff]  }
 0x9eb   : > { %16743 = vmatpush1.bf16.msra.mxu1 %v20735_v53  ;;  %v20791_v53 = vld [vmem:[#allocation7 + $0x68c] ss:$16 sps:$4 sm:$0xff]  }
 0x9ec   : > { %16744 = vmatprep.subr.bf16.mxu1 %v20740_v54  ;;  %v20789_v54 = vld [vmem:[#allocation7 + $0x688] ss:$16 sps:$4 sm:$0xff]  }
 0x9ed   : > { %17253 = vmatpush1.bf16.msra.mxu0 %v20831_v41  ;;  %v20866_v41 = vld [vmem:[#allocation10 + $0xd4] ss:$8 sps:$4 sm:$0xff]  }
 0x9ee   : > { %17254 = vmatprep.subr.bf16.mxu0 %v20836_v57 }
 0x9ef   : > { %16745 = vmatpush1.bf16.msra.mxu1 %v20738_v55  ;;  %v20794_v55 = vld [vmem:[#allocation7 + $0x6ac] ss:$16 sps:$4 sm:$0xff]  }
 0x9f0   : > { %16746 = vmatprep.subr.bf16.mxu1 %v20743_v56  ;;  %v20797_v56 = vld [vmem:[#allocation7 + $0x6cc] ss:$16 sps:$4 sm:$0xff]  }
 0x9f1   : > { %17255 = vmatpush1.bf16.msra.mxu0 %v20834_v30 }
 0x9f2   : > { %17256 = vmatprep.subr.bf16.mxu0 %v20839_v58 }
 0x9f3   : > { %16747 = vmatpush1.bf16.msra.mxu1 %v20741_v59  ;;  %v20795_v59 = vld [vmem:[#allocation7 + $0x6c8] ss:$16 sps:$4 sm:$0xff]  }
 0x9f4   : > { %16748 = vmatprep.subr.bf16.mxu1 %v20746_v60  ;;  %v20869_v60 = vld [vmem:[#allocation10 + $0xe4] ss:$8 sps:$4 sm:$0xff]  }
 0x9f5   : > { %17257 = vmatpush1.bf16.msra.mxu0 %v20837_v61 }
 0x9f6   : > { %17258 = vmatprep.subr.bf16.mxu0 %v20842_v62  ;;  %v20800_v62 = vld [vmem:[#allocation7 + $0x6ec] ss:$16 sps:$4 sm:$0xff]  }
 0x9f7   : > { %16749 = vmatpush1.bf16.msra.mxu1 %v20744_v63  ;;  %v20867_v63 = vld [vmem:[#allocation10 + $0xe0] ss:$8 sps:$4 sm:$0xff]  }
 0x9f8   : > { %16750 = vmatprep.subr.bf16.mxu1 %v20749_v0  ;;  %v20798_v0 = vld [vmem:[#allocation7 + $0x6e8] ss:$16 sps:$4 sm:$0xff]  }
 0x9f9   : > { %17259 = vmatpush1.bf16.msra.mxu0 %v20840_v1  ;;  %v20872_v1 = vld [vmem:[#allocation10 + $0xf4] ss:$8 sps:$4 sm:$0xff]  }
 0x9fa   : > { %17260 = vmatprep.subr.bf16.mxu0 %v20845_v2  ;;  %v20803_v2 = vld [vmem:[#allocation7 + $0x70c] ss:$16 sps:$4 sm:$0xff]  }
 0x9fb   : > { %16751 = vmatpush1.bf16.msra.mxu1 %v20747_v3  ;;  %v20870_v3 = vld [vmem:[#allocation10 + $0xf0] ss:$8 sps:$4 sm:$0xff]  }
 0x9fc   : > { %16752 = vmatprep.subr.bf16.mxu1 %v20752_v4  ;;  %v20801_v4 = vld [vmem:[#allocation7 + $0x708] ss:$16 sps:$4 sm:$0xff]  }
 0x9fd   : > { %17261 = vmatpush1.bf16.msra.mxu0 %v20843_v45  ;;  %v20806_v45 = vld [vmem:[#allocation7 + $0x72c] ss:$16 sps:$4 sm:$0xff]  }
 0x9fe   : > { %17262 = vmatprep.subr.bf16.mxu0 %v20848_v5  ;;  %v20875_v5 = vld [vmem:[#allocation10 + $0x104] ss:$8 sps:$4 sm:$0xff]  }
 0x9ff   : > { %16753 = vmatpush1.bf16.msra.mxu1 %v20750_v6  ;;  %v20804_v6 = vld [vmem:[#allocation7 + $0x728] ss:$16 sps:$4 sm:$0xff]  }
 0xa00   : > { %16754 = vmatprep.subr.bf16.mxu1 %v20755_v7  ;;  %v20809_v7 = vld [vmem:[#allocation7 + $0x74c] ss:$16 sps:$4 sm:$0xff]  }
 0xa01   : > { %17263 = vmatpush1.bf16.msra.mxu0 %v20846_v8  ;;  %v20807_v8 = vld [vmem:[#allocation7 + $0x748] ss:$16 sps:$4 sm:$0xff]  }
 0xa02   : > { %17264 = vmatprep.subr.bf16.mxu0 %v20851_v10  ;;  %v20812_v10 = vld [vmem:[#allocation7 + $0x76c] ss:$16 sps:$4 sm:$0xff]  }
 0xa03   : > { %16755 = vmatpush1.bf16.msra.mxu1 %v20753_v11  ;;  %v20810_v11 = vld [vmem:[#allocation7 + $0x768] ss:$16 sps:$4 sm:$0xff]  }
 0xa04   : > { %16756 = vmatprep.subr.bf16.mxu1 %v20758_v12  ;;  %v20815_v12 = vld [vmem:[#allocation7 + $0x78c] ss:$16 sps:$4 sm:$0xff]  }
 0xa05   : > { %17265 = vmatpush1.bf16.msra.mxu0 %v20849_v13  ;;  %v20813_v13 = vld [vmem:[#allocation7 + $0x788] ss:$16 sps:$4 sm:$0xff]  }
 0xa06   : > { %17266 = vmatprep.subr.bf16.mxu0 %v20854_v14  ;;  %v20818_v14 = vld [vmem:[#allocation7 + $0x7ac] ss:$16 sps:$4 sm:$0xff]  }
 0xa07   : > { %16757 = vmatpush1.bf16.msra.mxu1 %v20756_v15  ;;  %v20816_v15 = vld [vmem:[#allocation7 + $0x7a8] ss:$16 sps:$4 sm:$0xff]  }
 0xa08   : > { %16758 = vmatprep.subr.bf16.mxu1 %v20761_v16  ;;  %v20821_v16 = vld [vmem:[#allocation7 + $0x7cc] ss:$16 sps:$4 sm:$0xff]  }
 0xa09   : > { %17267 = vmatpush1.bf16.msra.mxu0 %v20852_v17  ;;  %v20819_v17 = vld [vmem:[#allocation7 + $0x7c8] ss:$16 sps:$4 sm:$0xff]  }
 0xa0a   : > { %17268 = vmatprep.subr.bf16.mxu0 %v20857_v37  ;;  %v20824_v37 = vld [vmem:[#allocation7 + $0x7ec] ss:$16 sps:$4 sm:$0xff]  }
 0xa0b   : > { %16759 = vmatpush1.bf16.msra.mxu1 %v20759_v18  ;;  %v20822_v18 = vld [vmem:[#allocation7 + $0x7e8] ss:$16 sps:$4 sm:$0xff]  }
 0xa0c   : > { %16760 = vmatprep.subr.bf16.mxu1 %v20764_v20  ;;  %v23638_v20 = vld [vmem:[#allocation8] sm:$0xf] }
 0xa0d   : > { %17269 = vmatpush1.bf16.msra.mxu0 %v20855_v21  ;;  %v15183_v21 = vrot.slane %v23638_v20, %v23569_v34 }
 0xa0e   : > { %17270 = vmatprep.subr.bf16.mxu0 %v20860_v40  ;;  %v15187_v40 = vrot.slane %v23638_v20, %v23564_v28 }
 0xa0f   : > { %16761 = vmatpush1.bf16.msra.mxu1 %v20762_v22 }
 0xa10   : > { %16762 = vmatprep.subr.bf16.mxu1 %v20767_v24 }
 0xa11   : > { %17271 = vmatpush1.bf16.msra.mxu0 %v20858_v26 }
 0xa12   : > { %17272 = vmatprep.subr.bf16.mxu0 %v20863_v31 }
 0xa13   : > { %16763 = vmatpush1.bf16.msra.mxu1 %v20765_v19 }
 0xa14   : > { %16764 = vmatprep.subr.bf16.mxu1 %v20770_v32 }
 0xa15   : > { %17273 = vmatpush1.bf16.msra.mxu0 %v20861_v33 }
 0xa16   : > { %17274 = vmatprep.subr.bf16.mxu0 %v20866_v41  ;;  %v20922_v41 = vld [vmem:[#allocation13] sm:$0xff]  }
 0xa17   : > { %16765 = vmatpush1.bf16.msra.mxu1 %v20768_v35 }
 0xa18   : > { %16766 = vmatprep.subr.bf16.mxu1 %v20773_v36 }
 0xa1b   : > { %16767 = vmatpush1.bf16.msra.mxu1 %v20771_v27 }
 0xa1c   : > { %16768 = vmatprep.subr.bf16.mxu1 %v20776_v39 }
 0xa1f   : > { %16769 = vmatpush1.bf16.msra.mxu1 %v20774_v42 }
 0xa20   : > { %16781 = vmatprep.subr.bf16.mxu1 %v20779_v44 }
 0xa22   : > { %16771 = vmatmul.mubr.bf16.vlgmr.msra.gmra.mrb[4].mxu1 %v23618_v9  ;;  %v20792_v9 = vld [vmem:[#allocation7 + $0x6a8] ss:$16 sps:$4 sm:$0xff]  }
 0xa23   : > { %16782 = vmatpush1.bf16.msra.mxu1 %v20777_v46  ;;  %16813 = vmatprep.mubr.bf16.mxu1 %v23625_v43  ;;  %v20864_v43 = vld [vmem:[#allocation10 + $0xd0] ss:$8 sps:$4 sm:$0xff]  }
 0xa24   : > { %16783 = vmatprep.subr.bf16.mxu1 %v20782_v47  ;;  %17275 = vmatpush1.bf16.msra.mxu0 %v20864_v43  ;;  %v20876_v43 = vld [vmem:[#allocation10 + $0x110] ss:$8 sps:$4 sm:$0xff]  }
 0xa25   : > { %17276 = vmatprep.subr.bf16.mxu0 %v20869_v60  ;;  %v20884_v60 = vld [vmem:[#allocation10 + $0x134] ss:$8 sps:$4 sm:$0xff]  }
 0xa27   : > { %16784 = vmatpush1.bf16.msra.mxu1 %v20780_v48 }
 0xa28   : > { %16785 = vmatprep.subr.bf16.mxu1 %v20785_v49  ;;  %17277 = vmatpush1.bf16.msra.mxu0 %v20867_v63  ;;  %v20882_v63 = vld [vmem:[#allocation10 + $0x130] ss:$8 sps:$4 sm:$0xff]  }
 0xa29   : > { %17278 = vmatprep.subr.bf16.mxu0 %v20872_v1  ;;  %v20928_v1 = vld [vmem:[#allocation13 + $0x18] sm:$0xff]  }
 0xa2b   : > { %16786 = vmatpush1.bf16.msra.mxu1 %v20783_v50 }
 0xa2c   : > { %16787 = vmatprep.subr.bf16.mxu1 %v20788_v51  ;;  %17279 = vmatpush1.bf16.msra.mxu0 %v20870_v3  ;;  %v20885_v3 = vld [vmem:[#allocation10 + $0x140] ss:$8 sps:$4 sm:$0xff]  }
 0xa2d   : > { %17291 = vmatprep.subr.bf16.mxu0 %v20875_v5  ;;  %v20888_v5 = vld [vmem:[#allocation10 + $0x150] ss:$8 sps:$4 sm:$0xff]  }
 0xa2f   : > { %16788 = vmatpush1.bf16.msra.mxu1 %v20786_v52 }
 0xa30   : > { %16789 = vmatprep.subr.bf16.mxu1 %v20791_v53 }
 0xa33   : > { %16790 = vmatpush1.bf16.msra.mxu1 %v20789_v54  ;;  %v20873_v54 = vld [vmem:[#allocation10 + $0x100] ss:$8 sps:$4 sm:$0xff]  }
 0xa34   : > { %16791 = vmatprep.subr.bf16.mxu1 %v20794_v55  ;;  %v20878_v55 = vld [vmem:[#allocation10 + $0x114] ss:$8 sps:$4 sm:$0xff]  }
 0xa35   : > { %v16514_v57 = vpop.f32.mrb[0].mxu1 }
 0xa36   : > { %v16516_v30 = vpop.f32.mrb[1].mxu1  ;;  %v16515_v22 = vadd.f32 %v16514_v57, %v15183_v21  ;;  %v20881_v57 = vld [vmem:[#allocation10 + $0x124] ss:$8 sps:$4 sm:$0xff]  }
 0xa37   : > { %v16518_v58 = vpop.f32.mrb[2].mxu1  ;;  %16792 = vmatpush1.bf16.msra.mxu1 %v20792_v9  ;;  %v16517_v24 = vadd.f32 %v16516_v30, %v15187_v40  ;;  %v20921_v9 = vld [vmem:[#allocation13 + $0x40] sm:$0xff]   ;;  %v20924_v30 = vld [vmem:[#allocation13 + $0x8] sm:$0xff]  }
 0xa38   : > { %v16520_v61 = vpop.f32.mrb[3].mxu1  ;;  %16793 = vmatprep.subr.bf16.mxu1 %v20797_v56  ;;  %v16519_v31 = vadd.f32 %v16518_v58, %v15183_v21  ;;  %v20923_v56 = vld [vmem:[#allocation13 + $0x48] sm:$0xff]   ;;  %v20925_v58 = vld [vmem:[#allocation13 + $0x50] sm:$0xff]  }
 0xa39   : > { %v16521_v33 = vadd.f32 %v16520_v61, %v15187_v40  ;;  %v20926_v61 = vld [vmem:[#allocation13 + $0x10] sm:$0xff]   ;;  %v20909_v21 = vld [vmem:[#allocation10 + $0x1c0] ss:$8 sps:$4 sm:$0xff]  }
 0xa3a   : > { %v20914_v40 = vld [vmem:[#allocation10 + $0x1d4] ss:$8 sps:$4 sm:$0xff]  }
 0xa3b   : > { %16794 = vmatpush1.bf16.msra.mxu1 %v20795_v59  ;;  %v20879_v59 = vld [vmem:[#allocation10 + $0x120] ss:$8 sps:$4 sm:$0xff]  }
 0xa3c   : > { %16795 = vmatprep.subr.bf16.mxu1 %v20800_v62  ;;  %v20927_v62 = vld [vmem:[#allocation13 + $0x58] sm:$0xff]  }
 0xa3f   : > { %16796 = vmatpush1.bf16.msra.mxu1 %v20798_v0  ;;  %v20887_v0 = vld [vmem:[#allocation10 + $0x144] ss:$8 sps:$4 sm:$0xff]  }
 0xa40   : > { %16797 = vmatprep.subr.bf16.mxu1 %v20803_v2  ;;  %v20929_v2 = vld [vmem:[#allocation13 + $0x60] sm:$0xff]  }
 0xa43   : > { %16798 = vmatpush1.bf16.msra.mxu1 %v20801_v4  ;;  %v20890_v4 = vld [vmem:[#allocation10 + $0x154] ss:$8 sps:$4 sm:$0xff]  }
 0xa44   : > { %16799 = vmatprep.subr.bf16.mxu1 %v20806_v45  ;;  %v20930_v45 = vld [vmem:[#allocation13 + $0x20] sm:$0xff]  }
 0xa47   : > { %16800 = vmatpush1.bf16.msra.mxu1 %v20804_v6  ;;  %v20893_v6 = vld [vmem:[#allocation10 + $0x164] ss:$8 sps:$4 sm:$0xff]  }
 0xa48   : > { %16801 = vmatprep.subr.bf16.mxu1 %v20809_v7  ;;  %v20891_v7 = vld [vmem:[#allocation10 + $0x160] ss:$8 sps:$4 sm:$0xff]  }
 0xa4b   : > { %16802 = vmatpush1.bf16.msra.mxu1 %v20807_v8  ;;  %v20896_v8 = vld [vmem:[#allocation10 + $0x174] ss:$8 sps:$4 sm:$0xff]  }
 0xa4c   : > { %16803 = vmatprep.subr.bf16.mxu1 %v20812_v10  ;;  %v20894_v10 = vld [vmem:[#allocation10 + $0x170] ss:$8 sps:$4 sm:$0xff]  }
 0xa4f   : > { %16804 = vmatpush1.bf16.msra.mxu1 %v20810_v11  ;;  %v20899_v11 = vld [vmem:[#allocation10 + $0x184] ss:$8 sps:$4 sm:$0xff]  }
 0xa50   : > { %16805 = vmatprep.subr.bf16.mxu1 %v20815_v12  ;;  %v20897_v12 = vld [vmem:[#allocation10 + $0x180] ss:$8 sps:$4 sm:$0xff]  }
 0xa53   : > { %16806 = vmatpush1.bf16.msra.mxu1 %v20813_v13  ;;  %v20902_v13 = vld [vmem:[#allocation10 + $0x194] ss:$8 sps:$4 sm:$0xff]  }
 0xa54   : > { %16807 = vmatprep.subr.bf16.mxu1 %v20818_v14  ;;  %v20900_v14 = vld [vmem:[#allocation10 + $0x190] ss:$8 sps:$4 sm:$0xff]  }
 0xa57   : > { %16808 = vmatpush1.bf16.msra.mxu1 %v20816_v15  ;;  %v20905_v15 = vld [vmem:[#allocation10 + $0x1a4] ss:$8 sps:$4 sm:$0xff]  }
 0xa58   : > { %16809 = vmatprep.subr.bf16.mxu1 %v20821_v16  ;;  %v20903_v16 = vld [vmem:[#allocation10 + $0x1a0] ss:$8 sps:$4 sm:$0xff]  }
 0xa5b   : > { %16810 = vmatpush1.bf16.msra.mxu1 %v20819_v17  ;;  %v20908_v17 = vld [vmem:[#allocation10 + $0x1b4] ss:$8 sps:$4 sm:$0xff]  }
 0xa5c   : > { %16811 = vmatprep.subr.bf16.mxu1 %v20824_v37  ;;  %v20906_v37 = vld [vmem:[#allocation10 + $0x1b0] ss:$8 sps:$4 sm:$0xff]  }
 0xa5f   : > { %16812 = vmatpush1.bf16.msra.mxu1 %v20822_v18  ;;  %v20911_v18 = vld [vmem:[#allocation10 + $0x1c4] ss:$8 sps:$4 sm:$0xff]  }
 0xa60   : > { %19959 = vmatprep.subr.bf16.mxu1 %v20921_v9  ;;  %v20934_v9 = vld [vmem:[#allocation13 + $0x30] sm:$0xff]  }
 0xa62   : > { %16814 = vmatmul.mubr.bf16.vlgmr.msra.gmra.mrb[4].mxu1 %v23630_v25 }
 0xa63   : > { %19960 = vmatpush3.bf16.msra.mxu1 %v20922_v41  ;;  %v20935_v41 = vld [vmem:[#allocation13 + $0x78] sm:$0xff]  }
 0xa64   : > { %19961 = vmatprep.subr.bf16.mxu1 %v20923_v56  ;;  %v20936_v56 = vld [vmem:[#allocation13 + $0x38] sm:$0xff]  }
 0xa67   : > { %19962 = vmatpush3.bf16.msra.mxu1 %v20924_v30 }
 0xa68   : > { %19963 = vmatprep.subr.bf16.mxu1 %v20925_v58 }
 0xa6b   : > { %19964 = vmatpush3.bf16.msra.mxu1 %v20926_v61 }
 0xa6c   : > { %19965 = vmatprep.subr.bf16.mxu1 %v20927_v62 }
 0xa6f   : > { %19966 = vmatpush3.bf16.msra.mxu1 %v20928_v1 }
 0xa70   : > { %19967 = vmatprep.subr.bf16.mxu1 %v20929_v2 }
 0xa73   : > { %19968 = vmatpush3.bf16.msra.mxu1 %v20930_v45 }
 0xab7   : > { %v16643_v26 = vpop.f32.mrb[0].mxu0 }
 0xab8   : > { %v20206_v19 = vadd.f32 %v16643_v26, %v16515_v22  ;;  %v16645_v32 = vpop.f32.mrb[1].mxu0  ;;  %v20912_v22 = vld [vmem:[#allocation10 + $0x1d0] ss:$8 sps:$4 sm:$0xff]   ;;  %v20915_v26 = vld [vmem:[#allocation10 + $0x1e0] ss:$8 sps:$4 sm:$0xff]  }
 0xab9   : > { %v20208_v35 = vadd.f32 %v16645_v32, %v16517_v24  ;;  %v16647_v36 = vpop.f32.mrb[2].mxu0  ;;  %v20917_v24 = vld [vmem:[#allocation10 + $0x1e4] ss:$8 sps:$4 sm:$0xff]   ;;  %v15191_v32 = vrot.slane %v23638_v20, %v14820_v38 }
 0xaba   : > { %v16832_v27 = vmul.f32 0.2, %v20206_v19  ;;  %v20210_v39 = vadd.f32 %v16647_v36, %v16519_v31  ;;  %v16649_v25 = vpop.f32.mrb[3].mxu0  ;;  %vm16824_vm0 = vcmp.gt.f32.partialorder %v20206_v19, 0.0  ;;  %v20920_v31 = vld [vmem:[#allocation10 + $0x1f4] ss:$8 sps:$4 sm:$0xff]  }
 0xabb   : > { %v16833_v42 = vmul.f32 0.2, %v20208_v35  ;;  %v20212_v44 = vadd.f32 %v16649_v25, %v16521_v33  ;;  %vm16825_vm1 = vcmp.gt.f32.partialorder %v20208_v35, 0.0  ;;  %v15195_v33 = vrot.slane %v23638_v20, %v14824_v29 }
 0xabc   : > { %vm16828_vm2 = vcmp.gt.f32.partialorder %v20210_v39, 0.0  ;;  %v16836_v46 = vmul.f32 0.2, %v20210_v39  ;;  %v16840_v48 = vsel %vm16824_vm0, %v20206_v19, %v16832_v27  ;;  %v20918_v19 = vld [vmem:[#allocation10 + $0x1f0] ss:$8 sps:$4 sm:$0xff]  }
 0xabd   : > { %vm16829_vm3 = vcmp.gt.f32.partialorder %v20212_v44, 0.0  ;;  %v16837_v47 = vmul.f32 0.2, %v20212_v44  ;;  %v16841_v51 = vsel %vm16825_vm1, %v20208_v35, %v16833_v42 }
 0xabe   : > { %v16844_v49 = vsel %vm16828_vm2, %v20210_v39, %v16836_v46 }
 0xabf   : > { %v16848_v50 = vpack.c.bf16 %v16844_v49, %v16840_v48  ;;  %v16845_v52 = vsel %vm16829_vm3, %v20212_v44, %v16837_v47 }
 0xac0   : > { %v16849_v53 = vpack.c.bf16 %v16845_v52, %v16841_v51 }
 0xac2   : > { %17280 = vmatprep.mubr.bf16.mxu0 %v16849_v53  ;;  %v20931_v53 = vld [vmem:[#allocation13 + $0x68] sm:$0xff]  }
 0xac3   : > { %17281 = vmatmul.mubr.bf16.vlgmr.msra.gmra.mrb[4].mxu0 %v16848_v50  ;;  %19969 = vmatprep.subr.bf16.mxu1 %v20931_v53 }
 0xac4   : > { %17292 = vmatpush1.bf16.msra.mxu0 %v20873_v54  ;;  %v20932_v54 = vld [vmem:[#allocation13 + $0x28] sm:$0xff]  }
 0xac5   : > { %17293 = vmatprep.subr.bf16.mxu0 %v20878_v55  ;;  %19970 = vmatpush3.bf16.msra.mxu1 %v20932_v54  ;;  %v20933_v55 = vld [vmem:[#allocation13 + $0x70] sm:$0xff]  }
 0xac6   : > { %19971 = vmatprep.subr.bf16.mxu1 %v20933_v55 }
 0xac8   : > { %17294 = vmatpush1.bf16.msra.mxu0 %v20876_v43  ;;  %v16916_v43 = vld [vmem:[#allocation11] sm:$0x3] }
 0xac9   : > { %17295 = vmatprep.subr.bf16.mxu0 %v20881_v57  ;;  %19972 = vmatpush3.bf16.msra.mxu1 %v20934_v9  ;;  %v16921_v57 = vrot.slane %v16916_v43, %v23569_v34  ;;  %v16925_v30 = vrot.slane %v16916_v43, %v23564_v28 }
 0xaca   : > { %19973 = vmatprep.subr.bf16.mxu1 %v20935_v41 }
 0xacc   : > { %17296 = vmatpush1.bf16.msra.mxu0 %v20879_v59 }
 0xacd   : > { %17297 = vmatprep.subr.bf16.mxu0 %v20884_v60  ;;  %19974 = vmatpush3.bf16.msra.mxu1 %v20936_v56 }
 0xad0   : > { %17298 = vmatpush1.bf16.msra.mxu0 %v20882_v63 }
 0xad1   : > { %17299 = vmatprep.subr.bf16.mxu0 %v20887_v0 }
 0xad4   : > { %17300 = vmatpush1.bf16.msra.mxu0 %v20885_v3 }
 0xad5   : > { %17301 = vmatprep.subr.bf16.mxu0 %v20890_v4 }
 0xad8   : > { %17302 = vmatpush1.bf16.msra.mxu0 %v20888_v5 }
 0xad9   : > { %17303 = vmatprep.subr.bf16.mxu0 %v20893_v6 }
 0xadc   : > { %17304 = vmatpush1.bf16.msra.mxu0 %v20891_v7 }
 0xadd   : > { %17305 = vmatprep.subr.bf16.mxu0 %v20896_v8 }
 0xae0   : > { %17306 = vmatpush1.bf16.msra.mxu0 %v20894_v10 }
 0xae1   : > { %17307 = vmatprep.subr.bf16.mxu0 %v20899_v11  ;;  %v19937_v11 = vld [vmem:[#allocation14] ss:$0 sm:$0xff] }
 0xae4   : > { %17308 = vmatpush1.bf16.msra.mxu0 %v20897_v12 }
 0xae5   : > { %17309 = vmatprep.subr.bf16.mxu0 %v20902_v13 }
 0xae8   : > { %17310 = vmatpush1.bf16.msra.mxu0 %v20900_v14 }
 0xae9   : > { %17311 = vmatprep.subr.bf16.mxu0 %v20905_v15 }
 0xaec   : > { %17312 = vmatpush1.bf16.msra.mxu0 %v20903_v16 }
 0xaed   : > { %17313 = vmatprep.subr.bf16.mxu0 %v20908_v17 }
 0xaf0   : > { %17314 = vmatpush1.bf16.msra.mxu0 %v20906_v37 }
 0xaf1   : > { %17315 = vmatprep.subr.bf16.mxu0 %v20911_v18 }
 0xaf4   : > { %17316 = vmatpush1.bf16.msra.mxu0 %v20909_v21 }
 0xaf5   : > { %17317 = vmatprep.subr.bf16.mxu0 %v20914_v40 }
 0xaf8   : > { %17318 = vmatpush1.bf16.msra.mxu0 %v20912_v22 }
 0xaf9   : > { %17319 = vmatprep.subr.bf16.mxu0 %v20917_v24 }
 0xafc   : > { %17320 = vmatpush1.bf16.msra.mxu0 %v20915_v26 }
 0xafd   : > { %17321 = vmatprep.subr.bf16.mxu0 %v20920_v31 }
 0xb00   : > { %17322 = vmatpush1.bf16.msra.mxu0 %v20918_v19 }
 0xb35   : > { %v16815_v35 = vpop.f32.mrb[4].mxu1 }
 0xb36   : > { %v20213_v36 = vadd.f32 %v16815_v35, %v15191_v32  ;;  %v16817_v27 = vpop.f32.mrb[5].mxu1 }
 0xb37   : > { %v20214_v39 = vadd.f32 %v16817_v27, %v15195_v33  ;;  %v16819_v25 = vpop.f32.mrb[6].mxu1 }
 0xb38   : > { %v16834_v42 = vmul.f32 0.2, %v20213_v36  ;;  %v20215_v44 = vadd.f32 %v16819_v25, %v15191_v32  ;;  %v16821_v46 = vpop.f32.mrb[7].mxu1  ;;  %vm16826_vm4 = vcmp.gt.f32.partialorder %v20213_v36, 0.0 }
 0xb39   : > { %v16835_v47 = vmul.f32 0.2, %v20214_v39  ;;  %v20216_v48 = vadd.f32 %v16821_v46, %v15195_v33  ;;  %vm16827_vm5 = vcmp.gt.f32.partialorder %v20214_v39, 0.0 }
 0xb3a   : > { %vm16830_vm6 = vcmp.gt.f32.partialorder %v20215_v44, 0.0  ;;  %v16838_v49 = vmul.f32 0.2, %v20215_v44  ;;  %v16842_v50 = vsel %vm16826_vm4, %v20213_v36, %v16834_v42 }
 0xb3b   : > { %vm16831_vm7 = vcmp.gt.f32.partialorder %v20216_v48, 0.0  ;;  %v16839_v38 = vmul.f32 0.2, %v20216_v48  ;;  %v16843_v29 = vsel %vm16827_vm5, %v20214_v39, %v16835_v47 }
 0xb3c   : > { %v16846_v23 = vsel %vm16830_vm6, %v20215_v44, %v16838_v49 }
 0xb3d   : > { %v16850_v51 = vpack.c.bf16 %v16846_v23, %v16842_v50  ;;  %v16847_v20 = vsel %vm16831_vm7, %v20216_v48, %v16839_v38 }
 0xb3e   : > { %v16851_v52 = vpack.c.bf16 %v16847_v20, %v16843_v29 }
 0xb40   : > { %17323 = vmatprep.mubr.bf16.mxu0 %v16851_v52 }
 0xb41   : > { %17324 = vmatmul.mubr.bf16.vlgmr.msra.gmra.mrb[4].mxu0 %v16850_v51 }
 0xc14   : > { %v17325_v58 = vpop.f32.mrb[4].mxu0 }
 0xc15   : > { %v20217_v59 = vadd.f32 %v17325_v58, %v16921_v57  ;;  %v17327_v60 = vpop.f32.mrb[5].mxu0 }
 0xc16   : > { %v20218_v61 = vadd.f32 %v17327_v60, %v16925_v30  ;;  %v17329_v62 = vpop.f32.mrb[6].mxu0 }
 0xc17   : > { %v17338_v63 = vmul.f32 0.2, %v20217_v59  ;;  %v20219_v0 = vadd.f32 %v17329_v62, %v16921_v57  ;;  %v17331_v1 = vpop.f32.mrb[7].mxu0  ;;  %vm17334_vm8 = vcmp.gt.f32.partialorder %v20217_v59, 0.0 }
 0xc18   : > { %v17339_v2 = vmul.f32 0.2, %v20218_v61  ;;  %v20220_v3 = vadd.f32 %v17331_v1, %v16925_v30  ;;  %vm17335_vm9 = vcmp.gt.f32.partialorder %v20218_v61, 0.0 }
 0xc19   : > { %vm17336_vm10 = vcmp.gt.f32.partialorder %v20219_v0, 0.0  ;;  %v17340_v4 = vmul.f32 0.2, %v20219_v0  ;;  %v17342_v5 = vsel %vm17334_vm8, %v20217_v59, %v17338_v63 }
 0xc1a   : > { %vm17337_vm11 = vcmp.gt.f32.partialorder %v20220_v3, 0.0  ;;  %v17341_v45 = vmul.f32 0.2, %v20220_v3  ;;  %v17343_v28 = vsel %vm17335_vm9, %v20218_v61, %v17339_v2 }
 0xc1b   : > { %v17344_v34 = vsel %vm17336_vm10, %v20219_v0, %v17340_v4 }
 0xc1c   : > { %v17346_v6 = vpack.c.bf16 %v17344_v34, %v17342_v5  ;;  %v17345_v7 = vsel %vm17337_vm11, %v20220_v3, %v17341_v45 }
 0xc1d   : > { %v17347_v8 = vpack.c.bf16 %v17345_v7, %v17343_v28 }
 0xc1f   : > { %17515 = vmatprep.mubr.bf16.mxu1 %v17347_v8 }
 0xc20   : > { %17516 = vmatmul.mubr.bf16.vlgmr.msra.gmra.mrb[8].mxu1 %v17346_v6 }
 0xcf3   : > { %v19975_v10 = vpop.f32.mrb[8].mxu1 }
 0xcf4   : > { %v19976_v12 = vpop.f32.mrb[9].mxu1 }
 0xcf5   : > { %v19977_v13 = vadd.f32 %v19976_v12, %v19975_v10  ;;  %v19978_v14 = vpop.f32.mrb[10].mxu1 }
 0xcf6   : > { %v19979_v15 = vpop.f32.mrb[11].mxu1 }
 0xcf7   : > { %v17518_v16 = vadd.f32 %v19977_v13, %v19937_v11  ;;  %v19980_v17 = vadd.f32 %v19979_v15, %v19978_v14 }
 0xcf9   : > { %v17524_v37 = vsub.f32 0.0, %v17518_v16  ;;  %v17521_v18 = vadd.f32 %v19980_v17, %v19937_v11 }
 0xcfb   : > { %v17526_v21 = vmul.f32 1.442695, %v17524_v37  ;;  %v17525_v40 = vsub.f32 0.0, %v17521_v18 }
 0xcfd   : > { %20937 = vpow2.f32 %v17526_v21  ;;  %v17528_v22 = vmul.f32 1.442695, %v17525_v40 }
 0xcff   : > { %20939 = vpow2.f32 %v17528_v22 }
 0xd07   : > { %v20938_v24 = vpop.eup %20937 }
 0xd08   : > { %v17530_v26 = vadd.f32 1.0, %v20938_v24 }
 0xd09   : > { %v20940_v31 = vpop.eup %20939 }
 0xd0a   : > { %20941 = vrcp.f32 %v17530_v26  ;;  %v17531_v19 = vadd.f32 1.0, %v20940_v31 }
 0xd0c   : > { %20943 = vrcp.f32 %v17531_v19 }
 0xd14   : > { %v20942_v32 = vpop.eup %20941 }
 0xd15   : > { %17534 = vst [vmem:[%s23680_s9] sm:$0xff] %v20942_v32 }
 0xd16   : > { %v20944_v33 = vpop.eup %20943 }
 0xd17   : > { %17535 = vst [vmem:[%s23680_s9 + $0x8] sm:$0xff] %v20944_v33 }
 0xd18 PF: > { %p23_p12 = scmp.ge.s32.totalorder %s21486_s29, 4   ;;  %s23701_s30 = smov %s21213_s10 }
 0xd19   : > { %s23702_s10 = smov %s21217_s11  ;;  %s23703_s11 = smov %s21497_s22 }
 0xd1a   : > { %s23704_s12 = smov %s21486_s29  ;;  %25 = sbr.rel (!%p23_p12) target bundleno = 9 (0x9), region = 129 }
 0xd21   :  { %17547 = vsyncpa [#allocation4], 1 }
 0xd22   :  { %17549 = vsyncpa [#allocation4 + $0x1], 1 }
 0xd23   :  { %17550 = vsyncpa [#allocation6], 1 }
 0xd24   :  { %17551 = vsyncpa [#allocation9], 1 }
 0xd25   :  { %17552 = vsyncpa [#allocation12], 1 }
 0xd26   :  { %17553 = vsyncpa [#allocation15], 1 }

</bundles_post_ra>
